<compile_context>
chip_gen: v6e
topology: v6e:2x2x1
jax: 0.10.0
libtpu: 0.0.40
codegen_flags: <defaults>
</compile_context>

<pallas_src>
import functools

import jax
import jax.numpy as jnp
from jax.experimental import pallas as pl
from jax.experimental.pallas import tpu as pltpu


# ----------------------------------------------------------------------------
# Compiler params (per-generation VMEM budget)
# ----------------------------------------------------------------------------
@functools.lru_cache(maxsize=None)
def _vmem_limit_bytes():
    # v5e/v6e: 128 MiB physical VMEM -> 96 MiB budget; v7x: 64 MiB -> 48 MiB.
    try:
        cap = int(pltpu.get_tpu_info().vmem_capacity_bytes)
        return int(min(cap * 3 // 4, 96 * 1024 * 1024))
    except Exception:
        return 48 * 1024 * 1024


def _compiler_params():
    return pltpu.CompilerParams(
        dimension_semantics=("parallel",),   # batch grid; >= 2 steps feeds both v7x TCs
        vmem_limit_bytes=_vmem_limit_bytes())


# ----------------------------------------------------------------------------
# DownBlock conv (k=4, s=2, p=1) as a 2x2-tap stride-1 conv over space-to-depth
# input, with BatchNorm statistics fused into the epilogue.
# ----------------------------------------------------------------------------
def _down_conv_kernel(z_ref, w_ref, mask_ref, y_ref, stats_ref, *, wz, hw):
    """One (space-to-depth) image per grid step.

    z_ref    : (1, Hz*Wz, Cz) bf16  flattened rows of the s2d input
    w_ref    : (4, Cz, Co)    bf16  per-tap GEMM weights, tap = 2*qh + qw
    mask_ref : (1, Hw, 1)     f32   1.0 on valid output columns (j < Wo)
    y_ref    : (1, Hw, Co)    bf16  pre-BN conv output (junk column zeroed)
    stats_ref: (1, 2, Co)     f32   per-image [sum ; sum of squares] partials
    """
    f32 = jnp.float32
    z0 = z_ref[0, :hw, :]           # rows used by the qh=0 taps (aligned prefix)
    z1 = z_ref[0, wz:wz + hw, :]    # rows used by the qh=1 taps (one image row down)

    # Register accumulation of the four taps; qw=0 and qw=1 products are kept
    # apart so only ONE 1-row shift is needed per grid step.
    p_even = (jnp.dot(z0, w_ref[0], preferred_element_type=f32) +
              jnp.dot(z1, w_ref[2], preferred_element_type=f32))
    p_odd = (jnp.dot(z0, w_ref[1], preferred_element_type=f32) +
             jnp.dot(z1, w_ref[3], preferred_element_type=f32))
    # qw=1 taps read the next flattened row: shift p_odd up by one row.  The
    # wrapped last row lands only on the masked junk column (j == Wo).
    p_odd = jnp.concatenate([p_odd[1:, :], p_odd[:1, :]], axis=0)

    acc = (p_even + p_odd) * mask_ref[0]            # zero the junk column

    # Single bf16 store of the pre-BN activations + fused BN stats partials
    # (computed on the f32 accumulator, before the bf16 cast).
    y_ref[0] = acc.astype(y_ref.dtype)
    stats_ref[0, 0:1, :] = jnp.sum(acc, axis=0, keepdims=True)
    stats_ref[0, 1:2, :] = jnp.sum(acc * acc, axis=0, keepdims=True)


def _bn_apply_kernel(y_ref, p_ref, o_ref):
    """y*scale + shift followed by LeakyReLU(0.2); bf16 in, bf16 out."""
    y = y_ref[0].astype(jnp.float32)
    z = y * p_ref[0:1, :] + p_ref[1:2, :]
    o_ref[0] = jnp.where(z > 0, z, 0.2 * z).astype(o_ref.dtype)


def down_block(x, w_oihw, gamma, beta):
    """Conv2d(c_in, c_out, 4, 2, 1) -> BatchNorm2d (batch stats) -> LeakyReLU(0.2).

    x: [N, H, W, Cin] bf16 (NHWC).  Returns [N, H//2, W//2, Cout] bf16.
    """
    n, h, w, c = x.shape
    co = w_oihw.shape[0]
    ho, wo = h // 2, w // 2
    hz, wz = ho + 1, wo + 1
    hw = ho * wz                 # accumulator rows per image (one junk column / row)
    nz = hz * wz
    cz = 4 * c

    # -- space-to-depth relayout of the zero-padded input (pure relayout, bf16) --
    xp = jnp.pad(x, ((0, 0), (1, 1), (1, 1), (0, 0)))
    z = xp.reshape(n, hz, 2, wz, 2, c)
    z = jnp.transpose(z, (0, 1, 3, 2, 4, 5)).reshape(n, nz, cz).astype(jnp.bfloat16)

    # -- per-tap GEMM weights: tap (qh, qw) <-> original kernel index (2qh+dh, 2qw+dw) --
    wt = jnp.transpose(w_oihw, (2, 3, 1, 0)).reshape(2, 2, 2, 2, c, co)
    wt = jnp.transpose(wt, (0, 2, 1, 3, 4, 5)).reshape(4, cz, co).astype(jnp.bfloat16)

    # Validity mask over the flattened (Ho, Wz) accumulator rows: column j < Wo.
    mask = (jnp.arange(hw) % wz < wo).astype(jnp.float32).reshape(1, hw, 1)

    y, stats = pl.pallas_call(
        functools.partial(_down_conv_kernel, wz=wz, hw=hw),
        out_shape=(jax.ShapeDtypeStruct((n, hw, co), jnp.bfloat16),
                   jax.ShapeDtypeStruct((n, 2, co), jnp.float32)),
        grid=(n,),
        in_specs=[pl.BlockSpec((1, nz, cz), lambda i: (i, 0, 0)),
                  pl.BlockSpec((4, cz, co), lambda i: (0, 0, 0)),
                  pl.BlockSpec((1, hw, 1), lambda i: (0, 0, 0))],
        out_specs=(pl.BlockSpec((1, hw, co), lambda i: (i, 0, 0)),
                   pl.BlockSpec((1, 2, co), lambda i: (i, 0, 0))),
        compiler_params=_compiler_params(),
    )(z, wt, mask)

    # -- BN scale/shift from the reduced partials (tiny per-channel XLA math) --
    count = float(n * ho * wo)
    s = jnp.sum(stats, axis=0)                           # (2, Co)
    mean = s[0] / count
    var = jnp.maximum(s[1] / count - mean * mean, 0.0)   # biased variance, clamped
    scale = gamma * jax.lax.rsqrt(var + 1e-5)
    shift = beta - mean * scale
    bn_p = jnp.stack([scale, shift], axis=0).astype(jnp.float32)

    act = pl.pallas_call(
        _bn_apply_kernel,
        out_shape=jax.ShapeDtypeStruct((n, hw, co), jnp.bfloat16),
        grid=(n,),
        in_specs=[pl.BlockSpec((1, hw, co), lambda i: (i, 0, 0)),
                  pl.BlockSpec((2, co), lambda i: (0, 0))],
        out_specs=pl.BlockSpec((1, hw, co), lambda i: (i, 0, 0)),
        compiler_params=_compiler_params(),
    )(y, bn_p)

    # TODO(synk): fuse this junk-column drop + the next layer's space-to-depth
    # into the BN-apply out_specs to remove the remaining inter-layer relayout.
    return act.reshape(n, ho, wz, co)[:, :, :wo, :]


# ----------------------------------------------------------------------------
# Head: spectral_norm(Conv2d(512, 1, 3, 1, 1)) as a VPU multiply + lane reduce
# ----------------------------------------------------------------------------
def _head_kernel(x_ref, w_ref, o_ref, *, hh, ww):
    """x_ref: (1, H+2, W+2, C) bf16; w_ref: (9, C) f32; o_ref: (1, H, W) f32."""
    acc = jnp.zeros((hh, ww), jnp.float32)
    for t in range(9):
        dh, dw = t // 3, t % 3
        patch = x_ref[0, dh:dh + hh, dw:dw + ww, :].astype(jnp.float32)
        acc = acc + jnp.sum(patch * w_ref[t:t + 1, :], axis=-1)
    o_ref[0] = acc


def head_conv(x, w_oihw, bias):
    """Spectral-normalized Conv2d(512, 1, 3, 1, 1) on x: [N, H, W, 512] bf16."""
    n, h, w, c = x.shape
    # Spectral norm of a 1-row weight matrix is exactly its L2 norm.
    sigma = jnp.sqrt(jnp.sum(w_oihw.astype(jnp.float32) ** 2))
    wn = w_oihw[0].astype(jnp.float32) / sigma              # (512, 3, 3)
    w9 = jnp.transpose(wn, (1, 2, 0)).reshape(9, c)         # tap-major (dh, dw)

    xp = jnp.pad(x, ((0, 0), (1, 1), (1, 1), (0, 0)))
    out = pl.pallas_call(
        functools.partial(_head_kernel, hh=h, ww=w),
        out_shape=jax.ShapeDtypeStruct((n, h, w), jnp.float32),
        grid=(n,),
        in_specs=[pl.BlockSpec((1, h + 2, w + 2, c), lambda i: (i, 0, 0, 0)),
                  pl.BlockSpec((9, c), lambda i: (0, 0))],
        out_specs=pl.BlockSpec((1, h, w), lambda i: (i, 0, 0)),
        compiler_params=_compiler_params(),
    )(xp, w9)
    return out + bias[0]


# ----------------------------------------------------------------------------
# Parameters + forward pass
# ----------------------------------------------------------------------------
def build_params(key, c_in, level):
    if level == 1:
        chs = [c_in, 64, 128, 256, 512]
    elif level == 2:
        chs = [c_in, 128, 256, 512]
    elif level == 3:
        chs = [c_in, 256, 512]
    elif level == 4:
        chs = [c_in, 512]
    else:
        raise ValueError("level must be in 1..4")
    blocks = []
    for ci, co in zip(chs[:-1], chs[1:]):
        key, k1, k2 = jax.random.split(key, 3)
        w = jax.random.normal(k1, (co, ci, 4, 4), jnp.float32) * 0.05
        b = jax.random.normal(k2, (co,), jnp.float32) * 0.05   # cancelled by BN
        gamma = jnp.ones((co,), jnp.float32)
        beta = jnp.zeros((co,), jnp.float32)
        blocks.append((w, b, gamma, beta))
    key, k1, k2 = jax.random.split(key, 3)
    head_w = jax.random.normal(k1, (1, 512, 3, 3), jnp.float32) * 0.05
    head_b = jax.random.normal(k2, (1,), jnp.float32) * 0.05
    return {"blocks": blocks, "head_w": head_w, "head_b": head_b}


def multi_scale_discriminator_forward(x_nchw, params):
    """NCHW input like the PyTorch module; returns NCHW [N, 1, Ho, Wo] float32."""
    x = jnp.transpose(x_nchw, (0, 2, 3, 1)).astype(jnp.bfloat16)    # NCHW -> NHWC
    # DownBlocks.  The conv bias is dropped: training-mode BatchNorm subtracts
    # the batch mean, which cancels a constant per-channel bias exactly.
    for (w, _bias_cancelled_by_bn, gamma, beta) in params["blocks"]:
        x = down_block(x, w, gamma, beta)
    y = head_conv(x, params["head_w"], params["head_b"])             # (N, H, W) f32
    return y[:, None, :, :]


if __name__ == "__main__":
    key = jax.random.PRNGKey(0)
    k_x, k_p = jax.random.split(key)

    c_in, level = 4, 3            # level 3: DownBlock(4, 256), DownBlock(256, 512)
    x = jax.random.normal(k_x, (2, c_in, 16, 16), jnp.float32)
    params = build_params(k_p, c_in, level)

    fwd = jax.jit(multi_scale_discriminator_forward)
    out = jax.block_until_ready(fwd(x, params))

    assert out.shape == (2, 1, 4, 4), out.shape
    assert out.dtype == jnp.float32
    assert bool(jnp.all(jnp.isfinite(out)))
    print("KERNEL_OK")
</pallas_src>

<mosaic_0001>
module attributes {stable_mosaic.version = 11 : i64} {
  func.func @_down_conv_kernel(%arg0: i32, %arg1: memref<1x81x16xbf16, #tpu.memory_space<vmem>>, %arg2: memref<4x16x256xbf16, #tpu.memory_space<vmem>>, %arg3: memref<1x72x1xf32, #tpu.memory_space<vmem>>, %arg4: memref<1x72x256xbf16, #tpu.memory_space<vmem>>, %arg5: memref<1x2x256xf32, #tpu.memory_space<vmem>>) attributes {dimension_semantics = [#tpu.dimension_semantics<parallel>], iteration_bounds = array<i64: 2>, scalar_prefetch = 0 : i64, scratch_operands = 0 : i64, tpu.core_type = #tpu.core_type<tc>, window_params = [{transform_indices = @transform_0, window_bounds = array<i64: 1, 81, 16>}, {pipeline_mode = #tpu.pipeline_mode<synchronous>, transform_indices = @transform_1, window_bounds = array<i64: 4, 16, 256>}, {pipeline_mode = #tpu.pipeline_mode<synchronous>, transform_indices = @transform_2, window_bounds = array<i64: 1, 72, 1>}, {transform_indices = @transform_3, window_bounds = array<i64: 1, 72, 256>}, {transform_indices = @transform_4, window_bounds = array<i64: 1, 2, 256>}]} {
    %c0 = arith.constant 0 : index
    %c0_0 = arith.constant 0 : index
    %c0_1 = arith.constant 0 : index
    %0 = vector.load %arg1[%c0, %c0_0, %c0_1] : memref<1x81x16xbf16, #tpu.memory_space<vmem>>, vector<1x72x16xbf16>
    %1 = vector.shape_cast %0 : vector<1x72x16xbf16> to vector<72x16xbf16>
    %c0_2 = arith.constant 0 : index
    %c9 = arith.constant 9 : index
    %c0_3 = arith.constant 0 : index
    %2 = vector.load %arg1[%c0_2, %c9, %c0_3] : memref<1x81x16xbf16, #tpu.memory_space<vmem>>, vector<1x72x16xbf16>
    %3 = vector.shape_cast %2 : vector<1x72x16xbf16> to vector<72x16xbf16>
    %c0_4 = arith.constant 0 : index
    %c0_5 = arith.constant 0 : index
    %c0_6 = arith.constant 0 : index
    %4 = vector.load %arg2[%c0_4, %c0_5, %c0_6] : memref<4x16x256xbf16, #tpu.memory_space<vmem>>, vector<1x16x256xbf16>
    %5 = vector.shape_cast %4 : vector<1x16x256xbf16> to vector<16x256xbf16>
    %cst = arith.constant dense<0.000000e+00> : vector<72x256xf32>
    %6 = tpu.matmul %1, %5, %cst {dimension_numbers = #tpu.dot_dimension_numbers<[1], [0], [0], [1], [0, 0, 1, 1], [], []>} : vector<72x16xbf16>, vector<16x256xbf16>, vector<72x256xf32> -> vector<72x256xf32>
    %c2 = arith.constant 2 : index
    %c0_7 = arith.constant 0 : index
    %c0_8 = arith.constant 0 : index
    %7 = vector.load %arg2[%c2, %c0_7, %c0_8] : memref<4x16x256xbf16, #tpu.memory_space<vmem>>, vector<1x16x256xbf16>
    %8 = vector.shape_cast %7 : vector<1x16x256xbf16> to vector<16x256xbf16>
    %cst_9 = arith.constant dense<0.000000e+00> : vector<72x256xf32>
    %9 = tpu.matmul %3, %8, %cst_9 {dimension_numbers = #tpu.dot_dimension_numbers<[1], [0], [0], [1], [0, 0, 1, 1], [], []>} : vector<72x16xbf16>, vector<16x256xbf16>, vector<72x256xf32> -> vector<72x256xf32>
    %10 = arith.addf %6, %9 : vector<72x256xf32>
    %c1 = arith.constant 1 : index
    %c0_10 = arith.constant 0 : index
    %c0_11 = arith.constant 0 : index
    %11 = vector.load %arg2[%c1, %c0_10, %c0_11] : memref<4x16x256xbf16, #tpu.memory_space<vmem>>, vector<1x16x256xbf16>
    %12 = vector.shape_cast %11 : vector<1x16x256xbf16> to vector<16x256xbf16>
    %cst_12 = arith.constant dense<0.000000e+00> : vector<72x256xf32>
    %13 = tpu.matmul %1, %12, %cst_12 {dimension_numbers = #tpu.dot_dimension_numbers<[1], [0], [0], [1], [0, 0, 1, 1], [], []>} : vector<72x16xbf16>, vector<16x256xbf16>, vector<72x256xf32> -> vector<72x256xf32>
    %c3 = arith.constant 3 : index
    %c0_13 = arith.constant 0 : index
    %c0_14 = arith.constant 0 : index
    %14 = vector.load %arg2[%c3, %c0_13, %c0_14] : memref<4x16x256xbf16, #tpu.memory_space<vmem>>, vector<1x16x256xbf16>
    %15 = vector.shape_cast %14 : vector<1x16x256xbf16> to vector<16x256xbf16>
    %cst_15 = arith.constant dense<0.000000e+00> : vector<72x256xf32>
    %16 = tpu.matmul %3, %15, %cst_15 {dimension_numbers = #tpu.dot_dimension_numbers<[1], [0], [0], [1], [0, 0, 1, 1], [], []>} : vector<72x16xbf16>, vector<16x256xbf16>, vector<72x256xf32> -> vector<72x256xf32>
    %17 = arith.addf %13, %16 : vector<72x256xf32>
    %18 = vector.extract_strided_slice %17 {offsets = [1, 0], sizes = [71, 256], strides = [1, 1]} : vector<72x256xf32> to vector<71x256xf32>
    %19 = vector.extract_strided_slice %17 {offsets = [0, 0], sizes = [1, 256], strides = [1, 1]} : vector<72x256xf32> to vector<1x256xf32>
    %20 = tpu.concatenate %18, %19 in 0 : vector<71x256xf32>, vector<1x256xf32> -> vector<72x256xf32>
    %21 = arith.addf %10, %20 : vector<72x256xf32>
    %c0_16 = arith.constant 0 : index
    %c0_17 = arith.constant 0 : index
    %c0_18 = arith.constant 0 : index
    %22 = vector.load %arg3[%c0_16, %c0_17, %c0_18] : memref<1x72x1xf32, #tpu.memory_space<vmem>>, vector<1x72x1xf32>
    %23 = vector.shape_cast %22 : vector<1x72x1xf32> to vector<72x1xf32>
    %24 = vector.broadcast %23 : vector<72x1xf32> to vector<72x256xf32>
    %25 = arith.mulf %21, %24 : vector<72x256xf32>
    %26 = arith.truncf %25 : vector<72x256xf32> to vector<72x256xbf16>
    %c0_19 = arith.constant 0 : index
    %c0_20 = arith.constant 0 : index
    %c0_21 = arith.constant 0 : index
    %27 = vector.load %arg4[%c0_19, %c0_20, %c0_21] : memref<1x72x256xbf16, #tpu.memory_space<vmem>>, vector<1x72x256xbf16>
    %28 = vector.shape_cast %27 : vector<1x72x256xbf16> to vector<72x256xbf16>
    %29 = vector.shape_cast %26 : vector<72x256xbf16> to vector<1x72x256xbf16>
    tpu.vector_store %arg4[%c0_19, %c0_20, %c0_21], %29 {strides = array<i32>} : memref<1x72x256xbf16, #tpu.memory_space<vmem>>, vector<1x72x256xbf16>,
    %cst_22 = arith.constant dense<0.000000e+00> : vector<256xf32>
    %30 = vector.multi_reduction <add>, %25, %cst_22 [0] : vector<72x256xf32> to vector<256xf32>
    %31 = vector.shape_cast %30 : vector<256xf32> to vector<1x256xf32>
    %c0_23 = arith.constant 0 : index
    %c0_24 = arith.constant 0 : index
    %c0_25 = arith.constant 0 : index
    %32 = vector.load %arg5[%c0_23, %c0_24, %c0_25] : memref<1x2x256xf32, #tpu.memory_space<vmem>>, vector<1x1x256xf32>
    %33 = vector.shape_cast %32 : vector<1x1x256xf32> to vector<1x256xf32>
    %34 = vector.shape_cast %31 : vector<1x256xf32> to vector<1x1x256xf32>
    tpu.vector_store %arg5[%c0_23, %c0_24, %c0_25], %34 {strides = array<i32>} : memref<1x2x256xf32, #tpu.memory_space<vmem>>, vector<1x1x256xf32>,
    %35 = arith.mulf %25, %25 : vector<72x256xf32>
    %cst_26 = arith.constant dense<0.000000e+00> : vector<256xf32>
    %36 = vector.multi_reduction <add>, %35, %cst_26 [0] : vector<72x256xf32> to vector<256xf32>
    %37 = vector.shape_cast %36 : vector<256xf32> to vector<1x256xf32>
    %c0_27 = arith.constant 0 : index
    %c1_28 = arith.constant 1 : index
    %c0_29 = arith.constant 0 : index
    %38 = vector.load %arg5[%c0_27, %c1_28, %c0_29] : memref<1x2x256xf32, #tpu.memory_space<vmem>>, vector<1x1x256xf32>
    %39 = vector.shape_cast %38 : vector<1x1x256xf32> to vector<1x256xf32>
    %40 = vector.shape_cast %37 : vector<1x256xf32> to vector<1x1x256xf32>
    tpu.vector_store %arg5[%c0_27, %c1_28, %c0_29], %40 {strides = array<i32>} : memref<1x2x256xf32, #tpu.memory_space<vmem>>, vector<1x1x256xf32>,
    return
  }
  func.func @transform_0(%arg0: i32) -> (i32, i32, i32) {
    %c0_i32 = arith.constant 0 : i32
    %c0_i32_0 = arith.constant 0 : i32
    %c0_i32_1 = arith.constant 0 : i32
    return %arg0, %c0_i32, %c0_i32_0 : i32, i32, i32
  }
  func.func @transform_1(%arg0: i32) -> (i32, i32, i32) {
    %c0_i32 = arith.constant 0 : i32
    %c0_i32_0 = arith.constant 0 : i32
    %c0_i32_1 = arith.constant 0 : i32
    %c0_i32_2 = arith.constant 0 : i32
    return %c0_i32, %c0_i32_0, %c0_i32_1 : i32, i32, i32
  }
  func.func @transform_2(%arg0: i32) -> (i32, i32, i32) {
    %c0_i32 = arith.constant 0 : i32
    %c0_i32_0 = arith.constant 0 : i32
    %c0_i32_1 = arith.constant 0 : i32
    %c0_i32_2 = arith.constant 0 : i32
    return %c0_i32, %c0_i32_0, %c0_i32_1 : i32, i32, i32
  }
  func.func @transform_3(%arg0: i32) -> (i32, i32, i32) {
    %c0_i32 = arith.constant 0 : i32
    %c0_i32_0 = arith.constant 0 : i32
    %c0_i32_1 = arith.constant 0 : i32
    return %arg0, %c0_i32, %c0_i32_0 : i32, i32, i32
  }
  func.func @transform_4(%arg0: i32) -> (i32, i32, i32) {
    %c0_i32 = arith.constant 0 : i32
    %c0_i32_0 = arith.constant 0 : i32
    %c0_i32_1 = arith.constant 0 : i32
    return %arg0, %c0_i32, %c0_i32_0 : i32, i32, i32
  }
}

module attributes {stable_mosaic.version = 11 : i64} {
  func.func @_bn_apply_kernel(%arg0: i32, %arg1: memref<1x72x256xbf16, #tpu.memory_space<vmem>>, %arg2: memref<2x256xf32, #tpu.memory_space<vmem>>, %arg3: memref<1x72x256xbf16, #tpu.memory_space<vmem>>) attributes {dimension_semantics = [#tpu.dimension_semantics<parallel>], iteration_bounds = array<i64: 2>, scalar_prefetch = 0 : i64, scratch_operands = 0 : i64, tpu.core_type = #tpu.core_type<tc>, window_params = [{transform_indices = @transform_0, window_bounds = array<i64: 1, 72, 256>}, {pipeline_mode = #tpu.pipeline_mode<synchronous>, transform_indices = @transform_1, window_bounds = array<i64: 2, 256>}, {transform_indices = @transform_2, window_bounds = array<i64: 1, 72, 256>}]} {
    %c0 = arith.constant 0 : index
    %c0_0 = arith.constant 0 : index
    %c0_1 = arith.constant 0 : index
    %0 = vector.load %arg1[%c0, %c0_0, %c0_1] : memref<1x72x256xbf16, #tpu.memory_space<vmem>>, vector<1x72x256xbf16>
    %1 = vector.shape_cast %0 : vector<1x72x256xbf16> to vector<72x256xbf16>
    %2 = arith.extf %1 : vector<72x256xbf16> to vector<72x256xf32>
    %c0_2 = arith.constant 0 : index
    %c0_3 = arith.constant 0 : index
    %3 = vector.load %arg2[%c0_2, %c0_3] : memref<2x256xf32, #tpu.memory_space<vmem>>, vector<1x256xf32>
    %4 = vector.broadcast %3 : vector<1x256xf32> to vector<72x256xf32>
    %5 = arith.mulf %2, %4 : vector<72x256xf32>
    %c1 = arith.constant 1 : index
    %c0_4 = arith.constant 0 : index
    %6 = vector.load %arg2[%c1, %c0_4] : memref<2x256xf32, #tpu.memory_space<vmem>>, vector<1x256xf32>
    %7 = vector.broadcast %6 : vector<1x256xf32> to vector<72x256xf32>
    %8 = arith.addf %5, %7 : vector<72x256xf32>
    %cst = arith.constant 0.000000e+00 : f32
    %9 = vector.broadcast %cst : f32 to vector<72x256xf32>
    %10 = arith.cmpf ogt, %8, %9 : vector<72x256xf32>
    %cst_5 = arith.constant 2.000000e-01 : f32
    %11 = vector.broadcast %cst_5 : f32 to vector<72x256xf32>
    %12 = arith.mulf %11, %8 : vector<72x256xf32>
    %13 = arith.select %10, %8, %12 : vector<72x256xi1>, vector<72x256xf32>
    %14 = arith.truncf %13 : vector<72x256xf32> to vector<72x256xbf16>
    %c0_6 = arith.constant 0 : index
    %c0_7 = arith.constant 0 : index
    %c0_8 = arith.constant 0 : index
    %15 = vector.load %arg3[%c0_6, %c0_7, %c0_8] : memref<1x72x256xbf16, #tpu.memory_space<vmem>>, vector<1x72x256xbf16>
    %16 = vector.shape_cast %15 : vector<1x72x256xbf16> to vector<72x256xbf16>
    %17 = vector.shape_cast %14 : vector<72x256xbf16> to vector<1x72x256xbf16>
    tpu.vector_store %arg3[%c0_6, %c0_7, %c0_8], %17 {strides = array<i32>} : memref<1x72x256xbf16, #tpu.memory_space<vmem>>, vector<1x72x256xbf16>,
    return
  }
  func.func @transform_0(%arg0: i32) -> (i32, i32, i32) {
    %c0_i32 = arith.constant 0 : i32
    %c0_i32_0 = arith.constant 0 : i32
    %c0_i32_1 = arith.constant 0 : i32
    return %arg0, %c0_i32, %c0_i32_0 : i32, i32, i32
  }
  func.func @transform_1(%arg0: i32) -> (i32, i32) {
    %c0_i32 = arith.constant 0 : i32
    %c0_i32_0 = arith.constant 0 : i32
    %c0_i32_1 = arith.constant 0 : i32
    return %c0_i32, %c0_i32_0 : i32, i32
  }
  func.func @transform_2(%arg0: i32) -> (i32, i32, i32) {
    %c0_i32 = arith.constant 0 : i32
    %c0_i32_0 = arith.constant 0 : i32
    %c0_i32_1 = arith.constant 0 : i32
    return %arg0, %c0_i32, %c0_i32_0 : i32, i32, i32
  }
}

module attributes {stable_mosaic.version = 11 : i64} {
  func.func @_down_conv_kernel(%arg0: i32, %arg1: memref<1x25x1024xbf16, #tpu.memory_space<vmem>>, %arg2: memref<4x1024x512xbf16, #tpu.memory_space<vmem>>, %arg3: memref<1x20x1xf32, #tpu.memory_space<vmem>>, %arg4: memref<1x20x512xbf16, #tpu.memory_space<vmem>>, %arg5: memref<1x2x512xf32, #tpu.memory_space<vmem>>) attributes {dimension_semantics = [#tpu.dimension_semantics<parallel>], iteration_bounds = array<i64: 2>, scalar_prefetch = 0 : i64, scratch_operands = 0 : i64, tpu.core_type = #tpu.core_type<tc>, window_params = [{transform_indices = @transform_0, window_bounds = array<i64: 1, 25, 1024>}, {pipeline_mode = #tpu.pipeline_mode<synchronous>, transform_indices = @transform_1, window_bounds = array<i64: 4, 1024, 512>}, {pipeline_mode = #tpu.pipeline_mode<synchronous>, transform_indices = @transform_2, window_bounds = array<i64: 1, 20, 1>}, {transform_indices = @transform_3, window_bounds = array<i64: 1, 20, 512>}, {transform_indices = @transform_4, window_bounds = array<i64: 1, 2, 512>}]} {
    %c0 = arith.constant 0 : index
    %c0_0 = arith.constant 0 : index
    %c0_1 = arith.constant 0 : index
    %0 = vector.load %arg1[%c0, %c0_0, %c0_1] : memref<1x25x1024xbf16, #tpu.memory_space<vmem>>, vector<1x20x1024xbf16>
    %1 = vector.shape_cast %0 : vector<1x20x1024xbf16> to vector<20x1024xbf16>
    %c0_2 = arith.constant 0 : index
    %c5 = arith.constant 5 : index
    %c0_3 = arith.constant 0 : index
    %2 = vector.load %arg1[%c0_2, %c5, %c0_3] : memref<1x25x1024xbf16, #tpu.memory_space<vmem>>, vector<1x20x1024xbf16>
    %3 = vector.shape_cast %2 : vector<1x20x1024xbf16> to vector<20x1024xbf16>
    %c0_4 = arith.constant 0 : index
    %c0_5 = arith.constant 0 : index
    %c0_6 = arith.constant 0 : index
    %4 = vector.load %arg2[%c0_4, %c0_5, %c0_6] : memref<4x1024x512xbf16, #tpu.memory_space<vmem>>, vector<1x1024x512xbf16>
    %5 = vector.shape_cast %4 : vector<1x1024x512xbf16> to vector<1024x512xbf16>
    %cst = arith.constant dense<0.000000e+00> : vector<20x512xf32>
    %6 = tpu.matmul %1, %5, %cst {dimension_numbers = #tpu.dot_dimension_numbers<[1], [0], [0], [1], [0, 0, 1, 1], [], []>} : vector<20x1024xbf16>, vector<1024x512xbf16>, vector<20x512xf32> -> vector<20x512xf32>
    %c2 = arith.constant 2 : index
    %c0_7 = arith.constant 0 : index
    %c0_8 = arith.constant 0 : index
    %7 = vector.load %arg2[%c2, %c0_7, %c0_8] : memref<4x1024x512xbf16, #tpu.memory_space<vmem>>, vector<1x1024x512xbf16>
    %8 = vector.shape_cast %7 : vector<1x1024x512xbf16> to vector<1024x512xbf16>
    %cst_9 = arith.constant dense<0.000000e+00> : vector<20x512xf32>
    %9 = tpu.matmul %3, %8, %cst_9 {dimension_numbers = #tpu.dot_dimension_numbers<[1], [0], [0], [1], [0, 0, 1, 1], [], []>} : vector<20x1024xbf16>, vector<1024x512xbf16>, vector<20x512xf32> -> vector<20x512xf32>
    %10 = arith.addf %6, %9 : vector<20x512xf32>
    %c1 = arith.constant 1 : index
    %c0_10 = arith.constant 0 : index
    %c0_11 = arith.constant 0 : index
    %11 = vector.load %arg2[%c1, %c0_10, %c0_11] : memref<4x1024x512xbf16, #tpu.memory_space<vmem>>, vector<1x1024x512xbf16>
    %12 = vector.shape_cast %11 : vector<1x1024x512xbf16> to vector<1024x512xbf16>
    %cst_12 = arith.constant dense<0.000000e+00> : vector<20x512xf32>
    %13 = tpu.matmul %1, %12, %cst_12 {dimension_numbers = #tpu.dot_dimension_numbers<[1], [0], [0], [1], [0, 0, 1, 1], [], []>} : vector<20x1024xbf16>, vector<1024x512xbf16>, vector<20x512xf32> -> vector<20x512xf32>
    %c3 = arith.constant 3 : index
    %c0_13 = arith.constant 0 : index
    %c0_14 = arith.constant 0 : index
    %14 = vector.load %arg2[%c3, %c0_13, %c0_14] : memref<4x1024x512xbf16, #tpu.memory_space<vmem>>, vector<1x1024x512xbf16>
    %15 = vector.shape_cast %14 : vector<1x1024x512xbf16> to vector<1024x512xbf16>
    %cst_15 = arith.constant dense<0.000000e+00> : vector<20x512xf32>
    %16 = tpu.matmul %3, %15, %cst_15 {dimension_numbers = #tpu.dot_dimension_numbers<[1], [0], [0], [1], [0, 0, 1, 1], [], []>} : vector<20x1024xbf16>, vector<1024x512xbf16>, vector<20x512xf32> -> vector<20x512xf32>
    %17 = arith.addf %13, %16 : vector<20x512xf32>
    %18 = vector.extract_strided_slice %17 {offsets = [1, 0], sizes = [19, 512], strides = [1, 1]} : vector<20x512xf32> to vector<19x512xf32>
    %19 = vector.extract_strided_slice %17 {offsets = [0, 0], sizes = [1, 512], strides = [1, 1]} : vector<20x512xf32> to vector<1x512xf32>
    %20 = tpu.concatenate %18, %19 in 0 : vector<19x512xf32>, vector<1x512xf32> -> vector<20x512xf32>
    %21 = arith.addf %10, %20 : vector<20x512xf32>
    %c0_16 = arith.constant 0 : index
    %c0_17 = arith.constant 0 : index
    %c0_18 = arith.constant 0 : index
    %22 = vector.load %arg3[%c0_16, %c0_17, %c0_18] : memref<1x20x1xf32, #tpu.memory_space<vmem>>, vector<1x20x1xf32>
    %23 = vector.shape_cast %22 : vector<1x20x1xf32> to vector<20x1xf32>
    %24 = vector.broadcast %23 : vector<20x1xf32> to vector<20x512xf32>
    %25 = arith.mulf %21, %24 : vector<20x512xf32>
    %26 = arith.truncf %25 : vector<20x512xf32> to vector<20x512xbf16>
    %c0_19 = arith.constant 0 : index
    %c0_20 = arith.constant 0 : index
    %c0_21 = arith.constant 0 : index
    %27 = vector.load %arg4[%c0_19, %c0_20, %c0_21] : memref<1x20x512xbf16, #tpu.memory_space<vmem>>, vector<1x20x512xbf16>
    %28 = vector.shape_cast %27 : vector<1x20x512xbf16> to vector<20x512xbf16>
    %29 = vector.shape_cast %26 : vector<20x512xbf16> to vector<1x20x512xbf16>
    tpu.vector_store %arg4[%c0_19, %c0_20, %c0_21], %29 {strides = array<i32>} : memref<1x20x512xbf16, #tpu.memory_space<vmem>>, vector<1x20x512xbf16>,
    %cst_22 = arith.constant dense<0.000000e+00> : vector<512xf32>
    %30 = vector.multi_reduction <add>, %25, %cst_22 [0] : vector<20x512xf32> to vector<512xf32>
    %31 = vector.shape_cast %30 : vector<512xf32> to vector<1x512xf32>
    %c0_23 = arith.constant 0 : index
    %c0_24 = arith.constant 0 : index
    %c0_25 = arith.constant 0 : index
    %32 = vector.load %arg5[%c0_23, %c0_24, %c0_25] : memref<1x2x512xf32, #tpu.memory_space<vmem>>, vector<1x1x512xf32>
    %33 = vector.shape_cast %32 : vector<1x1x512xf32> to vector<1x512xf32>
    %34 = vector.shape_cast %31 : vector<1x512xf32> to vector<1x1x512xf32>
    tpu.vector_store %arg5[%c0_23, %c0_24, %c0_25], %34 {strides = array<i32>} : memref<1x2x512xf32, #tpu.memory_space<vmem>>, vector<1x1x512xf32>,
    %35 = arith.mulf %25, %25 : vector<20x512xf32>
    %cst_26 = arith.constant dense<0.000000e+00> : vector<512xf32>
    %36 = vector.multi_reduction <add>, %35, %cst_26 [0] : vector<20x512xf32> to vector<512xf32>
    %37 = vector.shape_cast %36 : vector<512xf32> to vector<1x512xf32>
    %c0_27 = arith.constant 0 : index
    %c1_28 = arith.constant 1 : index
    %c0_29 = arith.constant 0 : index
    %38 = vector.load %arg5[%c0_27, %c1_28, %c0_29] : memref<1x2x512xf32, #tpu.memory_space<vmem>>, vector<1x1x512xf32>
    %39 = vector.shape_cast %38 : vector<1x1x512xf32> to vector<1x512xf32>
    %40 = vector.shape_cast %37 : vector<1x512xf32> to vector<1x1x512xf32>
    tpu.vector_store %arg5[%c0_27, %c1_28, %c0_29], %40 {strides = array<i32>} : memref<1x2x512xf32, #tpu.memory_space<vmem>>, vector<1x1x512xf32>,
    return
  }
  func.func @transform_0(%arg0: i32) -> (i32, i32, i32) {
    %c0_i32 = arith.constant 0 : i32
    %c0_i32_0 = arith.constant 0 : i32
    %c0_i32_1 = arith.constant 0 : i32
    return %arg0, %c0_i32, %c0_i32_0 : i32, i32, i32
  }
  func.func @transform_1(%arg0: i32) -> (i32, i32, i32) {
    %c0_i32 = arith.constant 0 : i32
    %c0_i32_0 = arith.constant 0 : i32
    %c0_i32_1 = arith.constant 0 : i32
    %c0_i32_2 = arith.constant 0 : i32
    return %c0_i32, %c0_i32_0, %c0_i32_1 : i32, i32, i32
  }
  func.func @transform_2(%arg0: i32) -> (i32, i32, i32) {
    %c0_i32 = arith.constant 0 : i32
    %c0_i32_0 = arith.constant 0 : i32
    %c0_i32_1 = arith.constant 0 : i32
    %c0_i32_2 = arith.constant 0 : i32
    return %c0_i32, %c0_i32_0, %c0_i32_1 : i32, i32, i32
  }
  func.func @transform_3(%arg0: i32) -> (i32, i32, i32) {
    %c0_i32 = arith.constant 0 : i32
    %c0_i32_0 = arith.constant 0 : i32
    %c0_i32_1 = arith.constant 0 : i32
    return %arg0, %c0_i32, %c0_i32_0 : i32, i32, i32
  }
  func.func @transform_4(%arg0: i32) -> (i32, i32, i32) {
    %c0_i32 = arith.constant 0 : i32
    %c0_i32_0 = arith.constant 0 : i32
    %c0_i32_1 = arith.constant 0 : i32
    return %arg0, %c0_i32, %c0_i32_0 : i32, i32, i32
  }
}

module attributes {stable_mosaic.version = 11 : i64} {
  func.func @_bn_apply_kernel(%arg0: i32, %arg1: memref<1x20x512xbf16, #tpu.memory_space<vmem>>, %arg2: memref<2x512xf32, #tpu.memory_space<vmem>>, %arg3: memref<1x20x512xbf16, #tpu.memory_space<vmem>>) attributes {dimension_semantics = [#tpu.dimension_semantics<parallel>], iteration_bounds = array<i64: 2>, scalar_prefetch = 0 : i64, scratch_operands = 0 : i64, tpu.core_type = #tpu.core_type<tc>, window_params = [{transform_indices = @transform_0, window_bounds = array<i64: 1, 20, 512>}, {pipeline_mode = #tpu.pipeline_mode<synchronous>, transform_indices = @transform_1, window_bounds = array<i64: 2, 512>}, {transform_indices = @transform_2, window_bounds = array<i64: 1, 20, 512>}]} {
    %c0 = arith.constant 0 : index
    %c0_0 = arith.constant 0 : index
    %c0_1 = arith.constant 0 : index
    %0 = vector.load %arg1[%c0, %c0_0, %c0_1] : memref<1x20x512xbf16, #tpu.memory_space<vmem>>, vector<1x20x512xbf16>
    %1 = vector.shape_cast %0 : vector<1x20x512xbf16> to vector<20x512xbf16>
    %2 = arith.extf %1 : vector<20x512xbf16> to vector<20x512xf32>
    %c0_2 = arith.constant 0 : index
    %c0_3 = arith.constant 0 : index
    %3 = vector.load %arg2[%c0_2, %c0_3] : memref<2x512xf32, #tpu.memory_space<vmem>>, vector<1x512xf32>
    %4 = vector.broadcast %3 : vector<1x512xf32> to vector<20x512xf32>
    %5 = arith.mulf %2, %4 : vector<20x512xf32>
    %c1 = arith.constant 1 : index
    %c0_4 = arith.constant 0 : index
    %6 = vector.load %arg2[%c1, %c0_4] : memref<2x512xf32, #tpu.memory_space<vmem>>, vector<1x512xf32>
    %7 = vector.broadcast %6 : vector<1x512xf32> to vector<20x512xf32>
    %8 = arith.addf %5, %7 : vector<20x512xf32>
    %cst = arith.constant 0.000000e+00 : f32
    %9 = vector.broadcast %cst : f32 to vector<20x512xf32>
    %10 = arith.cmpf ogt, %8, %9 : vector<20x512xf32>
    %cst_5 = arith.constant 2.000000e-01 : f32
    %11 = vector.broadcast %cst_5 : f32 to vector<20x512xf32>
    %12 = arith.mulf %11, %8 : vector<20x512xf32>
    %13 = arith.select %10, %8, %12 : vector<20x512xi1>, vector<20x512xf32>
    %14 = arith.truncf %13 : vector<20x512xf32> to vector<20x512xbf16>
    %c0_6 = arith.constant 0 : index
    %c0_7 = arith.constant 0 : index
    %c0_8 = arith.constant 0 : index
    %15 = vector.load %arg3[%c0_6, %c0_7, %c0_8] : memref<1x20x512xbf16, #tpu.memory_space<vmem>>, vector<1x20x512xbf16>
    %16 = vector.shape_cast %15 : vector<1x20x512xbf16> to vector<20x512xbf16>
    %17 = vector.shape_cast %14 : vector<20x512xbf16> to vector<1x20x512xbf16>
    tpu.vector_store %arg3[%c0_6, %c0_7, %c0_8], %17 {strides = array<i32>} : memref<1x20x512xbf16, #tpu.memory_space<vmem>>, vector<1x20x512xbf16>,
    return
  }
  func.func @transform_0(%arg0: i32) -> (i32, i32, i32) {
    %c0_i32 = arith.constant 0 : i32
    %c0_i32_0 = arith.constant 0 : i32
    %c0_i32_1 = arith.constant 0 : i32
    return %arg0, %c0_i32, %c0_i32_0 : i32, i32, i32
  }
  func.func @transform_1(%arg0: i32) -> (i32, i32) {
    %c0_i32 = arith.constant 0 : i32
    %c0_i32_0 = arith.constant 0 : i32
    %c0_i32_1 = arith.constant 0 : i32
    return %c0_i32, %c0_i32_0 : i32, i32
  }
  func.func @transform_2(%arg0: i32) -> (i32, i32, i32) {
    %c0_i32 = arith.constant 0 : i32
    %c0_i32_0 = arith.constant 0 : i32
    %c0_i32_1 = arith.constant 0 : i32
    return %arg0, %c0_i32, %c0_i32_0 : i32, i32, i32
  }
}

module attributes {stable_mosaic.version = 11 : i64} {
  func.func @_head_kernel(%arg0: i32, %arg1: memref<1x6x6x512xbf16, #tpu.memory_space<vmem>>, %arg2: memref<9x512xf32, #tpu.memory_space<vmem>>, %arg3: memref<1x4x4xf32, #tpu.memory_space<vmem>>) attributes {dimension_semantics = [#tpu.dimension_semantics<parallel>], iteration_bounds = array<i64: 2>, scalar_prefetch = 0 : i64, scratch_operands = 0 : i64, tpu.core_type = #tpu.core_type<tc>, window_params = [{transform_indices = @transform_0, window_bounds = array<i64: 1, 6, 6, 512>}, {pipeline_mode = #tpu.pipeline_mode<synchronous>, transform_indices = @transform_1, window_bounds = array<i64: 9, 512>}, {transform_indices = @transform_2, window_bounds = array<i64: 1, 4, 4>}]} {
    %cst = arith.constant 0.000000e+00 : f32
    %0 = vector.broadcast %cst : f32 to vector<4x4xf32>
    %c0 = arith.constant 0 : index
    %c0_0 = arith.constant 0 : index
    %c0_1 = arith.constant 0 : index
    %c0_2 = arith.constant 0 : index
    %1 = vector.load %arg1[%c0, %c0_0, %c0_1, %c0_2] : memref<1x6x6x512xbf16, #tpu.memory_space<vmem>>, vector<1x4x4x512xbf16>
    %2 = vector.shape_cast %1 : vector<1x4x4x512xbf16> to vector<4x4x512xbf16>
    %3 = arith.extf %2 : vector<4x4x512xbf16> to vector<4x4x512xf32>
    %c0_3 = arith.constant 0 : index
    %c0_4 = arith.constant 0 : index
    %4 = vector.load %arg2[%c0_3, %c0_4] : memref<9x512xf32, #tpu.memory_space<vmem>>, vector<1x512xf32>
    %5 = vector.shape_cast %4 : vector<1x512xf32> to vector<1x1x512xf32>
    %6 = vector.broadcast %5 : vector<1x1x512xf32> to vector<4x4x512xf32>
    %7 = arith.mulf %3, %6 : vector<4x4x512xf32>
    %cst_5 = arith.constant dense<0.000000e+00> : vector<4x4xf32>
    %8 = vector.multi_reduction <add>, %7, %cst_5 [2] : vector<4x4x512xf32> to vector<4x4xf32>
    %9 = arith.addf %0, %8 : vector<4x4xf32>
    %c0_6 = arith.constant 0 : index
    %c0_7 = arith.constant 0 : index
    %c1 = arith.constant 1 : index
    %c0_8 = arith.constant 0 : index
    %10 = vector.load %arg1[%c0_6, %c0_7, %c1, %c0_8] : memref<1x6x6x512xbf16, #tpu.memory_space<vmem>>, vector<1x4x4x512xbf16>
    %11 = vector.shape_cast %10 : vector<1x4x4x512xbf16> to vector<4x4x512xbf16>
    %12 = arith.extf %11 : vector<4x4x512xbf16> to vector<4x4x512xf32>
    %c1_9 = arith.constant 1 : index
    %c0_10 = arith.constant 0 : index
    %13 = vector.load %arg2[%c1_9, %c0_10] : memref<9x512xf32, #tpu.memory_space<vmem>>, vector<1x512xf32>
    %14 = vector.shape_cast %13 : vector<1x512xf32> to vector<1x1x512xf32>
    %15 = vector.broadcast %14 : vector<1x1x512xf32> to vector<4x4x512xf32>
    %16 = arith.mulf %12, %15 : vector<4x4x512xf32>
    %cst_11 = arith.constant dense<0.000000e+00> : vector<4x4xf32>
    %17 = vector.multi_reduction <add>, %16, %cst_11 [2] : vector<4x4x512xf32> to vector<4x4xf32>
    %18 = arith.addf %9, %17 : vector<4x4xf32>
    %c0_12 = arith.constant 0 : index
    %c0_13 = arith.constant 0 : index
    %c2 = arith.constant 2 : index
    %c0_14 = arith.constant 0 : index
    %19 = vector.load %arg1[%c0_12, %c0_13, %c2, %c0_14] : memref<1x6x6x512xbf16, #tpu.memory_space<vmem>>, vector<1x4x4x512xbf16>
    %20 = vector.shape_cast %19 : vector<1x4x4x512xbf16> to vector<4x4x512xbf16>
    %21 = arith.extf %20 : vector<4x4x512xbf16> to vector<4x4x512xf32>
    %c2_15 = arith.constant 2 : index
    %c0_16 = arith.constant 0 : index
    %22 = vector.load %arg2[%c2_15, %c0_16] : memref<9x512xf32, #tpu.memory_space<vmem>>, vector<1x512xf32>
    %23 = vector.shape_cast %22 : vector<1x512xf32> to vector<1x1x512xf32>
    %24 = vector.broadcast %23 : vector<1x1x512xf32> to vector<4x4x512xf32>
    %25 = arith.mulf %21, %24 : vector<4x4x512xf32>
    %cst_17 = arith.constant dense<0.000000e+00> : vector<4x4xf32>
    %26 = vector.multi_reduction <add>, %25, %cst_17 [2] : vector<4x4x512xf32> to vector<4x4xf32>
    %27 = arith.addf %18, %26 : vector<4x4xf32>
    %c0_18 = arith.constant 0 : index
    %c1_19 = arith.constant 1 : index
    %c0_20 = arith.constant 0 : index
    %c0_21 = arith.constant 0 : index
    %28 = vector.load %arg1[%c0_18, %c1_19, %c0_20, %c0_21] : memref<1x6x6x512xbf16, #tpu.memory_space<vmem>>, vector<1x4x4x512xbf16>
    %29 = vector.shape_cast %28 : vector<1x4x4x512xbf16> to vector<4x4x512xbf16>
    %30 = arith.extf %29 : vector<4x4x512xbf16> to vector<4x4x512xf32>
    %c3 = arith.constant 3 : index
    %c0_22 = arith.constant 0 : index
    %31 = vector.load %arg2[%c3, %c0_22] : memref<9x512xf32, #tpu.memory_space<vmem>>, vector<1x512xf32>
    %32 = vector.shape_cast %31 : vector<1x512xf32> to vector<1x1x512xf32>
    %33 = vector.broadcast %32 : vector<1x1x512xf32> to vector<4x4x512xf32>
    %34 = arith.mulf %30, %33 : vector<4x4x512xf32>
    %cst_23 = arith.constant dense<0.000000e+00> : vector<4x4xf32>
    %35 = vector.multi_reduction <add>, %34, %cst_23 [2] : vector<4x4x512xf32> to vector<4x4xf32>
    %36 = arith.addf %27, %35 : vector<4x4xf32>
    %c0_24 = arith.constant 0 : index
    %c1_25 = arith.constant 1 : index
    %c1_26 = arith.constant 1 : index
    %c0_27 = arith.constant 0 : index
    %37 = vector.load %arg1[%c0_24, %c1_25, %c1_26, %c0_27] : memref<1x6x6x512xbf16, #tpu.memory_space<vmem>>, vector<1x4x4x512xbf16>
    %38 = vector.shape_cast %37 : vector<1x4x4x512xbf16> to vector<4x4x512xbf16>
    %39 = arith.extf %38 : vector<4x4x512xbf16> to vector<4x4x512xf32>
    %c4 = arith.constant 4 : index
    %c0_28 = arith.constant 0 : index
    %40 = vector.load %arg2[%c4, %c0_28] : memref<9x512xf32, #tpu.memory_space<vmem>>, vector<1x512xf32>
    %41 = vector.shape_cast %40 : vector<1x512xf32> to vector<1x1x512xf32>
    %42 = vector.broadcast %41 : vector<1x1x512xf32> to vector<4x4x512xf32>
    %43 = arith.mulf %39, %42 : vector<4x4x512xf32>
    %cst_29 = arith.constant dense<0.000000e+00> : vector<4x4xf32>
    %44 = vector.multi_reduction <add>, %43, %cst_29 [2] : vector<4x4x512xf32> to vector<4x4xf32>
    %45 = arith.addf %36, %44 : vector<4x4xf32>
    %c0_30 = arith.constant 0 : index
    %c1_31 = arith.constant 1 : index
    %c2_32 = arith.constant 2 : index
    %c0_33 = arith.constant 0 : index
    %46 = vector.load %arg1[%c0_30, %c1_31, %c2_32, %c0_33] : memref<1x6x6x512xbf16, #tpu.memory_space<vmem>>, vector<1x4x4x512xbf16>
    %47 = vector.shape_cast %46 : vector<1x4x4x512xbf16> to vector<4x4x512xbf16>
    %48 = arith.extf %47 : vector<4x4x512xbf16> to vector<4x4x512xf32>
    %c5 = arith.constant 5 : index
    %c0_34 = arith.constant 0 : index
    %49 = vector.load %arg2[%c5, %c0_34] : memref<9x512xf32, #tpu.memory_space<vmem>>, vector<1x512xf32>
    %50 = vector.shape_cast %49 : vector<1x512xf32> to vector<1x1x512xf32>
    %51 = vector.broadcast %50 : vector<1x1x512xf32> to vector<4x4x512xf32>
    %52 = arith.mulf %48, %51 : vector<4x4x512xf32>
    %cst_35 = arith.constant dense<0.000000e+00> : vector<4x4xf32>
    %53 = vector.multi_reduction <add>, %52, %cst_35 [2] : vector<4x4x512xf32> to vector<4x4xf32>
    %54 = arith.addf %45, %53 : vector<4x4xf32>
    %c0_36 = arith.constant 0 : index
    %c2_37 = arith.constant 2 : index
    %c0_38 = arith.constant 0 : index
    %c0_39 = arith.constant 0 : index
    %55 = vector.load %arg1[%c0_36, %c2_37, %c0_38, %c0_39] : memref<1x6x6x512xbf16, #tpu.memory_space<vmem>>, vector<1x4x4x512xbf16>
    %56 = vector.shape_cast %55 : vector<1x4x4x512xbf16> to vector<4x4x512xbf16>
    %57 = arith.extf %56 : vector<4x4x512xbf16> to vector<4x4x512xf32>
    %c6 = arith.constant 6 : index
    %c0_40 = arith.constant 0 : index
    %58 = vector.load %arg2[%c6, %c0_40] : memref<9x512xf32, #tpu.memory_space<vmem>>, vector<1x512xf32>
    %59 = vector.shape_cast %58 : vector<1x512xf32> to vector<1x1x512xf32>
    %60 = vector.broadcast %59 : vector<1x1x512xf32> to vector<4x4x512xf32>
    %61 = arith.mulf %57, %60 : vector<4x4x512xf32>
    %cst_41 = arith.constant dense<0.000000e+00> : vector<4x4xf32>
    %62 = vector.multi_reduction <add>, %61, %cst_41 [2] : vector<4x4x512xf32> to vector<4x4xf32>
    %63 = arith.addf %54, %62 : vector<4x4xf32>
    %c0_42 = arith.constant 0 : index
    %c2_43 = arith.constant 2 : index
    %c1_44 = arith.constant 1 : index
    %c0_45 = arith.constant 0 : index
    %64 = vector.load %arg1[%c0_42, %c2_43, %c1_44, %c0_45] : memref<1x6x6x512xbf16, #tpu.memory_space<vmem>>, vector<1x4x4x512xbf16>
    %65 = vector.shape_cast %64 : vector<1x4x4x512xbf16> to vector<4x4x512xbf16>
    %66 = arith.extf %65 : vector<4x4x512xbf16> to vector<4x4x512xf32>
    %c7 = arith.constant 7 : index
    %c0_46 = arith.constant 0 : index
    %67 = vector.load %arg2[%c7, %c0_46] : memref<9x512xf32, #tpu.memory_space<vmem>>, vector<1x512xf32>
    %68 = vector.shape_cast %67 : vector<1x512xf32> to vector<1x1x512xf32>
    %69 = vector.broadcast %68 : vector<1x1x512xf32> to vector<4x4x512xf32>
    %70 = arith.mulf %66, %69 : vector<4x4x512xf32>
    %cst_47 = arith.constant dense<0.000000e+00> : vector<4x4xf32>
    %71 = vector.multi_reduction <add>, %70, %cst_47 [2] : vector<4x4x512xf32> to vector<4x4xf32>
    %72 = arith.addf %63, %71 : vector<4x4xf32>
    %c0_48 = arith.constant 0 : index
    %c2_49 = arith.constant 2 : index
    %c2_50 = arith.constant 2 : index
    %c0_51 = arith.constant 0 : index
    %73 = vector.load %arg1[%c0_48, %c2_49, %c2_50, %c0_51] : memref<1x6x6x512xbf16, #tpu.memory_space<vmem>>, vector<1x4x4x512xbf16>
    %74 = vector.shape_cast %73 : vector<1x4x4x512xbf16> to vector<4x4x512xbf16>
    %75 = arith.extf %74 : vector<4x4x512xbf16> to vector<4x4x512xf32>
    %c8 = arith.constant 8 : index
    %c0_52 = arith.constant 0 : index
    %76 = vector.load %arg2[%c8, %c0_52] : memref<9x512xf32, #tpu.memory_space<vmem>>, vector<1x512xf32>
    %77 = vector.shape_cast %76 : vector<1x512xf32> to vector<1x1x512xf32>
    %78 = vector.broadcast %77 : vector<1x1x512xf32> to vector<4x4x512xf32>
    %79 = arith.mulf %75, %78 : vector<4x4x512xf32>
    %cst_53 = arith.constant dense<0.000000e+00> : vector<4x4xf32>
    %80 = vector.multi_reduction <add>, %79, %cst_53 [2] : vector<4x4x512xf32> to vector<4x4xf32>
    %81 = arith.addf %72, %80 : vector<4x4xf32>
    %c0_54 = arith.constant 0 : index
    %c0_55 = arith.constant 0 : index
    %c0_56 = arith.constant 0 : index
    %82 = vector.load %arg3[%c0_54, %c0_55, %c0_56] : memref<1x4x4xf32, #tpu.memory_space<vmem>>, vector<1x4x4xf32>
    %83 = vector.shape_cast %82 : vector<1x4x4xf32> to vector<4x4xf32>
    %84 = vector.shape_cast %81 : vector<4x4xf32> to vector<1x4x4xf32>
    tpu.vector_store %arg3[%c0_54, %c0_55, %c0_56], %84 {strides = array<i32>} : memref<1x4x4xf32, #tpu.memory_space<vmem>>, vector<1x4x4xf32>,
    return
  }
  func.func @transform_0(%arg0: i32) -> (i32, i32, i32, i32) {
    %c0_i32 = arith.constant 0 : i32
    %c0_i32_0 = arith.constant 0 : i32
    %c0_i32_1 = arith.constant 0 : i32
    %c0_i32_2 = arith.constant 0 : i32
    return %arg0, %c0_i32, %c0_i32_0, %c0_i32_1 : i32, i32, i32, i32
  }
  func.func @transform_1(%arg0: i32) -> (i32, i32) {
    %c0_i32 = arith.constant 0 : i32
    %c0_i32_0 = arith.constant 0 : i32
    %c0_i32_1 = arith.constant 0 : i32
    return %c0_i32, %c0_i32_0 : i32, i32
  }
  func.func @transform_2(%arg0: i32) -> (i32, i32, i32) {
    %c0_i32 = arith.constant 0 : i32
    %c0_i32_0 = arith.constant 0 : i32
    %c0_i32_1 = arith.constant 0 : i32
    return %arg0, %c0_i32, %c0_i32_0 : i32, i32, i32
  }
}

</mosaic_0001>

<bundles_post_ra>
// kernel: multi_scale_discriminator_forward.6
= control target key start
LH: loop header
LB: loop body
LE: loop exit
PB: predicated region body
PF: predicated region fallthrough
CT: control target
= control target key end

     0   :  { %s466_s9 = smov 0   ;;  %s563_s0 = inlined_call_operand.vmem [shape: bf16[2,72,256], index: 0, kind: input, shape index: {}]   ;;  %s564_s1 = inlined_call_operand.vmem [shape: f32[2,256], index: 1, kind: input, shape index: {}]   ;;  %s565_s2 = inlined_call_operand.vmem [shape: bf16[2,72,256], index: 2, kind: output, shape index: {}]  }
   0x1 LB: > { %s406_s10 = sadd.s32 4294967295, %s449_s9   ;;  %p410_p0 = scmp.ge.s32.totalorder %s449_s9, 1  ;;  %s449_s9 = sphi %s466_s9, %s12_s9  }
   0x2   : > { %p112_p1 = scmp.lt.s32.totalorder %s449_s9, 3 }
   0x4   : > { %p113_p2 = pnand %p410_p0, %p112_p1 }
   0x5   : > { %p134_p3 = scmp.lt.s32.totalorder (!%p113_p2), %s406_s10, 1 }
   0x6   : > { %116 = sbr.rel (%p113_p2) target bundleno = 53 (0x35), region = 28 }
   0xb   : > { %v173_v0 = vlaneseq  ;;  %s567_s10 = smov (!%p134_p3, %s406_s10), 1  ;;  %v171_v2 = vld [vmem:[%s564_s1] ss:$2 sm:$0x3] }
   0xc   : > { %s434_s13 = smul.u32 72, %s567_s10  ;;  %v413_v5 = vld [vmem:[%s564_s1 + $0x1] ss:$2 sm:$0x3] }
   0xd   : > { %v174_v1 = vshrl.u32 %v173_v0, 7 }
   0xe   : > { %s488_s18 = scalar_lea.vmem %s563_s0, %s434_s13  ;;  %s523_s21 = scalar_lea.vmem %s565_s2, %s434_s13 }
   0xf   : > { %v175_v3 = vsub.s32 0, %v174_v1  ;;  %v179_v4 = vsub.s32 1, %v174_v1  ;;  %v144_v8 = vld [vmem:[%s488_s18] sm:$0xff]  ;;  %v145_v11 = vld [vmem:[%s488_s18 + $0x8] sm:$0xff]  ;;  %v146_v12 = vld [vmem:[%s488_s18 + $0x10] sm:$0xff] }
  0x10   : > { %v153_v13 = vunpack.c.l.bf16 %v144_v8  ;;  %v154_v14 = vunpack.c.h.bf16 %v144_v8  ;;  %v155_v15 = vunpack.c.l.bf16 %v145_v11  ;;  %v156_v16 = vunpack.c.h.bf16 %v145_v11  ;;  %v147_v17 = vld [vmem:[%s488_s18 + $0x18] sm:$0xff]  ;;  %v148_v44 = vld [vmem:[%s488_s18 + $0x20] sm:$0xff]  ;;  %v149_v49 = vld [vmem:[%s488_s18 + $0x28] sm:$0xff] }
  0x11   : > { %v490_v6 = vrot.slane %v171_v2, %v175_v3  ;;  %v492_v7 = vrot.slane %v171_v2, %v179_v4  ;;  %v495_v9 = vrot.slane %v413_v5, %v175_v3  ;;  %v497_v10 = vrot.slane %v413_v5, %v179_v4  ;;  %v150_v60 = vld [vmem:[%s488_s18 + $0x30] sm:$0xff]  ;;  %v151_v61 = vld [vmem:[%s488_s18 + $0x38] sm:$0xff] }
  0x12   : > { %v157_v18 = vunpack.c.l.bf16 %v146_v12  ;;  %v158_v19 = vunpack.c.h.bf16 %v146_v12  ;;  %v159_v20 = vunpack.c.l.bf16 %v147_v17  ;;  %v160_v21 = vunpack.c.h.bf16 %v147_v17 }
  0x13   : > { %v183_v22 = vmul.f32 %v490_v6, %v153_v13  ;;  %v184_v23 = vmul.f32 %v492_v7, %v154_v14  ;;  %v185_v24 = vmul.f32 %v490_v6, %v155_v15  ;;  %v186_v25 = vmul.f32 %v492_v7, %v156_v16 }
  0x14   : > { %v187_v26 = vmul.f32 %v490_v6, %v157_v18  ;;  %v188_v27 = vmul.f32 %v492_v7, %v158_v19  ;;  %v189_v28 = vmul.f32 %v490_v6, %v159_v20  ;;  %v190_v29 = vmul.f32 %v492_v7, %v160_v21 }
  0x15   : > { %v214_v30 = vadd.f32 %v495_v9, %v183_v22  ;;  %v215_v31 = vadd.f32 %v497_v10, %v184_v23  ;;  %v216_v32 = vadd.f32 %v495_v9, %v185_v24  ;;  %v217_v33 = vadd.f32 %v497_v10, %v186_v25 }
  0x16   : > { %v218_v34 = vadd.f32 %v495_v9, %v187_v26  ;;  %v219_v35 = vadd.f32 %v497_v10, %v188_v27  ;;  %v220_v36 = vadd.f32 %v495_v9, %v189_v28  ;;  %v221_v37 = vadd.f32 %v497_v10, %v190_v29 }
  0x17   : > { %vm232_vm0 = vcmp.gt.f32.partialorder %v214_v30, 0.0  ;;  %vm233_vm1 = vcmp.gt.f32.partialorder %v215_v31, 0.0  ;;  %v250_v38 = vmul.f32 0.2, %v214_v30  ;;  %v251_v39 = vmul.f32 0.2, %v215_v31 }
  0x18   : > { %vm234_vm2 = vcmp.gt.f32.partialorder %v216_v32, 0.0  ;;  %vm235_vm3 = vcmp.gt.f32.partialorder %v217_v33, 0.0  ;;  %v252_v40 = vmul.f32 0.2, %v216_v32  ;;  %v253_v41 = vmul.f32 0.2, %v217_v33 }
  0x19   : > { %v268_v42 = vsel %vm232_vm0, %v214_v30, %v250_v38  ;;  %v269_v43 = vsel %vm233_vm1, %v215_v31, %v251_v39  ;;  %vm236_vm4 = vcmp.gt.f32.partialorder %v218_v34, 0.0  ;;  %vm237_vm5 = vcmp.gt.f32.partialorder %v219_v35, 0.0  ;;  %v152_v30 = vld [vmem:[%s488_s18 + $0x40] sm:$0xff] }
  0x1a   : > { %v425_v45 = vpack.c.bf16 %v269_v43, %v268_v42  ;;  %v270_v46 = vsel %vm234_vm2, %v216_v32, %v252_v40  ;;  %v271_v47 = vsel %vm235_vm3, %v217_v33, %v253_v41  ;;  %v254_v48 = vmul.f32 0.2, %v218_v34 }
  0x1b   : > { %v426_v50 = vpack.c.bf16 %v271_v47, %v270_v46  ;;  %v255_v51 = vmul.f32 0.2, %v219_v35  ;;  %vm238_vm6 = vcmp.gt.f32.partialorder %v220_v36, 0.0  ;;  %vm239_vm7 = vcmp.gt.f32.partialorder %v221_v37, 0.0 }
  0x1c   : > { %342 = vst [vmem:[%s523_s21] sm:$0xff] %v425_v45  ;;  %v272_v52 = vsel %vm236_vm4, %v218_v34, %v254_v48  ;;  %v256_v53 = vmul.f32 0.2, %v220_v36  ;;  %v257_v54 = vmul.f32 0.2, %v221_v37  ;;  %v161_v55 = vunpack.c.l.bf16 %v148_v44 }
  0x1d   : > { %343 = vst [vmem:[%s523_s21 + $0x8] sm:$0xff] %v426_v50  ;;  %v273_v56 = vsel %vm237_vm5, %v219_v35, %v255_v51  ;;  %v162_v57 = vunpack.c.h.bf16 %v148_v44  ;;  %v163_v58 = vunpack.c.l.bf16 %v149_v49  ;;  %v164_v59 = vunpack.c.h.bf16 %v149_v49 }
  0x1e   : > { %v427_v62 = vpack.c.bf16 %v273_v56, %v272_v52  ;;  %v274_v63 = vsel %vm238_vm6, %v220_v36, %v256_v53  ;;  %v275_v0 = vsel %vm239_vm7, %v221_v37, %v257_v54  ;;  %v191_v1 = vmul.f32 %v490_v6, %v161_v55 }
  0x1f   : > { %v428_v2 = vpack.c.bf16 %v275_v0, %v274_v63  ;;  %v192_v3 = vmul.f32 %v492_v7, %v162_v57  ;;  %v193_v4 = vmul.f32 %v490_v6, %v163_v58  ;;  %v194_v5 = vmul.f32 %v492_v7, %v164_v59 }
  0x20   : > { %344 = vst [vmem:[%s523_s21 + $0x10] sm:$0xff] %v427_v62  ;;  %v222_v8 = vadd.f32 %v495_v9, %v191_v1  ;;  %v165_v11 = vunpack.c.l.bf16 %v150_v60  ;;  %v166_v12 = vunpack.c.h.bf16 %v150_v60  ;;  %v167_v13 = vunpack.c.l.bf16 %v151_v61 }
  0x21   : > { %345 = vst [vmem:[%s523_s21 + $0x18] sm:$0xff] %v428_v2  ;;  %v223_v14 = vadd.f32 %v497_v10, %v192_v3  ;;  %v224_v15 = vadd.f32 %v495_v9, %v193_v4  ;;  %v225_v16 = vadd.f32 %v497_v10, %v194_v5  ;;  %v168_v17 = vunpack.c.h.bf16 %v151_v61 }
  0x22   : > { %vm240_vm8 = vcmp.gt.f32.partialorder %v222_v8, 0.0  ;;  %v258_v18 = vmul.f32 0.2, %v222_v8  ;;  %v195_v19 = vmul.f32 %v490_v6, %v165_v11  ;;  %v196_v20 = vmul.f32 %v492_v7, %v166_v12 }
  0x23   : > { %vm241_vm9 = vcmp.gt.f32.partialorder %v223_v14, 0.0  ;;  %v259_v21 = vmul.f32 0.2, %v223_v14  ;;  %vm242_vm10 = vcmp.gt.f32.partialorder %v224_v15, 0.0  ;;  %vm243_vm11 = vcmp.gt.f32.partialorder %v225_v16, 0.0 }
  0x24   : > { %v276_v22 = vsel %vm240_vm8, %v222_v8, %v258_v18  ;;  %v260_v23 = vmul.f32 0.2, %v224_v15  ;;  %v261_v24 = vmul.f32 0.2, %v225_v16  ;;  %v226_v25 = vadd.f32 %v495_v9, %v195_v19 }
  0x25   : > { %v277_v26 = vsel %vm241_vm9, %v223_v14, %v259_v21  ;;  %v227_v27 = vadd.f32 %v497_v10, %v196_v20  ;;  %v197_v28 = vmul.f32 %v490_v6, %v167_v13  ;;  %v198_v29 = vmul.f32 %v492_v7, %v168_v17 }
  0x26   : > { %v429_v31 = vpack.c.bf16 %v277_v26, %v276_v22  ;;  %v278_v32 = vsel %vm242_vm10, %v224_v15, %v260_v23  ;;  %v279_v33 = vsel %vm243_vm11, %v225_v16, %v261_v24  ;;  %vm244_vm12 = vcmp.gt.f32.partialorder %v226_v25, 0.0 }
  0x27   : > { %v430_v34 = vpack.c.bf16 %v279_v33, %v278_v32  ;;  %vm245_vm13 = vcmp.gt.f32.partialorder %v227_v27, 0.0  ;;  %v262_v35 = vmul.f32 0.2, %v226_v25  ;;  %v263_v36 = vmul.f32 0.2, %v227_v27 }
  0x28   : > { %346 = vst [vmem:[%s523_s21 + $0x20] sm:$0xff] %v429_v31  ;;  %v228_v37 = vadd.f32 %v495_v9, %v197_v28  ;;  %v229_v38 = vadd.f32 %v497_v10, %v198_v29  ;;  %v169_v39 = vunpack.c.l.bf16 %v152_v30  ;;  %v170_v40 = vunpack.c.h.bf16 %v152_v30 }
  0x29   : > { %347 = vst [vmem:[%s523_s21 + $0x28] sm:$0xff] %v430_v34  ;;  %v280_v41 = vsel %vm244_vm12, %v226_v25, %v262_v35  ;;  %v281_v42 = vsel %vm245_vm13, %v227_v27, %v263_v36 }
  0x2a   : > { %v431_v43 = vpack.c.bf16 %v281_v42, %v280_v41  ;;  %vm246_vm14 = vcmp.gt.f32.partialorder %v228_v37, 0.0  ;;  %vm247_vm15 = vcmp.gt.f32.partialorder %v229_v38, 0.0  ;;  %v264_v44 = vmul.f32 0.2, %v228_v37 }
  0x2b   : > { %v265_v45 = vmul.f32 0.2, %v229_v38  ;;  %v199_v46 = vmul.f32 %v490_v6, %v169_v39  ;;  %v200_v47 = vmul.f32 %v492_v7, %v170_v40 }
  0x2c   : > { %348 = vst [vmem:[%s523_s21 + $0x30] sm:$0xff] %v431_v43  ;;  %v282_v48 = vsel %vm246_vm14, %v228_v37, %v264_v44 }
  0x2d   : > { %v283_v49 = vsel %vm247_vm15, %v229_v38, %v265_v45  ;;  %v230_v50 = vadd.f32 %v495_v9, %v199_v46  ;;  %v231_v51 = vadd.f32 %v497_v10, %v200_v47 }
  0x2e   : > { %v432_v52 = vpack.c.bf16 %v283_v49, %v282_v48 }
  0x2f   : > { %vm248_vm0 = vcmp.gt.f32.partialorder %v230_v50, 0.0  ;;  %vm249_vm1 = vcmp.gt.f32.partialorder %v231_v51, 0.0  ;;  %v266_v53 = vmul.f32 0.2, %v230_v50  ;;  %v267_v54 = vmul.f32 0.2, %v231_v51 }
  0x30   : > { %349 = vst [vmem:[%s523_s21 + $0x38] sm:$0xff] %v432_v52 }
  0x31   : > { %v284_v55 = vsel %vm248_vm0, %v230_v50, %v266_v53  ;;  %v285_v56 = vsel %vm249_vm1, %v231_v51, %v267_v54 }
  0x32   : > { %v433_v57 = vpack.c.bf16 %v285_v56, %v284_v55 }
  0x34   : > { %350 = vst [vmem:[%s523_s21 + $0x40] sm:$0xff] %v433_v57 }
  0x35 PF: > { %s12_s9 = sadd.s32 1, %s449_s9  }
  0x36   : > { %p9_p4 = scmp.ge.s32.totalorder %s12_s9, 4  }
  0x38   :  { %11 = sbr.rel (!%p9_p4) target bundleno = 1 (0x1), region = 59 }

// kernel: multi_scale_discriminator_forward.5
= control target key start
LH: loop header
LB: loop body
LE: loop exit
PB: predicated region body
PF: predicated region fallthrough
CT: control target
= control target key end

     0   :  { %s1282_s15 = smov 0   ;;  %s1592_s0 = inlined_call_operand.vmem [shape: bf16[2,81,16], index: 0, kind: input, shape index: {}]   ;;  %s1593_s1 = inlined_call_operand.vmem [shape: bf16[4,16,256], index: 1, kind: input, shape index: {}]   ;;  %s1594_s2 = inlined_call_operand.vmem [shape: f32[1,72,1], index: 2, kind: input, shape index: {}]   ;;  %s1595_s3 = inlined_call_operand.vmem [shape: bf16[2,72,256], index: 3, kind: output, shape index: {0}]   ;;  %s1596_s4 = inlined_call_operand.vmem [shape: f32[2,2,256], index: 4, kind: output, shape index: {1}]  }
   0x1 LB: > { %s1136_s16 = sadd.s32 4294967295, %s1253_s15   ;;  %p1140_p0 = scmp.ge.s32.totalorder %s1253_s15, 1  ;;  %s1253_s15 = sphi %s1282_s15, %s15_s15  }
   0x2   : > { %p165_p1 = scmp.lt.s32.totalorder %s1253_s15, 3 }
   0x4   : > { %p166_p2 = pnand %p1140_p0, %p165_p1 }
   0x5   : > { %p196_p3 = scmp.lt.s32.totalorder (!%p166_p2), %s1136_s16, 1 }
   0x6   : > { %169 = sbr.rel (%p166_p2) target bundleno = 329 (0x149), region = 32 }
   0xb   : > { %v1225_v0 = vld [vmem:[%s1593_s1 + $0x4] ss:$8 sps:$4 sm:$0xff]   ;;  %v1227_v1 = vld [vmem:[%s1593_s1] ss:$8 sps:$4 sm:$0xff]   ;;  %v1255_v2 = vmov 0   ;;  %s1598_s16 = smov (!%p196_p3, %s1136_s16), 1 }
   0xc   : > { %464 = vmatprep.mubr.bf16.mxu1 %v1255_v2  ;;  %351 = vmatprep.mubr.bf16.mxu0 %v1255_v2  ;;  %v1230_v3 = vld [vmem:[%s1593_s1 + $0x24] ss:$8 sps:$4 sm:$0xff]   ;;  %v1232_v4 = vld [vmem:[%s1593_s1 + $0x20] ss:$8 sps:$4 sm:$0xff]   ;;  %v1235_v5 = vld [vmem:[%s1593_s1 + $0x34] ss:$8 sps:$4 sm:$0xff]  }
   0xd   : > { %446 = vmatprep.subr.bf16.mxu1 %v1225_v0  ;;  %1223 = vset.pattern.permute.xlu0 %v1255_v2  ;;  %s1211_s27 = smul.u32 44, %s1598_s16  ;;  %v1238_v6 = vld [vmem:[%s1593_s1 + $0x14] ss:$8 sps:$4 sm:$0xff]   ;;  %v794_v7 = vld [vmem:[%s1594_s2] sm:$0xff]  ;;  %vm303_vm0 = vcmask 130048   ;;  %v795_v9 = vld [vmem:[%s1594_s2 + $0x8] sm:$0xff] }
   0xe   : > { %447 = vmatpush1.bf16.msra.mxu1 %v1227_v1  ;;  %1224 = vset.pattern.permute.xlu1 %v1255_v2  ;;  %v1236_v8 = vld [vmem:[%s1593_s1 + $0x10] ss:$8 sps:$4 sm:$0xff]   ;;  %v798_v26 = vld [vmem:[%s1594_s2 + $0x20] sm:$0xff]  ;;  %vm253_vm1 = vsmask.f32 7424  ;;  %v799_v29 = vld [vmem:[%s1594_s2 + $0x28] sm:$0xff] }
   0xf   : > { %333 = vmatprep.subr.bf16.mxu0 %v1230_v3  ;;  %s1321_s8 = scalar_lea.vmem %s1592_s0, %s1211_s27  ;;  %805 = vperm.xlu0 %1223, %v794_v7   ;;  %v796_v10 = vld [vmem:[%s1594_s2 + $0x10] sm:$0xff]  ;;  %v797_v21 = vld [vmem:[%s1594_s2 + $0x18] sm:$0xff]  ;;  %v802_v43 = vld [vmem:[%s1594_s2 + $0x40] sm:$0xff]  ;;  %vm719_vm2 = vcmask 1046528   ;;  %s1212_s5 = smul.u32 72, %s1598_s16 }
  0x10   : > { %334 = vmatpush1.bf16.msra.mxu0 %v1232_v4  ;;  %v212_v11 = vld [vmem:[%s1321_s8] sm:$0xf]  ;;  %v213_v12 = vld [vmem:[%s1321_s8 + $0x4] sm:$0xf]  ;;  %v214_v13 = vld [vmem:[%s1321_s8 + $0x8] sm:$0xf]  ;;  %634 = vmatprep.subr.bf16.mxu1 %v1238_v6 }
  0x11   : > { %543 = vmatprep.subr.bf16.mxu0 %v1235_v5  ;;  %815 = vperm.xlu1 %1224, %v796_v10   ;;  %v1147_v14 = vcombine.low %v213_v12, %v214_v13  ;;  %v1335_v15 = vcombine.low %v212_v11, %v213_v12  ;;  %v215_v16 = vld [vmem:[%s1321_s8 + $0xc] sm:$0xf]  ;;  %v216_v17 = vld [vmem:[%s1321_s8 + $0x10] sm:$0xf]  ;;  %v217_v18 = vld [vmem:[%s1321_s8 + $0x14] sm:$0xf] }
  0x12   : > { %v1148_v19 = vcombine.low %v215_v16, %v216_v17  ;;  %v218_v20 = vld [vmem:[%s1321_s8 + $0x18] sm:$0xf]  ;;  %v1160_v32 = vcombine.low %v214_v13, %v215_v16  ;;  %v219_v35 = vld [vmem:[%s1321_s8 + $0x1c] sm:$0xf]  ;;  %v220_v36 = vld [vmem:[%s1321_s8 + $0x20] sm:$0xf]  ;;  %v1161_v45 = vcombine.low %v216_v17, %v217_v18 }
  0x13   : > { %1166 = vmatmul.mubr.msk.bf16.vlgmr.msra.gmra.mxu1 %vm303_vm0, %v1335_v15  ;;  %v255_v22 = vshrl.u32 %v1147_v14, 16  ;;  %v257_v23 = vshll.u32 %v1147_v14, 16  ;;  %v1149_v24 = vcombine.low %v217_v18, %v218_v20  ;;  %810 = vperm.xlu0 %1223, %v795_v9   ;;  %v1233_v30 = vld [vmem:[%s1593_s1 + $0x30] ss:$8 sps:$4 sm:$0xff]   ;;  %v1150_v42 = vcombine.low %v219_v35, %v220_v36  ;;  %v1245_v50 = vld [vmem:[%s1321_s8 + $0x24] sm:$0x1f]   ;;  %s1511_s8 = scalar_lea.vmem %s1595_s3, %s1212_s5 }
  0x14   : > { %v262_v25 = vshll.u32 %v1148_v19, 16  ;;  %635 = vmatpush1.bf16.msra.mxu1 %v1236_v8  ;;  %474 = vmatprep.mubr.bf16.mxu1 %v1255_v2  ;;  %v266_v33 = vshrl.u32 %v1148_v19, 16  ;;  %v800_v38 = vld [vmem:[%s1594_s2 + $0x30] sm:$0xff]  ;;  %v801_v39 = vld [vmem:[%s1594_s2 + $0x38] sm:$0xff]  ;;  %v1162_v52 = vcombine.low %v218_v20, %v219_v35  ;;  %v286_v54 = vshll.u32 %v1245_v50, 16  ;;  %s1201_s9 = sshll.u32 %s1598_s16, 2 }
  0x15   : > { %v259_v27 = vrot.slane %v257_v23, 1  ;;  %820 = vperm.xlu1 %1224, %v797_v21   ;;  %v270_v34 = vshll.u32 %v1149_v24, 16  ;;  %v274_v46 = vshrl.u32 %v1149_v24, 16  ;;  %v278_v47 = vshll.u32 %v1150_v42, 16  ;;  %s210_s12 = scalar_lea.vmem %s1596_s4, %s1201_s9 }
  0x16   : > { %v264_v28 = vrot.slane %v262_v25, 1  ;;  %v282_v53 = vshrl.u32 %v1150_v42, 16  ;;  %v288_v56 = vrot.slane %v286_v54, 1  ;;  %v1163_v58 = vcombine.low %v220_v36, %v220_v36 }
  0x17   : > { %v260_v31 = vor.u32 %v259_v27, %v255_v22  ;;  %825 = vperm.xlu0 %1223, %v798_v26   ;;  %v272_v41 = vrot.slane %v270_v34, 1  ;;  %v280_v49 = vrot.slane %v278_v47, 1  ;;  %v290_v59 = vshrl.u32 %v1245_v50, 16 }
  0x18   : > { %v268_v40 = vor.u32 %v266_v33, %v264_v28 }
  0x19   : > { %v265_v37 = vsel %vm253_vm1, %v260_v31, %v264_v28  ;;  %830 = vperm.xlu1 %1224, %v799_v29   ;;  %v276_v48 = vor.u32 %v274_v46, %v272_v41  ;;  %v284_v55 = vor.u32 %v282_v53, %v280_v49  ;;  %v292_v60 = vor.u32 %v290_v59, %v288_v56 }
  0x1a   : > { %1154 = vmatmul.mubr.msk.bf16.vlgmr.msra.gmra.mxu0 %vm303_vm0, %v265_v37  ;;  %v273_v44 = vsel %vm253_vm1, %v268_v40, %v272_v41 }
  0x1b   : > { %544 = vmatpush1.bf16.msra.mxu0 %v1233_v30  ;;  %1167 = vmatmul.mubr.msk.bf16.gmra.mxu1 %vm303_vm0, %v1160_v32  ;;  %v281_v51 = vsel %vm253_vm1, %v276_v48, %v280_v49  ;;  %v289_v57 = vsel %vm253_vm1, %v284_v55, %v288_v56 }
  0x1c   : > { %361 = vmatprep.mubr.bf16.mxu0 %v1255_v2  ;;  %484 = vmatprep.mubr.bf16.mxu1 %v1255_v2 }
  0x1d   : > { %835 = vperm.xlu0 %1223, %v800_v38   ;;  %840 = vperm.xlu1 %1224, %v801_v39  }
  0x21   : > { %845 = vperm.xlu0 %1223, %v802_v43  }
  0x22   : > { %1155 = vmatmul.mubr.msk.bf16.gmra.mxu0 %vm303_vm0, %v273_v44 }
  0x23   : > { %1168 = vmatmul.mubr.msk.bf16.gmra.mxu1 %vm303_vm0, %v1161_v45  ;;  %371 = vmatprep.mubr.bf16.mxu0 %v1255_v2 }
  0x24   : > { %494 = vmatprep.mubr.bf16.mxu1 %v1255_v2 }
  0x2a   : > { %1156 = vmatmul.mubr.msk.bf16.gmra.mxu0 %vm303_vm0, %v281_v51 }
  0x2b   : > { %1169 = vmatmul.mubr.msk.bf16.gmra.mxu1 %vm303_vm0, %v1162_v52  ;;  %381 = vmatprep.mubr.bf16.mxu0 %v1255_v2 }
  0x2c   : > { %504 = vmatprep.mubr.bf16.mxu1 %v1255_v2 }
  0x32   : > { %1157 = vmatmul.mubr.msk.bf16.gmra.mxu0 %vm303_vm0, %v289_v57 }
  0x33   : > { %1170 = vmatmul.mubr.msk.bf16.gmra.mxu1 %vm303_vm0, %v1163_v58  ;;  %391 = vmatprep.mubr.bf16.mxu0 %v1255_v2 }
  0x34   : > { %652 = vmatprep.mubr.bf16.mxu1 %v1255_v2 }
  0x3a   : > { %1158 = vmatmul.mubr.msk.bf16.gmra.mxu0 %vm303_vm0, %v292_v60 }
  0x3b   : > { %1184 = vmatmul.mubr.msk.bf16.vlgmr.msra.gmra.mxu1 %vm303_vm0, %v1335_v15  ;;  %561 = vmatprep.mubr.bf16.mxu0 %v1255_v2 }
  0x3c   : > { %662 = vmatprep.mubr.bf16.mxu1 %v1255_v2 }
  0x42   : > { %1177 = vmatmul.mubr.msk.bf16.vlgmr.msra.gmra.mxu0 %vm303_vm0, %v265_v37 }
  0x43   : > { %1185 = vmatmul.mubr.msk.bf16.gmra.mxu1 %vm303_vm0, %v1160_v32  ;;  %571 = vmatprep.mubr.bf16.mxu0 %v1255_v2 }
  0x44   : > { %672 = vmatprep.mubr.bf16.mxu1 %v1255_v2 }
  0x4a   : > { %1178 = vmatmul.mubr.msk.bf16.gmra.mxu0 %vm303_vm0, %v273_v44 }
  0x4b   : > { %1186 = vmatmul.mubr.msk.bf16.gmra.mxu1 %vm303_vm0, %v1161_v45  ;;  %581 = vmatprep.mubr.bf16.mxu0 %v1255_v2 }
  0x4c   : > { %682 = vmatprep.mubr.bf16.mxu1 %v1255_v2 }
  0x52   : > { %1179 = vmatmul.mubr.msk.bf16.gmra.mxu0 %vm303_vm0, %v281_v51 }
  0x53   : > { %1187 = vmatmul.mubr.msk.bf16.gmra.mxu1 %vm303_vm0, %v1162_v52  ;;  %591 = vmatprep.mubr.bf16.mxu0 %v1255_v2 }
  0x54   : > { %692 = vmatprep.mubr.bf16.mxu1 %v1255_v2 }
  0x5a   : > { %1180 = vmatmul.mubr.msk.bf16.gmra.mxu0 %vm303_vm0, %v289_v57 }
  0x5b   : > { %1188 = vmatmul.mubr.msk.bf16.gmra.mxu1 %vm303_vm0, %v1163_v58  ;;  %601 = vmatprep.mubr.bf16.mxu0 %v1255_v2 }
  0x62   : > { %1181 = vmatmul.mubr.msk.bf16.gmra.mxu0 %vm303_vm0, %v292_v60 }
  0x8a   : > { %v806_v60 = vpop.permute.xlu0 %805 }
  0xd3   : > { %v466_v61 = vpop.f32.mrf.mxu1 }
  0xd5   : > { %v1409_v62 = vpop.f32.mrf.mxu1 }
  0xd7   : > { %v1411_v63 = vpop.f32.mrf.mxu1 }
  0xd9   : > { %v1413_v0 = vpop.f32.mrf.mxu1 }
  0xda   : > { %v353_v1 = vpop.f32.mrf.mxu0 }
  0xdb   : > { %v1415_v3 = vpop.f32.mrf.mxu1  ;;  %v467_v55 = vadd.f32 %v466_v61, %v353_v1 }
  0xdc   : > { %v355_v4 = vpop.f32.mrf.mxu0 }
  0xdd   : > { %v1417_v5 = vpop.f32.mrf.mxu1 }
  0xde   : > { %v357_v6 = vpop.f32.mrf.mxu0 }
  0xdf   : > { %v1419_v7 = vpop.f32.mrf.mxu1 }
  0xe0   : > { %v359_v8 = vpop.f32.mrf.mxu0 }
  0xe1   : > { %v1421_v2 = vpop.f32.mrf.mxu1 }
  0xe2   : > { %v1423_v9 = vpop.f32.mrf.mxu0 }
  0xe3   : > { %v1425_v10 = vpop.f32.mrf.mxu1 }
  0xe4   : > { %v1427_v11 = vpop.f32.mrf.mxu0 }
  0xe5   : > { %v1429_v12 = vpop.f32.mrf.mxu1 }
  0xe6   : > { %v1431_v13 = vpop.f32.mrf.mxu0 }
  0xe7   : > { %v1433_v14 = vpop.f32.mrf.mxu1 }
  0xe8   : > { %v1435_v15 = vpop.f32.mrf.mxu0 }
  0xe9   : > { %v1437_v16 = vpop.f32.mrf.mxu1 }
  0xea   : > { %v1439_v17 = vpop.f32.mrf.mxu0 }
  0xeb   : > { %v1441_v18 = vpop.f32.mrf.mxu1 }
  0xec   : > { %v1443_v19 = vpop.f32.mrf.mxu0 }
  0xed   : > { %v1445_v20 = vpop.f32.mrf.mxu1 }
  0xee   : > { %v1447_v21 = vpop.f32.mrf.mxu0 }
  0xef   : > { %v1449_v22 = vpop.f32.mrf.mxu1 }
  0xf0   : > { %v1451_v23 = vpop.f32.mrf.mxu0 }
  0xf1   : > { %v1453_v24 = vpop.f32.mrf.mxu1 }
  0xf2   : > { %v1455_v25 = vpop.f32.mrf.mxu0 }
  0xf3   : > { %v1457_v26 = vpop.f32.mrf.mxu1 }
  0xf4   : > { %v1459_v27 = vpop.f32.mrf.mxu0 }
  0xf5   : > { %v1461_v28 = vpop.f32.mrf.mxu1 }
  0xf6   : > { %v1463_v29 = vpop.f32.mrf.mxu0 }
  0xf7   : > { %v510_v30 = vpop.f32.mrf.mxu1 }
  0xf8   : > { %v1465_v31 = vpop.f32.mrf.mxu0 }
  0xf9   : > { %v511_v32 = vpop.f32.mrf.mxu1 }
  0xfa   : > { %v1467_v33 = vpop.f32.mrf.mxu0 }
  0xfb   : > { %v654_v34 = vpop.f32.mrf.mxu1 }
  0xfc   : > { %v1469_v35 = vpop.f32.mrf.mxu0 }
  0xfd   : > { %v656_v36 = vpop.f32.mrf.mxu1 }
  0xfe   : > { %v397_v37 = vpop.f32.mrf.mxu0 }
  0xff   : > { %v658_v38 = vpop.f32.mrf.mxu1 }
 0x100   : > { %v398_v39 = vpop.f32.mrf.mxu0 }
 0x101   : > { %v660_v40 = vpop.f32.mrf.mxu1  ;;  %v473_v39 = vadd.f32 %v1413_v0, %v359_v8 }
 0x102   : > { %v563_v41 = vpop.f32.mrf.mxu0 }
 0x103   : > { %v664_v42 = vpop.f32.mrf.mxu1  ;;  %v1471_v44 = vadd.f32 %v654_v34, %v563_v41  ;;  %v469_v34 = vadd.f32 %v1409_v62, %v355_v4  ;;  %v479_v62 = vadd.f32 %v1417_v5, %v1427_v11 }
 0x104   : > { %v565_v43 = vpop.f32.mrf.mxu0 }
 0x105   : > { %v666_v45 = vpop.f32.mrf.mxu1  ;;  %v1473_v47 = vadd.f32 %v656_v36, %v565_v43  ;;  %v720_v51 = vrot.slane %v1471_v44, 1  ;;  %v471_v36 = vadd.f32 %v1411_v63, %v357_v6  ;;  %v1493_v63 = vadd.f32 %v1419_v7, %v1431_v13 }
 0x106   : > { %v567_v46 = vpop.f32.mrf.mxu0  ;;  %v1497_v6 = vadd.f32 %v1421_v2, %v1435_v15  ;;  %v1506_v13 = vadd.f32 %v1429_v12, %v1443_v19  ;;  %v811_v15 = vpop.permute.xlu0 %810 }
 0x107   : > { %v659_v48 = vadd.f32 %v658_v38, %v567_v46  ;;  %v668_v49 = vpop.f32.mrf.mxu1  ;;  %v723_v57 = vrot.slane %v1473_v47, 1 }
 0x108   : > { %v569_v50 = vpop.f32.mrf.mxu0 }
 0x109   : > { %v721_v52 = vrot.slane %v659_v48, 1  ;;  %v661_v53 = vadd.f32 %v660_v40, %v569_v50  ;;  %v670_v54 = vpop.f32.mrf.mxu1 }
 0x10a   : > { %v573_v56 = vpop.f32.mrf.mxu0 }
 0x10b   : > { %v724_v58 = vrot.slane %v661_v53, 1  ;;  %v665_v59 = vadd.f32 %v664_v42, %v573_v56  ;;  %v722_v30 = vsel %vm719_vm2, %v720_v51, %v721_v52  ;;  %v674_v32 = vpop.f32.mrf.mxu1  ;;  %v477_v42 = vadd.f32 %v1415_v3, %v1423_v9 }
 0x10c   : > { %v776_v37 = vadd.f32 %v722_v30, %v467_v55  ;;  %v575_v38 = vpop.f32.mrf.mxu0  ;;  %v1502_v3 = vadd.f32 %v1425_v10, %v1439_v17  ;;  %v1520_v53 = vadd.f32 %v1437_v16, %v1451_v23  ;;  %v1534_v16 = vadd.f32 %v1449_v22, %v1463_v29 }
 0x10d   : > { %v726_v61 = vrot.slane %v665_v59, 1  ;;  %v725_v1 = vsel %vm719_vm2, %v723_v57, %v724_v58  ;;  %v667_v40 = vadd.f32 %v666_v45, %v575_v38  ;;  %v676_v41 = vpop.f32.mrf.mxu1 }
 0x10e   : > { %v777_v4 = vadd.f32 %v725_v1, %v469_v34  ;;  %v577_v0 = vpop.f32.mrf.mxu0  ;;  %v848_v5 = vmul.f32 %v806_v60, %v776_v37 }
 0x10f   : > { %v728_v8 = vrot.slane %v667_v40, 1  ;;  %v669_v43 = vadd.f32 %v668_v49, %v577_v0  ;;  %v727_v45 = vsel %vm719_vm2, %v721_v52, %v726_v61  ;;  %v678_v46 = vpop.f32.mrf.mxu1  ;;  %v1516_v49 = vadd.f32 %v1433_v14, %v1447_v21 }
 0x110   : > { %v849_v9 = vmul.f32 %v806_v60, %v777_v4  ;;  %v778_v11 = vadd.f32 %v727_v45, %v471_v36  ;;  %v579_v7 = vpop.f32.mrf.mxu0  ;;  %v1529_v14 = vadd.f32 %v1445_v20, %v1459_v27  ;;  %v1543_v20 = vadd.f32 %v1457_v26, %v1467_v33 }
 0x111   : > { %v730_v2 = vrot.slane %v669_v43, 1  ;;  %v729_v48 = vsel %vm719_vm2, %v724_v58, %v728_v8  ;;  %v671_v10 = vadd.f32 %v670_v54, %v579_v7  ;;  %v680_v17 = vpop.f32.mrf.mxu1  ;;  %v1525_v54 = vadd.f32 %v1441_v18, %v1455_v25 }
 0x112   : > { %v1202_v50 = vpack.c.bf16 %v849_v9, %v848_v5  ;;  %v779_v52 = vadd.f32 %v729_v48, %v473_v39  ;;  %v850_v12 = vmul.f32 %v811_v15, %v778_v11  ;;  %v583_v19 = vpop.f32.mrf.mxu0  ;;  %v1539_v25 = vadd.f32 %v1453_v24, %v1465_v31 }
 0x113   : > { %v732_v55 = vrot.slane %v671_v10, 1  ;;  %v675_v56 = vadd.f32 %v674_v32, %v583_v19  ;;  %v731_v59 = vsel %vm719_vm2, %v726_v61, %v730_v2  ;;  %v684_v60 = vpop.f32.mrf.mxu1  ;;  %v816_v32 = vpop.permute.xlu1 %815  ;;  %v1547_v40 = vadd.f32 %v1461_v28, %v1469_v35 }
 0x114   : > { %922 = vst [vmem:[%s1511_s8] sm:$0xff] %v1202_v50  ;;  %v851_v21 = vmul.f32 %v811_v15, %v779_v52  ;;  %v780_v58 = vadd.f32 %v731_v59, %v477_v42  ;;  %v585_v30 = vpop.f32.mrf.mxu0  ;;  %v984_v37 = vmul.f32 %v850_v12, %v850_v12  ;;  %v983_v42 = vmul.f32 %v849_v9, %v849_v9  ;;  %v826_v59 = vpop.permute.xlu0 %825 }
 0x115   : > { %v734_v23 = vrot.slane %v675_v56, 1  ;;  %v733_v34 = vsel %vm719_vm2, %v728_v8, %v732_v55  ;;  %v677_v36 = vadd.f32 %v676_v41, %v585_v30  ;;  %v686_v18 = vpop.f32.mrf.mxu1  ;;  %v982_v41 = vmul.f32 %v848_v5, %v848_v5 }
 0x116   : > { %v1203_v27 = vpack.c.bf16 %v851_v21, %v850_v12  ;;  %v587_v38 = vpop.f32.mrf.mxu0  ;;  %v781_v22 = vadd.f32 %v733_v34, %v479_v62  ;;  %v852_v29 = vmul.f32 %v816_v32, %v780_v58  ;;  %v931_v26 = vadd.f32 %v850_v12, %v848_v5 }
 0x117   : > { %v736_v39 = vrot.slane %v677_v36, 1  ;;  %v679_v61 = vadd.f32 %v678_v46, %v587_v38  ;;  %v688_v1 = vpop.f32.mrf.mxu1  ;;  %v735_v24 = vsel %vm719_vm2, %v730_v2, %v734_v23  ;;  %v985_v33 = vmul.f32 %v851_v21, %v851_v21  ;;  %v821_v48 = vpop.permute.xlu1 %820 }
 0x118   : > { %923 = vst [vmem:[%s1511_s8 + $0x8] sm:$0xff] %v1203_v27  ;;  %v589_v31 = vpop.f32.mrf.mxu0  ;;  %v853_v4 = vmul.f32 %v816_v32, %v781_v22  ;;  %v945_v62 = vadd.f32 %v851_v21, %v849_v9  ;;  %v782_v45 = vadd.f32 %v735_v24, %v1493_v63  ;;  %v1000_v35 = vadd.f32 %v984_v37, %v982_v41 }
 0x119   : > { %v738_v0 = vrot.slane %v679_v61, 1  ;;  %v690_v8 = vpop.f32.mrf.mxu1  ;;  %v737_v43 = vsel %vm719_vm2, %v732_v55, %v736_v39  ;;  %v681_v46 = vadd.f32 %v680_v17, %v589_v31  ;;  %v986_v7 = vmul.f32 %v852_v29, %v852_v29 }
 0x11a   : > { %v593_v28 = vpop.f32.mrf.mxu0  ;;  %v1204_v11 = vpack.c.bf16 %v853_v4, %v852_v29  ;;  %v987_v15 = vmul.f32 %v853_v4, %v853_v4  ;;  %v783_v10 = vadd.f32 %v737_v43, %v1497_v6  ;;  %v854_v50 = vmul.f32 %v821_v48, %v782_v45 }
 0x11b   : > { %v694_v2 = vpop.f32.mrf.mxu1  ;;  %v739_v5 = vsel %vm719_vm2, %v734_v23, %v738_v0  ;;  %v740_v52 = vrot.slane %v681_v46, 1  ;;  %v1014_v12 = vadd.f32 %v985_v33, %v983_v42  ;;  %v685_v63 = vadd.f32 %v684_v60, %v593_v28  ;;  %v831_v43 = vpop.permute.xlu1 %830 }
 0x11c   : > { %v595_v9 = vpop.f32.mrf.mxu0  ;;  %924 = vst [vmem:[%s1511_s8 + $0x10] sm:$0xff] %v1204_v11  ;;  %v784_v19 = vadd.f32 %v739_v5, %v1502_v3  ;;  %v932_v56 = vadd.f32 %v931_v26, %v852_v29  ;;  %v855_v21 = vmul.f32 %v821_v48, %v783_v10  ;;  %v988_v58 = vmul.f32 %v854_v50, %v854_v50 }
 0x11d   : > { %v687_v17 = vadd.f32 %v686_v18, %v595_v9  ;;  %v696_v55 = vpop.f32.mrf.mxu1  ;;  %v741_v30 = vsel %vm719_vm2, %v736_v39, %v740_v52  ;;  %v742_v34 = vrot.slane %v685_v63, 1  ;;  %v946_v37 = vadd.f32 %v945_v62, %v853_v4 }
 0x11e   : > { %v597_v32 = vpop.f32.mrf.mxu0  ;;  %v856_v23 = vmul.f32 %v826_v59, %v784_v19  ;;  %v785_v6 = vadd.f32 %v741_v30, %v1506_v13  ;;  %v1001_v38 = vadd.f32 %v1000_v35, %v986_v7  ;;  %v1015_v3 = vadd.f32 %v1014_v12, %v987_v15  ;;  %v836_v15 = vpop.permute.xlu0 %835 }
 0x11f   : > { %v744_v36 = vrot.slane %v687_v17, 1  ;;  %v698_v27 = vpop.f32.mrf.mxu1  ;;  %v1205_v60 = vpack.c.bf16 %v855_v21, %v854_v50  ;;  %v933_v22 = vadd.f32 %v932_v56, %v854_v50  ;;  %v989_v29 = vmul.f32 %v855_v21, %v855_v21 }
 0x120   : > { %v599_v18 = vpop.f32.mrf.mxu0  ;;  %v857_v61 = vmul.f32 %v826_v59, %v785_v6  ;;  %v743_v41 = vsel %vm719_vm2, %v738_v0, %v742_v34  ;;  %v990_v24 = vmul.f32 %v856_v23, %v856_v23  ;;  %v689_v31 = vadd.f32 %v688_v1, %v597_v32 }
 0x121   : > { %v699_v42 = vpop.f32.mrf.mxu1  ;;  %925 = vst [vmem:[%s1511_s8 + $0x18] sm:$0xff] %v1205_v60  ;;  %v786_v39 = vadd.f32 %v743_v41, %v1516_v49  ;;  %v745_v13 = vsel %vm719_vm2, %v740_v52, %v744_v36  ;;  %v947_v33 = vadd.f32 %v946_v37, %v855_v21  ;;  %v1002_v4 = vadd.f32 %v1001_v38, %v988_v58  ;;  %v841_v38 = vpop.permute.xlu1 %840 }
 0x122   : > { %v603_v26 = vpop.f32.mrf.mxu0  ;;  %v1206_v62 = vpack.c.bf16 %v857_v61, %v856_v23  ;;  %v934_v45 = vadd.f32 %v933_v22, %v856_v23  ;;  %v787_v28 = vadd.f32 %v745_v13, %v1520_v53  ;;  %v746_v35 = vrot.slane %v689_v31, 1 }
 0x123   : > { %v858_v46 = vmul.f32 %v831_v43, %v786_v39  ;;  %v691_v0 = vadd.f32 %v690_v8, %v599_v18  ;;  %v1016_v7 = vadd.f32 %v1015_v3, %v989_v29  ;;  %v948_v49 = vadd.f32 %v947_v33, %v857_v61 }
 0x124   : > { %v605_v11 = vpop.f32.mrf.mxu0  ;;  %926 = vst [vmem:[%s1511_s8 + $0x20] sm:$0xff] %v1206_v62  ;;  %v695_v48 = vadd.f32 %v694_v2, %v603_v26  ;;  %v1003_v1 = vadd.f32 %v1002_v4, %v990_v24  ;;  %v859_v50 = vmul.f32 %v831_v43, %v787_v28  ;;  %v747_v52 = vsel %vm719_vm2, %v742_v34, %v746_v35  ;;  %v846_v34 = vpop.permute.xlu0 %845 }
 0x125   : > { %v697_v5 = vadd.f32 %v696_v55, %v605_v11  ;;  %v992_v10 = vmul.f32 %v858_v46, %v858_v46  ;;  %v788_v12 = vadd.f32 %v747_v52, %v1525_v54  ;;  %v748_v19 = vrot.slane %v691_v0, 1 }
 0x126   : > { %v607_v9 = vpop.f32.mrf.mxu0  ;;  %v750_v53 = vrot.slane %v695_v48, 1  ;;  %v991_v8 = vmul.f32 %v857_v61, %v857_v61  ;;  %v935_v17 = vadd.f32 %v934_v45, %v858_v46  ;;  %v1207_v59 = vpack.c.bf16 %v859_v50, %v858_v46 }
 0x127   : > { %v752_v63 = vrot.slane %v697_v5, 1  ;;  %v1004_v56 = vadd.f32 %v1003_v1, %v992_v10  ;;  %v860_v58 = vmul.f32 %v836_v15, %v788_v12  ;;  %v749_v2 = vsel %vm719_vm2, %v744_v36, %v748_v19 }
 0x128   : > { %v608_v21 = vpop.f32.mrf.mxu0  ;;  %v751_v55 = vsel %vm719_vm2, %v746_v35, %v750_v53  ;;  %v774_v30 = vsel %vm719_vm2, %v750_v53, %v720_v51  ;;  %927 = vst [vmem:[%s1511_s8 + $0x28] sm:$0xff] %v1207_v59  ;;  %v993_v32 = vmul.f32 %v859_v50, %v859_v50  ;;  %v789_v54 = vadd.f32 %v749_v2, %v1529_v14 }
 0x129   : > { %v790_v23 = vadd.f32 %v751_v55, %v1534_v16  ;;  %v792_v6 = vadd.f32 %v774_v30, %v1543_v20  ;;  %v936_v27 = vadd.f32 %v935_v17, %v860_v58  ;;  %v994_v37 = vmul.f32 %v860_v58, %v860_v58 }
 0x12a   : > { %v753_v36 = vsel %vm719_vm2, %v748_v19, %v752_v63  ;;  %v775_v44 = vsel %vm719_vm2, %v752_v63, %v723_v57  ;;  %v861_v3 = vmul.f32 %v836_v15, %v789_v54  ;;  %v1017_v18 = vadd.f32 %v1016_v7, %v991_v8 }
 0x12b   : > { %v862_v51 = vmul.f32 %v841_v38, %v790_v23  ;;  %v864_v60 = vmul.f32 %v846_v34, %v792_v6  ;;  %v791_v14 = vadd.f32 %v753_v36, %v1539_v25  ;;  %v949_v16 = vadd.f32 %v948_v49, %v859_v50 }
 0x12c   : > { %v793_v20 = vadd.f32 %v775_v44, %v1547_v40  ;;  %v1005_v22 = vadd.f32 %v1004_v56, %v994_v37  ;;  %v1208_v29 = vpack.c.bf16 %v861_v3, %v860_v58  ;;  %v995_v61 = vmul.f32 %v861_v3, %v861_v3 }
 0x12d   : > { %v937_v41 = vadd.f32 %v936_v27, %v862_v51  ;;  %v950_v42 = vadd.f32 %v949_v16, %v861_v3  ;;  %v996_v39 = vmul.f32 %v862_v51, %v862_v51  ;;  %v863_v47 = vmul.f32 %v841_v38, %v791_v14 }
 0x12e   : > { %v865_v57 = vmul.f32 %v846_v34, %v793_v20  ;;  %v1018_v24 = vadd.f32 %v1017_v18, %v993_v32  ;;  %928 = vst [vmem:[%s1511_s8 + $0x30] sm:$0xff] %v1208_v29  ;;  %v998_v31 = vmul.f32 %v864_v60, %v864_v60  ;;  %v1256_v49 = vmov 1966171168  }
 0x12f   : > { %v938_v13 = vadd.f32 %v937_v41, %v864_v60  ;;  %v1006_v26 = vadd.f32 %v1005_v22, %v996_v39  ;;  %v1209_v25 = vpack.c.bf16 %v863_v47, %v862_v51  ;;  %v951_v4 = vadd.f32 %v950_v42, %v863_v47 }
 0x130   : > { %v1210_v33 = vpack.c.bf16 %v865_v57, %v864_v60  ;;  %v1019_v62 = vadd.f32 %v1018_v24, %v995_v61  ;;  %v997_v43 = vmul.f32 %v863_v47, %v863_v47  ;;  %v999_v35 = vmul.f32 %v865_v57, %v865_v57 }
 0x131   : > { %v939_v40 = vrot.slane %v938_v13, 4  ;;  %v1007_v45 = vadd.f32 %v1006_v26, %v998_v31  ;;  %929 = vst [vmem:[%s1511_s8 + $0x38] sm:$0xff] %v1209_v25  ;;  %v952_v46 = vadd.f32 %v951_v4, %v865_v57  ;;  %v963_v48 = vunpack.c.l.s4 %v1256_v49 }
 0x132   : > { %930 = vst [vmem:[%s1511_s8 + $0x40] sm:$0xff] %v1210_v33  ;;  %v1020_v0 = vadd.f32 %v1019_v62, %v997_v43  ;;  %v965_v50 = vlaneseq }
 0x133   : > { %v940_v28 = vadd.f32 %v939_v40, %v938_v13  ;;  %v1008_v11 = vrot.slane %v1007_v45, 4  ;;  %v953_v7 = vrot.slane %v952_v46, 4  ;;  %v964_v53 = vunpack.c.0.s8 %v963_v48 }
 0x134   : > { %v1021_v5 = vadd.f32 %v1020_v0, %v999_v35  ;;  %v966_v59 = vshrl.u32 %v965_v50, 7  ;;  %vm979_vm3 = vcmp.lt.s32.totalorder %v965_v50, 256 }
 0x135   : > { %v941_v15 = vrot.slane %v940_v28, 2  ;;  %v1009_v10 = vadd.f32 %v1008_v11, %v1007_v45  ;;  %v954_v1 = vadd.f32 %v953_v7, %v952_v46 }
 0x136   : > { %v1022_v9 = vrot.slane %v1021_v5, 4  ;;  %v967_v54 = vsub.s32 %v964_v53, %v966_v59 }
 0x137   : > { %v942_v52 = vadd.f32 %v941_v15, %v940_v28  ;;  %v1010_v12 = vrot.slane %v1009_v10, 2  ;;  %v955_v19 = vrot.slane %v954_v1, 2 }
 0x138   : > { %v1023_v63 = vadd.f32 %v1022_v9, %v1021_v5 }
 0x139   : > { %v943_v8 = vrot.slane %v942_v52, 1  ;;  %v1011_v17 = vadd.f32 %v1010_v12, %v1009_v10  ;;  %v956_v56 = vadd.f32 %v955_v19, %v954_v1 }
 0x13a   : > { %v1024_v21 = vrot.slane %v1023_v63, 2 }
 0x13b   : > { %v957_v58 = vrot.slane %v956_v56, 1  ;;  %v1012_v2 = vrot.slane %v1011_v17, 1  ;;  %v944_v30 = vadd.f32 %v943_v8, %v942_v52 }
 0x13c   : > { %v1025_v55 = vadd.f32 %v1024_v21, %v1023_v63 }
 0x13d   : > { %v958_v32 = vadd.f32 %v957_v58, %v956_v56  ;;  %v1013_v34 = vadd.f32 %v1012_v2, %v1011_v17 }
 0x13e   : > { %v1026_v23 = vrot.slane %v1025_v55, 1 }
 0x13f   : > { %v961_v6 = vcombine.low %v944_v30, %v958_v32 }
 0x140   : > { %v1027_v27 = vadd.f32 %v1026_v23, %v1025_v55 }
 0x141   : > { %v968_v37 = vrot.slane %v961_v6, %v967_v54 }
 0x142   : > { %v1030_v38 = vcombine.low %v1013_v34, %v1027_v27 }
 0x143   : > { %v975_v36 = vrot.slane %v968_v37, %v967_v54 }
 0x144   : > { %v1037_v44 = vrot.slane %v1030_v38, %v967_v54 }
 0x145   : > { %981 = vst.msk [vmem:[%s210_s12] ss:$2 sm:$0x3] %vm979_vm3, %v975_v36 }
 0x146   : > { %v1044_v3 = vrot.slane %v1037_v44, %v967_v54 }
 0x148   : > { %1198 = vst.msk [vmem:[%s210_s12 + $0x1] ss:$2 sm:$0x3] %vm979_vm3, %v1044_v3 }
 0x149 PF: > { %s15_s15 = sadd.s32 1, %s1253_s15  }
 0x14a   : > { %p12_p4 = scmp.ge.s32.totalorder %s15_s15, 4  }
 0x14c   :  { %14 = sbr.rel (!%p12_p4) target bundleno = 1 (0x1), region = 78 }

// kernel: multi_scale_discriminator_forward.8
= control target key start
LH: loop header
LB: loop body
LE: loop exit
PB: predicated region body
PF: predicated region fallthrough
CT: control target
= control target key end

     0   :  { %s422_s9 = smov 0   ;;  %s509_s0 = inlined_call_operand.vmem [shape: bf16[2,20,512], index: 0, kind: input, shape index: {}]   ;;  %s510_s1 = inlined_call_operand.vmem [shape: f32[2,512], index: 1, kind: input, shape index: {}]   ;;  %s511_s2 = inlined_call_operand.vmem [shape: bf16[2,20,512], index: 2, kind: output, shape index: {}]  }
   0x1 LB: > { %s368_s10 = sadd.s32 4294967295, %s405_s9   ;;  %p372_p0 = scmp.ge.s32.totalorder %s405_s9, 1  ;;  %s405_s9 = sphi %s422_s9, %s12_s9  }
   0x2   : > { %p112_p1 = scmp.lt.s32.totalorder %s405_s9, 3 }
   0x4   : > { %p113_p2 = pnand %p372_p0, %p112_p1 }
   0x5   : > { %p134_p3 = scmp.lt.s32.totalorder (!%p113_p2), %s368_s10, 1 }
   0x6   : > { %116 = sbr.rel (%p113_p2) target bundleno = 43 (0x2b), region = 28 }
   0xb   : > { %v164_v0 = vlaneseq  ;;  %s513_s10 = smov (!%p134_p3, %s368_s10), 1  ;;  %v162_v2 = vld [vmem:[%s510_s1] ss:$2 sm:$0xf] }
   0xc   : > { %v375_v3 = vld [vmem:[%s510_s1 + $0x1] ss:$2 sm:$0xf]  ;;  %s390_s15 = smul.u32 48, %s513_s10 }
   0xd   : > { %v165_v1 = vshrl.u32 %v164_v0, 7 }
   0xe   : > { %s444_s18 = scalar_lea.vmem %s509_s0, %s390_s15  ;;  %s487_s21 = scalar_lea.vmem %s511_s2, %s390_s15 }
   0xf   : > { %v166_v4 = vsub.s32 0, %v165_v1  ;;  %v170_v5 = vsub.s32 1, %v165_v1  ;;  %v174_v6 = vsub.s32 2, %v165_v1  ;;  %v178_v7 = vsub.s32 3, %v165_v1  ;;  %v144_v12 = vld [vmem:[%s444_s18] sm:$0xff]  ;;  %v145_v13 = vld [vmem:[%s444_s18 + $0x8] sm:$0xff] }
  0x10   : > { %v146_v18 = vld [vmem:[%s444_s18 + $0x10] sm:$0xff]  ;;  %v150_v19 = vunpack.c.l.bf16 %v144_v12  ;;  %v151_v20 = vunpack.c.h.bf16 %v144_v12  ;;  %v152_v21 = vunpack.c.l.bf16 %v145_v13  ;;  %v153_v22 = vunpack.c.h.bf16 %v145_v13  ;;  %v147_v23 = vld [vmem:[%s444_s18 + $0x18] sm:$0xff]  ;;  %v148_v50 = vld [vmem:[%s444_s18 + $0x20] sm:$0x33] }
  0x11   : > { %v446_v8 = vrot.slane %v162_v2, %v166_v4  ;;  %v448_v9 = vrot.slane %v162_v2, %v170_v5  ;;  %v450_v10 = vrot.slane %v375_v3, %v166_v4  ;;  %v452_v11 = vrot.slane %v375_v3, %v170_v5  ;;  %v149_v55 = vld [vmem:[%s444_s18 + $0x28] sm:$0x33] }
  0x12   : > { %v456_v14 = vrot.slane %v162_v2, %v174_v6  ;;  %v458_v15 = vrot.slane %v162_v2, %v178_v7  ;;  %v460_v16 = vrot.slane %v375_v3, %v174_v6  ;;  %v462_v17 = vrot.slane %v375_v3, %v178_v7 }
  0x13   : > { %v154_v24 = vunpack.c.l.bf16 %v146_v18  ;;  %v155_v25 = vunpack.c.h.bf16 %v146_v18  ;;  %v156_v26 = vunpack.c.l.bf16 %v147_v23  ;;  %v157_v27 = vunpack.c.h.bf16 %v147_v23 }
  0x14   : > { %v184_v28 = vmul.f32 %v446_v8, %v150_v19  ;;  %v185_v29 = vmul.f32 %v448_v9, %v151_v20  ;;  %v186_v30 = vmul.f32 %v456_v14, %v152_v21  ;;  %v187_v31 = vmul.f32 %v458_v15, %v153_v22 }
  0x15   : > { %v188_v32 = vmul.f32 %v446_v8, %v154_v24  ;;  %v189_v33 = vmul.f32 %v448_v9, %v155_v25  ;;  %v190_v34 = vmul.f32 %v456_v14, %v156_v26  ;;  %v191_v35 = vmul.f32 %v458_v15, %v157_v27 }
  0x16   : > { %v219_v36 = vadd.f32 %v450_v10, %v184_v28  ;;  %v220_v37 = vadd.f32 %v452_v11, %v185_v29  ;;  %v221_v38 = vadd.f32 %v460_v16, %v186_v30  ;;  %v222_v39 = vadd.f32 %v462_v17, %v187_v31 }
  0x17   : > { %v223_v40 = vadd.f32 %v450_v10, %v188_v32  ;;  %v224_v41 = vadd.f32 %v452_v11, %v189_v33  ;;  %v225_v42 = vadd.f32 %v460_v16, %v190_v34  ;;  %v226_v43 = vadd.f32 %v462_v17, %v191_v35 }
  0x18   : > { %vm231_vm0 = vcmp.gt.f32.partialorder %v219_v36, 0.0  ;;  %vm232_vm1 = vcmp.gt.f32.partialorder %v220_v37, 0.0  ;;  %v243_v44 = vmul.f32 0.2, %v219_v36  ;;  %v244_v45 = vmul.f32 0.2, %v220_v37 }
  0x19   : > { %vm233_vm2 = vcmp.gt.f32.partialorder %v221_v38, 0.0  ;;  %vm234_vm3 = vcmp.gt.f32.partialorder %v222_v39, 0.0  ;;  %v245_v46 = vmul.f32 0.2, %v221_v38  ;;  %v246_v47 = vmul.f32 0.2, %v222_v39 }
  0x1a   : > { %v255_v48 = vsel %vm231_vm0, %v219_v36, %v243_v44  ;;  %v256_v49 = vsel %vm232_vm1, %v220_v37, %v244_v45  ;;  %vm235_vm4 = vcmp.gt.f32.partialorder %v223_v40, 0.0  ;;  %vm236_vm5 = vcmp.gt.f32.partialorder %v224_v41, 0.0 }
  0x1b   : > { %v384_v51 = vpack.c.bf16 %v256_v49, %v255_v48  ;;  %v257_v52 = vsel %vm233_vm2, %v221_v38, %v245_v46  ;;  %v258_v53 = vsel %vm234_vm3, %v222_v39, %v246_v47  ;;  %v247_v54 = vmul.f32 0.2, %v223_v40 }
  0x1c   : > { %v385_v56 = vpack.c.bf16 %v258_v53, %v257_v52  ;;  %v248_v57 = vmul.f32 0.2, %v224_v41  ;;  %vm237_vm6 = vcmp.gt.f32.partialorder %v225_v42, 0.0  ;;  %vm238_vm7 = vcmp.gt.f32.partialorder %v226_v43, 0.0 }
  0x1d   : > { %307 = vst [vmem:[%s487_s21] sm:$0xff] %v384_v51  ;;  %v259_v58 = vsel %vm235_vm4, %v223_v40, %v247_v54  ;;  %v249_v59 = vmul.f32 0.2, %v225_v42  ;;  %v250_v60 = vmul.f32 0.2, %v226_v43  ;;  %v158_v61 = vunpack.c.l.bf16 %v148_v50 }
  0x1e   : > { %308 = vst [vmem:[%s487_s21 + $0x8] sm:$0xff] %v385_v56  ;;  %v260_v62 = vsel %vm236_vm5, %v224_v41, %v248_v57  ;;  %v159_v63 = vunpack.c.h.bf16 %v148_v50  ;;  %v160_v0 = vunpack.c.l.bf16 %v149_v55  ;;  %v161_v1 = vunpack.c.h.bf16 %v149_v55 }
  0x1f   : > { %v386_v2 = vpack.c.bf16 %v260_v62, %v259_v58  ;;  %v261_v3 = vsel %vm237_vm6, %v225_v42, %v249_v59  ;;  %v262_v4 = vsel %vm238_vm7, %v226_v43, %v250_v60  ;;  %v192_v5 = vmul.f32 %v446_v8, %v158_v61 }
  0x20   : > { %v387_v6 = vpack.c.bf16 %v262_v4, %v261_v3  ;;  %v193_v7 = vmul.f32 %v448_v9, %v159_v63  ;;  %v194_v12 = vmul.f32 %v456_v14, %v160_v0  ;;  %v195_v13 = vmul.f32 %v458_v15, %v161_v1 }
  0x21   : > { %309 = vst [vmem:[%s487_s21 + $0x10] sm:$0xff] %v386_v2  ;;  %v227_v18 = vadd.f32 %v450_v10, %v192_v5 }
  0x22   : > { %310 = vst [vmem:[%s487_s21 + $0x18] sm:$0xff] %v387_v6  ;;  %v228_v19 = vadd.f32 %v452_v11, %v193_v7  ;;  %v229_v20 = vadd.f32 %v460_v16, %v194_v12  ;;  %v230_v21 = vadd.f32 %v462_v17, %v195_v13 }
  0x23   : > { %vm239_vm8 = vcmp.gt.f32.partialorder %v227_v18, 0.0  ;;  %v251_v8 = vmul.f32 0.2, %v227_v18 }
  0x24   : > { %vm240_vm9 = vcmp.gt.f32.partialorder %v228_v19, 0.0  ;;  %v252_v9 = vmul.f32 0.2, %v228_v19  ;;  %vm241_vm10 = vcmp.gt.f32.partialorder %v229_v20, 0.0  ;;  %vm242_vm11 = vcmp.gt.f32.partialorder %v230_v21, 0.0 }
  0x25   : > { %v263_v14 = vsel %vm239_vm8, %v227_v18, %v251_v8  ;;  %v253_v15 = vmul.f32 0.2, %v229_v20  ;;  %v254_v22 = vmul.f32 0.2, %v230_v21 }
  0x26   : > { %v264_v23 = vsel %vm240_vm9, %v228_v19, %v252_v9 }
  0x27   : > { %v388_v10 = vpack.c.bf16 %v264_v23, %v263_v14  ;;  %v265_v24 = vsel %vm241_vm10, %v229_v20, %v253_v15  ;;  %v266_v25 = vsel %vm242_vm11, %v230_v21, %v254_v22 }
  0x28   : > { %v389_v11 = vpack.c.bf16 %v266_v25, %v265_v24 }
  0x29   : > { %311 = vst [vmem:[%s487_s21 + $0x20] sm:$0x33] %v388_v10 }
  0x2a   : > { %312 = vst [vmem:[%s487_s21 + $0x28] sm:$0x33] %v389_v11 }
  0x2b PF: > { %s12_s9 = sadd.s32 1, %s405_s9  }
  0x2c   : > { %p9_p4 = scmp.ge.s32.totalorder %s12_s9, 4  }
  0x2e   :  { %11 = sbr.rel (!%p9_p4) target bundleno = 1 (0x1), region = 59 }

// kernel: multi_scale_discriminator_forward.9
= control target key start
LH: loop header
LB: loop body
LE: loop exit
PB: predicated region body
PF: predicated region fallthrough
CT: control target
= control target key end

     0   :  { %s1342_s9 = smov 0   ;;  %s1829_s0 = inlined_call_operand.vmem [shape: bf16[2,6,6,512], index: 0, kind: input, shape index: {}]   ;;  %s1830_s1 = inlined_call_operand.vmem [shape: f32[9,512], index: 1, kind: input, shape index: {}]   ;;  %s1831_s2 = inlined_call_operand.vmem [shape: f32[2,4,4], index: 2, kind: output, shape index: {}]  }
   0x1 LB: > { %s1241_s10 = sadd.s32 4294967295, %s1324_s9   ;;  %p1245_p0 = scmp.ge.s32.totalorder %s1324_s9, 1  ;;  %s1324_s9 = sphi %s1342_s9, %s12_s9  }
   0x2   : > { %p112_p1 = scmp.lt.s32.totalorder %s1324_s9, 3 }
   0x4   : > { %p113_p2 = pnand %p1245_p0, %p112_p1 }
   0x5   : > { %p133_p3 = scmp.lt.s32.totalorder (!%p113_p2), %s1241_s10, 1 }
   0x6   : > { %116 = sbr.rel (%p113_p2) target bundleno = 436 (0x1b4), region = 28 }
   0xb   : > { %v168_v0 = vlaneseq  ;;  %s1833_s10 = smov (!%p133_p3, %s1241_s10), 1  ;;  %v1248_v2 = vld [vmem:[%s1830_s1 + $0x1] ss:$8 sm:$0xf]  ;;  %vm308_vm0 = vcmask 1044481   ;;  %vm204_vm1 = vcmask 1043456  }
   0xc   : > { %v166_v3 = vld [vmem:[%s1830_s1] ss:$8 sm:$0xf]  ;;  %s1306_s15 = smul.u32 96, %s1833_s10  ;;  %vm424_vm2 = vcmask 1045506   ;;  %vm1179_vm3 = vcmask 1041409  }
   0xd   : > { %v1353_v1 = vshrl.u32 %v168_v0, 7  ;;  %s1247_s5 = sshll.u32 %s1833_s10, 2  ;;  %vm1181_vm4 = vcmask 1042434   ;;  %vm1183_vm5 = vcmask 1043459   ;;  %vm1186_vm6 = vcmask 27648  }
   0xe   : > { %s1377_s18 = scalar_lea.vmem %s1829_s0, %s1306_s15  ;;  %s141_s8 = scalar_lea.vmem %s1831_s2, %s1247_s5 }
   0xf   : > { %v1363_v4 = vsub.s32 0, %v1353_v1  ;;  %v1366_v5 = vsub.s32 1, %v1353_v1  ;;  %v1369_v6 = vsub.s32 2, %v1353_v1  ;;  %v1372_v7 = vsub.s32 3, %v1353_v1  ;;  %v249_v12 = vld [vmem:[%s1377_s18 + $0x20] sm:$0x77] }
  0x10   : > { %v250_v13 = vld [vmem:[%s1377_s18 + $0x28] sm:$0x77]  ;;  %v245_v14 = vld [vmem:[%s1377_s18] sm:$0x77]  ;;  %v261_v19 = vunpack.c.l.bf16 %v249_v12  ;;  %v262_v20 = vunpack.c.h.bf16 %v249_v12  ;;  %v247_v36 = vld [vmem:[%s1377_s18 + $0x10] sm:$0x77] }
  0x11   : > { %v1380_v8 = vrot.slane %v1248_v2, %v1363_v4  ;;  %v1383_v9 = vrot.slane %v1248_v2, %v1366_v5  ;;  %v1386_v10 = vrot.slane %v1248_v2, %v1369_v6  ;;  %v1389_v11 = vrot.slane %v1248_v2, %v1372_v7  ;;  %v246_v23 = vld [vmem:[%s1377_s18 + $0x8] sm:$0x77]  ;;  %v248_v37 = vld [vmem:[%s1377_s18 + $0x18] sm:$0x77]  ;;  %v142_v42 = vld [vmem:[%s1377_s18] sm:$0x33] }
  0x12   : > { %v1395_v15 = vrot.slane %v166_v3, %v1363_v4  ;;  %v1398_v16 = vrot.slane %v166_v3, %v1366_v5  ;;  %v1401_v17 = vrot.slane %v166_v3, %v1369_v6  ;;  %v1404_v18 = vrot.slane %v166_v3, %v1372_v7  ;;  %v143_v51 = vld [vmem:[%s1377_s18 + $0x8] sm:$0x33]  ;;  %v144_v2 = vld [vmem:[%s1377_s18 + $0x10] sm:$0x33] }
  0x13   : > { %v263_v21 = vunpack.c.l.bf16 %v250_v13  ;;  %v264_v22 = vunpack.c.h.bf16 %v250_v13  ;;  %v253_v24 = vunpack.c.l.bf16 %v245_v14  ;;  %v254_v25 = vunpack.c.h.bf16 %v245_v14 }
  0x14   : > { %v255_v26 = vunpack.c.l.bf16 %v246_v23  ;;  %v256_v27 = vunpack.c.h.bf16 %v246_v23  ;;  %v300_v28 = vmul.f32 %v1380_v8, %v261_v19  ;;  %v301_v29 = vmul.f32 %v1383_v9, %v262_v20  ;;  %v145_v19 = vld [vmem:[%s1377_s18 + $0x18] sm:$0x33] }
  0x15   : > { %v302_v30 = vmul.f32 %v1386_v10, %v263_v21  ;;  %v303_v31 = vmul.f32 %v1389_v11, %v264_v22  ;;  %v292_v32 = vmul.f32 %v1380_v8, %v253_v24  ;;  %v293_v33 = vmul.f32 %v1383_v9, %v254_v25 }
  0x16   : > { %v294_v34 = vmul.f32 %v1386_v10, %v255_v26  ;;  %v295_v35 = vmul.f32 %v1389_v11, %v256_v27  ;;  %v327_v38 = vsel %vm308_vm0, %v300_v28, 0.0  ;;  %v328_v39 = vsel %vm308_vm0, %v301_v29, 0.0 }
  0x17   : > { %v330_v40 = vsel %vm308_vm0, %v302_v30, 0.0  ;;  %v332_v41 = vsel %vm308_vm0, %v303_v31, 0.0  ;;  %v329_v43 = vadd.f32 %v328_v39, %v327_v38  ;;  %v309_v44 = vsel %vm308_vm0, %v292_v32, 0.0  ;;  %v251_v32 = vld [vmem:[%s1377_s18 + $0x30] sm:$0x77] }
  0x18   : > { %v310_v45 = vsel %vm308_vm0, %v293_v33, 0.0  ;;  %v312_v46 = vsel %vm308_vm0, %v294_v34, 0.0  ;;  %v314_v48 = vsel %vm308_vm0, %v295_v35, 0.0  ;;  %v257_v49 = vunpack.c.l.bf16 %v247_v36 }
  0x19   : > { %v311_v47 = vadd.f32 %v310_v45, %v309_v44  ;;  %v258_v50 = vunpack.c.h.bf16 %v247_v36  ;;  %v331_v52 = vadd.f32 %v330_v40, %v329_v43  ;;  %v259_v53 = vunpack.c.l.bf16 %v248_v37 }
  0x1a   : > { %v260_v54 = vunpack.c.h.bf16 %v248_v37  ;;  %v150_v55 = vunpack.c.l.bf16 %v142_v42  ;;  %v296_v57 = vmul.f32 %v1380_v8, %v257_v49  ;;  %v151_v59 = vunpack.c.h.bf16 %v142_v42  ;;  %v252_v37 = vld [vmem:[%s1377_s18 + $0x38] sm:$0x77] }
  0x1b   : > { %v313_v56 = vadd.f32 %v312_v46, %v311_v47  ;;  %v297_v58 = vmul.f32 %v1383_v9, %v258_v50  ;;  %v333_v60 = vadd.f32 %v332_v41, %v331_v52  ;;  %v298_v61 = vmul.f32 %v1386_v10, %v259_v53  ;;  %v361_v50 = vld [vmem:[%s1377_s18] sm:$0x66] }
  0x1c   : > { %v299_v62 = vmul.f32 %v1389_v11, %v260_v54  ;;  %v152_v63 = vunpack.c.l.bf16 %v143_v51  ;;  %v318_v12 = vsel %vm308_vm0, %v296_v57, 0.0  ;;  %v153_v14 = vunpack.c.h.bf16 %v143_v51 }
  0x1d   : > { %v315_v3 = vadd.f32 %v314_v48, %v313_v56  ;;  %v319_v13 = vsel %vm308_vm0, %v297_v58, 0.0  ;;  %334 = vadd.xlane.f32.xlu1 %v333_v60  ;;  %v321_v21 = vsel %vm308_vm0, %v298_v61, 0.0  ;;  %v188_v23 = vmul.f32 %v1395_v15, %v150_v55  ;;  %v362_v55 = vld [vmem:[%s1377_s18 + $0x8] sm:$0x66] }
  0x1e   : > { %v320_v20 = vadd.f32 %v319_v13, %v318_v12  ;;  %v323_v22 = vsel %vm308_vm0, %v299_v62, 0.0  ;;  %v189_v24 = vmul.f32 %v1398_v16, %v151_v59  ;;  %v190_v25 = vmul.f32 %v1401_v17, %v152_v63 }
  0x1f   : > { %316 = vadd.xlane.f32.xlu0 %v315_v3  ;;  %v191_v26 = vmul.f32 %v1404_v18, %v153_v14  ;;  %v154_v27 = vunpack.c.l.bf16 %v144_v2  ;;  %v205_v29 = vsel %vm204_vm1, %v188_v23, 0.0  ;;  %v155_v30 = vunpack.c.h.bf16 %v144_v2  ;;  %v1249_v2 = vld [vmem:[%s1830_s1 + $0x2] ss:$8 sm:$0xf] }
  0x20   : > { %v322_v28 = vadd.f32 %v321_v21, %v320_v20  ;;  %v156_v31 = vunpack.c.l.bf16 %v145_v19  ;;  %v206_v33 = vsel %vm204_vm1, %v189_v24, 0.0  ;;  %v208_v34 = vsel %vm204_vm1, %v190_v25, 0.0  ;;  %v363_v3 = vld [vmem:[%s1377_s18 + $0x10] sm:$0x66]  ;;  %v364_v14 = vld [vmem:[%s1377_s18 + $0x18] sm:$0x66] }
  0x21   : > { %v210_v35 = vsel %vm204_vm1, %v191_v26, 0.0  ;;  %v157_v36 = vunpack.c.h.bf16 %v145_v19  ;;  %v207_v39 = vadd.f32 %v206_v33, %v205_v29  ;;  %v192_v40 = vmul.f32 %v1395_v15, %v154_v27 }
  0x22   : > { %v324_v38 = vadd.f32 %v323_v22, %v322_v28  ;;  %v193_v41 = vmul.f32 %v1398_v16, %v155_v30  ;;  %v194_v42 = vmul.f32 %v1401_v17, %v156_v31  ;;  %v265_v44 = vunpack.c.l.bf16 %v251_v32 }
  0x23   : > { %v195_v43 = vmul.f32 %v1404_v18, %v157_v36  ;;  %v266_v45 = vunpack.c.h.bf16 %v251_v32  ;;  %v209_v46 = vadd.f32 %v208_v34, %v207_v39  ;;  %v214_v47 = vsel %vm204_vm1, %v192_v40, 0.0 }
  0x24   : > { %325 = vadd.xlane.f32.xlu0 %v324_v38  ;;  %v215_v48 = vsel %vm204_vm1, %v193_v41, 0.0  ;;  %v267_v49 = vunpack.c.l.bf16 %v252_v37  ;;  %v217_v52 = vsel %vm204_vm1, %v194_v42, 0.0  ;;  %v268_v54 = vunpack.c.h.bf16 %v252_v37  ;;  %v146_v37 = vld [vmem:[%s1377_s18 + $0x20] sm:$0x33]  ;;  %v147_v38 = vld [vmem:[%s1377_s18 + $0x28] sm:$0x33] }
  0x25   : > { %v216_v51 = vadd.f32 %v215_v48, %v214_v47  ;;  %v219_v53 = vsel %vm204_vm1, %v195_v43, 0.0  ;;  %v211_v56 = vadd.f32 %v210_v35, %v209_v46  ;;  %v304_v57 = vmul.f32 %v1380_v8, %v265_v44 }
  0x26   : > { %v305_v58 = vmul.f32 %v1383_v9, %v266_v45  ;;  %v306_v59 = vmul.f32 %v1386_v10, %v267_v49  ;;  %v307_v61 = vmul.f32 %v1389_v11, %v268_v54  ;;  %v369_v62 = vunpack.c.l.bf16 %v361_v50 }
  0x27   : > { %v218_v60 = vadd.f32 %v217_v52, %v216_v51  ;;  %v370_v63 = vunpack.c.h.bf16 %v361_v50  ;;  %212 = vadd.xlane.f32.xlu1 %v211_v56  ;;  %v336_v12 = vsel %vm308_vm0, %v304_v57, 0.0  ;;  %v371_v9 = vunpack.c.l.bf16 %v362_v55  ;;  %v365_v51 = vld [vmem:[%s1377_s18 + $0x20] sm:$0x66] }
  0x28   : > { %v337_v13 = vsel %vm308_vm0, %v305_v58, 0.0  ;;  %v339_v8 = vsel %vm308_vm0, %v306_v59, 0.0  ;;  %v341_v11 = vsel %vm308_vm0, %v307_v61, 0.0  ;;  %v372_v20 = vunpack.c.h.bf16 %v362_v55 }
  0x29   : > { %v220_v10 = vadd.f32 %v219_v53, %v218_v60  ;;  %v338_v19 = vadd.f32 %v337_v13, %v336_v12  ;;  %v1471_v21 = vrot.slane %v1249_v2, %v1363_v4  ;;  %v1474_v22 = vrot.slane %v1249_v2, %v1366_v5  ;;  %v366_v60 = vld [vmem:[%s1377_s18 + $0x28] sm:$0x66] }
  0x2a   : > { %v1477_v23 = vrot.slane %v1249_v2, %v1369_v6  ;;  %v1480_v24 = vrot.slane %v1249_v2, %v1372_v7  ;;  %v373_v26 = vunpack.c.l.bf16 %v363_v3  ;;  %v374_v27 = vunpack.c.h.bf16 %v363_v3  ;;  %v148_v3 = vld [vmem:[%s1377_s18 + $0x30] sm:$0x33] }
  0x2b   : > { %221 = vadd.xlane.f32.xlu0 %v220_v10  ;;  %v340_v25 = vadd.f32 %v339_v8, %v338_v19  ;;  %v375_v28 = vunpack.c.l.bf16 %v364_v14  ;;  %v408_v29 = vmul.f32 %v1471_v21, %v369_v62  ;;  %v409_v30 = vmul.f32 %v1474_v22, %v370_v63 }
  0x2c   : > { %v410_v31 = vmul.f32 %v1477_v23, %v371_v9  ;;  %v411_v32 = vmul.f32 %v1480_v24, %v372_v20  ;;  %v376_v34 = vunpack.c.h.bf16 %v364_v14  ;;  %v412_v35 = vmul.f32 %v1471_v21, %v373_v26  ;;  %v149_v20 = vld [vmem:[%s1377_s18 + $0x38] sm:$0x33] }
  0x2d   : > { %v342_v33 = vadd.f32 %v341_v11, %v340_v25  ;;  %v413_v36 = vmul.f32 %v1474_v22, %v374_v27  ;;  %v425_v39 = vsel %vm424_vm2, %v408_v29, 0.0  ;;  %v426_v40 = vsel %vm424_vm2, %v409_v30, 0.0 }
  0x2e   : > { %v428_v41 = vsel %vm424_vm2, %v410_v31, 0.0  ;;  %v430_v42 = vsel %vm424_vm2, %v411_v32, 0.0  ;;  %v427_v43 = vadd.f32 %v426_v40, %v425_v39  ;;  %v414_v44 = vmul.f32 %v1477_v23, %v375_v28 }
  0x2f   : > { %343 = vadd.xlane.f32.xlu1 %v342_v33  ;;  %v415_v45 = vmul.f32 %v1480_v24, %v376_v34  ;;  %v434_v46 = vsel %vm424_vm2, %v412_v35, 0.0  ;;  %v435_v47 = vsel %vm424_vm2, %v413_v36, 0.0  ;;  %v158_v48 = vunpack.c.l.bf16 %v146_v37 }
  0x30   : > { %v159_v49 = vunpack.c.h.bf16 %v146_v37  ;;  %v160_v50 = vunpack.c.l.bf16 %v147_v38  ;;  %v429_v52 = vadd.f32 %v428_v41, %v427_v43  ;;  %v436_v53 = vadd.f32 %v435_v47, %v434_v46  ;;  %v367_v37 = vld [vmem:[%s1377_s18 + $0x30] sm:$0x66] }
  0x31   : > { %v437_v54 = vsel %vm424_vm2, %v414_v44, 0.0  ;;  %v439_v55 = vsel %vm424_vm2, %v415_v45, 0.0  ;;  %v161_v56 = vunpack.c.h.bf16 %v147_v38  ;;  %v196_v57 = vmul.f32 %v1395_v15, %v158_v48  ;;  %v368_v38 = vld [vmem:[%s1377_s18 + $0x38] sm:$0x66] }
  0x32   : > { %v197_v58 = vmul.f32 %v1398_v16, %v159_v49  ;;  %v198_v59 = vmul.f32 %v1401_v17, %v160_v50  ;;  %v431_v61 = vadd.f32 %v430_v42, %v429_v52  ;;  %v438_v62 = vadd.f32 %v437_v54, %v436_v53 }
  0x33   : > { %v377_v63 = vunpack.c.l.bf16 %v365_v51  ;;  %v378_v2 = vunpack.c.h.bf16 %v365_v51  ;;  %v199_v12 = vmul.f32 %v1404_v18, %v161_v56  ;;  %v223_v13 = vsel %vm204_vm1, %v196_v57, 0.0  ;;  %v1250_v51 = vld [vmem:[%s1377_s18 + $0x10] sm:$0x33]  ;;  %v1258_v57 = vld [vmem:[%s1830_s1 + $0x3] ss:$8 sm:$0xf] }
  0x34   : > { %v224_v8 = vsel %vm204_vm1, %v197_v58, 0.0  ;;  %v226_v9 = vsel %vm204_vm1, %v198_v59, 0.0  ;;  %432 = vadd.xlane.f32.xlu0 %v431_v61  ;;  %v440_v14 = vadd.f32 %v439_v55, %v438_v62  ;;  %v379_v19 = vunpack.c.l.bf16 %v366_v60 }
  0x35   : > { %v225_v10 = vadd.f32 %v224_v8, %v223_v13  ;;  %v380_v11 = vunpack.c.h.bf16 %v366_v60  ;;  %v228_v25 = vsel %vm204_vm1, %v199_v12, 0.0  ;;  %v416_v26 = vmul.f32 %v1471_v21, %v377_v63  ;;  %v1252_v12 = vld [vmem:[%s1377_s18 + $0x20] sm:$0x33] }
  0x36   : > { %v417_v27 = vmul.f32 %v1474_v22, %v378_v2  ;;  %v162_v28 = vunpack.c.l.bf16 %v148_v3  ;;  %441 = vadd.xlane.f32.xlu1 %v440_v14  ;;  %v418_v30 = vmul.f32 %v1477_v23, %v379_v19  ;;  %v163_v32 = vunpack.c.h.bf16 %v148_v3 }
  0x37   : > { %v227_v29 = vadd.f32 %v226_v9, %v225_v10  ;;  %v419_v31 = vmul.f32 %v1480_v24, %v380_v11  ;;  %v443_v33 = vsel %vm424_vm2, %v416_v26, 0.0  ;;  %v164_v35 = vunpack.c.l.bf16 %v149_v20 }
  0x38   : > { %v444_v34 = vsel %vm424_vm2, %v417_v27, 0.0  ;;  %v165_v36 = vunpack.c.h.bf16 %v149_v20  ;;  %v446_v41 = vsel %vm424_vm2, %v418_v30, 0.0  ;;  %v200_v43 = vmul.f32 %v1395_v15, %v162_v28 }
  0x39   : > { %v229_v39 = vadd.f32 %v228_v25, %v227_v29  ;;  %v445_v40 = vadd.f32 %v444_v34, %v443_v33  ;;  %v448_v42 = vsel %vm424_vm2, %v419_v31, 0.0  ;;  %v201_v44 = vmul.f32 %v1398_v16, %v163_v32  ;;  %v1251_v16 = vld [vmem:[%s1377_s18 + $0x18] sm:$0x33]  ;;  %v1259_v34 = vld [vmem:[%s1377_s18 + $0x10] sm:$0x77] }
  0x3a   : > { %v202_v45 = vmul.f32 %v1401_v17, %v164_v35  ;;  %v203_v46 = vmul.f32 %v1404_v18, %v165_v36  ;;  %v381_v48 = vunpack.c.l.bf16 %v367_v37  ;;  %v382_v49 = vunpack.c.h.bf16 %v367_v37 }
  0x3b   : > { %230 = vadd.xlane.f32.xlu0 %v229_v39  ;;  %v447_v47 = vadd.f32 %v446_v41, %v445_v40  ;;  %v383_v50 = vunpack.c.l.bf16 %v368_v38  ;;  %v232_v52 = vsel %vm204_vm1, %v200_v43, 0.0  ;;  %v233_v53 = vsel %vm204_vm1, %v201_v44, 0.0  ;;  %v1267_v39 = vld [vmem:[%s1830_s1 + $0x4] ss:$8 sm:$0xf] }
  0x3c   : > { %v235_v54 = vsel %vm204_vm1, %v202_v45, 0.0  ;;  %v237_v15 = vsel %vm204_vm1, %v203_v46, 0.0  ;;  %v234_v17 = vadd.f32 %v233_v53, %v232_v52  ;;  %v384_v56 = vunpack.c.h.bf16 %v368_v38  ;;  %v1260_v44 = vld [vmem:[%s1377_s18 + $0x18] sm:$0x77]  ;;  %v1261_v53 = vld [vmem:[%s1377_s18 + $0x20] sm:$0x77] }
  0x3d   : > { %v449_v55 = vadd.f32 %v448_v42, %v447_v47  ;;  %v420_v18 = vmul.f32 %v1471_v21, %v381_v48  ;;  %v421_v58 = vmul.f32 %v1474_v22, %v382_v49  ;;  %v422_v59 = vmul.f32 %v1477_v23, %v383_v50  ;;  %v1253_v22 = vld [vmem:[%s1377_s18 + $0x28] sm:$0x33] }
  0x3e   : > { %v486_v60 = vunpack.c.l.bf16 %v1250_v51  ;;  %v487_v61 = vunpack.c.h.bf16 %v1250_v51  ;;  %v236_v62 = vadd.f32 %v235_v54, %v234_v17  ;;  %v423_v63 = vmul.f32 %v1480_v24, %v384_v56  ;;  %v1262_v17 = vld [vmem:[%s1377_s18 + $0x28] sm:$0x77] }
  0x3f   : > { %450 = vadd.xlane.f32.xlu1 %v449_v55  ;;  %v452_v2 = vsel %vm424_vm2, %v420_v18, 0.0  ;;  %v488_v3 = vunpack.c.l.bf16 %v1251_v16  ;;  %v453_v21 = vsel %vm424_vm2, %v421_v58, 0.0  ;;  %v455_v13 = vsel %vm424_vm2, %v422_v59, 0.0 }
  0x40   : > { %v489_v8 = vunpack.c.h.bf16 %v1251_v16  ;;  %v1544_v9 = vrot.slane %v1258_v57, %v1363_v4  ;;  %v238_v23 = vadd.f32 %v237_v15, %v236_v62  ;;  %v454_v14 = vadd.f32 %v453_v21, %v452_v2 }
  0x41   : > { %v457_v10 = vsel %vm424_vm2, %v423_v63, 0.0  ;;  %v1549_v24 = vrot.slane %v1258_v57, %v1366_v5  ;;  %v1552_v19 = vrot.slane %v1258_v57, %v1369_v6  ;;  %v1555_v11 = vrot.slane %v1258_v57, %v1372_v7 }
  0x42   : > { %v525_v20 = vmul.f32 %v1544_v9, %v486_v60  ;;  %v490_v25 = vunpack.c.l.bf16 %v1252_v12  ;;  %239 = vadd.xlane.f32.xlu0 %v238_v23  ;;  %v456_v26 = vadd.f32 %v455_v13, %v454_v14  ;;  %v491_v28 = vunpack.c.h.bf16 %v1252_v12  ;;  %v1254_v23 = vld [vmem:[%s1377_s18 + $0x30] sm:$0x33] }
  0x43   : > { %v526_v27 = vmul.f32 %v1549_v24, %v487_v61  ;;  %v492_v29 = vunpack.c.l.bf16 %v1253_v22  ;;  %v527_v30 = vmul.f32 %v1552_v19, %v488_v3  ;;  %v528_v31 = vmul.f32 %v1555_v11, %v489_v8 }
  0x44   : > { %v541_v32 = vsel %vm204_vm1, %v525_v20, 0.0  ;;  %v493_v33 = vunpack.c.h.bf16 %v1253_v22  ;;  %v458_v35 = vadd.f32 %v457_v10, %v456_v26  ;;  %v529_v37 = vmul.f32 %v1544_v9, %v490_v25  ;;  %v1255_v26 = vld [vmem:[%s1377_s18 + $0x38] sm:$0x33] }
  0x45   : > { %v542_v36 = vsel %vm204_vm1, %v526_v27, 0.0  ;;  %v530_v38 = vmul.f32 %v1549_v24, %v491_v28  ;;  %v544_v41 = vsel %vm204_vm1, %v527_v30, 0.0  ;;  %v546_v42 = vsel %vm204_vm1, %v528_v31, 0.0  ;;  %v1263_v31 = vld [vmem:[%s1377_s18 + $0x30] sm:$0x77] }
  0x46   : > { %v543_v40 = vadd.f32 %v542_v36, %v541_v32  ;;  %v531_v43 = vmul.f32 %v1552_v19, %v492_v29  ;;  %459 = vadd.xlane.f32.xlu1 %v458_v35  ;;  %v532_v45 = vmul.f32 %v1555_v11, %v493_v33  ;;  %v550_v46 = vsel %vm204_vm1, %v529_v37, 0.0 }
  0x47   : > { %v551_v47 = vsel %vm204_vm1, %v530_v38, 0.0  ;;  %v589_v48 = vunpack.c.l.bf16 %v1259_v34  ;;  %v590_v52 = vunpack.c.h.bf16 %v1259_v34  ;;  %v591_v15 = vunpack.c.l.bf16 %v1260_v44 }
  0x48   : > { %v545_v49 = vadd.f32 %v544_v41, %v543_v40  ;;  %v552_v50 = vadd.f32 %v551_v47, %v550_v46  ;;  %v553_v51 = vsel %vm204_vm1, %v531_v43, 0.0  ;;  %v555_v54 = vsel %vm204_vm1, %v532_v45, 0.0  ;;  %v1264_v40 = vld [vmem:[%s1377_s18 + $0x38] sm:$0x77] }
  0x49   : > { %v592_v16 = vunpack.c.h.bf16 %v1260_v44  ;;  %v1580_v55 = vrot.slane %v1267_v39, %v1363_v4  ;;  %v1584_v57 = vrot.slane %v1267_v39, %v1366_v5  ;;  %v1587_v58 = vrot.slane %v1267_v39, %v1369_v6 }
  0x4a   : > { %v547_v56 = vadd.f32 %v546_v42, %v545_v49  ;;  %v554_v18 = vadd.f32 %v553_v51, %v552_v50  ;;  %v1590_v59 = vrot.slane %v1267_v39, %v1372_v7  ;;  %v593_v61 = vunpack.c.l.bf16 %v1261_v53 }
  0x4b   : > { %v628_v60 = vmul.f32 %v1580_v55, %v589_v48  ;;  %v594_v62 = vunpack.c.h.bf16 %v1261_v53  ;;  %v629_v2 = vmul.f32 %v1584_v57, %v590_v52  ;;  %v630_v3 = vmul.f32 %v1587_v58, %v591_v15  ;;  %v1256_v53 = vld [vmem:[%s1377_s18 + $0x40] sm:$0x33] }
  0x4c   : > { %548 = vadd.xlane.f32.xlu0 %v547_v56  ;;  %v556_v63 = vadd.f32 %v555_v54, %v554_v18  ;;  %v595_v12 = vunpack.c.l.bf16 %v1262_v17  ;;  %v631_v21 = vmul.f32 %v1590_v59, %v592_v16  ;;  %v596_v8 = vunpack.c.h.bf16 %v1262_v17  ;;  %v1257_v56 = vld [vmem:[%s1377_s18 + $0x48] sm:$0x33] }
  0x4d   : > { %v644_v13 = vsel %vm308_vm0, %v628_v60, 0.0  ;;  %v632_v22 = vmul.f32 %v1580_v55, %v593_v61  ;;  %v645_v14 = vsel %vm308_vm0, %v629_v2, 0.0  ;;  %v647_v10 = vsel %vm308_vm0, %v630_v3, 0.0 }
  0x4e   : > { %557 = vadd.xlane.f32.xlu1 %v556_v63  ;;  %v633_v20 = vmul.f32 %v1584_v57, %v594_v62  ;;  %v634_v25 = vmul.f32 %v1587_v58, %v595_v12  ;;  %v646_v27 = vadd.f32 %v645_v14, %v644_v13  ;;  %v649_v28 = vsel %vm308_vm0, %v631_v21, 0.0  ;;  %v1265_v21 = vld [vmem:[%s1377_s18 + $0x40] sm:$0x77]  ;;  %v1266_v14 = vld [vmem:[%s1377_s18 + $0x48] sm:$0x77] }
  0x4f   : > { %v635_v29 = vmul.f32 %v1590_v59, %v596_v8  ;;  %v653_v30 = vsel %vm308_vm0, %v632_v22, 0.0  ;;  %v494_v34 = vunpack.c.l.bf16 %v1254_v23  ;;  %v495_v35 = vunpack.c.h.bf16 %v1254_v23 }
  0x50   : > { %v654_v32 = vsel %vm308_vm0, %v633_v20, 0.0  ;;  %v656_v33 = vsel %vm308_vm0, %v634_v25, 0.0  ;;  %v648_v36 = vadd.f32 %v647_v10, %v646_v27  ;;  %v496_v39 = vunpack.c.l.bf16 %v1255_v26 }
  0x51   : > { %v655_v37 = vadd.f32 %v654_v32, %v653_v30  ;;  %v658_v38 = vsel %vm308_vm0, %v635_v29, 0.0  ;;  %v497_v41 = vunpack.c.h.bf16 %v1255_v26  ;;  %v533_v42 = vmul.f32 %v1544_v9, %v494_v34 }
  0x52   : > { %v534_v43 = vmul.f32 %v1549_v24, %v495_v35  ;;  %v597_v44 = vunpack.c.l.bf16 %v1263_v31  ;;  %v650_v45 = vadd.f32 %v649_v28, %v648_v36  ;;  %v535_v47 = vmul.f32 %v1552_v19, %v496_v39  ;;  %v1268_v35 = vld [vmem:[%s1377_s18 + $0x10] sm:$0x66] }
  0x53   : > { %v657_v46 = vadd.f32 %v656_v33, %v655_v37  ;;  %v598_v48 = vunpack.c.h.bf16 %v1263_v31  ;;  %v536_v49 = vmul.f32 %v1555_v11, %v497_v41  ;;  %v559_v50 = vsel %vm204_vm1, %v533_v42, 0.0 }
  0x54   : > { %v560_v51 = vsel %vm204_vm1, %v534_v43, 0.0  ;;  %v599_v52 = vunpack.c.l.bf16 %v1264_v40  ;;  %651 = vadd.xlane.f32.xlu0 %v650_v45  ;;  %v562_v16 = vsel %vm204_vm1, %v535_v47, 0.0  ;;  %v600_v17 = vunpack.c.h.bf16 %v1264_v40  ;;  %v1276_v45 = vld [vmem:[%s1830_s1 + $0x5] ss:$8 sm:$0xf] }
  0x55   : > { %v659_v54 = vadd.f32 %v658_v38, %v657_v46  ;;  %v561_v15 = vadd.f32 %v560_v51, %v559_v50  ;;  %v564_v18 = vsel %vm204_vm1, %v536_v49, 0.0  ;;  %v636_v60 = vmul.f32 %v1580_v55, %v597_v44  ;;  %v1270_v50 = vld [vmem:[%s1377_s18 + $0x20] sm:$0x66] }
  0x56   : > { %v637_v61 = vmul.f32 %v1584_v57, %v598_v48  ;;  %v638_v62 = vmul.f32 %v1587_v58, %v599_v52  ;;  %v639_v2 = vmul.f32 %v1590_v59, %v600_v17  ;;  %v498_v3 = vunpack.c.l.bf16 %v1256_v53 }
  0x57   : > { %660 = vadd.xlane.f32.xlu1 %v659_v54  ;;  %v563_v63 = vadd.f32 %v562_v16, %v561_v15  ;;  %v499_v12 = vunpack.c.h.bf16 %v1256_v53  ;;  %v662_v13 = vsel %vm308_vm0, %v636_v60, 0.0  ;;  %v500_v23 = vunpack.c.l.bf16 %v1257_v56 }
  0x58   : > { %v663_v8 = vsel %vm308_vm0, %v637_v61, 0.0  ;;  %v665_v22 = vsel %vm308_vm0, %v638_v62, 0.0  ;;  %v667_v25 = vsel %vm308_vm0, %v639_v2, 0.0  ;;  %v501_v26 = vunpack.c.h.bf16 %v1257_v56 }
  0x59   : > { %v565_v10 = vadd.f32 %v564_v18, %v563_v63  ;;  %v664_v20 = vadd.f32 %v663_v8, %v662_v13  ;;  %v537_v27 = vmul.f32 %v1544_v9, %v498_v3  ;;  %v538_v28 = vmul.f32 %v1549_v24, %v499_v12  ;;  %v1269_v9 = vld [vmem:[%s1377_s18 + $0x18] sm:$0x66]  ;;  %v1272_v13 = vld [vmem:[%s1377_s18 + $0x30] sm:$0x66] }
  0x5a   : > { %v539_v29 = vmul.f32 %v1552_v19, %v500_v23  ;;  %v601_v30 = vunpack.c.l.bf16 %v1265_v21  ;;  %v540_v32 = vmul.f32 %v1555_v11, %v501_v26  ;;  %v602_v33 = vunpack.c.h.bf16 %v1265_v21 }
  0x5b   : > { %566 = vadd.xlane.f32.xlu0 %v565_v10  ;;  %v666_v31 = vadd.f32 %v665_v22, %v664_v20  ;;  %v603_v34 = vunpack.c.l.bf16 %v1266_v14  ;;  %v568_v36 = vsel %vm204_vm1, %v537_v27, 0.0  ;;  %v569_v37 = vsel %vm204_vm1, %v538_v28, 0.0  ;;  %v1273_v27 = vld [vmem:[%s1377_s18 + $0x38] sm:$0x66] }
  0x5c   : > { %v571_v38 = vsel %vm204_vm1, %v539_v29, 0.0  ;;  %v604_v39 = vunpack.c.h.bf16 %v1266_v14  ;;  %v570_v40 = vadd.f32 %v569_v37, %v568_v36  ;;  %v573_v19 = vsel %vm204_vm1, %v540_v32, 0.0  ;;  %v1274_v32 = vld [vmem:[%s1377_s18 + $0x40] sm:$0x66] }
  0x5d   : > { %v668_v24 = vadd.f32 %v667_v25, %v666_v31  ;;  %v640_v41 = vmul.f32 %v1580_v55, %v601_v30  ;;  %v641_v11 = vmul.f32 %v1584_v57, %v602_v33  ;;  %v642_v42 = vmul.f32 %v1587_v58, %v603_v34 }
  0x5e   : > { %v643_v43 = vmul.f32 %v1590_v59, %v604_v39  ;;  %v704_v44 = vunpack.c.l.bf16 %v1268_v35  ;;  %v572_v46 = vadd.f32 %v571_v38, %v570_v40  ;;  %v705_v48 = vunpack.c.h.bf16 %v1268_v35  ;;  %v1271_v59 = vld [vmem:[%s1377_s18 + $0x28] sm:$0x66] }
  0x5f   : > { %669 = vadd.xlane.f32.xlu1 %v668_v24  ;;  %v671_v47 = vsel %vm308_vm0, %v640_v41, 0.0  ;;  %v706_v49 = vunpack.c.l.bf16 %v1269_v9  ;;  %v672_v55 = vsel %vm308_vm0, %v641_v11, 0.0  ;;  %v674_v57 = vsel %vm308_vm0, %v642_v42, 0.0  ;;  %v1275_v24 = vld [vmem:[%s1377_s18 + $0x48] sm:$0x66] }
  0x60   : > { %v676_v58 = vsel %vm308_vm0, %v643_v43, 0.0  ;;  %v707_v51 = vunpack.c.h.bf16 %v1269_v9  ;;  %v574_v52 = vadd.f32 %v573_v19, %v572_v46  ;;  %v673_v53 = vadd.f32 %v672_v55, %v671_v47  ;;  %v1277_v46 = vld [vmem:[%s1377_s18 + $0x20] sm:$0x33]  ;;  %v1278_v55 = vld [vmem:[%s1377_s18 + $0x28] sm:$0x33] }
  0x61   : > { %v726_v54 = vrot.slane %v1276_v45, %v1363_v4  ;;  %v730_v15 = vrot.slane %v1276_v45, %v1366_v5  ;;  %v734_v16 = vrot.slane %v1276_v45, %v1369_v6  ;;  %v738_v17 = vrot.slane %v1276_v45, %v1372_v7 }
  0x62   : > { %v708_v56 = vunpack.c.l.bf16 %v1270_v50  ;;  %v709_v18 = vunpack.c.h.bf16 %v1270_v50  ;;  %575 = vadd.xlane.f32.xlu0 %v574_v52  ;;  %v675_v60 = vadd.f32 %v674_v57, %v673_v53  ;;  %v710_v63 = vunpack.c.l.bf16 %v1271_v59 }
  0x63   : > { %v743_v61 = vmul.f32 %v726_v54, %v704_v44  ;;  %v744_v62 = vmul.f32 %v730_v15, %v705_v48  ;;  %v745_v2 = vmul.f32 %v734_v16, %v706_v49  ;;  %v746_v3 = vmul.f32 %v738_v17, %v707_v51 }
  0x64   : > { %v711_v12 = vunpack.c.h.bf16 %v1271_v59  ;;  %v747_v21 = vmul.f32 %v726_v54, %v708_v56  ;;  %v677_v8 = vadd.f32 %v676_v58, %v675_v60  ;;  %v748_v14 = vmul.f32 %v730_v15, %v709_v18  ;;  %v1285_v60 = vld [vmem:[%s1830_s1 + $0x6] ss:$8 sm:$0xf] }
  0x65   : > { %v759_v22 = vsel %vm424_vm2, %v743_v61, 0.0  ;;  %v760_v23 = vsel %vm424_vm2, %v744_v62, 0.0  ;;  %v762_v20 = vsel %vm424_vm2, %v745_v2, 0.0  ;;  %v764_v25 = vsel %vm424_vm2, %v746_v3, 0.0  ;;  %v1279_v3 = vld [vmem:[%s1377_s18 + $0x30] sm:$0x33] }
  0x66   : > { %v761_v10 = vadd.f32 %v760_v23, %v759_v22  ;;  %v749_v26 = vmul.f32 %v734_v16, %v710_v63  ;;  %678 = vadd.xlane.f32.xlu1 %v677_v8  ;;  %v750_v28 = vmul.f32 %v738_v17, %v711_v12  ;;  %v768_v29 = vsel %vm424_vm2, %v747_v21, 0.0 }
  0x67   : > { %v769_v30 = vsel %vm424_vm2, %v748_v14, 0.0  ;;  %v712_v31 = vunpack.c.l.bf16 %v1272_v13  ;;  %v713_v36 = vunpack.c.h.bf16 %v1272_v13  ;;  %v714_v38 = vunpack.c.l.bf16 %v1273_v27 }
  0x68   : > { %v763_v33 = vadd.f32 %v762_v20, %v761_v10  ;;  %v770_v34 = vadd.f32 %v769_v30, %v768_v29  ;;  %v771_v35 = vsel %vm424_vm2, %v749_v26, 0.0  ;;  %v773_v37 = vsel %vm424_vm2, %v750_v28, 0.0 }
  0x69   : > { %v715_v39 = vunpack.c.h.bf16 %v1273_v27  ;;  %v751_v9 = vmul.f32 %v726_v54, %v712_v31  ;;  %v752_v41 = vmul.f32 %v730_v15, %v713_v36  ;;  %v716_v11 = vunpack.c.l.bf16 %v1274_v32 }
  0x6a   : > { %v765_v40 = vadd.f32 %v764_v25, %v763_v33  ;;  %v772_v19 = vadd.f32 %v771_v35, %v770_v34  ;;  %v753_v42 = vmul.f32 %v734_v16, %v714_v38  ;;  %v717_v45 = vunpack.c.h.bf16 %v1274_v32  ;;  %v1286_v33 = vld [vmem:[%s1377_s18 + $0x20] sm:$0x77]  ;;  %v1294_v38 = vld [vmem:[%s1830_s1 + $0x7] ss:$8 sm:$0xf] }
  0x6b   : > { %v754_v43 = vmul.f32 %v738_v17, %v715_v39  ;;  %v777_v44 = vsel %vm424_vm2, %v751_v9, 0.0  ;;  %v778_v48 = vsel %vm424_vm2, %v752_v41, 0.0  ;;  %v718_v49 = vunpack.c.l.bf16 %v1275_v24 }
  0x6c   : > { %766 = vadd.xlane.f32.xlu0 %v765_v40  ;;  %v774_v47 = vadd.f32 %v773_v37, %v772_v19  ;;  %v719_v50 = vunpack.c.h.bf16 %v1275_v24  ;;  %v779_v57 = vadd.f32 %v778_v48, %v777_v44  ;;  %v780_v58 = vsel %vm424_vm2, %v753_v42, 0.0  ;;  %v1287_v19 = vld [vmem:[%s1377_s18 + $0x28] sm:$0x77]  ;;  %v1288_v48 = vld [vmem:[%s1377_s18 + $0x30] sm:$0x77] }
  0x6d   : > { %v782_v51 = vsel %vm424_vm2, %v754_v43, 0.0  ;;  %v755_v59 = vmul.f32 %v726_v54, %v716_v11  ;;  %v756_v52 = vmul.f32 %v730_v15, %v717_v45  ;;  %v757_v53 = vmul.f32 %v734_v16, %v718_v49  ;;  %v1280_v16 = vld [vmem:[%s1377_s18 + $0x38] sm:$0x33] }
  0x6e   : > { %775 = vadd.xlane.f32.xlu1 %v774_v47  ;;  %v758_v56 = vmul.f32 %v738_v17, %v719_v50  ;;  %v820_v18 = vunpack.c.l.bf16 %v1277_v46  ;;  %v781_v61 = vadd.f32 %v780_v58, %v779_v57  ;;  %v821_v63 = vunpack.c.h.bf16 %v1277_v46  ;;  %v1289_v58 = vld [vmem:[%s1377_s18 + $0x38] sm:$0x77] }
  0x6f   : > { %v786_v62 = vsel %vm424_vm2, %v755_v59, 0.0  ;;  %v822_v2 = vunpack.c.l.bf16 %v1278_v55  ;;  %v787_v12 = vsel %vm424_vm2, %v756_v52, 0.0  ;;  %v789_v54 = vsel %vm424_vm2, %v757_v53, 0.0 }
  0x70   : > { %v791_v21 = vsel %vm424_vm2, %v758_v56, 0.0  ;;  %v823_v15 = vunpack.c.h.bf16 %v1278_v55  ;;  %v783_v17 = vadd.f32 %v782_v51, %v781_v61  ;;  %v788_v13 = vadd.f32 %v787_v12, %v786_v62 }
  0x71   : > { %v1687_v8 = vrot.slane %v1285_v60, %v1363_v4  ;;  %v1690_v22 = vrot.slane %v1285_v60, %v1366_v5  ;;  %v1693_v23 = vrot.slane %v1285_v60, %v1369_v6  ;;  %v1696_v14 = vrot.slane %v1285_v60, %v1372_v7 }
  0x72   : > { %v824_v10 = vunpack.c.l.bf16 %v1279_v3  ;;  %v825_v20 = vunpack.c.h.bf16 %v1279_v3  ;;  %784 = vadd.xlane.f32.xlu0 %v783_v17  ;;  %v790_v25 = vadd.f32 %v789_v54, %v788_v13  ;;  %v826_v28 = vunpack.c.l.bf16 %v1280_v16 }
  0x73   : > { %v859_v26 = vmul.f32 %v1687_v8, %v820_v18  ;;  %v860_v27 = vmul.f32 %v1690_v22, %v821_v63  ;;  %v861_v29 = vmul.f32 %v1693_v23, %v822_v2  ;;  %v862_v30 = vmul.f32 %v1696_v14, %v823_v15 }
  0x74   : > { %v827_v31 = vunpack.c.h.bf16 %v1280_v16  ;;  %v863_v32 = vmul.f32 %v1687_v8, %v824_v10  ;;  %v792_v34 = vadd.f32 %v791_v21, %v790_v25  ;;  %v864_v37 = vmul.f32 %v1690_v22, %v825_v20  ;;  %v1281_v16 = vld [vmem:[%s1377_s18 + $0x40] sm:$0x33]  ;;  %v1282_v25 = vld [vmem:[%s1377_s18 + $0x48] sm:$0x33] }
  0x75   : > { %v875_v35 = vsel %vm204_vm1, %v859_v26, 0.0  ;;  %v876_v36 = vsel %vm204_vm1, %v860_v27, 0.0  ;;  %v878_v9 = vsel %vm204_vm1, %v861_v29, 0.0  ;;  %v880_v24 = vsel %vm204_vm1, %v862_v30, 0.0  ;;  %v1290_v30 = vld [vmem:[%s1377_s18 + $0x40] sm:$0x77] }
  0x76   : > { %v877_v39 = vadd.f32 %v876_v36, %v875_v35  ;;  %v865_v40 = vmul.f32 %v1693_v23, %v826_v28  ;;  %793 = vadd.xlane.f32.xlu1 %v792_v34  ;;  %v866_v41 = vmul.f32 %v1696_v14, %v827_v31  ;;  %v884_v11 = vsel %vm204_vm1, %v863_v32, 0.0 }
  0x77   : > { %v885_v42 = vsel %vm204_vm1, %v864_v37, 0.0  ;;  %v923_v43 = vunpack.c.l.bf16 %v1286_v33  ;;  %v924_v47 = vunpack.c.h.bf16 %v1286_v33  ;;  %v925_v50 = vunpack.c.l.bf16 %v1287_v19 }
  0x78   : > { %v879_v44 = vadd.f32 %v878_v9, %v877_v39  ;;  %v886_v45 = vadd.f32 %v885_v42, %v884_v11  ;;  %v887_v46 = vsel %vm204_vm1, %v865_v40, 0.0  ;;  %v889_v49 = vsel %vm204_vm1, %v866_v41, 0.0  ;;  %v1291_v39 = vld [vmem:[%s1377_s18 + $0x48] sm:$0x77] }
  0x79   : > { %v926_v55 = vunpack.c.h.bf16 %v1287_v19  ;;  %v1721_v57 = vrot.slane %v1294_v38, %v1363_v4  ;;  %v1725_v52 = vrot.slane %v1294_v38, %v1366_v5  ;;  %v1728_v53 = vrot.slane %v1294_v38, %v1369_v6 }
  0x7a   : > { %v881_v51 = vadd.f32 %v880_v24, %v879_v44  ;;  %v888_v59 = vadd.f32 %v887_v46, %v886_v45  ;;  %v1731_v56 = vrot.slane %v1294_v38, %v1372_v7  ;;  %v927_v60 = vunpack.c.l.bf16 %v1288_v48 }
  0x7b   : > { %v962_v18 = vmul.f32 %v1721_v57, %v923_v43  ;;  %v928_v61 = vunpack.c.h.bf16 %v1288_v48  ;;  %v963_v63 = vmul.f32 %v1725_v52, %v924_v47  ;;  %v964_v2 = vmul.f32 %v1728_v53, %v925_v50  ;;  %v1283_v48 = vld [vmem:[%s1377_s18 + $0x50] sm:$0x33] }
  0x7c   : > { %882 = vadd.xlane.f32.xlu0 %v881_v51  ;;  %v890_v62 = vadd.f32 %v889_v49, %v888_v59  ;;  %v929_v3 = vunpack.c.l.bf16 %v1289_v58  ;;  %v965_v12 = vmul.f32 %v1731_v56, %v926_v55  ;;  %v930_v21 = vunpack.c.h.bf16 %v1289_v58  ;;  %v1284_v51 = vld [vmem:[%s1377_s18 + $0x58] sm:$0x33] }
  0x7d   : > { %v978_v54 = vsel %vm308_vm0, %v962_v18, 0.0  ;;  %v966_v15 = vmul.f32 %v1721_v57, %v927_v60  ;;  %v979_v17 = vsel %vm308_vm0, %v963_v63, 0.0  ;;  %v981_v13 = vsel %vm308_vm0, %v964_v2, 0.0 }
  0x7e   : > { %891 = vadd.xlane.f32.xlu1 %v890_v62  ;;  %v967_v10 = vmul.f32 %v1725_v52, %v928_v61  ;;  %v968_v20 = vmul.f32 %v1728_v53, %v929_v3  ;;  %v980_v26 = vadd.f32 %v979_v17, %v978_v54  ;;  %v983_v27 = vsel %vm308_vm0, %v965_v12, 0.0  ;;  %v1292_v12 = vld [vmem:[%s1377_s18 + $0x50] sm:$0x77]  ;;  %v1293_v17 = vld [vmem:[%s1377_s18 + $0x58] sm:$0x77] }
  0x7f   : > { %v969_v28 = vmul.f32 %v1731_v56, %v930_v21  ;;  %v987_v29 = vsel %vm308_vm0, %v966_v15, 0.0  ;;  %v828_v33 = vunpack.c.l.bf16 %v1281_v16  ;;  %v829_v34 = vunpack.c.h.bf16 %v1281_v16 }
  0x80   : > { %v988_v31 = vsel %vm308_vm0, %v967_v10, 0.0  ;;  %v990_v32 = vsel %vm308_vm0, %v968_v20, 0.0  ;;  %v982_v35 = vadd.f32 %v981_v13, %v980_v26  ;;  %v830_v38 = vunpack.c.l.bf16 %v1282_v25 }
  0x81   : > { %v989_v36 = vadd.f32 %v988_v31, %v987_v29  ;;  %v992_v37 = vsel %vm308_vm0, %v969_v28, 0.0  ;;  %v831_v9 = vunpack.c.h.bf16 %v1282_v25  ;;  %v867_v24 = vmul.f32 %v1687_v8, %v828_v33 }
  0x82   : > { %v868_v40 = vmul.f32 %v1690_v22, %v829_v34  ;;  %v931_v19 = vunpack.c.l.bf16 %v1290_v30  ;;  %v984_v41 = vadd.f32 %v983_v27, %v982_v35  ;;  %v869_v42 = vmul.f32 %v1693_v23, %v830_v38  ;;  %v1295_v34 = vld [vmem:[%s1377_s18 + $0x20] sm:$0x66] }
  0x83   : > { %v991_v11 = vadd.f32 %v990_v32, %v989_v36  ;;  %v932_v43 = vunpack.c.h.bf16 %v1290_v30  ;;  %v870_v44 = vmul.f32 %v1696_v14, %v831_v9  ;;  %v893_v45 = vsel %vm204_vm1, %v867_v24, 0.0 }
  0x84   : > { %v894_v46 = vsel %vm204_vm1, %v868_v40, 0.0  ;;  %v933_v47 = vunpack.c.l.bf16 %v1291_v39  ;;  %985 = vadd.xlane.f32.xlu0 %v984_v41  ;;  %v896_v55 = vsel %vm204_vm1, %v869_v42, 0.0  ;;  %v934_v58 = vunpack.c.h.bf16 %v1291_v39  ;;  %v1303_v41 = vld [vmem:[%s1830_s1 + $0x20] ss:$8 sm:$0xf] }
  0x85   : > { %v993_v49 = vadd.f32 %v992_v37, %v991_v11  ;;  %v895_v50 = vadd.f32 %v894_v46, %v893_v45  ;;  %v898_v59 = vsel %vm204_vm1, %v870_v44, 0.0  ;;  %v970_v18 = vmul.f32 %v1721_v57, %v931_v19  ;;  %v1297_v45 = vld [vmem:[%s1377_s18 + $0x30] sm:$0x66] }
  0x86   : > { %v971_v60 = vmul.f32 %v1725_v52, %v932_v43  ;;  %v972_v61 = vmul.f32 %v1728_v53, %v933_v47  ;;  %v973_v63 = vmul.f32 %v1731_v56, %v934_v58  ;;  %v832_v2 = vunpack.c.l.bf16 %v1283_v48 }
  0x87   : > { %994 = vadd.xlane.f32.xlu1 %v993_v49  ;;  %v897_v62 = vadd.f32 %v896_v55, %v895_v50  ;;  %v833_v3 = vunpack.c.h.bf16 %v1283_v48  ;;  %v996_v54 = vsel %vm308_vm0, %v970_v18, 0.0  ;;  %v834_v16 = vunpack.c.l.bf16 %v1284_v51 }
  0x88   : > { %v997_v21 = vsel %vm308_vm0, %v971_v60, 0.0  ;;  %v999_v15 = vsel %vm308_vm0, %v972_v61, 0.0  ;;  %v1001_v20 = vsel %vm308_vm0, %v973_v63, 0.0  ;;  %v835_v25 = vunpack.c.h.bf16 %v1284_v51 }
  0x89   : > { %v899_v13 = vadd.f32 %v898_v59, %v897_v62  ;;  %v998_v10 = vadd.f32 %v997_v21, %v996_v54  ;;  %v871_v26 = vmul.f32 %v1687_v8, %v832_v2  ;;  %v872_v27 = vmul.f32 %v1690_v22, %v833_v3  ;;  %v1296_v8 = vld [vmem:[%s1377_s18 + $0x28] sm:$0x66] }
  0x8a   : > { %v873_v28 = vmul.f32 %v1693_v23, %v834_v16  ;;  %v935_v29 = vunpack.c.l.bf16 %v1292_v12  ;;  %v874_v31 = vmul.f32 %v1696_v14, %v835_v25  ;;  %v936_v32 = vunpack.c.h.bf16 %v1292_v12 }
  0x8b   : > { %900 = vadd.xlane.f32.xlu0 %v899_v13  ;;  %v1000_v30 = vadd.f32 %v999_v15, %v998_v10  ;;  %v937_v33 = vunpack.c.l.bf16 %v1293_v17  ;;  %v902_v35 = vsel %vm204_vm1, %v871_v26, 0.0  ;;  %v903_v36 = vsel %vm204_vm1, %v872_v27, 0.0  ;;  %v1300_v13 = vld [vmem:[%s1377_s18 + $0x48] sm:$0x66]  ;;  %v1301_v27 = vld [vmem:[%s1377_s18 + $0x50] sm:$0x66] }
  0x8c   : > { %v905_v37 = vsel %vm204_vm1, %v873_v28, 0.0  ;;  %v938_v38 = vunpack.c.h.bf16 %v1293_v17  ;;  %v904_v39 = vadd.f32 %v903_v36, %v902_v35  ;;  %v907_v23 = vsel %vm204_vm1, %v874_v31, 0.0  ;;  %v1302_v36 = vld [vmem:[%s1377_s18 + $0x58] sm:$0x66] }
  0x8d   : > { %v1002_v22 = vadd.f32 %v1001_v20, %v1000_v30  ;;  %v974_v9 = vmul.f32 %v1721_v57, %v935_v29  ;;  %v975_v14 = vmul.f32 %v1725_v52, %v936_v32  ;;  %v976_v24 = vmul.f32 %v1728_v53, %v937_v33 }
  0x8e   : > { %v977_v40 = vmul.f32 %v1731_v56, %v938_v38  ;;  %v1038_v19 = vunpack.c.l.bf16 %v1295_v34  ;;  %v906_v11 = vadd.f32 %v905_v37, %v904_v39  ;;  %v1039_v43 = vunpack.c.h.bf16 %v1295_v34  ;;  %v1298_v56 = vld [vmem:[%s1377_s18 + $0x38] sm:$0x66] }
  0x8f   : > { %1003 = vadd.xlane.f32.xlu1 %v1002_v22  ;;  %v1005_v42 = vsel %vm308_vm0, %v974_v9, 0.0  ;;  %v1040_v44 = vunpack.c.l.bf16 %v1296_v8  ;;  %v1006_v57 = vsel %vm308_vm0, %v975_v14, 0.0  ;;  %v1008_v52 = vsel %vm308_vm0, %v976_v24, 0.0 }
  0x90   : > { %v1010_v53 = vsel %vm308_vm0, %v977_v40, 0.0  ;;  %v1041_v46 = vunpack.c.h.bf16 %v1296_v8  ;;  %v908_v47 = vadd.f32 %v907_v23, %v906_v11  ;;  %v1007_v48 = vadd.f32 %v1006_v57, %v1005_v42 }
  0x91   : > { %v1060_v49 = vrot.slane %v1303_v41, %v1363_v4  ;;  %v1064_v50 = vrot.slane %v1303_v41, %v1366_v5  ;;  %v1068_v55 = vrot.slane %v1303_v41, %v1369_v6  ;;  %v1072_v58 = vrot.slane %v1303_v41, %v1372_v7  ;;  %v1299_v4 = vld [vmem:[%s1377_s18 + $0x40] sm:$0x66] }
  0x92   : > { %v1042_v51 = vunpack.c.l.bf16 %v1297_v45  ;;  %v1043_v59 = vunpack.c.h.bf16 %v1297_v45  ;;  %909 = vadd.xlane.f32.xlu0 %v908_v47  ;;  %v1009_v18 = vadd.f32 %v1008_v52, %v1007_v48  ;;  %v1044_v62 = vunpack.c.l.bf16 %v1298_v56 }
  0x93   : > { %v1077_v60 = vmul.f32 %v1060_v49, %v1038_v19  ;;  %v1078_v61 = vmul.f32 %v1064_v50, %v1039_v43  ;;  %v1079_v63 = vmul.f32 %v1068_v55, %v1040_v44  ;;  %v1080_v2 = vmul.f32 %v1072_v58, %v1041_v46 }
  0x94   : > { %v1045_v3 = vunpack.c.h.bf16 %v1298_v56  ;;  %v1081_v12 = vmul.f32 %v1060_v49, %v1042_v51  ;;  %v1011_v54 = vadd.f32 %v1010_v53, %v1009_v18  ;;  %v1082_v7 = vmul.f32 %v1064_v50, %v1043_v59 }
  0x95   : > { %v1093_v5 = vsel %vm424_vm2, %v1077_v60, 0.0  ;;  %v1094_v6 = vsel %vm424_vm2, %v1078_v61, 0.0  ;;  %v1096_v15 = vsel %vm424_vm2, %v1079_v63, 0.0  ;;  %v1098_v16 = vsel %vm424_vm2, %v1080_v2, 0.0 }
  0x96   : > { %v1095_v21 = vadd.f32 %v1094_v6, %v1093_v5  ;;  %v1083_v17 = vmul.f32 %v1068_v55, %v1044_v62  ;;  %1012 = vadd.xlane.f32.xlu1 %v1011_v54  ;;  %v1084_v10 = vmul.f32 %v1072_v58, %v1045_v3  ;;  %v1102_v20 = vsel %vm424_vm2, %v1081_v12, 0.0 }
  0x97   : > { %v1103_v25 = vsel %vm424_vm2, %v1082_v7, 0.0  ;;  %v1046_v26 = vunpack.c.l.bf16 %v1299_v4  ;;  %v1047_v31 = vunpack.c.h.bf16 %v1299_v4  ;;  %v1048_v33 = vunpack.c.l.bf16 %v1300_v13 }
  0x98   : > { %v1097_v28 = vadd.f32 %v1096_v15, %v1095_v21  ;;  %v1104_v29 = vadd.f32 %v1103_v25, %v1102_v20  ;;  %v1105_v30 = vsel %vm424_vm2, %v1083_v17, 0.0  ;;  %v1107_v32 = vsel %vm424_vm2, %v1084_v10, 0.0 }
  0x99   : > { %v1049_v34 = vunpack.c.h.bf16 %v1300_v13  ;;  %v1085_v35 = vmul.f32 %v1060_v49, %v1046_v26  ;;  %v1086_v8 = vmul.f32 %v1064_v50, %v1047_v31  ;;  %v1050_v22 = vunpack.c.l.bf16 %v1301_v27 }
  0x9a   : > { %v1099_v37 = vadd.f32 %v1098_v16, %v1097_v28  ;;  %v1106_v38 = vadd.f32 %v1105_v30, %v1104_v29  ;;  %v1087_v39 = vmul.f32 %v1068_v55, %v1048_v33  ;;  %v1051_v14 = vunpack.c.h.bf16 %v1301_v27 }
  0x9b   : > { %v1088_v23 = vmul.f32 %v1072_v58, %v1049_v34  ;;  %v1111_v9 = vsel %vm424_vm2, %v1085_v35, 0.0  ;;  %v1112_v40 = vsel %vm424_vm2, %v1086_v8, 0.0  ;;  %v1052_v19 = vunpack.c.l.bf16 %v1302_v36 }
  0x9c   : > { %1100 = vadd.xlane.f32.xlu0 %v1099_v37  ;;  %v1108_v24 = vadd.f32 %v1107_v32, %v1106_v38  ;;  %v1053_v41 = vunpack.c.h.bf16 %v1302_v36  ;;  %v1113_v11 = vadd.f32 %v1112_v40, %v1111_v9  ;;  %v1114_v42 = vsel %vm424_vm2, %v1087_v39, 0.0 }
  0x9d   : > { %v1089_v43 = vmul.f32 %v1060_v49, %v1050_v22  ;;  %v1116_v44 = vsel %vm424_vm2, %v1088_v23, 0.0  ;;  %v1090_v45 = vmul.f32 %v1064_v50, %v1051_v14  ;;  %v1091_v57 = vmul.f32 %v1068_v55, %v1052_v19 }
  0x9e   : > { %1109 = vadd.xlane.f32.xlu1 %v1108_v24  ;;  %v1092_v52 = vmul.f32 %v1072_v58, %v1053_v41  ;;  %v1115_v53 = vadd.f32 %v1114_v42, %v1113_v11  ;;  %v1326_v60 = vmov 0  }
  0x9f   : > { %v1120_v46 = vsel %vm424_vm2, %v1089_v43, 0.0  ;;  %v1121_v56 = vsel %vm424_vm2, %v1090_v45, 0.0  ;;  %v1123_v47 = vsel %vm424_vm2, %v1091_v57, 0.0  ;;  %1317 = vset.pattern.permute.xlu1 %v1326_v60  ;;  %1316 = vset.pattern.permute.xlu0 %v1326_v60 }
  0xa0   : > { %v1117_v48 = vadd.f32 %v1116_v44, %v1115_v53  ;;  %v1122_v51 = vadd.f32 %v1121_v56, %v1120_v46  ;;  %v1125_v59 = vsel %vm424_vm2, %v1092_v52, 0.0 }
  0xa2   : > { %1118 = vadd.xlane.f32.xlu0 %v1117_v48  ;;  %v1124_v18 = vadd.f32 %v1123_v47, %v1122_v51 }
  0xa4   : > { %v1126_v49 = vadd.f32 %v1125_v59, %v1124_v18 }
  0xa6   : > { %1127 = vadd.xlane.f32.xlu1 %v1126_v49  ;;  %v335_v55 = vpop.xlane.xlu1 %334 }
  0xa7   : > { %v351_v34 = vrot.slane %v335_v55, 1 }
  0xa8   : > { %v317_v50 = vpop.xlane.xlu0 %316 }
  0xa9   : > { %v349_v32 = vrot.slane %v317_v50, 1 }
  0xad   : > { %v326_v58 = vpop.xlane.xlu0 %325 }
  0xae   : > { %v350_v36 = vrot.slane %v326_v58, 1 }
  0xb0   : > { %v213_v61 = vpop.xlane.xlu1 %212 }
  0xb1   : > { %v357_v37 = vadd.f32 %v349_v32, %v213_v61 }
  0xb4   : > { %v222_v62 = vpop.xlane.xlu0 %221 }
  0xb5   : > { %v358_v23 = vadd.f32 %v350_v36, %v222_v62 }
  0xb8   : > { %v344_v63 = vpop.xlane.xlu1 %343 }
  0xb9   : > { %v352_v24 = vrot.slane %v344_v63, 1 }
  0xbd   : > { %v433_v2 = vpop.xlane.xlu0 %432 }
  0xbe   : > { %v465_v33 = vrot.slane %v433_v2, 2 }
  0xbf   : > { %v442_v3 = vpop.xlane.xlu1 %441 }
  0xc0   : > { %v466_v38 = vrot.slane %v442_v3, 2  ;;  %v473_v9 = vadd.f32 %v465_v33, %v357_v37 }
  0xc2   : > { %v474_v19 = vadd.f32 %v466_v38, %v358_v23 }
  0xc4   : > { %v231_v12 = vpop.xlane.xlu0 %230 }
  0xc5   : > { %v359_v8 = vadd.f32 %v351_v34, %v231_v12  ;;  %v1162_v34 = vand.u32 127, %v168_v0 }
  0xc7   : > { %v1165_v36 = vsub.s32 %v1162_v34, %v1353_v1 }
  0xc8   : > { %v451_v4 = vpop.xlane.xlu1 %450 }
  0xc9   : > { %v467_v22 = vrot.slane %v451_v4, 2 }
  0xcb   : > { %v240_v54 = vpop.xlane.xlu0 %239  ;;  %v475_v44 = vadd.f32 %v467_v22, %v359_v8 }
  0xcc   : > { %v360_v42 = vadd.f32 %v352_v24, %v240_v54 }
  0xcf   : > { %v460_v5 = vpop.xlane.xlu1 %459 }
  0xd0   : > { %v468_v43 = vrot.slane %v460_v5, 2 }
  0xd2   : > { %v476_v18 = vadd.f32 %v468_v43, %v360_v42 }
  0xd5   : > { %v549_v6 = vpop.xlane.xlu0 %548 }
  0xd6   : > { %v577_v40 = vadd.f32 %v549_v6, %v473_v9 }
  0xd7   : > { %v558_v7 = vpop.xlane.xlu1 %557 }
  0xd8   : > { %v578_v57 = vadd.f32 %v558_v7, %v474_v19 }
  0xdd   : > { %v652_v21 = vpop.xlane.xlu0 %651 }
  0xde   : > { %v684_v14 = vrot.slane %v652_v21, 1 }
  0xe0   : > { %v661_v15 = vpop.xlane.xlu1 %660  ;;  %v692_v52 = vadd.f32 %v684_v14, %v577_v40 }
  0xe1   : > { %v685_v41 = vrot.slane %v661_v15, 1 }
  0xe3   : > { %v693_v48 = vadd.f32 %v685_v41, %v578_v57 }
  0xe4   : > { %v567_v16 = vpop.xlane.xlu0 %566 }
  0xe5   : > { %v579_v46 = vadd.f32 %v567_v16, %v475_v44 }
  0xe8   : > { %v670_v17 = vpop.xlane.xlu1 %669 }
  0xe9   : > { %v686_v56 = vrot.slane %v670_v17, 1 }
  0xeb   : > { %v576_v13 = vpop.xlane.xlu0 %575  ;;  %v694_v58 = vadd.f32 %v686_v56, %v579_v46 }
  0xec   : > { %v580_v61 = vadd.f32 %v576_v13, %v476_v18 }
  0xef   : > { %v679_v10 = vpop.xlane.xlu1 %678 }
  0xf0   : > { %v687_v62 = vrot.slane %v679_v10, 1 }
  0xf2   : > { %v695_v15 = vadd.f32 %v687_v62, %v580_v61 }
  0xf5   : > { %v767_v20 = vpop.xlane.xlu0 %766 }
  0xf6   : > { %v799_v11 = vrot.slane %v767_v20, 2 }
  0xf7   : > { %v776_v25 = vpop.xlane.xlu1 %775 }
  0xf8   : > { %v800_v53 = vrot.slane %v776_v25, 2  ;;  %v807_v51 = vadd.f32 %v799_v11, %v692_v52 }
  0xfa   : > { %v808_v50 = vadd.f32 %v800_v53, %v693_v48 }
  0xfb   : > { %v785_v26 = vpop.xlane.xlu0 %784 }
  0xfc   : > { %v801_v49 = vrot.slane %v785_v26, 2 }
  0xfe   : > { %v809_v54 = vadd.f32 %v801_v49, %v694_v58 }
  0xff   : > { %v794_v27 = vpop.xlane.xlu1 %793 }
 0x100   : > { %v802_v4 = vrot.slane %v794_v27, 2 }
 0x102   : > { %v810_v25 = vadd.f32 %v802_v4, %v695_v15 }
 0x105   : > { %v883_v28 = vpop.xlane.xlu0 %882 }
 0x106   : > { %v911_v60 = vadd.f32 %v883_v28, %v807_v51 }
 0x107   : > { %v892_v29 = vpop.xlane.xlu1 %891 }
 0x108   : > { %v912_v2 = vadd.f32 %v892_v29, %v808_v50 }
 0x10d   : > { %v986_v30 = vpop.xlane.xlu0 %985 }
 0x10e   : > { %v1018_v59 = vrot.slane %v986_v30, 1 }
 0x110   : > { %v995_v31 = vpop.xlane.xlu1 %994  ;;  %v1026_v3 = vadd.f32 %v1018_v59, %v911_v60 }
 0x111   : > { %v1019_v55 = vrot.slane %v995_v31, 1 }
 0x113   : > { %v1027_v6 = vadd.f32 %v1019_v55, %v912_v2 }
 0x114   : > { %v901_v35 = vpop.xlane.xlu0 %900 }
 0x115   : > { %v913_v16 = vadd.f32 %v901_v35, %v809_v54 }
 0x118   : > { %v1004_v39 = vpop.xlane.xlu1 %1003 }
 0x119   : > { %v1020_v17 = vrot.slane %v1004_v39, 1 }
 0x11b   : > { %v910_v45 = vpop.xlane.xlu0 %909  ;;  %v1028_v13 = vadd.f32 %v1020_v17, %v913_v16 }
 0x11c   : > { %v914_v10 = vadd.f32 %v910_v45, %v810_v25 }
 0x11f   : > { %v1013_v47 = vpop.xlane.xlu1 %1012 }
 0x120   : > { %v1021_v28 = vrot.slane %v1013_v47, 1 }
 0x122   : > { %v1029_v31 = vadd.f32 %v1021_v28, %v914_v10 }
 0x125   : > { %v1101_v63 = vpop.xlane.xlu0 %1100 }
 0x126   : > { %v1133_v12 = vrot.slane %v1101_v63, 2 }
 0x127   : > { %v1110_v5 = vpop.xlane.xlu1 %1109 }
 0x128   : > { %v1141_v7 = vadd.f32 %v1133_v12, %v1026_v3  ;;  %v1134_v21 = vrot.slane %v1110_v5, 2 }
 0x12a   : > { %v1142_v20 = vadd.f32 %v1134_v21, %v1027_v6  ;;  %1150 = vperm.xlu0 %1316, %v1141_v7  }
 0x12b   : > { %v1119_v26 = vpop.xlane.xlu0 %1118 }
 0x12c   : > { %1153 = vperm.xlu1 %1317, %v1142_v20   ;;  %v1135_v29 = vrot.slane %v1119_v26, 2 }
 0x12e   : > { %v1143_v30 = vadd.f32 %v1135_v29, %v1028_v13 }
 0x12f   : > { %v1128_v27 = vpop.xlane.xlu1 %1127 }
 0x130   : > { %v1136_v32 = vrot.slane %v1128_v27, 2  ;;  %1156 = vperm.xlu1 %1317, %v1143_v30  }
 0x132   : > { %v1144_v33 = vadd.f32 %v1136_v32, %v1029_v31 }
 0x134   : > { %1159 = vperm.xlu1 %1317, %v1144_v33  }
 0x1a5   : > { %v1151_v37 = vpop.permute.xlu0 %1150 }
 0x1a6   : > { %v1166_v8 = vrot.slane %v1151_v37, %v1165_v36 }
 0x1a7   : > { %v1154_v35 = vpop.permute.xlu1 %1153 }
 0x1a8   : > { %v1170_v22 = vrot.slane %v1154_v35, %v1165_v36 }
 0x1aa   : > { %v1180_v9 = vsel %vm1179_vm3, %v1170_v22, %v1166_v8 }
 0x1ab   : > { %v1157_v38 = vpop.permute.xlu1 %1156 }
 0x1ac   : > { %v1174_v39 = vrot.slane %v1157_v38, %v1165_v36 }
 0x1ae   : > { %v1182_v14 = vsel %vm1181_vm4, %v1174_v39, %v1180_v9 }
 0x1af   : > { %v1160_v23 = vpop.permute.xlu1 %1159 }
 0x1b0   : > { %v1178_v0 = vrot.slane %v1160_v23, %v1165_v36 }
 0x1b2   : > { %v1184_v24 = vsel %vm1183_vm5, %v1178_v0, %v1182_v14 }
 0x1b3   : > { %1187 = vst.msk [vmem:[%s141_s8] sm:$0xf] %vm1186_vm6, %v1184_v24 }
 0x1b4 PF: > { %s12_s9 = sadd.s32 1, %s1324_s9  }
 0x1b5   : > { %p9_p4 = scmp.ge.s32.totalorder %s12_s9, 4  }
 0x1b7   :  { %11 = sbr.rel (!%p9_p4) target bundleno = 1 (0x1), region = 68 }

// kernel: multi_scale_discriminator_forward.7
= control target key start
LH: loop header
LB: loop body
LE: loop exit
PB: predicated region body
PF: predicated region fallthrough
CT: control target
= control target key end

     0   :  { %s12118_s15 = smov 0   ;;  %s15816_s0 = inlined_call_operand.vmem [shape: bf16[2,25,1024], index: 0, kind: input, shape index: {}]   ;;  %s15817_s1 = inlined_call_operand.vmem [shape: bf16[4,1024,512], index: 1, kind: input, shape index: {}]   ;;  %s15818_s2 = inlined_call_operand.vmem [shape: f32[1,20,1], index: 2, kind: input, shape index: {}]   ;;  %s15819_s3 = inlined_call_operand.vmem [shape: bf16[2,20,512], index: 3, kind: output, shape index: {0}]   ;;  %s15820_s4 = inlined_call_operand.vmem [shape: f32[2,2,512], index: 4, kind: output, shape index: {1}]  }
   0x1 LB: > { %s8671_s16 = sadd.s32 4294967295, %s12089_s15   ;;  %p8675_p0 = scmp.ge.s32.totalorder %s12089_s15, 1  ;;  %s12089_s15 = sphi %s12118_s15, %s15_s15  }
   0x2   : > { %p165_p1 = scmp.lt.s32.totalorder %s12089_s15, 3 }
   0x4   : > { %p166_p2 = pnand %p8675_p0, %p165_p1 }
   0x5   : > { %p196_p3 = scmp.lt.s32.totalorder (!%p166_p2), %s8671_s16, 1 }
   0x6   : > { %169 = sbr.rel (%p166_p2) target bundleno = 1279 (0x4ff), region = 32 }
   0xb   : > { %v10535_v0 = vld [vmem:[%s15817_s1 + $0x10e4] ss:$16 sps:$4 sm:$0xff]   ;;  %v10539_v2 = vld [vmem:[%s15817_s1 + $0x10e0] ss:$16 sps:$4 sm:$0xff]   ;;  %s15822_s16 = smov (!%p196_p3, %s8671_s16), 1  ;;  %vm8299_vm1 = vcmask 1046528  }
   0xc   : > { %v10537_v1 = vld [vmem:[%s15817_s1 + $0x12e4] ss:$16 sps:$4 sm:$0xff]   ;;  %2245 = vmatprep.subr.bf16.mxu0 %v10535_v0  ;;  %v10540_v3 = vld [vmem:[%s15817_s1 + $0x12e0] ss:$16 sps:$4 sm:$0xff]   ;;  %s10514_s27 = sshll.u32 %s15822_s16, 7  ;;  %vm8340_vm2 = vcmask 1042432  }
   0xd   : > { %2296 = vmatprep.subr.bf16.mxu1 %v10537_v1  ;;  %v10541_v4 = vld [vmem:[%s15817_s1 + $0x10c4] ss:$16 sps:$4 sm:$0xff]   ;;  %2246 = vmatpush1.bf16.msra.mxu0 %v10539_v2  ;;  %v10545_v6 = vld [vmem:[%s15817_s1 + $0x10c0] ss:$16 sps:$4 sm:$0xff]   ;;  %s12268_s10 = scalar_lea.vmem %s15816_s0, %s10514_s27  ;;  %vm812_vm0 = vsmask.f32 5376 }
   0xe   : > { %2297 = vmatpush1.bf16.msra.mxu1 %v10540_v3  ;;  %v10543_v5 = vld [vmem:[%s15817_s1 + $0x12c4] ss:$16 sps:$4 sm:$0xff]   ;;  %2247 = vmatprep.subr.bf16.mxu0 %v10541_v4  ;;  %v10546_v7 = vld [vmem:[%s15817_s1 + $0x12c0] ss:$16 sps:$4 sm:$0xff]   ;;  %v216_v56 = vld [vmem:[%s12268_s10 + $0x28] sm:$0xff]  ;;  %s10522_s14 = smul.u32 48, %s15822_s16 }
   0xf   : > { %2298 = vmatprep.subr.bf16.mxu1 %v10543_v5  ;;  %v10547_v8 = vld [vmem:[%s15817_s1 + $0x10a4] ss:$16 sps:$4 sm:$0xff]   ;;  %v10551_v10 = vld [vmem:[%s15817_s1 + $0x10a0] ss:$16 sps:$4 sm:$0xff]   ;;  %v224_v57 = vld [vmem:[%s12268_s10 + $0x8] sm:$0xcc] }
  0x10   : > { %v10549_v9 = vld [vmem:[%s15817_s1 + $0x12a4] ss:$16 sps:$4 sm:$0xff]   ;;  %v10552_v11 = vld [vmem:[%s15817_s1 + $0x12a0] ss:$16 sps:$4 sm:$0xff]   ;;  %v228_v58 = vld [vmem:[%s12268_s10 + $0x48] sm:$0xff]  ;;  %v8940_v60 = vcombine.high %v224_v57, %v216_v56  ;;  %s15745_s19 = scalar_lea.vmem %s15819_s3, %s10522_s14  ;;  %vm8434_vm3 = vcmask 1043456  }
  0x11   : > { %2248 = vmatpush1.bf16.msra.mxu0 %v10545_v6  ;;  %v10553_v12 = vld [vmem:[%s15817_s1 + $0x1084] ss:$16 sps:$4 sm:$0xff]   ;;  %v10557_v14 = vld [vmem:[%s15817_s1 + $0x1080] ss:$16 sps:$4 sm:$0xff]   ;;  %v232_v59 = vld [vmem:[%s12268_s10 + $0x68] sm:$0x11] }
  0x12   : > { %2299 = vmatpush1.bf16.msra.mxu1 %v10546_v7  ;;  %2249 = vmatprep.subr.bf16.mxu0 %v10547_v8  ;;  %v10555_v13 = vld [vmem:[%s15817_s1 + $0x1284] ss:$16 sps:$4 sm:$0xff]   ;;  %v10558_v15 = vld [vmem:[%s15817_s1 + $0x1280] ss:$16 sps:$4 sm:$0xff]   ;;  %v8948_v6 = vcombine.high %v228_v58, %v232_v59  ;;  %v865_v7 = vshrl.u32 %v8940_v60, 16  ;;  %v868_v8 = vshll.u32 %v8940_v60, 16 }
  0x13   : > { %2300 = vmatprep.subr.bf16.mxu1 %v10549_v9  ;;  %v10559_v16 = vld [vmem:[%s15817_s1 + $0x1064] ss:$16 sps:$4 sm:$0xff]   ;;  %v10563_v18 = vld [vmem:[%s15817_s1 + $0x1060] ss:$16 sps:$4 sm:$0xff]   ;;  %v8939_v9 = vcombine.low %v224_v57, %v216_v56  ;;  %s10515_s20 = sshll.u32 %s15822_s16, 3 }
  0x14   : > { %v10561_v17 = vld [vmem:[%s15817_s1 + $0x1264] ss:$16 sps:$4 sm:$0xff]   ;;  %v10564_v19 = vld [vmem:[%s15817_s1 + $0x1260] ss:$16 sps:$4 sm:$0xff]   ;;  %s210_s23 = scalar_lea.vmem %s15820_s4, %s10515_s20 }
  0x15   : > { %2250 = vmatpush1.bf16.msra.mxu0 %v10551_v10  ;;  %v10565_v20 = vld [vmem:[%s15817_s1 + $0x1044] ss:$16 sps:$4 sm:$0xff]   ;;  %v10569_v22 = vld [vmem:[%s15817_s1 + $0x1040] ss:$16 sps:$4 sm:$0xff]  }
  0x16   : > { %2301 = vmatpush1.bf16.msra.mxu1 %v10552_v11  ;;  %2251 = vmatprep.subr.bf16.mxu0 %v10553_v12  ;;  %v10567_v21 = vld [vmem:[%s15817_s1 + $0x1244] ss:$16 sps:$4 sm:$0xff]   ;;  %v10570_v23 = vld [vmem:[%s15817_s1 + $0x1240] ss:$16 sps:$4 sm:$0xff]  }
  0x17   : > { %2302 = vmatprep.subr.bf16.mxu1 %v10555_v13  ;;  %v10571_v24 = vld [vmem:[%s15817_s1 + $0x1024] ss:$16 sps:$4 sm:$0xff]   ;;  %v10575_v26 = vld [vmem:[%s15817_s1 + $0x1020] ss:$16 sps:$4 sm:$0xff]  }
  0x18   : > { %v10573_v25 = vld [vmem:[%s15817_s1 + $0x1224] ss:$16 sps:$4 sm:$0xff]   ;;  %v10576_v27 = vld [vmem:[%s15817_s1 + $0x1220] ss:$16 sps:$4 sm:$0xff]  }
  0x19   : > { %2252 = vmatpush1.bf16.msra.mxu0 %v10557_v14  ;;  %v10577_v28 = vld [vmem:[%s15817_s1 + $0x1004] ss:$16 sps:$4 sm:$0xff]   ;;  %v10581_v30 = vld [vmem:[%s15817_s1 + $0x1000] ss:$16 sps:$4 sm:$0xff]  }
  0x1a   : > { %2303 = vmatpush1.bf16.msra.mxu1 %v10558_v15  ;;  %2253 = vmatprep.subr.bf16.mxu0 %v10559_v16  ;;  %v10579_v29 = vld [vmem:[%s15817_s1 + $0x1204] ss:$16 sps:$4 sm:$0xff]   ;;  %v10582_v31 = vld [vmem:[%s15817_s1 + $0x1200] ss:$16 sps:$4 sm:$0xff]   ;;  %v867_v15 = vrot.slane %v865_v7, 2  ;;  %v870_v16 = vrot.slane %v868_v8, 3 }
  0x1b   : > { %2304 = vmatprep.subr.bf16.mxu1 %v10561_v17  ;;  %v10583_v32 = vld [vmem:[%s15817_s1 + $0x11e4] ss:$16 sps:$4 sm:$0xff]   ;;  %v10587_v34 = vld [vmem:[%s15817_s1 + $0x11e0] ss:$16 sps:$4 sm:$0xff]   ;;  %v873_v17 = vshrl.u32 %v8948_v6, 16 }
  0x1c   : > { %v10585_v33 = vld [vmem:[%s15817_s1 + $0x13e4] ss:$16 sps:$4 sm:$0xff]   ;;  %v10588_v35 = vld [vmem:[%s15817_s1 + $0x13e0] ss:$16 sps:$4 sm:$0xff]  }
  0x1d   : > { %2254 = vmatpush1.bf16.msra.mxu0 %v10563_v18  ;;  %v10589_v36 = vld [vmem:[%s15817_s1 + $0x11c4] ss:$16 sps:$4 sm:$0xff]   ;;  %v10593_v38 = vld [vmem:[%s15817_s1 + $0x11c0] ss:$16 sps:$4 sm:$0xff]   ;;  %v876_v18 = vshll.u32 %v8948_v6, 16 }
  0x1e   : > { %2305 = vmatpush1.bf16.msra.mxu1 %v10564_v19  ;;  %2255 = vmatprep.subr.bf16.mxu0 %v10565_v20  ;;  %v10591_v37 = vld [vmem:[%s15817_s1 + $0x13c4] ss:$16 sps:$4 sm:$0xff]   ;;  %v10594_v39 = vld [vmem:[%s15817_s1 + $0x13c0] ss:$16 sps:$4 sm:$0xff]  }
  0x1f   : > { %2306 = vmatprep.subr.bf16.mxu1 %v10567_v21  ;;  %v10595_v40 = vld [vmem:[%s15817_s1 + $0x11a4] ss:$16 sps:$4 sm:$0xff]   ;;  %v10599_v42 = vld [vmem:[%s15817_s1 + $0x11a0] ss:$16 sps:$4 sm:$0xff]  }
  0x20   : > { %v10597_v41 = vld [vmem:[%s15817_s1 + $0x13a4] ss:$16 sps:$4 sm:$0xff]   ;;  %v10600_v43 = vld [vmem:[%s15817_s1 + $0x13a0] ss:$16 sps:$4 sm:$0xff]  }
  0x21   : > { %2256 = vmatpush1.bf16.msra.mxu0 %v10569_v22  ;;  %v10601_v44 = vld [vmem:[%s15817_s1 + $0x1184] ss:$16 sps:$4 sm:$0xff]   ;;  %v10605_v46 = vld [vmem:[%s15817_s1 + $0x1180] ss:$16 sps:$4 sm:$0xff]  }
  0x22   : > { %2307 = vmatpush1.bf16.msra.mxu1 %v10570_v23  ;;  %2257 = vmatprep.subr.bf16.mxu0 %v10571_v24  ;;  %v10603_v45 = vld [vmem:[%s15817_s1 + $0x1384] ss:$16 sps:$4 sm:$0xff]   ;;  %v10606_v47 = vld [vmem:[%s15817_s1 + $0x1380] ss:$16 sps:$4 sm:$0xff]   ;;  %v871_v24 = vor.u32 %v870_v16, %v867_v15 }
  0x23   : > { %2308 = vmatprep.subr.bf16.mxu1 %v10573_v25  ;;  %v215_v48 = vld [vmem:[%s12268_s10 + $0x20] sm:$0xff]  ;;  %v875_v25 = vrot.slane %v873_v17, 2 }
  0x24   : > { %v10607_v49 = vld [vmem:[%s15817_s1 + $0x1164] ss:$16 sps:$4 sm:$0xff]   ;;  %v10611_v63 = vld [vmem:[%s15817_s1 + $0x1160] ss:$16 sps:$4 sm:$0xff]  }
  0x25   : > { %2258 = vmatpush1.bf16.msra.mxu0 %v10575_v26  ;;  %v10609_v50 = vld [vmem:[%s15817_s1 + $0x1364] ss:$16 sps:$4 sm:$0xff]   ;;  %v10612_v0 = vld [vmem:[%s15817_s1 + $0x1360] ss:$16 sps:$4 sm:$0xff]   ;;  %v878_v26 = vrot.slane %v876_v18, 3 }
  0x26   : > { %2309 = vmatpush1.bf16.msra.mxu1 %v10576_v27  ;;  %2259 = vmatprep.subr.bf16.mxu0 %v10577_v28  ;;  %v223_v51 = vld [vmem:[%s12268_s10] sm:$0xcc]  ;;  %v231_v53 = vld [vmem:[%s12268_s10 + $0x60] sm:$0x11] }
  0x27   : > { %2310 = vmatprep.subr.bf16.mxu1 %v10579_v29  ;;  %v227_v52 = vld [vmem:[%s12268_s10 + $0x40] sm:$0xff]  ;;  %v8938_v54 = vcombine.high %v223_v51, %v215_v48  ;;  %v8937_v61 = vcombine.low %v223_v51, %v215_v48 }
  0x28   : > { %v8946_v55 = vcombine.high %v227_v52, %v231_v53  ;;  %v8945_v62 = vcombine.low %v227_v52, %v231_v53  ;;  %v10613_v5 = vld [vmem:[%s15817_s1 + $0x1144] ss:$16 sps:$4 sm:$0xff]   ;;  %v10617_v23 = vld [vmem:[%s15817_s1 + $0x1140] ss:$16 sps:$4 sm:$0xff]  }
  0x29   : > { %2260 = vmatpush1.bf16.msra.mxu0 %v10581_v30  ;;  %v831_v1 = vshrl.u32 %v8938_v54, 16  ;;  %v834_v2 = vshll.u32 %v8938_v54, 16  ;;  %v10615_v14 = vld [vmem:[%s15817_s1 + $0x1344] ss:$16 sps:$4 sm:$0xff]   ;;  %v814_v21 = vshrl.u32 %v8937_v61, 16  ;;  %v817_v22 = vshll.u32 %v8937_v61, 16 }
  0x2a   : > { %2311 = vmatpush1.bf16.msra.mxu1 %v10582_v31  ;;  %2261 = vmatprep.subr.bf16.mxu0 %v10583_v32  ;;  %v839_v3 = vshrl.u32 %v8946_v55, 16  ;;  %v842_v4 = vshll.u32 %v8946_v55, 16  ;;  %v822_v27 = vshrl.u32 %v8945_v62, 16  ;;  %v10618_v28 = vld [vmem:[%s15817_s1 + $0x1340] ss:$16 sps:$4 sm:$0xff]   ;;  %v825_v31 = vshll.u32 %v8945_v62, 16 }
  0x2b   : > { %2312 = vmatprep.subr.bf16.mxu1 %v10585_v33  ;;  %v833_v10 = vrot.slane %v831_v1, 2  ;;  %v836_v11 = vrot.slane %v834_v2, 3  ;;  %v10619_v29 = vld [vmem:[%s15817_s1 + $0x1124] ss:$16 sps:$4 sm:$0xff]   ;;  %v8947_v32 = vcombine.low %v228_v58, %v232_v59  ;;  %v10629_v52 = vld [vmem:[%s15817_s1 + $0x1100] ss:$16 sps:$4 sm:$0xff]  }
  0x2c   : > { %v841_v12 = vrot.slane %v839_v3, 2  ;;  %v844_v13 = vrot.slane %v842_v4, 3  ;;  %v10621_v33 = vld [vmem:[%s15817_s1 + $0x1324] ss:$16 sps:$4 sm:$0xff]   ;;  %v10630_v54 = vld [vmem:[%s15817_s1 + $0x1300] ss:$16 sps:$4 sm:$0xff]  }
  0x2d   : > { %2262 = vmatpush2.bf16.msra.mxu0 %v10587_v34  ;;  %v837_v19 = vor.u32 %v836_v11, %v833_v10  ;;  %v12326_v34 = vor.u32 %v878_v26, %v875_v25  ;;  %v10627_v51 = vld [vmem:[%s15817_s1 + $0x1304] ss:$16 sps:$4 sm:$0xff]   ;;  %v10631_v60 = vld [vmem:[%s15817_s1 + $0x14e0] ss:$16 sps:$4 sm:$0xff]  }
  0x2e   : > { %2313 = vmatpush2.bf16.msra.mxu1 %v10588_v35  ;;  %2263 = vmatprep.subr.bf16.mxu0 %v10589_v36  ;;  %v12308_v20 = vor.u32 %v844_v13, %v841_v12  ;;  %v848_v35 = vshrl.u32 %v8939_v9, 16  ;;  %v851_v36 = vshll.u32 %v8939_v9, 16  ;;  %v10633_v58 = vld [vmem:[%s15817_s1 + $0x14e4] ss:$16 sps:$4 sm:$0xff]   ;;  %v10637_v2 = vld [vmem:[%s15817_s1 + $0x14c0] ss:$16 sps:$4 sm:$0xff]  }
  0x2f   : > { %2314 = vmatprep.subr.bf16.mxu1 %v10591_v37  ;;  %v10623_v37 = vld [vmem:[%s15817_s1 + $0x1120] ss:$16 sps:$4 sm:$0xff]   ;;  %v10636_v59 = vld [vmem:[%s15817_s1 + $0x16e4] ss:$16 sps:$4 sm:$0xff]  }
  0x30   : > { %v12321_v30 = vsel %vm812_vm0, %v837_v19, %v12308_v20  ;;  %v853_v48 = vrot.slane %v851_v36, 3  ;;  %v10642_v1 = vld [vmem:[%s15817_s1 + $0x16c4] ss:$16 sps:$4 sm:$0xff]   ;;  %v10640_v3 = vld [vmem:[%s15817_s1 + $0x16c0] ss:$16 sps:$4 sm:$0xff]  }
  0x31   : > { %2264 = vmatpush2.bf16.msra.mxu0 %v10593_v38  ;;  %v10624_v38 = vld [vmem:[%s15817_s1 + $0x1320] ss:$16 sps:$4 sm:$0xff]   ;;  %2277 = vmatprep.mubr.bf16.mxu0 %v12321_v30  ;;  %v10645_v4 = vld [vmem:[%s15817_s1 + $0x14a4] ss:$16 sps:$4 sm:$0xff]  }
  0x32   : > { %2315 = vmatpush2.bf16.msra.mxu1 %v10594_v39  ;;  %2265 = vmatprep.subr.bf16.mxu0 %v10595_v40  ;;  %v816_v39 = vrot.slane %v814_v21, 2  ;;  %v856_v40 = vshrl.u32 %v8947_v32, 16  ;;  %v10643_v6 = vld [vmem:[%s15817_s1 + $0x14a0] ss:$16 sps:$4 sm:$0xff]   ;;  %v10651_v8 = vld [vmem:[%s15817_s1 + $0x1484] ss:$16 sps:$4 sm:$0xff]  }
  0x33   : > { %2316 = vmatprep.subr.bf16.mxu1 %v10597_v41  ;;  %v859_v41 = vshll.u32 %v8947_v32, 16  ;;  %v10646_v7 = vld [vmem:[%s15817_s1 + $0x16a0] ss:$16 sps:$4 sm:$0xff]   ;;  %v10654_v9 = vld [vmem:[%s15817_s1 + $0x1684] ss:$16 sps:$4 sm:$0xff]  }
  0x34   : > { %v10649_v10 = vld [vmem:[%s15817_s1 + $0x1480] ss:$16 sps:$4 sm:$0xff]   ;;  %v10657_v12 = vld [vmem:[%s15817_s1 + $0x1464] ss:$16 sps:$4 sm:$0xff]  }
  0x35   : > { %2266 = vmatpush2.bf16.msra.mxu0 %v10599_v42  ;;  %v12337_v42 = vsel %vm812_vm0, %v871_v24, %v12326_v34  ;;  %v10652_v11 = vld [vmem:[%s15817_s1 + $0x1680] ss:$16 sps:$4 sm:$0xff]   ;;  %v10660_v13 = vld [vmem:[%s15817_s1 + $0x1664] ss:$16 sps:$4 sm:$0xff]  }
  0x36   : > { %2317 = vmatpush2.bf16.msra.mxu1 %v10600_v43  ;;  %2267 = vmatprep.subr.bf16.mxu0 %v10601_v44  ;;  %v819_v43 = vrot.slane %v817_v22, 3  ;;  %v824_v44 = vrot.slane %v822_v27, 2  ;;  %v10658_v15 = vld [vmem:[%s15817_s1 + $0x1660] ss:$16 sps:$4 sm:$0xff]   ;;  %v10663_v16 = vld [vmem:[%s15817_s1 + $0x1444] ss:$16 sps:$4 sm:$0xff]  }
  0x37   : > { %2318 = vmatprep.subr.bf16.mxu1 %v10603_v45  ;;  %v827_v45 = vrot.slane %v825_v31, 3  ;;  %2328 = vmatprep.mubr.bf16.mxu1 %v12337_v42  ;;  %v10666_v17 = vld [vmem:[%s15817_s1 + $0x1644] ss:$16 sps:$4 sm:$0xff]   ;;  %v10661_v18 = vld [vmem:[%s15817_s1 + $0x1440] ss:$16 sps:$4 sm:$0xff]  }
  0x38   : > { %v820_v53 = vor.u32 %v819_v43, %v816_v39  ;;  %v10664_v19 = vld [vmem:[%s15817_s1 + $0x1640] ss:$16 sps:$4 sm:$0xff]   ;;  %v10669_v21 = vld [vmem:[%s15817_s1 + $0x1424] ss:$16 sps:$4 sm:$0xff]   ;;  %v12490_v39 = vld [vmem:[%s12268_s10 + $0x18] sm:$0xcc] }
  0x39   : > { %2268 = vmatpush2.bf16.msra.mxu0 %v10605_v46  ;;  %v10625_v46 = vld [vmem:[%s15817_s1 + $0x1104] ss:$16 sps:$4 sm:$0xff]   ;;  %v12352_v55 = vor.u32 %v827_v45, %v824_v44  ;;  %v10670_v24 = vld [vmem:[%s15817_s1 + $0x1620] ss:$16 sps:$4 sm:$0xff]   ;;  %v12501_v44 = vld [vmem:[%s12268_s10 + $0x78] sm:$0x11] }
  0x3a   : > { %2319 = vmatpush2.bf16.msra.mxu1 %v10606_v47  ;;  %2269 = vmatprep.subr.bf16.mxu0 %v10607_v49  ;;  %v850_v47 = vrot.slane %v848_v35, 2  ;;  %v858_v49 = vrot.slane %v856_v40, 2  ;;  %v10672_v22 = vld [vmem:[%s15817_s1 + $0x1624] ss:$16 sps:$4 sm:$0xff]   ;;  %v10673_v27 = vld [vmem:[%s15817_s1 + $0x1400] ss:$16 sps:$4 sm:$0xff]  }
  0x3b   : > { %2320 = vmatprep.subr.bf16.mxu1 %v10609_v50  ;;  %v861_v50 = vrot.slane %v859_v41, 3  ;;  %v12367_v61 = vsel %vm812_vm0, %v820_v53, %v12352_v55  ;;  %v10675_v25 = vld [vmem:[%s15817_s1 + $0x1404] ss:$16 sps:$4 sm:$0xff]   ;;  %v12493_v40 = vld [vmem:[%s12268_s10 + $0x58] sm:$0xff]  ;;  %v10679_v41 = vld [vmem:[%s15817_s1 + $0x15e0] ss:$16 sps:$4 sm:$0xff]  }
  0x3c   : > { %v854_v56 = vor.u32 %v853_v48, %v850_v47  ;;  %v10678_v26 = vld [vmem:[%s15817_s1 + $0x1604] ss:$16 sps:$4 sm:$0xff]  }
  0x3d   : > { %2270 = vmatpush2.bf16.msra.mxu0 %v10611_v63  ;;  %v12354_v57 = vor.u32 %v861_v50, %v858_v49  ;;  %v10634_v63 = vld [vmem:[%s15817_s1 + $0x16e0] ss:$16 sps:$4 sm:$0xff]   ;;  %v10684_v31 = vld [vmem:[%s15817_s1 + $0x17e4] ss:$16 sps:$4 sm:$0xff]   ;;  %v8952_v50 = vcombine.high %v12493_v40, %v12501_v44 }
  0x3e   : > { %2321 = vmatpush2.bf16.msra.mxu1 %v10612_v0  ;;  %2271 = vmatprep.subr.bf16.mxu0 %v10613_v5  ;;  %v10639_v0 = vld [vmem:[%s15817_s1 + $0x14c4] ss:$16 sps:$4 sm:$0xff]  }
  0x3f   : > { %2322 = vmatprep.subr.bf16.mxu1 %v10615_v14  ;;  %v12371_v62 = vsel %vm812_vm0, %v854_v56, %v12354_v57  ;;  %v10648_v5 = vld [vmem:[%s15817_s1 + $0x16a4] ss:$16 sps:$4 sm:$0xff]   ;;  %v10655_v14 = vld [vmem:[%s15817_s1 + $0x1460] ss:$16 sps:$4 sm:$0xff]  }
  0x40   : > { %v12473_v32 = vld [vmem:[%s12268_s10 + $0x30] sm:$0xff] }
  0x41   : > { %2272 = vmatpush2.bf16.msra.mxu0 %v10617_v23  ;;  %v10667_v23 = vld [vmem:[%s15817_s1 + $0x1420] ss:$16 sps:$4 sm:$0xff]   ;;  %v10687_v47 = vld [vmem:[%s15817_s1 + $0x15c4] ss:$16 sps:$4 sm:$0xff]  }
  0x42   : > { %2323 = vmatpush2.bf16.msra.mxu1 %v10618_v28  ;;  %2273 = vmatprep.subr.bf16.mxu0 %v10619_v29  ;;  %v10676_v28 = vld [vmem:[%s15817_s1 + $0x1600] ss:$16 sps:$4 sm:$0xff]   ;;  %v10681_v29 = vld [vmem:[%s15817_s1 + $0x15e4] ss:$16 sps:$4 sm:$0xff]  }
  0x43   : > { %2324 = vmatprep.subr.bf16.mxu1 %v10621_v33  ;;  %v12476_v33 = vld [vmem:[%s12268_s10 + $0x10] sm:$0xcc]  ;;  %v12482_v36 = vld [vmem:[%s12268_s10 + $0x70] sm:$0x11] }
  0x44   : > { %v12479_v35 = vld [vmem:[%s12268_s10 + $0x50] sm:$0xff] }
  0x45   : > { %2274 = vmatpush2.bf16.msra.mxu0 %v10623_v37  ;;  %v8942_v37 = vcombine.high %v12476_v33, %v12473_v32  ;;  %v8950_v43 = vcombine.high %v12479_v35, %v12482_v36  ;;  %v10690_v56 = vld [vmem:[%s15817_s1 + $0x17c4] ss:$16 sps:$4 sm:$0xff]  }
  0x46   : > { %2325 = vmatpush2.bf16.msra.mxu1 %v10624_v38  ;;  %2275 = vmatprep.subr.bf16.mxu0 %v10625_v46  ;;  %v12487_v38 = vld [vmem:[%s12268_s10 + $0x38] sm:$0xff]  ;;  %v10682_v46 = vld [vmem:[%s15817_s1 + $0x17e0] ss:$16 sps:$4 sm:$0xff]  }
  0x47   : > { %2326 = vmatprep.subr.bf16.mxu1 %v10627_v51  ;;  %v8944_v45 = vcombine.high %v12490_v39, %v12487_v38  ;;  %v899_v48 = vshrl.u32 %v8942_v37, 16  ;;  %v902_v49 = vshll.u32 %v8942_v37, 16  ;;  %v907_v51 = vshrl.u32 %v8950_v43, 16 }
  0x49   : > { %2276 = vmatpush2.bf16.msra.mxu0 %v10629_v52  ;;  %v910_v52 = vshll.u32 %v8950_v43, 16  ;;  %v933_v53 = vshrl.u32 %v8944_v45, 16 }
  0x4a   : > { %2327 = vmatpush2.bf16.msra.mxu1 %v10630_v54  ;;  %2347 = vmatprep.subr.bf16.mxu0 %v10633_v58  ;;  %v936_v54 = vshll.u32 %v8944_v45, 16  ;;  %v901_v58 = vrot.slane %v899_v48, 2  ;;  %v10715_v48 = vld [vmem:[%s15817_s1 + $0x1520] ss:$16 sps:$4 sm:$0xff]  }
  0x4b   : > { %2398 = vmatprep.subr.bf16.mxu1 %v10636_v59  ;;  %v904_v59 = vrot.slane %v902_v49, 3  ;;  %v10718_v49 = vld [vmem:[%s15817_s1 + $0x1720] ss:$16 sps:$4 sm:$0xff]  }
  0x4c   : > { %2278 = vmatmul.mubr.bf16.vlgmr.msra.gmra.mxu0 %v12367_v61 }
  0x4d   : > { %2329 = vmatmul.mubr.bf16.vlgmr.msra.gmra.mxu1 %v12371_v62  ;;  %2348 = vmatpush1.bf16.msra.mxu0 %v10631_v60  ;;  %v941_v60 = vshrl.u32 %v8952_v50, 16 }
  0x4e   : > { %2399 = vmatpush1.bf16.msra.mxu1 %v10634_v63  ;;  %2349 = vmatprep.subr.bf16.mxu0 %v10639_v0  ;;  %v944_v63 = vshll.u32 %v8952_v50, 16  ;;  %v909_v0 = vrot.slane %v907_v51, 2 }
  0x4f   : > { %2400 = vmatprep.subr.bf16.mxu1 %v10642_v1  ;;  %2287 = vmatprep.mubr.bf16.mxu0 %v12308_v20  ;;  %v912_v1 = vrot.slane %v910_v52, 3 }
  0x50   : > { %2338 = vmatprep.mubr.bf16.mxu1 %v12326_v34 }
  0x51   : > { %2350 = vmatpush1.bf16.msra.mxu0 %v10637_v2  ;;  %v935_v2 = vrot.slane %v933_v53, 2 }
  0x52   : > { %2401 = vmatpush1.bf16.msra.mxu1 %v10640_v3  ;;  %2351 = vmatprep.subr.bf16.mxu0 %v10645_v4  ;;  %v938_v3 = vrot.slane %v936_v54, 3  ;;  %v905_v4 = vor.u32 %v904_v59, %v901_v58 }
  0x53   : > { %2402 = vmatprep.subr.bf16.mxu1 %v10648_v5  ;;  %v943_v5 = vrot.slane %v941_v60, 2  ;;  %v10723_v60 = vld [vmem:[%s15817_s1 + $0x1504] ss:$16 sps:$4 sm:$0xff]  }
  0x54   : > { %2288 = vmatmul.mubr.bf16.gmra.mxu0 %v12352_v55 }
  0x55   : > { %2339 = vmatmul.mubr.bf16.gmra.mxu1 %v12354_v57  ;;  %2352 = vmatpush1.bf16.msra.mxu0 %v10643_v6  ;;  %v946_v6 = vrot.slane %v944_v63, 3  ;;  %v10726_v63 = vld [vmem:[%s15817_s1 + $0x1704] ss:$16 sps:$4 sm:$0xff]  }
  0x56   : > { %2403 = vmatpush1.bf16.msra.mxu1 %v10646_v7  ;;  %2353 = vmatprep.subr.bf16.mxu0 %v10651_v8  ;;  %v10685_v7 = vld [vmem:[%s15817_s1 + $0x15c0] ss:$16 sps:$4 sm:$0xff]  }
  0x57   : > { %2404 = vmatprep.subr.bf16.mxu1 %v10654_v9  ;;  %v10688_v8 = vld [vmem:[%s15817_s1 + $0x17c0] ss:$16 sps:$4 sm:$0xff]   ;;  %v12522_v9 = vor.u32 %v912_v1, %v909_v0 }
  0x58   : > { %v10721_v0 = vld [vmem:[%s15817_s1 + $0x1500] ss:$16 sps:$4 sm:$0xff]  }
  0x59   : > { %2354 = vmatpush1.bf16.msra.mxu0 %v10649_v10  ;;  %v939_v10 = vor.u32 %v938_v3, %v935_v2  ;;  %v10724_v2 = vld [vmem:[%s15817_s1 + $0x1700] ss:$16 sps:$4 sm:$0xff]  }
  0x5a   : > { %2405 = vmatpush1.bf16.msra.mxu1 %v10652_v11  ;;  %2355 = vmatprep.subr.bf16.mxu0 %v10657_v12  ;;  %v10693_v11 = vld [vmem:[%s15817_s1 + $0x15a4] ss:$16 sps:$4 sm:$0xff]  }
  0x5b   : > { %2406 = vmatprep.subr.bf16.mxu1 %v10660_v13  ;;  %v10696_v12 = vld [vmem:[%s15817_s1 + $0x17a4] ss:$16 sps:$4 sm:$0xff]   ;;  %v12530_v13 = vor.u32 %v946_v6, %v943_v5  ;;  %v10729_v6 = vld [vmem:[%s15817_s1 + $0x10ec] ss:$16 sps:$4 sm:$0xff]  }
  0x5d   : > { %2356 = vmatpush1.bf16.msra.mxu0 %v10655_v14  ;;  %v12534_v14 = vsel %vm812_vm0, %v905_v4, %v12522_v9 }
  0x5e   : > { %2407 = vmatpush1.bf16.msra.mxu1 %v10658_v15  ;;  %2357 = vmatprep.subr.bf16.mxu0 %v10663_v16  ;;  %v10691_v15 = vld [vmem:[%s15817_s1 + $0x15a0] ss:$16 sps:$4 sm:$0xff]   ;;  %v12542_v16 = vsel %vm812_vm0, %v939_v10, %v12530_v13 }
  0x5f   : > { %2408 = vmatprep.subr.bf16.mxu1 %v10666_v17  ;;  %2379 = vmatprep.mubr.bf16.mxu0 %v12534_v14  ;;  %v10694_v17 = vld [vmem:[%s15817_s1 + $0x17a0] ss:$16 sps:$4 sm:$0xff]  }
  0x60   : > { %2430 = vmatprep.mubr.bf16.mxu1 %v12542_v16 }
  0x61   : > { %2358 = vmatpush1.bf16.msra.mxu0 %v10661_v18  ;;  %v10699_v18 = vld [vmem:[%s15817_s1 + $0x1584] ss:$16 sps:$4 sm:$0xff]  }
  0x62   : > { %2409 = vmatpush1.bf16.msra.mxu1 %v10664_v19  ;;  %2359 = vmatprep.subr.bf16.mxu0 %v10669_v21  ;;  %v10702_v19 = vld [vmem:[%s15817_s1 + $0x1784] ss:$16 sps:$4 sm:$0xff]   ;;  %v10697_v21 = vld [vmem:[%s15817_s1 + $0x1580] ss:$16 sps:$4 sm:$0xff]  }
  0x63   : > { %2410 = vmatprep.subr.bf16.mxu1 %v10672_v22  ;;  %v10700_v22 = vld [vmem:[%s15817_s1 + $0x1780] ss:$16 sps:$4 sm:$0xff]  }
  0x65   : > { %2360 = vmatpush1.bf16.msra.mxu0 %v10667_v23  ;;  %v10705_v23 = vld [vmem:[%s15817_s1 + $0x1564] ss:$16 sps:$4 sm:$0xff]  }
  0x66   : > { %2411 = vmatpush1.bf16.msra.mxu1 %v10670_v24  ;;  %2361 = vmatprep.subr.bf16.mxu0 %v10675_v25  ;;  %v10708_v24 = vld [vmem:[%s15817_s1 + $0x1764] ss:$16 sps:$4 sm:$0xff]   ;;  %v10703_v25 = vld [vmem:[%s15817_s1 + $0x1560] ss:$16 sps:$4 sm:$0xff]  }
  0x67   : > { %2412 = vmatprep.subr.bf16.mxu1 %v10678_v26  ;;  %v8941_v26 = vcombine.low %v12476_v33, %v12473_v32  ;;  %v10711_v32 = vld [vmem:[%s15817_s1 + $0x1544] ss:$16 sps:$4 sm:$0xff]  }
  0x68   : > { %v10714_v33 = vld [vmem:[%s15817_s1 + $0x1744] ss:$16 sps:$4 sm:$0xff]  }
  0x69   : > { %2362 = vmatpush1.bf16.msra.mxu0 %v10673_v27  ;;  %v8949_v27 = vcombine.low %v12479_v35, %v12482_v36  ;;  %v10709_v35 = vld [vmem:[%s15817_s1 + $0x1540] ss:$16 sps:$4 sm:$0xff]   ;;  %v882_v37 = vshrl.u32 %v8941_v26, 16 }
  0x6a   : > { %2413 = vmatpush1.bf16.msra.mxu1 %v10676_v28  ;;  %2363 = vmatprep.subr.bf16.mxu0 %v10681_v29  ;;  %v10706_v28 = vld [vmem:[%s15817_s1 + $0x1760] ss:$16 sps:$4 sm:$0xff]   ;;  %v8943_v29 = vcombine.low %v12490_v39, %v12487_v38  ;;  %v885_v38 = vshll.u32 %v8941_v26, 16  ;;  %v10750_v26 = vld [vmem:[%s15817_s1 + $0x128c] ss:$16 sps:$4 sm:$0xff]  }
  0x6b   : > { %2414 = vmatprep.subr.bf16.mxu1 %v10684_v31  ;;  %v8951_v31 = vcombine.low %v12493_v40, %v12501_v44  ;;  %v10712_v36 = vld [vmem:[%s15817_s1 + $0x1740] ss:$16 sps:$4 sm:$0xff]   ;;  %v890_v39 = vshrl.u32 %v8949_v27, 16  ;;  %v893_v40 = vshll.u32 %v8949_v27, 16  ;;  %v884_v50 = vrot.slane %v882_v37, 2 }
  0x6c   : > { %v919_v43 = vshll.u32 %v8943_v29, 16  ;;  %v887_v51 = vrot.slane %v885_v38, 3  ;;  %v10745_v27 = vld [vmem:[%s15817_s1 + $0x1088] ss:$16 sps:$4 sm:$0xff]  }
  0x6d   : > { %2364 = vmatpush2.bf16.msra.mxu0 %v10679_v41  ;;  %v916_v41 = vshrl.u32 %v8943_v29, 16  ;;  %v924_v44 = vshrl.u32 %v8951_v31, 16  ;;  %v927_v45 = vshll.u32 %v8951_v31, 16  ;;  %v892_v52 = vrot.slane %v890_v39, 2  ;;  %v10753_v29 = vld [vmem:[%s15817_s1 + $0x106c] ss:$16 sps:$4 sm:$0xff]  }
  0x6e   : > { %2415 = vmatpush2.bf16.msra.mxu1 %v10682_v46  ;;  %2365 = vmatprep.subr.bf16.mxu0 %v10687_v47  ;;  %v10717_v46 = vld [vmem:[%s15817_s1 + $0x1524] ss:$16 sps:$4 sm:$0xff]   ;;  %v895_v53 = vrot.slane %v893_v40, 3  ;;  %v888_v1 = vor.u32 %v887_v51, %v884_v50  ;;  %v10756_v31 = vld [vmem:[%s15817_s1 + $0x126c] ss:$16 sps:$4 sm:$0xff]  }
  0x6f   : > { %2416 = vmatprep.subr.bf16.mxu1 %v10690_v56  ;;  %v10720_v47 = vld [vmem:[%s15817_s1 + $0x1724] ss:$16 sps:$4 sm:$0xff]   ;;  %v918_v54 = vrot.slane %v916_v41, 2  ;;  %v921_v56 = vrot.slane %v919_v43, 3  ;;  %v926_v58 = vrot.slane %v924_v44, 2  ;;  %v929_v59 = vrot.slane %v927_v45, 3 }
  0x70   : > { %v12616_v3 = vor.u32 %v895_v53, %v892_v52  ;;  %v10757_v37 = vld [vmem:[%s15817_s1 + $0x1048] ss:$16 sps:$4 sm:$0xff]   ;;  %v10765_v39 = vld [vmem:[%s15817_s1 + $0x102c] ss:$16 sps:$4 sm:$0xff]  }
  0x71   : > { %2366 = vmatpush2.bf16.msra.mxu0 %v10685_v7  ;;  %v922_v4 = vor.u32 %v921_v56, %v918_v54  ;;  %v12618_v5 = vor.u32 %v929_v59, %v926_v58  ;;  %v10732_v7 = vld [vmem:[%s15817_s1 + $0x12ec] ss:$16 sps:$4 sm:$0xff]   ;;  %v10760_v38 = vld [vmem:[%s15817_s1 + $0x1248] ss:$16 sps:$4 sm:$0xff]  }
  0x72   : > { %2417 = vmatpush2.bf16.msra.mxu1 %v10688_v8  ;;  %2367 = vmatprep.subr.bf16.mxu0 %v10693_v11  ;;  %v10727_v8 = vld [vmem:[%s15817_s1 + $0x10e8] ss:$16 sps:$4 sm:$0xff]   ;;  %v12631_v10 = vsel %vm812_vm0, %v888_v1, %v12616_v3  ;;  %v10768_v40 = vld [vmem:[%s15817_s1 + $0x122c] ss:$16 sps:$4 sm:$0xff]  }
  0x73   : > { %2418 = vmatprep.subr.bf16.mxu1 %v10696_v12  ;;  %v12635_v11 = vsel %vm812_vm0, %v922_v4, %v12618_v5  ;;  %v10730_v12 = vld [vmem:[%s15817_s1 + $0x12e8] ss:$16 sps:$4 sm:$0xff]   ;;  %v10771_v44 = vld [vmem:[%s15817_s1 + $0x100c] ss:$16 sps:$4 sm:$0xff]  }
  0x74   : > { %v10763_v41 = vld [vmem:[%s15817_s1 + $0x1028] ss:$16 sps:$4 sm:$0xff]   ;;  %v10774_v45 = vld [vmem:[%s15817_s1 + $0x120c] ss:$16 sps:$4 sm:$0xff]  }
  0x75   : > { %2368 = vmatpush2.bf16.msra.mxu0 %v10691_v15  ;;  %v10735_v15 = vld [vmem:[%s15817_s1 + $0x10cc] ss:$16 sps:$4 sm:$0xff]   ;;  %v10766_v43 = vld [vmem:[%s15817_s1 + $0x1228] ss:$16 sps:$4 sm:$0xff]  }
  0x76   : > { %2419 = vmatpush2.bf16.msra.mxu1 %v10694_v17  ;;  %2369 = vmatprep.subr.bf16.mxu0 %v10699_v18  ;;  %v10738_v17 = vld [vmem:[%s15817_s1 + $0x12cc] ss:$16 sps:$4 sm:$0xff]   ;;  %v10733_v18 = vld [vmem:[%s15817_s1 + $0x10c8] ss:$16 sps:$4 sm:$0xff]  }
  0x77   : > { %2420 = vmatprep.subr.bf16.mxu1 %v10702_v19  ;;  %v10736_v19 = vld [vmem:[%s15817_s1 + $0x12c8] ss:$16 sps:$4 sm:$0xff]   ;;  %v10783_v52 = vld [vmem:[%s15817_s1 + $0x11cc] ss:$16 sps:$4 sm:$0xff]  }
  0x78   : > { %v10775_v50 = vld [vmem:[%s15817_s1 + $0x11e8] ss:$16 sps:$4 sm:$0xff]   ;;  %v10786_v53 = vld [vmem:[%s15817_s1 + $0x13cc] ss:$16 sps:$4 sm:$0xff]  }
  0x79   : > { %2370 = vmatpush2.bf16.msra.mxu0 %v10697_v21  ;;  %v10741_v21 = vld [vmem:[%s15817_s1 + $0x10ac] ss:$16 sps:$4 sm:$0xff]   ;;  %v10778_v51 = vld [vmem:[%s15817_s1 + $0x13e8] ss:$16 sps:$4 sm:$0xff]  }
  0x7a   : > { %2421 = vmatpush2.bf16.msra.mxu1 %v10700_v22  ;;  %2371 = vmatprep.subr.bf16.mxu0 %v10705_v23  ;;  %v10744_v22 = vld [vmem:[%s15817_s1 + $0x12ac] ss:$16 sps:$4 sm:$0xff]   ;;  %v10739_v23 = vld [vmem:[%s15817_s1 + $0x10a8] ss:$16 sps:$4 sm:$0xff]  }
  0x7b   : > { %2422 = vmatprep.subr.bf16.mxu1 %v10708_v24  ;;  %v10742_v24 = vld [vmem:[%s15817_s1 + $0x12a8] ss:$16 sps:$4 sm:$0xff]   ;;  %v10789_v58 = vld [vmem:[%s15817_s1 + $0x11ac] ss:$16 sps:$4 sm:$0xff]  }
  0x7c   : > { %v10781_v54 = vld [vmem:[%s15817_s1 + $0x11c8] ss:$16 sps:$4 sm:$0xff]   ;;  %v10792_v59 = vld [vmem:[%s15817_s1 + $0x13ac] ss:$16 sps:$4 sm:$0xff]  }
  0x7d   : > { %2372 = vmatpush2.bf16.msra.mxu0 %v10703_v25  ;;  %v10747_v25 = vld [vmem:[%s15817_s1 + $0x108c] ss:$16 sps:$4 sm:$0xff]   ;;  %v10784_v56 = vld [vmem:[%s15817_s1 + $0x13c8] ss:$16 sps:$4 sm:$0xff]  }
  0x7e   : > { %2423 = vmatpush2.bf16.msra.mxu1 %v10706_v28  ;;  %2373 = vmatprep.subr.bf16.mxu0 %v10711_v32  ;;  %v10748_v28 = vld [vmem:[%s15817_s1 + $0x1288] ss:$16 sps:$4 sm:$0xff]   ;;  %v10798_v1 = vld [vmem:[%s15817_s1 + $0x138c] ss:$16 sps:$4 sm:$0xff]  }
  0x7f   : > { %2424 = vmatprep.subr.bf16.mxu1 %v10714_v33  ;;  %v10751_v32 = vld [vmem:[%s15817_s1 + $0x1068] ss:$16 sps:$4 sm:$0xff]  }
  0x80   : > { %v10754_v33 = vld [vmem:[%s15817_s1 + $0x1268] ss:$16 sps:$4 sm:$0xff]  }
  0x81   : > { %2374 = vmatpush2.bf16.msra.mxu0 %v10709_v35  ;;  %v10759_v35 = vld [vmem:[%s15817_s1 + $0x104c] ss:$16 sps:$4 sm:$0xff]   ;;  %v10796_v4 = vld [vmem:[%s15817_s1 + $0x1388] ss:$16 sps:$4 sm:$0xff]  }
  0x82   : > { %2425 = vmatpush2.bf16.msra.mxu1 %v10712_v36  ;;  %2375 = vmatprep.subr.bf16.mxu0 %v10717_v46  ;;  %v10762_v36 = vld [vmem:[%s15817_s1 + $0x124c] ss:$16 sps:$4 sm:$0xff]   ;;  %v10769_v46 = vld [vmem:[%s15817_s1 + $0x1008] ss:$16 sps:$4 sm:$0xff]  }
  0x83   : > { %2426 = vmatprep.subr.bf16.mxu1 %v10720_v47  ;;  %v10772_v47 = vld [vmem:[%s15817_s1 + $0x1208] ss:$16 sps:$4 sm:$0xff]  }
  0x85   : > { %2376 = vmatpush2.bf16.msra.mxu0 %v10715_v48  ;;  %v10777_v48 = vld [vmem:[%s15817_s1 + $0x11ec] ss:$16 sps:$4 sm:$0xff]  }
  0x86   : > { %2427 = vmatpush2.bf16.msra.mxu1 %v10718_v49  ;;  %2377 = vmatprep.subr.bf16.mxu0 %v10723_v60  ;;  %v10780_v49 = vld [vmem:[%s15817_s1 + $0x13ec] ss:$16 sps:$4 sm:$0xff]   ;;  %v10787_v60 = vld [vmem:[%s15817_s1 + $0x11a8] ss:$16 sps:$4 sm:$0xff]  }
  0x87   : > { %2428 = vmatprep.subr.bf16.mxu1 %v10726_v63  ;;  %v10790_v63 = vld [vmem:[%s15817_s1 + $0x13a8] ss:$16 sps:$4 sm:$0xff]  }
  0x89   : > { %2378 = vmatpush2.bf16.msra.mxu0 %v10721_v0  ;;  %v10795_v0 = vld [vmem:[%s15817_s1 + $0x118c] ss:$16 sps:$4 sm:$0xff]  }
  0x8a   : > { %2429 = vmatpush2.bf16.msra.mxu1 %v10724_v2  ;;  %2449 = vmatprep.subr.bf16.mxu0 %v10729_v6  ;;  %v10793_v2 = vld [vmem:[%s15817_s1 + $0x1188] ss:$16 sps:$4 sm:$0xff]   ;;  %v10801_v6 = vld [vmem:[%s15817_s1 + $0x116c] ss:$16 sps:$4 sm:$0xff]  }
  0x8b   : > { %2500 = vmatprep.subr.bf16.mxu1 %v10732_v7  ;;  %v10804_v7 = vld [vmem:[%s15817_s1 + $0x136c] ss:$16 sps:$4 sm:$0xff]  }
  0x8c   : > { %2380 = vmatmul.mubr.bf16.vlgmr.msra.gmra.mxu0 %v12631_v10 }
  0x8d   : > { %2431 = vmatmul.mubr.bf16.vlgmr.msra.gmra.mxu1 %v12635_v11  ;;  %2450 = vmatpush1.bf16.msra.mxu0 %v10727_v8  ;;  %v10799_v8 = vld [vmem:[%s15817_s1 + $0x1168] ss:$16 sps:$4 sm:$0xff]  }
  0x8e   : > { %2501 = vmatpush1.bf16.msra.mxu1 %v10730_v12  ;;  %2451 = vmatprep.subr.bf16.mxu0 %v10735_v15  ;;  %v10802_v12 = vld [vmem:[%s15817_s1 + $0x1368] ss:$16 sps:$4 sm:$0xff]   ;;  %v10807_v15 = vld [vmem:[%s15817_s1 + $0x114c] ss:$16 sps:$4 sm:$0xff]  }
  0x8f   : > { %2502 = vmatprep.subr.bf16.mxu1 %v10738_v17  ;;  %2389 = vmatprep.mubr.bf16.mxu0 %v12522_v9  ;;  %v10810_v17 = vld [vmem:[%s15817_s1 + $0x134c] ss:$16 sps:$4 sm:$0xff]  }
  0x90   : > { %2440 = vmatprep.mubr.bf16.mxu1 %v12530_v13 }
  0x91   : > { %2452 = vmatpush1.bf16.msra.mxu0 %v10733_v18  ;;  %v10805_v18 = vld [vmem:[%s15817_s1 + $0x1148] ss:$16 sps:$4 sm:$0xff]  }
  0x92   : > { %2503 = vmatpush1.bf16.msra.mxu1 %v10736_v19  ;;  %2453 = vmatprep.subr.bf16.mxu0 %v10741_v21  ;;  %v10808_v19 = vld [vmem:[%s15817_s1 + $0x1348] ss:$16 sps:$4 sm:$0xff]   ;;  %v10813_v21 = vld [vmem:[%s15817_s1 + $0x112c] ss:$16 sps:$4 sm:$0xff]  }
  0x93   : > { %2504 = vmatprep.subr.bf16.mxu1 %v10744_v22  ;;  %v10816_v22 = vld [vmem:[%s15817_s1 + $0x132c] ss:$16 sps:$4 sm:$0xff]  }
  0x94   : > { %2390 = vmatmul.mubr.bf16.gmra.mxu0 %v12616_v3 }
  0x95   : > { %2441 = vmatmul.mubr.bf16.gmra.mxu1 %v12618_v5  ;;  %2454 = vmatpush1.bf16.msra.mxu0 %v10739_v23  ;;  %v10811_v23 = vld [vmem:[%s15817_s1 + $0x1128] ss:$16 sps:$4 sm:$0xff]  }
  0x96   : > { %2505 = vmatpush1.bf16.msra.mxu1 %v10742_v24  ;;  %2455 = vmatprep.subr.bf16.mxu0 %v10747_v25  ;;  %v10814_v24 = vld [vmem:[%s15817_s1 + $0x1328] ss:$16 sps:$4 sm:$0xff]   ;;  %v10819_v25 = vld [vmem:[%s15817_s1 + $0x110c] ss:$16 sps:$4 sm:$0xff]  }
  0x97   : > { %2506 = vmatprep.subr.bf16.mxu1 %v10750_v26  ;;  %2481 = vmatprep.mubr.bf16.mxu0 %v12321_v30  ;;  %v10822_v26 = vld [vmem:[%s15817_s1 + $0x130c] ss:$16 sps:$4 sm:$0xff]  }
  0x98   : > { %2532 = vmatprep.mubr.bf16.mxu1 %v12337_v42 }
  0x99   : > { %2456 = vmatpush1.bf16.msra.mxu0 %v10745_v27  ;;  %v10817_v27 = vld [vmem:[%s15817_s1 + $0x1108] ss:$16 sps:$4 sm:$0xff]  }
  0x9a   : > { %2507 = vmatpush1.bf16.msra.mxu1 %v10748_v28  ;;  %2457 = vmatprep.subr.bf16.mxu0 %v10753_v29  ;;  %v10820_v28 = vld [vmem:[%s15817_s1 + $0x1308] ss:$16 sps:$4 sm:$0xff]   ;;  %v10825_v29 = vld [vmem:[%s15817_s1 + $0x14ec] ss:$16 sps:$4 sm:$0xff]  }
  0x9b   : > { %2508 = vmatprep.subr.bf16.mxu1 %v10756_v31  ;;  %v10828_v31 = vld [vmem:[%s15817_s1 + $0x16ec] ss:$16 sps:$4 sm:$0xff]  }
  0x9d   : > { %2458 = vmatpush1.bf16.msra.mxu0 %v10751_v32  ;;  %v10823_v32 = vld [vmem:[%s15817_s1 + $0x14e8] ss:$16 sps:$4 sm:$0xff]  }
  0x9e   : > { %2509 = vmatpush1.bf16.msra.mxu1 %v10754_v33  ;;  %2459 = vmatprep.subr.bf16.mxu0 %v10759_v35  ;;  %v10826_v33 = vld [vmem:[%s15817_s1 + $0x16e8] ss:$16 sps:$4 sm:$0xff]   ;;  %v10831_v35 = vld [vmem:[%s15817_s1 + $0x14cc] ss:$16 sps:$4 sm:$0xff]  }
  0x9f   : > { %2510 = vmatprep.subr.bf16.mxu1 %v10762_v36  ;;  %v10834_v36 = vld [vmem:[%s15817_s1 + $0x16cc] ss:$16 sps:$4 sm:$0xff]  }
  0xa1   : > { %2460 = vmatpush1.bf16.msra.mxu0 %v10757_v37  ;;  %v10829_v37 = vld [vmem:[%s15817_s1 + $0x14c8] ss:$16 sps:$4 sm:$0xff]  }
  0xa2   : > { %2511 = vmatpush1.bf16.msra.mxu1 %v10760_v38  ;;  %2461 = vmatprep.subr.bf16.mxu0 %v10765_v39  ;;  %v10832_v38 = vld [vmem:[%s15817_s1 + $0x16c8] ss:$16 sps:$4 sm:$0xff]   ;;  %v10837_v39 = vld [vmem:[%s15817_s1 + $0x14ac] ss:$16 sps:$4 sm:$0xff]  }
  0xa3   : > { %2512 = vmatprep.subr.bf16.mxu1 %v10768_v40  ;;  %v10840_v40 = vld [vmem:[%s15817_s1 + $0x16ac] ss:$16 sps:$4 sm:$0xff]  }
  0xa5   : > { %2462 = vmatpush1.bf16.msra.mxu0 %v10763_v41  ;;  %v10835_v41 = vld [vmem:[%s15817_s1 + $0x14a8] ss:$16 sps:$4 sm:$0xff]  }
  0xa6   : > { %2513 = vmatpush1.bf16.msra.mxu1 %v10766_v43  ;;  %2463 = vmatprep.subr.bf16.mxu0 %v10771_v44  ;;  %v10838_v43 = vld [vmem:[%s15817_s1 + $0x16a8] ss:$16 sps:$4 sm:$0xff]   ;;  %v10843_v44 = vld [vmem:[%s15817_s1 + $0x148c] ss:$16 sps:$4 sm:$0xff]  }
  0xa7   : > { %2514 = vmatprep.subr.bf16.mxu1 %v10774_v45  ;;  %v10846_v45 = vld [vmem:[%s15817_s1 + $0x168c] ss:$16 sps:$4 sm:$0xff]  }
  0xa9   : > { %2464 = vmatpush1.bf16.msra.mxu0 %v10769_v46  ;;  %v10841_v46 = vld [vmem:[%s15817_s1 + $0x1488] ss:$16 sps:$4 sm:$0xff]  }
  0xaa   : > { %2515 = vmatpush1.bf16.msra.mxu1 %v10772_v47  ;;  %2465 = vmatprep.subr.bf16.mxu0 %v10777_v48  ;;  %v10844_v47 = vld [vmem:[%s15817_s1 + $0x1688] ss:$16 sps:$4 sm:$0xff]   ;;  %v10849_v48 = vld [vmem:[%s15817_s1 + $0x146c] ss:$16 sps:$4 sm:$0xff]  }
  0xab   : > { %2516 = vmatprep.subr.bf16.mxu1 %v10780_v49  ;;  %v10852_v49 = vld [vmem:[%s15817_s1 + $0x166c] ss:$16 sps:$4 sm:$0xff]  }
  0xad   : > { %2466 = vmatpush2.bf16.msra.mxu0 %v10775_v50  ;;  %v10847_v50 = vld [vmem:[%s15817_s1 + $0x1468] ss:$16 sps:$4 sm:$0xff]  }
  0xae   : > { %2517 = vmatpush2.bf16.msra.mxu1 %v10778_v51  ;;  %2467 = vmatprep.subr.bf16.mxu0 %v10783_v52  ;;  %v10850_v51 = vld [vmem:[%s15817_s1 + $0x1668] ss:$16 sps:$4 sm:$0xff]   ;;  %v10855_v52 = vld [vmem:[%s15817_s1 + $0x144c] ss:$16 sps:$4 sm:$0xff]  }
  0xaf   : > { %2518 = vmatprep.subr.bf16.mxu1 %v10786_v53  ;;  %v10858_v53 = vld [vmem:[%s15817_s1 + $0x164c] ss:$16 sps:$4 sm:$0xff]  }
  0xb1   : > { %2468 = vmatpush2.bf16.msra.mxu0 %v10781_v54  ;;  %v10853_v54 = vld [vmem:[%s15817_s1 + $0x1448] ss:$16 sps:$4 sm:$0xff]  }
  0xb2   : > { %2519 = vmatpush2.bf16.msra.mxu1 %v10784_v56  ;;  %2469 = vmatprep.subr.bf16.mxu0 %v10789_v58  ;;  %v10856_v56 = vld [vmem:[%s15817_s1 + $0x1648] ss:$16 sps:$4 sm:$0xff]   ;;  %v10861_v58 = vld [vmem:[%s15817_s1 + $0x142c] ss:$16 sps:$4 sm:$0xff]  }
  0xb3   : > { %2520 = vmatprep.subr.bf16.mxu1 %v10792_v59  ;;  %v10864_v59 = vld [vmem:[%s15817_s1 + $0x162c] ss:$16 sps:$4 sm:$0xff]  }
  0xb5   : > { %2470 = vmatpush2.bf16.msra.mxu0 %v10787_v60  ;;  %v10859_v60 = vld [vmem:[%s15817_s1 + $0x1428] ss:$16 sps:$4 sm:$0xff]  }
  0xb6   : > { %2521 = vmatpush2.bf16.msra.mxu1 %v10790_v63  ;;  %2471 = vmatprep.subr.bf16.mxu0 %v10795_v0  ;;  %v10862_v63 = vld [vmem:[%s15817_s1 + $0x1628] ss:$16 sps:$4 sm:$0xff]   ;;  %v10867_v0 = vld [vmem:[%s15817_s1 + $0x140c] ss:$16 sps:$4 sm:$0xff]  }
  0xb7   : > { %2522 = vmatprep.subr.bf16.mxu1 %v10798_v1  ;;  %v10870_v1 = vld [vmem:[%s15817_s1 + $0x160c] ss:$16 sps:$4 sm:$0xff]  }
  0xb9   : > { %2472 = vmatpush2.bf16.msra.mxu0 %v10793_v2  ;;  %v10865_v2 = vld [vmem:[%s15817_s1 + $0x1408] ss:$16 sps:$4 sm:$0xff]  }
  0xba   : > { %2523 = vmatpush2.bf16.msra.mxu1 %v10796_v4  ;;  %2473 = vmatprep.subr.bf16.mxu0 %v10801_v6  ;;  %v10868_v4 = vld [vmem:[%s15817_s1 + $0x1608] ss:$16 sps:$4 sm:$0xff]   ;;  %v10873_v6 = vld [vmem:[%s15817_s1 + $0x15ec] ss:$16 sps:$4 sm:$0xff]  }
  0xbb   : > { %2524 = vmatprep.subr.bf16.mxu1 %v10804_v7  ;;  %v10876_v7 = vld [vmem:[%s15817_s1 + $0x17ec] ss:$16 sps:$4 sm:$0xff]  }
  0xbd   : > { %2474 = vmatpush2.bf16.msra.mxu0 %v10799_v8  ;;  %v10871_v8 = vld [vmem:[%s15817_s1 + $0x15e8] ss:$16 sps:$4 sm:$0xff]  }
  0xbe   : > { %2525 = vmatpush2.bf16.msra.mxu1 %v10802_v12  ;;  %2475 = vmatprep.subr.bf16.mxu0 %v10807_v15  ;;  %v10874_v12 = vld [vmem:[%s15817_s1 + $0x17e8] ss:$16 sps:$4 sm:$0xff]   ;;  %v10879_v15 = vld [vmem:[%s15817_s1 + $0x15cc] ss:$16 sps:$4 sm:$0xff]  }
  0xbf   : > { %2526 = vmatprep.subr.bf16.mxu1 %v10810_v17  ;;  %v10882_v17 = vld [vmem:[%s15817_s1 + $0x17cc] ss:$16 sps:$4 sm:$0xff]  }
  0xc1   : > { %2476 = vmatpush2.bf16.msra.mxu0 %v10805_v18  ;;  %v10877_v18 = vld [vmem:[%s15817_s1 + $0x15c8] ss:$16 sps:$4 sm:$0xff]  }
  0xc2   : > { %2527 = vmatpush2.bf16.msra.mxu1 %v10808_v19  ;;  %2477 = vmatprep.subr.bf16.mxu0 %v10813_v21  ;;  %v10880_v19 = vld [vmem:[%s15817_s1 + $0x17c8] ss:$16 sps:$4 sm:$0xff]   ;;  %v10885_v21 = vld [vmem:[%s15817_s1 + $0x15ac] ss:$16 sps:$4 sm:$0xff]  }
  0xc3   : > { %2528 = vmatprep.subr.bf16.mxu1 %v10816_v22  ;;  %v10888_v22 = vld [vmem:[%s15817_s1 + $0x17ac] ss:$16 sps:$4 sm:$0xff]  }
  0xc5   : > { %2478 = vmatpush2.bf16.msra.mxu0 %v10811_v23  ;;  %v10883_v23 = vld [vmem:[%s15817_s1 + $0x15a8] ss:$16 sps:$4 sm:$0xff]  }
  0xc6   : > { %2529 = vmatpush2.bf16.msra.mxu1 %v10814_v24  ;;  %2479 = vmatprep.subr.bf16.mxu0 %v10819_v25  ;;  %v10886_v24 = vld [vmem:[%s15817_s1 + $0x17a8] ss:$16 sps:$4 sm:$0xff]   ;;  %v10891_v25 = vld [vmem:[%s15817_s1 + $0x158c] ss:$16 sps:$4 sm:$0xff]  }
  0xc7   : > { %2530 = vmatprep.subr.bf16.mxu1 %v10822_v26  ;;  %v10894_v26 = vld [vmem:[%s15817_s1 + $0x178c] ss:$16 sps:$4 sm:$0xff]  }
  0xc9   : > { %2480 = vmatpush2.bf16.msra.mxu0 %v10817_v27  ;;  %v10889_v27 = vld [vmem:[%s15817_s1 + $0x1588] ss:$16 sps:$4 sm:$0xff]  }
  0xca   : > { %2531 = vmatpush2.bf16.msra.mxu1 %v10820_v28  ;;  %2551 = vmatprep.subr.bf16.mxu0 %v10825_v29  ;;  %v10892_v28 = vld [vmem:[%s15817_s1 + $0x1788] ss:$16 sps:$4 sm:$0xff]   ;;  %v10897_v29 = vld [vmem:[%s15817_s1 + $0x156c] ss:$16 sps:$4 sm:$0xff]  }
  0xcb   : > { %2602 = vmatprep.subr.bf16.mxu1 %v10828_v31  ;;  %v10900_v31 = vld [vmem:[%s15817_s1 + $0x176c] ss:$16 sps:$4 sm:$0xff]  }
  0xcc   : > { %2482 = vmatmul.mubr.bf16.vlgmr.msra.gmra.mxu0 %v12367_v61 }
  0xcd   : > { %2533 = vmatmul.mubr.bf16.vlgmr.msra.gmra.mxu1 %v12371_v62  ;;  %2552 = vmatpush1.bf16.msra.mxu0 %v10823_v32  ;;  %v10895_v32 = vld [vmem:[%s15817_s1 + $0x1568] ss:$16 sps:$4 sm:$0xff]  }
  0xce   : > { %2603 = vmatpush1.bf16.msra.mxu1 %v10826_v33  ;;  %2553 = vmatprep.subr.bf16.mxu0 %v10831_v35  ;;  %v10898_v33 = vld [vmem:[%s15817_s1 + $0x1768] ss:$16 sps:$4 sm:$0xff]   ;;  %v10903_v35 = vld [vmem:[%s15817_s1 + $0x154c] ss:$16 sps:$4 sm:$0xff]  }
  0xcf   : > { %2604 = vmatprep.subr.bf16.mxu1 %v10834_v36  ;;  %2491 = vmatprep.mubr.bf16.mxu0 %v12308_v20  ;;  %v10906_v36 = vld [vmem:[%s15817_s1 + $0x174c] ss:$16 sps:$4 sm:$0xff]  }
  0xd0   : > { %2542 = vmatprep.mubr.bf16.mxu1 %v12326_v34 }
  0xd1   : > { %2554 = vmatpush1.bf16.msra.mxu0 %v10829_v37  ;;  %v10901_v37 = vld [vmem:[%s15817_s1 + $0x1548] ss:$16 sps:$4 sm:$0xff]  }
  0xd2   : > { %2605 = vmatpush1.bf16.msra.mxu1 %v10832_v38  ;;  %2555 = vmatprep.subr.bf16.mxu0 %v10837_v39  ;;  %v10904_v38 = vld [vmem:[%s15817_s1 + $0x1748] ss:$16 sps:$4 sm:$0xff]   ;;  %v10909_v39 = vld [vmem:[%s15817_s1 + $0x152c] ss:$16 sps:$4 sm:$0xff]  }
  0xd3   : > { %2606 = vmatprep.subr.bf16.mxu1 %v10840_v40  ;;  %v10912_v40 = vld [vmem:[%s15817_s1 + $0x172c] ss:$16 sps:$4 sm:$0xff]  }
  0xd4   : > { %2492 = vmatmul.mubr.bf16.gmra.mxu0 %v12352_v55 }
  0xd5   : > { %2543 = vmatmul.mubr.bf16.gmra.mxu1 %v12354_v57  ;;  %2556 = vmatpush1.bf16.msra.mxu0 %v10835_v41  ;;  %v10907_v41 = vld [vmem:[%s15817_s1 + $0x1528] ss:$16 sps:$4 sm:$0xff]  }
  0xd6   : > { %2607 = vmatpush1.bf16.msra.mxu1 %v10838_v43  ;;  %2557 = vmatprep.subr.bf16.mxu0 %v10843_v44  ;;  %v10910_v43 = vld [vmem:[%s15817_s1 + $0x1728] ss:$16 sps:$4 sm:$0xff]   ;;  %v10915_v44 = vld [vmem:[%s15817_s1 + $0x150c] ss:$16 sps:$4 sm:$0xff]  }
  0xd7   : > { %2608 = vmatprep.subr.bf16.mxu1 %v10846_v45  ;;  %2583 = vmatprep.mubr.bf16.mxu0 %v12534_v14  ;;  %v10918_v45 = vld [vmem:[%s15817_s1 + $0x170c] ss:$16 sps:$4 sm:$0xff]  }
  0xd8   : > { %2634 = vmatprep.mubr.bf16.mxu1 %v12542_v16 }
  0xd9   : > { %2558 = vmatpush1.bf16.msra.mxu0 %v10841_v46  ;;  %v10913_v46 = vld [vmem:[%s15817_s1 + $0x1508] ss:$16 sps:$4 sm:$0xff]  }
  0xda   : > { %2609 = vmatpush1.bf16.msra.mxu1 %v10844_v47  ;;  %2559 = vmatprep.subr.bf16.mxu0 %v10849_v48  ;;  %v10916_v47 = vld [vmem:[%s15817_s1 + $0x1708] ss:$16 sps:$4 sm:$0xff]   ;;  %v10921_v48 = vld [vmem:[%s15817_s1 + $0xe4] ss:$16 sps:$4 sm:$0xff]  }
  0xdb   : > { %2610 = vmatprep.subr.bf16.mxu1 %v10852_v49  ;;  %v10924_v49 = vld [vmem:[%s15817_s1 + $0x2e4] ss:$16 sps:$4 sm:$0xff]  }
  0xdd   : > { %2560 = vmatpush1.bf16.msra.mxu0 %v10847_v50  ;;  %v10919_v50 = vld [vmem:[%s15817_s1 + $0xe0] ss:$16 sps:$4 sm:$0xff]  }
  0xde   : > { %2611 = vmatpush1.bf16.msra.mxu1 %v10850_v51  ;;  %2561 = vmatprep.subr.bf16.mxu0 %v10855_v52  ;;  %v10922_v51 = vld [vmem:[%s15817_s1 + $0x2e0] ss:$16 sps:$4 sm:$0xff]   ;;  %v10927_v52 = vld [vmem:[%s15817_s1 + $0xc4] ss:$16 sps:$4 sm:$0xff]  }
  0xdf   : > { %2612 = vmatprep.subr.bf16.mxu1 %v10858_v53  ;;  %v10930_v53 = vld [vmem:[%s15817_s1 + $0x2c4] ss:$16 sps:$4 sm:$0xff]  }
  0xe1   : > { %2562 = vmatpush1.bf16.msra.mxu0 %v10853_v54 }
  0xe2   : > { %2613 = vmatpush1.bf16.msra.mxu1 %v10856_v56  ;;  %2563 = vmatprep.subr.bf16.mxu0 %v10861_v58  ;;  %v10925_v58 = vld [vmem:[%s15817_s1 + $0xc0] ss:$16 sps:$4 sm:$0xff]  }
  0xe3   : > { %2614 = vmatprep.subr.bf16.mxu1 %v10864_v59 }
  0xe5   : > { %2564 = vmatpush1.bf16.msra.mxu0 %v10859_v60  ;;  %v10928_v60 = vld [vmem:[%s15817_s1 + $0x2c0] ss:$16 sps:$4 sm:$0xff]  }
  0xe6   : > { %2615 = vmatpush1.bf16.msra.mxu1 %v10862_v63  ;;  %2565 = vmatprep.subr.bf16.mxu0 %v10867_v0 }
  0xe7   : > { %2616 = vmatprep.subr.bf16.mxu1 %v10870_v1  ;;  %v10933_v1 = vld [vmem:[%s15817_s1 + $0xa4] ss:$16 sps:$4 sm:$0xff]  }
  0xe9   : > { %2566 = vmatpush1.bf16.msra.mxu0 %v10865_v2  ;;  %v10936_v2 = vld [vmem:[%s15817_s1 + $0x2a4] ss:$16 sps:$4 sm:$0xff]  }
  0xea   : > { %2617 = vmatpush1.bf16.msra.mxu1 %v10868_v4  ;;  %2567 = vmatprep.subr.bf16.mxu0 %v10873_v6  ;;  %v10931_v6 = vld [vmem:[%s15817_s1 + $0xa0] ss:$16 sps:$4 sm:$0xff]  }
  0xeb   : > { %2618 = vmatprep.subr.bf16.mxu1 %v10876_v7  ;;  %v13070_v7 = vld [vmem:[%s12268_s10] sm:$0xff] }
  0xed   : > { %2568 = vmatpush2.bf16.msra.mxu0 %v10871_v8 }
  0xee   : > { %2619 = vmatpush2.bf16.msra.mxu1 %v10874_v12  ;;  %2569 = vmatprep.subr.bf16.mxu0 %v10879_v15  ;;  %v13073_v15 = vld [vmem:[%s12268_s10 + $0x8] sm:$0xff] }
  0xef   : > { %2620 = vmatprep.subr.bf16.mxu1 %v10882_v17 }
  0xf1   : > { %2570 = vmatpush2.bf16.msra.mxu0 %v10877_v18  ;;  %v10934_v18 = vld [vmem:[%s15817_s1 + $0x2a0] ss:$16 sps:$4 sm:$0xff]  }
  0xf2   : > { %2621 = vmatpush2.bf16.msra.mxu1 %v10880_v19  ;;  %2571 = vmatprep.subr.bf16.mxu0 %v10885_v21 }
  0xf3   : > { %2622 = vmatprep.subr.bf16.mxu1 %v10888_v22  ;;  %v10939_v22 = vld [vmem:[%s15817_s1 + $0x84] ss:$16 sps:$4 sm:$0xff]  }
  0xf5   : > { %2572 = vmatpush2.bf16.msra.mxu0 %v10883_v23  ;;  %v10942_v23 = vld [vmem:[%s15817_s1 + $0x284] ss:$16 sps:$4 sm:$0xff]  }
  0xf6   : > { %2623 = vmatpush2.bf16.msra.mxu1 %v10886_v24  ;;  %2573 = vmatprep.subr.bf16.mxu0 %v10891_v25  ;;  %v13091_v24 = vld [vmem:[%s12268_s10 + $0x20] sm:$0xff] }
  0xf7   : > { %2624 = vmatprep.subr.bf16.mxu1 %v10894_v26  ;;  %v13095_v25 = vcombine.high %v13070_v7, %v13091_v24  ;;  %v13098_v26 = vld [vmem:[%s12268_s10 + $0x28] sm:$0xff] }
  0xf9   : > { %2574 = vmatpush2.bf16.msra.mxu0 %v10889_v27  ;;  %v13102_v27 = vcombine.high %v13073_v15, %v13098_v26 }
  0xfa   : > { %2625 = vmatpush2.bf16.msra.mxu1 %v10892_v28  ;;  %2575 = vmatprep.subr.bf16.mxu0 %v10897_v29  ;;  %v10937_v28 = vld [vmem:[%s15817_s1 + $0x80] ss:$16 sps:$4 sm:$0xff]  }
  0xfb   : > { %2626 = vmatprep.subr.bf16.mxu1 %v10900_v31 }
  0xfd   : > { %2576 = vmatpush2.bf16.msra.mxu0 %v10895_v32  ;;  %v10940_v32 = vld [vmem:[%s15817_s1 + $0x280] ss:$16 sps:$4 sm:$0xff]  }
  0xfe   : > { %2627 = vmatpush2.bf16.msra.mxu1 %v10898_v33  ;;  %2577 = vmatprep.subr.bf16.mxu0 %v10903_v35  ;;  %v10945_v35 = vld [vmem:[%s15817_s1 + $0x64] ss:$16 sps:$4 sm:$0xff]  }
  0xff   : > { %2628 = vmatprep.subr.bf16.mxu1 %v10906_v36  ;;  %v10948_v36 = vld [vmem:[%s15817_s1 + $0x264] ss:$16 sps:$4 sm:$0xff]  }
 0x101   : > { %2578 = vmatpush2.bf16.msra.mxu0 %v10901_v37 }
 0x102   : > { %2629 = vmatpush2.bf16.msra.mxu1 %v10904_v38  ;;  %2579 = vmatprep.subr.bf16.mxu0 %v10909_v39 }
 0x103   : > { %2630 = vmatprep.subr.bf16.mxu1 %v10912_v40  ;;  %v10943_v40 = vld [vmem:[%s15817_s1 + $0x60] ss:$16 sps:$4 sm:$0xff]  }
 0x105   : > { %2580 = vmatpush2.bf16.msra.mxu0 %v10907_v41 }
 0x106   : > { %2631 = vmatpush2.bf16.msra.mxu1 %v10910_v43  ;;  %2581 = vmatprep.subr.bf16.mxu0 %v10915_v44  ;;  %v10946_v44 = vld [vmem:[%s15817_s1 + $0x260] ss:$16 sps:$4 sm:$0xff]  }
 0x107   : > { %2632 = vmatprep.subr.bf16.mxu1 %v10918_v45  ;;  %v10951_v45 = vld [vmem:[%s15817_s1 + $0x44] ss:$16 sps:$4 sm:$0xff]  }
 0x109   : > { %2582 = vmatpush2.bf16.msra.mxu0 %v10913_v46  ;;  %v10954_v46 = vld [vmem:[%s15817_s1 + $0x244] ss:$16 sps:$4 sm:$0xff]  }
 0x10a   : > { %2633 = vmatpush2.bf16.msra.mxu1 %v10916_v47  ;;  %3989 = vmatprep.subr.bf16.mxu0 %v10921_v48 }
 0x10b   : > { %4040 = vmatprep.subr.bf16.mxu1 %v10924_v49  ;;  %v10949_v49 = vld [vmem:[%s15817_s1 + $0x40] ss:$16 sps:$4 sm:$0xff]  }
 0x10c   : > { %v2279_v54 = vpop.f32.mrf.mxu0  ;;  %2584 = vmatmul.mubr.bf16.vlgmr.msra.gmra.mxu0 %v12631_v10 }
 0x10d   : > { %v2330_v56 = vpop.f32.mrf.mxu1  ;;  %2635 = vmatmul.mubr.bf16.vlgmr.msra.gmra.mxu1 %v12635_v11  ;;  %3990 = vmatpush1.bf16.msra.mxu0 %v10919_v50  ;;  %v10952_v50 = vld [vmem:[%s15817_s1 + $0x240] ss:$16 sps:$4 sm:$0xff]  }
 0x10e   : > { %v13051_v59 = vadd.f32 %v2330_v56, %v2279_v54  ;;  %4041 = vmatpush1.bf16.msra.mxu1 %v10922_v51  ;;  %v2281_v63 = vpop.f32.mrf.mxu0  ;;  %3991 = vmatprep.subr.bf16.mxu0 %v10927_v52  ;;  %v10957_v51 = vld [vmem:[%s15817_s1 + $0x24] ss:$16 sps:$4 sm:$0xff]   ;;  %v10958_v54 = vld [vmem:[%s15817_s1 + $0x220] ss:$16 sps:$4 sm:$0xff]  }
 0x10f   : > { %v2332_v0 = vpop.f32.mrf.mxu1  ;;  %4042 = vmatprep.subr.bf16.mxu1 %v10930_v53  ;;  %2593 = vmatprep.mubr.bf16.mxu0 %v12522_v9  ;;  %v10960_v52 = vld [vmem:[%s15817_s1 + $0x224] ss:$16 sps:$4 sm:$0xff]   ;;  %v10955_v53 = vld [vmem:[%s15817_s1 + $0x20] ss:$16 sps:$4 sm:$0xff]  }
 0x110   : > { %v13062_v4 = vadd.f32 %v2332_v0, %v2281_v63  ;;  %2644 = vmatprep.mubr.bf16.mxu1 %v12530_v13  ;;  %v2283_v8 = vpop.f32.mrf.mxu0  ;;  %v10963_v56 = vld [vmem:[%s15817_s1 + $0x4] ss:$16 sps:$4 sm:$0xff]   ;;  %v10964_v63 = vld [vmem:[%s15817_s1 + $0x200] ss:$16 sps:$4 sm:$0xff]  }
 0x111   : > { %v2334_v12 = vpop.f32.mrf.mxu1  ;;  %3992 = vmatpush1.bf16.msra.mxu0 %v10925_v58  ;;  %v10966_v58 = vld [vmem:[%s15817_s1 + $0x204] ss:$16 sps:$4 sm:$0xff]  }
 0x112   : > { %v13075_v17 = vadd.f32 %v2334_v12, %v2283_v8  ;;  %4043 = vmatpush1.bf16.msra.mxu1 %v10928_v60  ;;  %v13080_v19 = vpop.f32.mrf.mxu0  ;;  %3993 = vmatprep.subr.bf16.mxu0 %v10933_v1  ;;  %v10961_v60 = vld [vmem:[%s15817_s1] ss:$16 sps:$4 sm:$0xff]   ;;  %v10969_v0 = vld [vmem:[%s15817_s1 + $0x1e4] ss:$16 sps:$4 sm:$0xff]  }
 0x113   : > { %v13082_v21 = vpop.f32.mrf.mxu1  ;;  %4044 = vmatprep.subr.bf16.mxu1 %v10936_v2  ;;  %v10972_v1 = vld [vmem:[%s15817_s1 + $0x3e4] ss:$16 sps:$4 sm:$0xff]   ;;  %v10967_v2 = vld [vmem:[%s15817_s1 + $0x1e0] ss:$16 sps:$4 sm:$0xff]  }
 0x114   : > { %2594 = vmatmul.mubr.bf16.gmra.mxu0 %v12616_v3  ;;  %v2289_v29 = vpop.f32.mrf.mxu0  ;;  %v10975_v8 = vld [vmem:[%s15817_s1 + $0x1c4] ss:$16 sps:$4 sm:$0xff]  }
 0x115   : > { %2645 = vmatmul.mubr.bf16.gmra.mxu1 %v12618_v5  ;;  %v2340_v31 = vpop.f32.mrf.mxu1  ;;  %3994 = vmatpush1.bf16.msra.mxu0 %v10931_v6  ;;  %v10970_v6 = vld [vmem:[%s15817_s1 + $0x3e0] ss:$16 sps:$4 sm:$0xff]   ;;  %v10978_v12 = vld [vmem:[%s15817_s1 + $0x3c4] ss:$16 sps:$4 sm:$0xff]  }
 0x116   : > { %4045 = vmatpush1.bf16.msra.mxu1 %v10934_v18  ;;  %v13112_v33 = vadd.f32 %v2340_v31, %v2289_v29  ;;  %3995 = vmatprep.subr.bf16.mxu0 %v10939_v22  ;;  %v2291_v37 = vpop.f32.mrf.mxu0  ;;  %v10973_v18 = vld [vmem:[%s15817_s1 + $0x1c0] ss:$16 sps:$4 sm:$0xff]  }
 0x117   : > { %4046 = vmatprep.subr.bf16.mxu1 %v10942_v23  ;;  %v2342_v38 = vpop.f32.mrf.mxu1  ;;  %4021 = vmatprep.mubr.bf16.mxu0 %v13095_v25  ;;  %v10976_v22 = vld [vmem:[%s15817_s1 + $0x3c0] ss:$16 sps:$4 sm:$0xff]   ;;  %v10981_v23 = vld [vmem:[%s15817_s1 + $0x1a4] ss:$16 sps:$4 sm:$0xff]  }
 0x118   : > { %v13120_v39 = vadd.f32 %v2342_v38, %v2291_v37  ;;  %4072 = vmatprep.mubr.bf16.mxu1 %v13102_v27  ;;  %v2293_v41 = vpop.f32.mrf.mxu0  ;;  %v10979_v29 = vld [vmem:[%s15817_s1 + $0x1a0] ss:$16 sps:$4 sm:$0xff]   ;;  %v10993_v38 = vld [vmem:[%s15817_s1 + $0x164] ss:$16 sps:$4 sm:$0xff]  }
 0x119   : > { %v2344_v43 = vpop.f32.mrf.mxu1  ;;  %3996 = vmatpush1.bf16.msra.mxu0 %v10937_v28  ;;  %v10984_v28 = vld [vmem:[%s15817_s1 + $0x3a4] ss:$16 sps:$4 sm:$0xff]   ;;  %v10982_v31 = vld [vmem:[%s15817_s1 + $0x3a0] ss:$16 sps:$4 sm:$0xff]  }
 0x11a   : > { %4047 = vmatpush1.bf16.msra.mxu1 %v10940_v32  ;;  %3997 = vmatprep.subr.bf16.mxu0 %v10945_v35  ;;  %v2294_v47 = vpop.f32.mrf.mxu0  ;;  %v10987_v32 = vld [vmem:[%s15817_s1 + $0x184] ss:$16 sps:$4 sm:$0xff]   ;;  %v10988_v37 = vld [vmem:[%s15817_s1 + $0x380] ss:$16 sps:$4 sm:$0xff]  }
 0x11b   : > { %4048 = vmatprep.subr.bf16.mxu1 %v10948_v36  ;;  %v2345_v48 = vpop.f32.mrf.mxu1  ;;  %v10990_v35 = vld [vmem:[%s15817_s1 + $0x384] ss:$16 sps:$4 sm:$0xff]   ;;  %v10985_v36 = vld [vmem:[%s15817_s1 + $0x180] ss:$16 sps:$4 sm:$0xff]  }
 0x11c   : > { %v10991_v41 = vld [vmem:[%s15817_s1 + $0x160] ss:$16 sps:$4 sm:$0xff]   ;;  %v11005_v48 = vld [vmem:[%s15817_s1 + $0x124] ss:$16 sps:$4 sm:$0xff]  }
 0x11d   : > { %3998 = vmatpush1.bf16.msra.mxu0 %v10943_v40  ;;  %v10996_v40 = vld [vmem:[%s15817_s1 + $0x364] ss:$16 sps:$4 sm:$0xff]   ;;  %v10994_v43 = vld [vmem:[%s15817_s1 + $0x360] ss:$16 sps:$4 sm:$0xff]  }
 0x11e   : > { %4049 = vmatpush1.bf16.msra.mxu1 %v10946_v44  ;;  %3999 = vmatprep.subr.bf16.mxu0 %v10951_v45  ;;  %v10999_v44 = vld [vmem:[%s15817_s1 + $0x144] ss:$16 sps:$4 sm:$0xff]   ;;  %v11000_v47 = vld [vmem:[%s15817_s1 + $0x340] ss:$16 sps:$4 sm:$0xff]  }
 0x11f   : > { %4050 = vmatprep.subr.bf16.mxu1 %v10954_v46  ;;  %v11002_v45 = vld [vmem:[%s15817_s1 + $0x344] ss:$16 sps:$4 sm:$0xff]   ;;  %v10997_v46 = vld [vmem:[%s15817_s1 + $0x140] ss:$16 sps:$4 sm:$0xff]  }
 0x121   : > { %4000 = vmatpush1.bf16.msra.mxu0 %v10949_v49  ;;  %v11008_v49 = vld [vmem:[%s15817_s1 + $0x324] ss:$16 sps:$4 sm:$0xff]  }
 0x122   : > { %4051 = vmatpush1.bf16.msra.mxu1 %v10952_v50  ;;  %4001 = vmatprep.subr.bf16.mxu0 %v10957_v51  ;;  %v11003_v50 = vld [vmem:[%s15817_s1 + $0x120] ss:$16 sps:$4 sm:$0xff]  }
 0x123   : > { %4052 = vmatprep.subr.bf16.mxu1 %v10960_v52  ;;  %v11006_v51 = vld [vmem:[%s15817_s1 + $0x320] ss:$16 sps:$4 sm:$0xff]   ;;  %v11011_v52 = vld [vmem:[%s15817_s1 + $0x104] ss:$16 sps:$4 sm:$0xff]  }
 0x125   : > { %4002 = vmatpush1.bf16.msra.mxu0 %v10955_v53  ;;  %v11014_v53 = vld [vmem:[%s15817_s1 + $0x304] ss:$16 sps:$4 sm:$0xff]  }
 0x126   : > { %4053 = vmatpush1.bf16.msra.mxu1 %v10958_v54  ;;  %4003 = vmatprep.subr.bf16.mxu0 %v10963_v56  ;;  %v11009_v54 = vld [vmem:[%s15817_s1 + $0x100] ss:$16 sps:$4 sm:$0xff]  }
 0x127   : > { %4054 = vmatprep.subr.bf16.mxu1 %v10966_v58  ;;  %v11012_v56 = vld [vmem:[%s15817_s1 + $0x300] ss:$16 sps:$4 sm:$0xff]   ;;  %v11017_v58 = vld [vmem:[%s15817_s1 + $0x4e4] ss:$16 sps:$4 sm:$0xff]  }
 0x129   : > { %4004 = vmatpush1.bf16.msra.mxu0 %v10961_v60  ;;  %v11020_v60 = vld [vmem:[%s15817_s1 + $0x6e4] ss:$16 sps:$4 sm:$0xff]  }
 0x12a   : > { %4055 = vmatpush1.bf16.msra.mxu1 %v10964_v63  ;;  %4005 = vmatprep.subr.bf16.mxu0 %v10969_v0  ;;  %v219_v63 = vld [vmem:[%s12268_s10 + $0x40] sm:$0x33]  ;;  %v220_v0 = vld [vmem:[%s12268_s10 + $0x48] sm:$0x33] }
 0x12b   : > { %4056 = vmatprep.subr.bf16.mxu1 %v10972_v1  ;;  %v11015_v1 = vld [vmem:[%s15817_s1 + $0x4e0] ss:$16 sps:$4 sm:$0xff]  }
 0x12d   : > { %4006 = vmatpush2.bf16.msra.mxu0 %v10967_v2  ;;  %v11018_v2 = vld [vmem:[%s15817_s1 + $0x6e0] ss:$16 sps:$4 sm:$0xff]  }
 0x12e   : > { %4057 = vmatpush2.bf16.msra.mxu1 %v10970_v6  ;;  %4007 = vmatprep.subr.bf16.mxu0 %v10975_v8  ;;  %v13278_v6 = vcombine.low %v13070_v7, %v13091_v24  ;;  %v13282_v8 = vcombine.low %v13073_v15, %v13098_v26  ;;  %v11021_v7 = vld [vmem:[%s15817_s1 + $0x4c0] ss:$16 sps:$4 sm:$0xff]   ;;  %v13296_v24 = vcombine.high %v219_v63, %v219_v63 }
 0x12f   : > { %4058 = vmatprep.subr.bf16.mxu1 %v10978_v12  ;;  %v11023_v12 = vld [vmem:[%s15817_s1 + $0x4c4] ss:$16 sps:$4 sm:$0xff]   ;;  %v11024_v15 = vld [vmem:[%s15817_s1 + $0x6c0] ss:$16 sps:$4 sm:$0xff]   ;;  %v13298_v26 = vcombine.high %v220_v0, %v220_v0 }
 0x131   : > { %4008 = vmatpush2.bf16.msra.mxu0 %v10973_v18  ;;  %v11026_v18 = vld [vmem:[%s15817_s1 + $0x6c4] ss:$16 sps:$4 sm:$0xff]  }
 0x132   : > { %4059 = vmatpush2.bf16.msra.mxu1 %v10976_v22  ;;  %4009 = vmatprep.subr.bf16.mxu0 %v10981_v23 }
 0x133   : > { %4060 = vmatprep.subr.bf16.mxu1 %v10984_v28 }
 0x135   : > { %4010 = vmatpush2.bf16.msra.mxu0 %v10979_v29 }
 0x136   : > { %4061 = vmatpush2.bf16.msra.mxu1 %v10982_v31  ;;  %4011 = vmatprep.subr.bf16.mxu0 %v10987_v32  ;;  %v11031_v32 = vld [vmem:[%s15817_s1 + $0x4a4] ss:$16 sps:$4 sm:$0xff]  }
 0x137   : > { %4062 = vmatprep.subr.bf16.mxu1 %v10990_v35  ;;  %v11034_v35 = vld [vmem:[%s15817_s1 + $0x6a4] ss:$16 sps:$4 sm:$0xff]  }
 0x139   : > { %4012 = vmatpush2.bf16.msra.mxu0 %v10985_v36 }
 0x13a   : > { %4063 = vmatpush2.bf16.msra.mxu1 %v10988_v37  ;;  %4013 = vmatprep.subr.bf16.mxu0 %v10993_v38  ;;  %v11032_v38 = vld [vmem:[%s15817_s1 + $0x6a0] ss:$16 sps:$4 sm:$0xff]  }
 0x13b   : > { %4064 = vmatprep.subr.bf16.mxu1 %v10996_v40  ;;  %v13321_v40 = vld [vmem:[%s12268_s10 + $0x10] sm:$0xff] }
 0x13d   : > { %4014 = vmatpush2.bf16.msra.mxu0 %v10991_v41  ;;  %v13324_v41 = vld [vmem:[%s12268_s10 + $0x18] sm:$0xff] }
 0x13e   : > { %4065 = vmatpush2.bf16.msra.mxu1 %v10994_v43  ;;  %4015 = vmatprep.subr.bf16.mxu0 %v10999_v44 }
 0x13f   : > { %4066 = vmatprep.subr.bf16.mxu1 %v11002_v45  ;;  %v13328_v45 = vcombine.low %v220_v0, %v220_v0 }
 0x141   : > { %4016 = vmatpush2.bf16.msra.mxu0 %v10997_v46 }
 0x142   : > { %4067 = vmatpush2.bf16.msra.mxu1 %v11000_v47  ;;  %4017 = vmatprep.subr.bf16.mxu0 %v11005_v48 }
 0x143   : > { %4068 = vmatprep.subr.bf16.mxu1 %v11008_v49 }
 0x145   : > { %4018 = vmatpush2.bf16.msra.mxu0 %v11003_v50  ;;  %v11039_v50 = vld [vmem:[%s15817_s1 + $0x484] ss:$16 sps:$4 sm:$0xff]  }
 0x146   : > { %4069 = vmatpush2.bf16.msra.mxu1 %v11006_v51  ;;  %4019 = vmatprep.subr.bf16.mxu0 %v11011_v52  ;;  %v11042_v51 = vld [vmem:[%s15817_s1 + $0x684] ss:$16 sps:$4 sm:$0xff]  }
 0x147   : > { %4070 = vmatprep.subr.bf16.mxu1 %v11014_v53  ;;  %v11040_v53 = vld [vmem:[%s15817_s1 + $0x680] ss:$16 sps:$4 sm:$0xff]  }
 0x149   : > { %4020 = vmatpush2.bf16.msra.mxu0 %v11009_v54  ;;  %v13352_v54 = vld [vmem:[%s12268_s10 + $0x30] sm:$0xff] }
 0x14a   : > { %4071 = vmatpush2.bf16.msra.mxu1 %v11012_v56  ;;  %4091 = vmatprep.subr.bf16.mxu0 %v11017_v58  ;;  %v13356_v56 = vcombine.high %v13321_v40, %v13352_v54  ;;  %v13359_v58 = vld [vmem:[%s12268_s10 + $0x38] sm:$0xff] }
 0x14b   : > { %4142 = vmatprep.subr.bf16.mxu1 %v11020_v60  ;;  %v13363_v60 = vcombine.high %v13324_v41, %v13359_v58 }
 0x14c   : > { %v2381_v22 = vpop.f32.mrf.mxu0  ;;  %4022 = vmatmul.mubr.bf16.vlgmr.msra.gmra.mxu0 %v13278_v6 }
 0x14d   : > { %v2432_v23 = vpop.f32.mrf.mxu1  ;;  %4073 = vmatmul.mubr.bf16.vlgmr.msra.gmra.mxu1 %v13282_v8  ;;  %v2382_v28 = vadd.f32 %v2381_v22, %v13051_v59  ;;  %4092 = vmatpush1.bf16.msra.mxu0 %v11015_v1  ;;  %v11029_v59 = vld [vmem:[%s15817_s1 + $0x4a0] ss:$16 sps:$4 sm:$0xff]  }
 0x14e   : > { %4143 = vmatpush1.bf16.msra.mxu1 %v11018_v2  ;;  %v2383_v29 = vpop.f32.mrf.mxu0  ;;  %4093 = vmatprep.subr.bf16.mxu0 %v11023_v12 }
 0x14f   : > { %v2434_v31 = vpop.f32.mrf.mxu1  ;;  %4144 = vmatprep.subr.bf16.mxu1 %v11026_v18  ;;  %v13309_v36 = vadd.f32 %v2432_v23, %v2382_v28  ;;  %v2384_v37 = vadd.f32 %v2383_v29, %v13062_v4  ;;  %4031 = vmatprep.mubr.bf16.mxu0 %v13296_v24  ;;  %v13326_v4 = vcombine.low %v219_v63, %v219_v63  ;;  %v11045_v18 = vld [vmem:[%s15817_s1 + $0x464] ss:$16 sps:$4 sm:$0xff]   ;;  %v11043_v29 = vld [vmem:[%s15817_s1 + $0x460] ss:$16 sps:$4 sm:$0xff]  }
 0x150   : > { %4082 = vmatprep.mubr.bf16.mxu1 %v13298_v26  ;;  %v2385_v43 = vpop.f32.mrf.mxu0 }
 0x151   : > { %v2436_v44 = vpop.f32.mrf.mxu1  ;;  %v13330_v46 = vadd.f32 %v2434_v31, %v2384_v37  ;;  %v2386_v47 = vadd.f32 %v2385_v43, %v13075_v17  ;;  %4094 = vmatpush1.bf16.msra.mxu0 %v11021_v7  ;;  %v11037_v17 = vld [vmem:[%s15817_s1 + $0x480] ss:$16 sps:$4 sm:$0xff]   ;;  %v11048_v7 = vld [vmem:[%s15817_s1 + $0x664] ss:$16 sps:$4 sm:$0xff]  }
 0x152   : > { %4145 = vmatpush1.bf16.msra.mxu1 %v11024_v15  ;;  %v13333_v48 = vpop.f32.mrf.mxu0  ;;  %4095 = vmatprep.subr.bf16.mxu0 %v11031_v32  ;;  %v11051_v31 = vld [vmem:[%s15817_s1 + $0x444] ss:$16 sps:$4 sm:$0xff]  }
 0x153   : > { %v13335_v49 = vpop.f32.mrf.mxu1  ;;  %4146 = vmatprep.subr.bf16.mxu1 %v11034_v35  ;;  %v13343_v52 = vadd.f32 %v2436_v44, %v2386_v47  ;;  %v11054_v32 = vld [vmem:[%s15817_s1 + $0x644] ss:$16 sps:$4 sm:$0xff]   ;;  %v11055_v47 = vld [vmem:[%s15817_s1 + $0x420] ss:$16 sps:$4 sm:$0xff]  }
 0x154   : > { %v2391_v63 = vpop.f32.mrf.mxu0  ;;  %4032 = vmatmul.mubr.bf16.gmra.mxu0 %v13326_v4  ;;  %v11057_v43 = vld [vmem:[%s15817_s1 + $0x424] ss:$16 sps:$4 sm:$0xff]  }
 0x155   : > { %v2442_v0 = vpop.f32.mrf.mxu1  ;;  %4083 = vmatmul.mubr.bf16.gmra.mxu1 %v13328_v45  ;;  %v2392_v1 = vadd.f32 %v2391_v63, %v13112_v33  ;;  %4096 = vmatpush1.bf16.msra.mxu0 %v11029_v59  ;;  %v11049_v59 = vld [vmem:[%s15817_s1 + $0x440] ss:$16 sps:$4 sm:$0xff]   ;;  %v11060_v44 = vld [vmem:[%s15817_s1 + $0x624] ss:$16 sps:$4 sm:$0xff]  }
 0x156   : > { %4147 = vmatpush1.bf16.msra.mxu1 %v11032_v38  ;;  %v2393_v2 = vpop.f32.mrf.mxu0  ;;  %4097 = vmatprep.subr.bf16.mxu0 %v11039_v50  ;;  %v11052_v38 = vld [vmem:[%s15817_s1 + $0x640] ss:$16 sps:$4 sm:$0xff]  }
 0x157   : > { %v2444_v12 = vpop.f32.mrf.mxu1  ;;  %4148 = vmatprep.subr.bf16.mxu1 %v11042_v51  ;;  %v2394_v15 = vadd.f32 %v2393_v2, %v13120_v39  ;;  %v13375_v22 = vadd.f32 %v2442_v0, %v2392_v1  ;;  %4123 = vmatprep.mubr.bf16.mxu0 %v13356_v56  ;;  %v11046_v39 = vld [vmem:[%s15817_s1 + $0x660] ss:$16 sps:$4 sm:$0xff]   ;;  %v11063_v51 = vld [vmem:[%s15817_s1 + $0x404] ss:$16 sps:$4 sm:$0xff]  }
 0x158   : > { %4174 = vmatprep.mubr.bf16.mxu1 %v13363_v60  ;;  %v2395_v33 = vpop.f32.mrf.mxu0  ;;  %v11058_v50 = vld [vmem:[%s15817_s1 + $0x620] ss:$16 sps:$4 sm:$0xff]   ;;  %v11069_v0 = vld [vmem:[%s15817_s1 + $0x5e4] ss:$16 sps:$4 sm:$0xff]  }
 0x159   : > { %v2446_v23 = vpop.f32.mrf.mxu1  ;;  %v13379_v28 = vadd.f32 %v2444_v12, %v2394_v15  ;;  %4098 = vmatpush1.bf16.msra.mxu0 %v11037_v17  ;;  %v11066_v17 = vld [vmem:[%s15817_s1 + $0x604] ss:$16 sps:$4 sm:$0xff]   ;;  %v11064_v63 = vld [vmem:[%s15817_s1 + $0x600] ss:$16 sps:$4 sm:$0xff]  }
 0x15a   : > { %4149 = vmatpush1.bf16.msra.mxu1 %v11040_v53  ;;  %4099 = vmatprep.subr.bf16.mxu0 %v11045_v18  ;;  %v2396_v35 = vpop.f32.mrf.mxu0  ;;  %v11061_v53 = vld [vmem:[%s15817_s1 + $0x400] ss:$16 sps:$4 sm:$0xff]   ;;  %v11072_v1 = vld [vmem:[%s15817_s1 + $0x7e4] ss:$16 sps:$4 sm:$0xff]  }
 0x15b   : > { %4150 = vmatprep.subr.bf16.mxu1 %v11048_v7  ;;  %v2447_v37 = vpop.f32.mrf.mxu1  ;;  %v11067_v2 = vld [vmem:[%s15817_s1 + $0x5e0] ss:$16 sps:$4 sm:$0xff]   ;;  %v11075_v18 = vld [vmem:[%s15817_s1 + $0x5c4] ss:$16 sps:$4 sm:$0xff]  }
 0x15c   : > { %v11070_v12 = vld [vmem:[%s15817_s1 + $0x7e0] ss:$16 sps:$4 sm:$0xff]   ;;  %v11078_v7 = vld [vmem:[%s15817_s1 + $0x7c4] ss:$16 sps:$4 sm:$0xff]  }
 0x15d   : > { %4100 = vmatpush1.bf16.msra.mxu0 %v11043_v29  ;;  %v11073_v15 = vld [vmem:[%s15817_s1 + $0x5c0] ss:$16 sps:$4 sm:$0xff]   ;;  %v11081_v23 = vld [vmem:[%s15817_s1 + $0x5a4] ss:$16 sps:$4 sm:$0xff]  }
 0x15e   : > { %4151 = vmatpush1.bf16.msra.mxu1 %v11046_v39  ;;  %4101 = vmatprep.subr.bf16.mxu0 %v11051_v31  ;;  %v11076_v33 = vld [vmem:[%s15817_s1 + $0x7c0] ss:$16 sps:$4 sm:$0xff]   ;;  %v11084_v29 = vld [vmem:[%s15817_s1 + $0x7a4] ss:$16 sps:$4 sm:$0xff]  }
 0x15f   : > { %4152 = vmatprep.subr.bf16.mxu1 %v11054_v32  ;;  %v11079_v39 = vld [vmem:[%s15817_s1 + $0x5a0] ss:$16 sps:$4 sm:$0xff]   ;;  %v11087_v32 = vld [vmem:[%s15817_s1 + $0x584] ss:$16 sps:$4 sm:$0xff]  }
 0x160   : > { %v11082_v31 = vld [vmem:[%s15817_s1 + $0x7a0] ss:$16 sps:$4 sm:$0xff]   ;;  %v11090_v35 = vld [vmem:[%s15817_s1 + $0x784] ss:$16 sps:$4 sm:$0xff]  }
 0x161   : > { %4102 = vmatpush1.bf16.msra.mxu0 %v11049_v59  ;;  %v11085_v37 = vld [vmem:[%s15817_s1 + $0x580] ss:$16 sps:$4 sm:$0xff]  }
 0x162   : > { %4153 = vmatpush1.bf16.msra.mxu1 %v11052_v38  ;;  %4103 = vmatprep.subr.bf16.mxu0 %v11057_v43  ;;  %v11088_v59 = vld [vmem:[%s15817_s1 + $0x780] ss:$16 sps:$4 sm:$0xff]   ;;  %v11093_v38 = vld [vmem:[%s15817_s1 + $0x564] ss:$16 sps:$4 sm:$0xff]  }
 0x163   : > { %4154 = vmatprep.subr.bf16.mxu1 %v11060_v44  ;;  %v11096_v43 = vld [vmem:[%s15817_s1 + $0x764] ss:$16 sps:$4 sm:$0xff]   ;;  %v11091_v44 = vld [vmem:[%s15817_s1 + $0x560] ss:$16 sps:$4 sm:$0xff]  }
 0x165   : > { %4104 = vmatpush1.bf16.msra.mxu0 %v11055_v47  ;;  %v11094_v47 = vld [vmem:[%s15817_s1 + $0x760] ss:$16 sps:$4 sm:$0xff]  }
 0x166   : > { %4155 = vmatpush1.bf16.msra.mxu1 %v11058_v50  ;;  %4105 = vmatprep.subr.bf16.mxu0 %v11063_v51  ;;  %v11099_v50 = vld [vmem:[%s15817_s1 + $0x544] ss:$16 sps:$4 sm:$0xff]  }
 0x167   : > { %4156 = vmatprep.subr.bf16.mxu1 %v11066_v17  ;;  %v11102_v51 = vld [vmem:[%s15817_s1 + $0x744] ss:$16 sps:$4 sm:$0xff]   ;;  %v11097_v17 = vld [vmem:[%s15817_s1 + $0x540] ss:$16 sps:$4 sm:$0xff]  }
 0x169   : > { %4106 = vmatpush1.bf16.msra.mxu0 %v11061_v53  ;;  %v11100_v53 = vld [vmem:[%s15817_s1 + $0x740] ss:$16 sps:$4 sm:$0xff]  }
 0x16a   : > { %4157 = vmatpush1.bf16.msra.mxu1 %v11064_v63  ;;  %4107 = vmatprep.subr.bf16.mxu0 %v11069_v0  ;;  %v11105_v63 = vld [vmem:[%s15817_s1 + $0x524] ss:$16 sps:$4 sm:$0xff]  }
 0x16b   : > { %4158 = vmatprep.subr.bf16.mxu1 %v11072_v1  ;;  %v11108_v0 = vld [vmem:[%s15817_s1 + $0x724] ss:$16 sps:$4 sm:$0xff]   ;;  %v11103_v1 = vld [vmem:[%s15817_s1 + $0x520] ss:$16 sps:$4 sm:$0xff]  }
 0x16d   : > { %4108 = vmatpush2.bf16.msra.mxu0 %v11067_v2  ;;  %v11106_v2 = vld [vmem:[%s15817_s1 + $0x720] ss:$16 sps:$4 sm:$0xff]  }
 0x16e   : > { %4159 = vmatpush2.bf16.msra.mxu1 %v11070_v12  ;;  %4109 = vmatprep.subr.bf16.mxu0 %v11075_v18  ;;  %v11111_v12 = vld [vmem:[%s15817_s1 + $0x504] ss:$16 sps:$4 sm:$0xff]  }
 0x16f   : > { %4160 = vmatprep.subr.bf16.mxu1 %v11078_v7  ;;  %v11114_v18 = vld [vmem:[%s15817_s1 + $0x704] ss:$16 sps:$4 sm:$0xff]   ;;  %v11109_v7 = vld [vmem:[%s15817_s1 + $0x500] ss:$16 sps:$4 sm:$0xff]  }
 0x171   : > { %4110 = vmatpush2.bf16.msra.mxu0 %v11073_v15  ;;  %v11112_v15 = vld [vmem:[%s15817_s1 + $0x700] ss:$16 sps:$4 sm:$0xff]  }
 0x172   : > { %4161 = vmatpush2.bf16.msra.mxu1 %v11076_v33  ;;  %4111 = vmatprep.subr.bf16.mxu0 %v11081_v23  ;;  %v11117_v33 = vld [vmem:[%s15817_s1 + $0xec] ss:$16 sps:$4 sm:$0xff]  }
 0x173   : > { %4162 = vmatprep.subr.bf16.mxu1 %v11084_v29  ;;  %v11120_v23 = vld [vmem:[%s15817_s1 + $0x2ec] ss:$16 sps:$4 sm:$0xff]   ;;  %v221_v29 = vld [vmem:[%s12268_s10 + $0x50] sm:$0x33] }
 0x175   : > { %4112 = vmatpush2.bf16.msra.mxu0 %v11079_v39  ;;  %v222_v39 = vld [vmem:[%s12268_s10 + $0x58] sm:$0x33] }
 0x176   : > { %4163 = vmatpush2.bf16.msra.mxu1 %v11082_v31  ;;  %4113 = vmatprep.subr.bf16.mxu0 %v11087_v32  ;;  %v11115_v31 = vld [vmem:[%s15817_s1 + $0xe8] ss:$16 sps:$4 sm:$0xff]  }
 0x177   : > { %4164 = vmatprep.subr.bf16.mxu1 %v11090_v35  ;;  %v11118_v32 = vld [vmem:[%s15817_s1 + $0x2e8] ss:$16 sps:$4 sm:$0xff]   ;;  %v13535_v35 = vcombine.low %v13321_v40, %v13352_v54  ;;  %v13553_v54 = vcombine.high %v221_v29, %v221_v29 }
 0x178   : > { %v11121_v40 = vld [vmem:[%s15817_s1 + $0xc8] ss:$16 sps:$4 sm:$0xff]  }
 0x179   : > { %4114 = vmatpush2.bf16.msra.mxu0 %v11085_v37  ;;  %v13539_v37 = vcombine.low %v13324_v41, %v13359_v58  ;;  %v11124_v41 = vld [vmem:[%s15817_s1 + $0x2c8] ss:$16 sps:$4 sm:$0xff]   ;;  %v13555_v58 = vcombine.high %v222_v39, %v222_v39 }
 0x17a   : > { %4165 = vmatpush2.bf16.msra.mxu1 %v11088_v59  ;;  %4115 = vmatprep.subr.bf16.mxu0 %v11093_v38  ;;  %v11123_v59 = vld [vmem:[%s15817_s1 + $0xcc] ss:$16 sps:$4 sm:$0xff]  }
 0x17b   : > { %4166 = vmatprep.subr.bf16.mxu1 %v11096_v43  ;;  %v11126_v38 = vld [vmem:[%s15817_s1 + $0x2cc] ss:$16 sps:$4 sm:$0xff]  }
 0x17d   : > { %4116 = vmatpush2.bf16.msra.mxu0 %v11091_v44 }
 0x17e   : > { %4167 = vmatpush2.bf16.msra.mxu1 %v11094_v47  ;;  %4117 = vmatprep.subr.bf16.mxu0 %v11099_v50 }
 0x17f   : > { %4168 = vmatprep.subr.bf16.mxu1 %v11102_v51 }
 0x181   : > { %4118 = vmatpush2.bf16.msra.mxu0 %v11097_v17  ;;  %v11131_v17 = vld [vmem:[%s15817_s1 + $0xac] ss:$16 sps:$4 sm:$0xff]  }
 0x182   : > { %4169 = vmatpush2.bf16.msra.mxu1 %v11100_v53  ;;  %4119 = vmatprep.subr.bf16.mxu0 %v11105_v63  ;;  %v11134_v53 = vld [vmem:[%s15817_s1 + $0x2ac] ss:$16 sps:$4 sm:$0xff]  }
 0x183   : > { %4170 = vmatprep.subr.bf16.mxu1 %v11108_v0  ;;  %v11129_v0 = vld [vmem:[%s15817_s1 + $0xa8] ss:$16 sps:$4 sm:$0xff]  }
 0x185   : > { %4120 = vmatpush2.bf16.msra.mxu0 %v11103_v1  ;;  %v11132_v1 = vld [vmem:[%s15817_s1 + $0x2a8] ss:$16 sps:$4 sm:$0xff]  }
 0x186   : > { %4171 = vmatpush2.bf16.msra.mxu1 %v11106_v2  ;;  %4121 = vmatprep.subr.bf16.mxu0 %v11111_v12 }
 0x187   : > { %4172 = vmatprep.subr.bf16.mxu1 %v11114_v18  ;;  %v13577_v18 = vcombine.low %v221_v29, %v221_v29 }
 0x189   : > { %4122 = vmatpush2.bf16.msra.mxu0 %v11109_v7  ;;  %v13579_v7 = vcombine.low %v222_v39, %v222_v39  ;;  %v11137_v39 = vld [vmem:[%s15817_s1 + $0x88] ss:$16 sps:$4 sm:$0xff]  }
 0x18a   : > { %4173 = vmatpush2.bf16.msra.mxu1 %v11112_v15  ;;  %4193 = vmatprep.subr.bf16.mxu0 %v11117_v33 }
 0x18b   : > { %4244 = vmatprep.subr.bf16.mxu1 %v11120_v23 }
 0x18c   : > { %v2483_v43 = vpop.f32.mrf.mxu0  ;;  %4124 = vmatmul.mubr.bf16.vlgmr.msra.gmra.mxu0 %v13535_v35 }
 0x18d   : > { %v2534_v44 = vpop.f32.mrf.mxu1  ;;  %4175 = vmatmul.mubr.bf16.vlgmr.msra.gmra.mxu1 %v13539_v37  ;;  %4194 = vmatpush1.bf16.msra.mxu0 %v11115_v31  ;;  %v11139_v31 = vld [vmem:[%s15817_s1 + $0x8c] ss:$16 sps:$4 sm:$0xff]  }
 0x18e   : > { %v13559_v47 = vadd.f32 %v2534_v44, %v2483_v43  ;;  %4245 = vmatpush1.bf16.msra.mxu1 %v11118_v32  ;;  %v2485_v50 = vpop.f32.mrf.mxu0  ;;  %4195 = vmatprep.subr.bf16.mxu0 %v11123_v59  ;;  %v11142_v32 = vld [vmem:[%s15817_s1 + $0x28c] ss:$16 sps:$4 sm:$0xff]   ;;  %v11140_v59 = vld [vmem:[%s15817_s1 + $0x288] ss:$16 sps:$4 sm:$0xff]  }
 0x18f   : > { %v2536_v51 = vpop.f32.mrf.mxu1  ;;  %4246 = vmatprep.subr.bf16.mxu1 %v11126_v38  ;;  %4133 = vmatprep.mubr.bf16.mxu0 %v13553_v54  ;;  %v11145_v43 = vld [vmem:[%s15817_s1 + $0x6c] ss:$16 sps:$4 sm:$0xff]  }
 0x190   : > { %v13567_v63 = vadd.f32 %v2536_v51, %v2485_v50  ;;  %4184 = vmatprep.mubr.bf16.mxu1 %v13555_v58  ;;  %v2487_v2 = vpop.f32.mrf.mxu0  ;;  %v11148_v44 = vld [vmem:[%s15817_s1 + $0x26c] ss:$16 sps:$4 sm:$0xff]  }
 0x191   : > { %v2538_v12 = vpop.f32.mrf.mxu1  ;;  %4196 = vmatpush1.bf16.msra.mxu0 %v11121_v40 }
 0x192   : > { %v13581_v15 = vadd.f32 %v2538_v12, %v2487_v2  ;;  %4247 = vmatpush1.bf16.msra.mxu1 %v11124_v41  ;;  %v2489_v33 = vpop.f32.mrf.mxu0  ;;  %4197 = vmatprep.subr.bf16.mxu0 %v11131_v17  ;;  %v11146_v2 = vld [vmem:[%s15817_s1 + $0x268] ss:$16 sps:$4 sm:$0xff]   ;;  %v11151_v12 = vld [vmem:[%s15817_s1 + $0x4c] ss:$16 sps:$4 sm:$0xff]  }
 0x193   : > { %v2540_v23 = vpop.f32.mrf.mxu1  ;;  %4248 = vmatprep.subr.bf16.mxu1 %v11134_v53 }
 0x194   : > { %v13589_v29 = vadd.f32 %v2540_v23, %v2489_v33  ;;  %4134 = vmatmul.mubr.bf16.gmra.mxu0 %v13577_v18  ;;  %v2493_v38 = vpop.f32.mrf.mxu0  ;;  %v11154_v33 = vld [vmem:[%s15817_s1 + $0x24c] ss:$16 sps:$4 sm:$0xff]  }
 0x195   : > { %4185 = vmatmul.mubr.bf16.gmra.mxu1 %v13579_v7  ;;  %v2544_v40 = vpop.f32.mrf.mxu1  ;;  %4198 = vmatpush1.bf16.msra.mxu0 %v11129_v0 }
 0x196   : > { %4249 = vmatpush1.bf16.msra.mxu1 %v11132_v1  ;;  %v13599_v41 = vadd.f32 %v2544_v40, %v2493_v38  ;;  %4199 = vmatprep.subr.bf16.mxu0 %v11139_v31  ;;  %v2495_v50 = vpop.f32.mrf.mxu0  ;;  %v11143_v1 = vld [vmem:[%s15817_s1 + $0x68] ss:$16 sps:$4 sm:$0xff]   ;;  %v11160_v38 = vld [vmem:[%s15817_s1 + $0x22c] ss:$16 sps:$4 sm:$0xff]  }
 0x197   : > { %4250 = vmatprep.subr.bf16.mxu1 %v11142_v32  ;;  %v2546_v51 = vpop.f32.mrf.mxu1  ;;  %4225 = vmatprep.mubr.bf16.mxu0 %v13095_v25  ;;  %v11149_v32 = vld [vmem:[%s15817_s1 + $0x48] ss:$16 sps:$4 sm:$0xff]  }
 0x198   : > { %v13607_v17 = vadd.f32 %v2546_v51, %v2495_v50  ;;  %4276 = vmatprep.mubr.bf16.mxu1 %v13102_v27  ;;  %v2497_v53 = vpop.f32.mrf.mxu0  ;;  %v11155_v40 = vld [vmem:[%s15817_s1 + $0x28] ss:$16 sps:$4 sm:$0xff]   ;;  %v11166_v50 = vld [vmem:[%s15817_s1 + $0x20c] ss:$16 sps:$4 sm:$0xff]  }
 0x199   : > { %v2548_v0 = vpop.f32.mrf.mxu1  ;;  %4200 = vmatpush1.bf16.msra.mxu0 %v11137_v39  ;;  %v11152_v39 = vld [vmem:[%s15817_s1 + $0x248] ss:$16 sps:$4 sm:$0xff]  }
 0x19a   : > { %4251 = vmatpush1.bf16.msra.mxu1 %v11140_v59  ;;  %4201 = vmatprep.subr.bf16.mxu0 %v11145_v43  ;;  %v2498_v23 = vpop.f32.mrf.mxu0  ;;  %v11157_v59 = vld [vmem:[%s15817_s1 + $0x2c] ss:$16 sps:$4 sm:$0xff]   ;;  %v11158_v43 = vld [vmem:[%s15817_s1 + $0x228] ss:$16 sps:$4 sm:$0xff]  }
 0x19b   : > { %4252 = vmatprep.subr.bf16.mxu1 %v11148_v44  ;;  %v2549_v31 = vpop.f32.mrf.mxu1  ;;  %v11163_v44 = vld [vmem:[%s15817_s1 + $0xc] ss:$16 sps:$4 sm:$0xff]   ;;  %v11161_v51 = vld [vmem:[%s15817_s1 + $0x8] ss:$16 sps:$4 sm:$0xff]  }
 0x19c   : > { %v11164_v53 = vld [vmem:[%s15817_s1 + $0x208] ss:$16 sps:$4 sm:$0xff]   ;;  %v11169_v0 = vld [vmem:[%s15817_s1 + $0x1ec] ss:$16 sps:$4 sm:$0xff]  }
 0x19d   : > { %4202 = vmatpush1.bf16.msra.mxu0 %v11143_v1  ;;  %v11172_v1 = vld [vmem:[%s15817_s1 + $0x3ec] ss:$16 sps:$4 sm:$0xff]   ;;  %v11173_v31 = vld [vmem:[%s15817_s1 + $0x1c8] ss:$16 sps:$4 sm:$0xff]  }
 0x19e   : > { %4253 = vmatpush1.bf16.msra.mxu1 %v11146_v2  ;;  %4203 = vmatprep.subr.bf16.mxu0 %v11151_v12  ;;  %v11167_v2 = vld [vmem:[%s15817_s1 + $0x1e8] ss:$16 sps:$4 sm:$0xff]   ;;  %v11178_v23 = vld [vmem:[%s15817_s1 + $0x3cc] ss:$16 sps:$4 sm:$0xff]  }
 0x19f   : > { %4254 = vmatprep.subr.bf16.mxu1 %v11154_v33  ;;  %v11170_v12 = vld [vmem:[%s15817_s1 + $0x3e8] ss:$16 sps:$4 sm:$0xff]   ;;  %v11175_v33 = vld [vmem:[%s15817_s1 + $0x1cc] ss:$16 sps:$4 sm:$0xff]  }
 0x1a1   : > { %4204 = vmatpush1.bf16.msra.mxu0 %v11149_v32  ;;  %v11176_v32 = vld [vmem:[%s15817_s1 + $0x3c8] ss:$16 sps:$4 sm:$0xff]  }
 0x1a2   : > { %4255 = vmatpush1.bf16.msra.mxu1 %v11152_v39  ;;  %4205 = vmatprep.subr.bf16.mxu0 %v11157_v59  ;;  %v11181_v39 = vld [vmem:[%s15817_s1 + $0x1ac] ss:$16 sps:$4 sm:$0xff]  }
 0x1a3   : > { %4256 = vmatprep.subr.bf16.mxu1 %v11160_v38  ;;  %v11184_v59 = vld [vmem:[%s15817_s1 + $0x3ac] ss:$16 sps:$4 sm:$0xff]   ;;  %v11179_v38 = vld [vmem:[%s15817_s1 + $0x1a8] ss:$16 sps:$4 sm:$0xff]  }
 0x1a5   : > { %4206 = vmatpush1.bf16.msra.mxu0 %v11155_v40  ;;  %v11182_v40 = vld [vmem:[%s15817_s1 + $0x3a8] ss:$16 sps:$4 sm:$0xff]  }
 0x1a6   : > { %4257 = vmatpush1.bf16.msra.mxu1 %v11158_v43  ;;  %4207 = vmatprep.subr.bf16.mxu0 %v11163_v44  ;;  %v11187_v43 = vld [vmem:[%s15817_s1 + $0x18c] ss:$16 sps:$4 sm:$0xff]  }
 0x1a7   : > { %4258 = vmatprep.subr.bf16.mxu1 %v11166_v50  ;;  %v11190_v44 = vld [vmem:[%s15817_s1 + $0x38c] ss:$16 sps:$4 sm:$0xff]   ;;  %v11185_v50 = vld [vmem:[%s15817_s1 + $0x188] ss:$16 sps:$4 sm:$0xff]  }
 0x1a9   : > { %4208 = vmatpush1.bf16.msra.mxu0 %v11161_v51  ;;  %v11188_v51 = vld [vmem:[%s15817_s1 + $0x388] ss:$16 sps:$4 sm:$0xff]  }
 0x1aa   : > { %4259 = vmatpush1.bf16.msra.mxu1 %v11164_v53  ;;  %4209 = vmatprep.subr.bf16.mxu0 %v11169_v0  ;;  %v11193_v53 = vld [vmem:[%s15817_s1 + $0x16c] ss:$16 sps:$4 sm:$0xff]  }
 0x1ab   : > { %4260 = vmatprep.subr.bf16.mxu1 %v11172_v1  ;;  %v11196_v0 = vld [vmem:[%s15817_s1 + $0x36c] ss:$16 sps:$4 sm:$0xff]   ;;  %v11191_v1 = vld [vmem:[%s15817_s1 + $0x168] ss:$16 sps:$4 sm:$0xff]  }
 0x1ad   : > { %4210 = vmatpush2.bf16.msra.mxu0 %v11167_v2  ;;  %v11194_v2 = vld [vmem:[%s15817_s1 + $0x368] ss:$16 sps:$4 sm:$0xff]  }
 0x1ae   : > { %4261 = vmatpush2.bf16.msra.mxu1 %v11170_v12  ;;  %4211 = vmatprep.subr.bf16.mxu0 %v11175_v33  ;;  %v11199_v12 = vld [vmem:[%s15817_s1 + $0x14c] ss:$16 sps:$4 sm:$0xff]  }
 0x1af   : > { %4262 = vmatprep.subr.bf16.mxu1 %v11178_v23  ;;  %v11202_v33 = vld [vmem:[%s15817_s1 + $0x34c] ss:$16 sps:$4 sm:$0xff]   ;;  %v11197_v23 = vld [vmem:[%s15817_s1 + $0x148] ss:$16 sps:$4 sm:$0xff]  }
 0x1b1   : > { %4212 = vmatpush2.bf16.msra.mxu0 %v11173_v31  ;;  %v11200_v31 = vld [vmem:[%s15817_s1 + $0x348] ss:$16 sps:$4 sm:$0xff]  }
 0x1b2   : > { %4263 = vmatpush2.bf16.msra.mxu1 %v11176_v32  ;;  %4213 = vmatprep.subr.bf16.mxu0 %v11181_v39  ;;  %v11205_v32 = vld [vmem:[%s15817_s1 + $0x12c] ss:$16 sps:$4 sm:$0xff]  }
 0x1b3   : > { %4264 = vmatprep.subr.bf16.mxu1 %v11184_v59  ;;  %v11208_v39 = vld [vmem:[%s15817_s1 + $0x32c] ss:$16 sps:$4 sm:$0xff]   ;;  %v11203_v59 = vld [vmem:[%s15817_s1 + $0x128] ss:$16 sps:$4 sm:$0xff]  }
 0x1b5   : > { %4214 = vmatpush2.bf16.msra.mxu0 %v11179_v38  ;;  %v11206_v38 = vld [vmem:[%s15817_s1 + $0x328] ss:$16 sps:$4 sm:$0xff]  }
 0x1b6   : > { %4265 = vmatpush2.bf16.msra.mxu1 %v11182_v40  ;;  %4215 = vmatprep.subr.bf16.mxu0 %v11187_v43  ;;  %v11211_v40 = vld [vmem:[%s15817_s1 + $0x10c] ss:$16 sps:$4 sm:$0xff]  }
 0x1b7   : > { %4266 = vmatprep.subr.bf16.mxu1 %v11190_v44  ;;  %v11214_v43 = vld [vmem:[%s15817_s1 + $0x30c] ss:$16 sps:$4 sm:$0xff]   ;;  %v11209_v44 = vld [vmem:[%s15817_s1 + $0x108] ss:$16 sps:$4 sm:$0xff]  }
 0x1b9   : > { %4216 = vmatpush2.bf16.msra.mxu0 %v11185_v50  ;;  %v11212_v50 = vld [vmem:[%s15817_s1 + $0x308] ss:$16 sps:$4 sm:$0xff]  }
 0x1ba   : > { %4267 = vmatpush2.bf16.msra.mxu1 %v11188_v51  ;;  %4217 = vmatprep.subr.bf16.mxu0 %v11193_v53  ;;  %v11217_v51 = vld [vmem:[%s15817_s1 + $0x4ec] ss:$16 sps:$4 sm:$0xff]  }
 0x1bb   : > { %4268 = vmatprep.subr.bf16.mxu1 %v11196_v0  ;;  %v11220_v53 = vld [vmem:[%s15817_s1 + $0x6ec] ss:$16 sps:$4 sm:$0xff]   ;;  %v11215_v0 = vld [vmem:[%s15817_s1 + $0x4e8] ss:$16 sps:$4 sm:$0xff]  }
 0x1bd   : > { %4218 = vmatpush2.bf16.msra.mxu0 %v11191_v1  ;;  %v11218_v1 = vld [vmem:[%s15817_s1 + $0x6e8] ss:$16 sps:$4 sm:$0xff]  }
 0x1be   : > { %4269 = vmatpush2.bf16.msra.mxu1 %v11194_v2  ;;  %4219 = vmatprep.subr.bf16.mxu0 %v11199_v12  ;;  %v11223_v2 = vld [vmem:[%s15817_s1 + $0x4cc] ss:$16 sps:$4 sm:$0xff]  }
 0x1bf   : > { %4270 = vmatprep.subr.bf16.mxu1 %v11202_v33  ;;  %v11226_v12 = vld [vmem:[%s15817_s1 + $0x6cc] ss:$16 sps:$4 sm:$0xff]   ;;  %v11221_v33 = vld [vmem:[%s15817_s1 + $0x4c8] ss:$16 sps:$4 sm:$0xff]  }
 0x1c1   : > { %4220 = vmatpush2.bf16.msra.mxu0 %v11197_v23  ;;  %v11224_v23 = vld [vmem:[%s15817_s1 + $0x6c8] ss:$16 sps:$4 sm:$0xff]  }
 0x1c2   : > { %4271 = vmatpush2.bf16.msra.mxu1 %v11200_v31  ;;  %4221 = vmatprep.subr.bf16.mxu0 %v11205_v32 }
 0x1c3   : > { %4272 = vmatprep.subr.bf16.mxu1 %v11208_v39 }
 0x1c5   : > { %4222 = vmatpush2.bf16.msra.mxu0 %v11203_v59 }
 0x1c6   : > { %4273 = vmatpush2.bf16.msra.mxu1 %v11206_v38  ;;  %4223 = vmatprep.subr.bf16.mxu0 %v11211_v40  ;;  %v11229_v40 = vld [vmem:[%s15817_s1 + $0x4ac] ss:$16 sps:$4 sm:$0xff]  }
 0x1c7   : > { %4274 = vmatprep.subr.bf16.mxu1 %v11214_v43  ;;  %v11232_v43 = vld [vmem:[%s15817_s1 + $0x6ac] ss:$16 sps:$4 sm:$0xff]  }
 0x1c9   : > { %4224 = vmatpush2.bf16.msra.mxu0 %v11209_v44 }
 0x1ca   : > { %4275 = vmatpush2.bf16.msra.mxu1 %v11212_v50  ;;  %4295 = vmatprep.subr.bf16.mxu0 %v11217_v51  ;;  %v11230_v51 = vld [vmem:[%s15817_s1 + $0x6a8] ss:$16 sps:$4 sm:$0xff]  }
 0x1cb   : > { %4346 = vmatprep.subr.bf16.mxu1 %v11220_v53 }
 0x1cc   : > { %v2585_v31 = vpop.f32.mrf.mxu0  ;;  %4226 = vmatmul.mubr.bf16.vlgmr.msra.gmra.mxu0 %v13278_v6 }
 0x1cd   : > { %v2636_v32 = vpop.f32.mrf.mxu1  ;;  %4277 = vmatmul.mubr.bf16.vlgmr.msra.gmra.mxu1 %v13282_v8  ;;  %v2586_v39 = vadd.f32 %v2585_v31, %v13559_v47  ;;  %4296 = vmatpush1.bf16.msra.mxu0 %v11215_v0  ;;  %v11227_v47 = vld [vmem:[%s15817_s1 + $0x4a8] ss:$16 sps:$4 sm:$0xff]   ;;  %v11235_v31 = vld [vmem:[%s15817_s1 + $0x48c] ss:$16 sps:$4 sm:$0xff]  }
 0x1ce   : > { %4347 = vmatpush1.bf16.msra.mxu1 %v11218_v1  ;;  %v2587_v59 = vpop.f32.mrf.mxu0  ;;  %4297 = vmatprep.subr.bf16.mxu0 %v11223_v2 }
 0x1cf   : > { %v2638_v38 = vpop.f32.mrf.mxu1  ;;  %4348 = vmatprep.subr.bf16.mxu1 %v11226_v12  ;;  %v13782_v44 = vadd.f32 %v2636_v32, %v2586_v39  ;;  %v2588_v50 = vadd.f32 %v2587_v59, %v13567_v63  ;;  %4235 = vmatprep.mubr.bf16.mxu0 %v13296_v24  ;;  %v11238_v32 = vld [vmem:[%s15817_s1 + $0x68c] ss:$16 sps:$4 sm:$0xff]  }
 0x1d0   : > { %4286 = vmatprep.mubr.bf16.mxu1 %v13298_v26  ;;  %v2589_v53 = vpop.f32.mrf.mxu0 }
 0x1d1   : > { %v2640_v0 = vpop.f32.mrf.mxu1  ;;  %v13793_v1 = vadd.f32 %v2638_v38, %v2588_v50  ;;  %v2590_v2 = vadd.f32 %v2589_v53, %v13581_v15  ;;  %4298 = vmatpush1.bf16.msra.mxu0 %v11221_v33  ;;  %v11233_v15 = vld [vmem:[%s15817_s1 + $0x488] ss:$16 sps:$4 sm:$0xff]   ;;  %v11241_v53 = vld [vmem:[%s15817_s1 + $0x46c] ss:$16 sps:$4 sm:$0xff]  }
 0x1d2   : > { %4349 = vmatpush1.bf16.msra.mxu1 %v11224_v23  ;;  %v2591_v63 = vpop.f32.mrf.mxu0  ;;  %4299 = vmatprep.subr.bf16.mxu0 %v11229_v40  ;;  %v11236_v33 = vld [vmem:[%s15817_s1 + $0x688] ss:$16 sps:$4 sm:$0xff]  }
 0x1d3   : > { %v2642_v12 = vpop.f32.mrf.mxu1  ;;  %4350 = vmatprep.subr.bf16.mxu1 %v11232_v43  ;;  %v13802_v39 = vadd.f32 %v2640_v0, %v2590_v2  ;;  %v2592_v59 = vadd.f32 %v2591_v63, %v13589_v29  ;;  %v11244_v0 = vld [vmem:[%s15817_s1 + $0x66c] ss:$16 sps:$4 sm:$0xff]  }
 0x1d4   : > { %v2595_v23 = vpop.f32.mrf.mxu0  ;;  %4236 = vmatmul.mubr.bf16.gmra.mxu0 %v13326_v4 }
 0x1d5   : > { %v2646_v38 = vpop.f32.mrf.mxu1  ;;  %4287 = vmatmul.mubr.bf16.gmra.mxu1 %v13328_v45  ;;  %v13813_v40 = vadd.f32 %v2642_v12, %v2592_v59  ;;  %v2596_v43 = vadd.f32 %v2595_v23, %v13599_v41  ;;  %4300 = vmatpush1.bf16.msra.mxu0 %v11227_v47  ;;  %v11239_v12 = vld [vmem:[%s15817_s1 + $0x468] ss:$16 sps:$4 sm:$0xff]  }
 0x1d6   : > { %4351 = vmatpush1.bf16.msra.mxu1 %v11230_v51  ;;  %v2597_v29 = vpop.f32.mrf.mxu0  ;;  %4301 = vmatprep.subr.bf16.mxu0 %v11235_v31  ;;  %v11247_v31 = vld [vmem:[%s15817_s1 + $0x44c] ss:$16 sps:$4 sm:$0xff]   ;;  %v11248_v23 = vld [vmem:[%s15817_s1 + $0x648] ss:$16 sps:$4 sm:$0xff]  }
 0x1d7   : > { %v2648_v50 = vpop.f32.mrf.mxu1  ;;  %4352 = vmatprep.subr.bf16.mxu1 %v11238_v32  ;;  %v2598_v2 = vadd.f32 %v2597_v29, %v13607_v17  ;;  %v13823_v63 = vadd.f32 %v2646_v38, %v2596_v43  ;;  %4327 = vmatprep.mubr.bf16.mxu0 %v13356_v56  ;;  %v11242_v17 = vld [vmem:[%s15817_s1 + $0x668] ss:$16 sps:$4 sm:$0xff]   ;;  %v11250_v32 = vld [vmem:[%s15817_s1 + $0x64c] ss:$16 sps:$4 sm:$0xff]  }
 0x1d8   : > { %4378 = vmatprep.mubr.bf16.mxu1 %v13363_v60  ;;  %v2599_v41 = vpop.f32.mrf.mxu0  ;;  %v11253_v38 = vld [vmem:[%s15817_s1 + $0x42c] ss:$16 sps:$4 sm:$0xff]   ;;  %v11251_v29 = vld [vmem:[%s15817_s1 + $0x428] ss:$16 sps:$4 sm:$0xff]  }
 0x1d9   : > { %v2650_v47 = vpop.f32.mrf.mxu1  ;;  %v13827_v51 = vadd.f32 %v2648_v50, %v2598_v2  ;;  %4302 = vmatpush1.bf16.msra.mxu0 %v11233_v15  ;;  %v11256_v43 = vld [vmem:[%s15817_s1 + $0x62c] ss:$16 sps:$4 sm:$0xff]   ;;  %v11254_v50 = vld [vmem:[%s15817_s1 + $0x628] ss:$16 sps:$4 sm:$0xff]  }
 0x1da   : > { %4353 = vmatpush1.bf16.msra.mxu1 %v11236_v33  ;;  %4303 = vmatprep.subr.bf16.mxu0 %v11241_v53  ;;  %v2600_v59 = vpop.f32.mrf.mxu0  ;;  %v11245_v33 = vld [vmem:[%s15817_s1 + $0x448] ss:$16 sps:$4 sm:$0xff]   ;;  %v11259_v53 = vld [vmem:[%s15817_s1 + $0x40c] ss:$16 sps:$4 sm:$0xff]  }
 0x1db   : > { %4354 = vmatprep.subr.bf16.mxu1 %v11244_v0  ;;  %v2651_v15 = vpop.f32.mrf.mxu1  ;;  %v11262_v0 = vld [vmem:[%s15817_s1 + $0x60c] ss:$16 sps:$4 sm:$0xff]   ;;  %v11257_v2 = vld [vmem:[%s15817_s1 + $0x408] ss:$16 sps:$4 sm:$0xff]  }
 0x1dc   : > { %v11260_v41 = vld [vmem:[%s15817_s1 + $0x608] ss:$16 sps:$4 sm:$0xff]   ;;  %v11265_v47 = vld [vmem:[%s15817_s1 + $0x5ec] ss:$16 sps:$4 sm:$0xff]  }
 0x1dd   : > { %4304 = vmatpush1.bf16.msra.mxu0 %v11239_v12  ;;  %v11268_v12 = vld [vmem:[%s15817_s1 + $0x7ec] ss:$16 sps:$4 sm:$0xff]   ;;  %v11269_v15 = vld [vmem:[%s15817_s1 + $0x5c8] ss:$16 sps:$4 sm:$0xff]  }
 0x1de   : > { %4355 = vmatpush1.bf16.msra.mxu1 %v11242_v17  ;;  %4305 = vmatprep.subr.bf16.mxu0 %v11247_v31  ;;  %v11263_v17 = vld [vmem:[%s15817_s1 + $0x5e8] ss:$16 sps:$4 sm:$0xff]   ;;  %v11274_v59 = vld [vmem:[%s15817_s1 + $0x7cc] ss:$16 sps:$4 sm:$0xff]  }
 0x1df   : > { %4356 = vmatprep.subr.bf16.mxu1 %v11250_v32  ;;  %v11266_v31 = vld [vmem:[%s15817_s1 + $0x7e8] ss:$16 sps:$4 sm:$0xff]   ;;  %v11271_v32 = vld [vmem:[%s15817_s1 + $0x5cc] ss:$16 sps:$4 sm:$0xff]  }
 0x1e1   : > { %4306 = vmatpush1.bf16.msra.mxu0 %v11245_v33  ;;  %v11272_v33 = vld [vmem:[%s15817_s1 + $0x7c8] ss:$16 sps:$4 sm:$0xff]  }
 0x1e2   : > { %4357 = vmatpush1.bf16.msra.mxu1 %v11248_v23  ;;  %4307 = vmatprep.subr.bf16.mxu0 %v11253_v38  ;;  %v11277_v23 = vld [vmem:[%s15817_s1 + $0x5ac] ss:$16 sps:$4 sm:$0xff]  }
 0x1e3   : > { %4358 = vmatprep.subr.bf16.mxu1 %v11256_v43  ;;  %v11280_v38 = vld [vmem:[%s15817_s1 + $0x7ac] ss:$16 sps:$4 sm:$0xff]   ;;  %v11275_v43 = vld [vmem:[%s15817_s1 + $0x5a8] ss:$16 sps:$4 sm:$0xff]  }
 0x1e5   : > { %4308 = vmatpush1.bf16.msra.mxu0 %v11251_v29  ;;  %v11278_v29 = vld [vmem:[%s15817_s1 + $0x7a8] ss:$16 sps:$4 sm:$0xff]  }
 0x1e6   : > { %4359 = vmatpush1.bf16.msra.mxu1 %v11254_v50  ;;  %4309 = vmatprep.subr.bf16.mxu0 %v11259_v53  ;;  %v11283_v50 = vld [vmem:[%s15817_s1 + $0x58c] ss:$16 sps:$4 sm:$0xff]  }
 0x1e7   : > { %4360 = vmatprep.subr.bf16.mxu1 %v11262_v0  ;;  %v11286_v53 = vld [vmem:[%s15817_s1 + $0x78c] ss:$16 sps:$4 sm:$0xff]   ;;  %v11281_v0 = vld [vmem:[%s15817_s1 + $0x588] ss:$16 sps:$4 sm:$0xff]  }
 0x1e9   : > { %4310 = vmatpush1.bf16.msra.mxu0 %v11257_v2  ;;  %v11284_v2 = vld [vmem:[%s15817_s1 + $0x788] ss:$16 sps:$4 sm:$0xff]  }
 0x1ea   : > { %4361 = vmatpush1.bf16.msra.mxu1 %v11260_v41  ;;  %4311 = vmatprep.subr.bf16.mxu0 %v11265_v47  ;;  %v11289_v41 = vld [vmem:[%s15817_s1 + $0x56c] ss:$16 sps:$4 sm:$0xff]  }
 0x1eb   : > { %4362 = vmatprep.subr.bf16.mxu1 %v11268_v12  ;;  %v11292_v47 = vld [vmem:[%s15817_s1 + $0x76c] ss:$16 sps:$4 sm:$0xff]   ;;  %v11287_v12 = vld [vmem:[%s15817_s1 + $0x568] ss:$16 sps:$4 sm:$0xff]  }
 0x1ed   : > { %4312 = vmatpush2.bf16.msra.mxu0 %v11263_v17  ;;  %v11290_v17 = vld [vmem:[%s15817_s1 + $0x768] ss:$16 sps:$4 sm:$0xff]  }
 0x1ee   : > { %4363 = vmatpush2.bf16.msra.mxu1 %v11266_v31  ;;  %4313 = vmatprep.subr.bf16.mxu0 %v11271_v32  ;;  %v11295_v31 = vld [vmem:[%s15817_s1 + $0x54c] ss:$16 sps:$4 sm:$0xff]  }
 0x1ef   : > { %4364 = vmatprep.subr.bf16.mxu1 %v11274_v59  ;;  %v11298_v32 = vld [vmem:[%s15817_s1 + $0x74c] ss:$16 sps:$4 sm:$0xff]   ;;  %v11293_v59 = vld [vmem:[%s15817_s1 + $0x548] ss:$16 sps:$4 sm:$0xff]  }
 0x1f1   : > { %4314 = vmatpush2.bf16.msra.mxu0 %v11269_v15  ;;  %v11296_v15 = vld [vmem:[%s15817_s1 + $0x748] ss:$16 sps:$4 sm:$0xff]  }
 0x1f2   : > { %4365 = vmatpush2.bf16.msra.mxu1 %v11272_v33  ;;  %4315 = vmatprep.subr.bf16.mxu0 %v11277_v23  ;;  %v11301_v33 = vld [vmem:[%s15817_s1 + $0x52c] ss:$16 sps:$4 sm:$0xff]  }
 0x1f3   : > { %4366 = vmatprep.subr.bf16.mxu1 %v11280_v38  ;;  %v11304_v23 = vld [vmem:[%s15817_s1 + $0x72c] ss:$16 sps:$4 sm:$0xff]   ;;  %v11299_v38 = vld [vmem:[%s15817_s1 + $0x528] ss:$16 sps:$4 sm:$0xff]  }
 0x1f5   : > { %4316 = vmatpush2.bf16.msra.mxu0 %v11275_v43  ;;  %v11302_v43 = vld [vmem:[%s15817_s1 + $0x728] ss:$16 sps:$4 sm:$0xff]  }
 0x1f6   : > { %4367 = vmatpush2.bf16.msra.mxu1 %v11278_v29  ;;  %4317 = vmatprep.subr.bf16.mxu0 %v11283_v50  ;;  %v11307_v29 = vld [vmem:[%s15817_s1 + $0x50c] ss:$16 sps:$4 sm:$0xff]  }
 0x1f7   : > { %4368 = vmatprep.subr.bf16.mxu1 %v11286_v53  ;;  %v11310_v50 = vld [vmem:[%s15817_s1 + $0x70c] ss:$16 sps:$4 sm:$0xff]   ;;  %v11305_v53 = vld [vmem:[%s15817_s1 + $0x508] ss:$16 sps:$4 sm:$0xff]  }
 0x1f9   : > { %4318 = vmatpush2.bf16.msra.mxu0 %v11281_v0  ;;  %v11308_v0 = vld [vmem:[%s15817_s1 + $0x708] ss:$16 sps:$4 sm:$0xff]  }
 0x1fa   : > { %4369 = vmatpush2.bf16.msra.mxu1 %v11284_v2  ;;  %4319 = vmatprep.subr.bf16.mxu0 %v11289_v41  ;;  %v11313_v2 = vld [vmem:[%s15817_s1 + $0x18e4] ss:$16 sps:$4 sm:$0xff]  }
 0x1fb   : > { %4370 = vmatprep.subr.bf16.mxu1 %v11292_v47  ;;  %v11316_v41 = vld [vmem:[%s15817_s1 + $0x1ae4] ss:$16 sps:$4 sm:$0xff]   ;;  %v11311_v47 = vld [vmem:[%s15817_s1 + $0x18e0] ss:$16 sps:$4 sm:$0xff]  }
 0x1fd   : > { %4320 = vmatpush2.bf16.msra.mxu0 %v11287_v12  ;;  %v11314_v12 = vld [vmem:[%s15817_s1 + $0x1ae0] ss:$16 sps:$4 sm:$0xff]  }
 0x1fe   : > { %4371 = vmatpush2.bf16.msra.mxu1 %v11290_v17  ;;  %4321 = vmatprep.subr.bf16.mxu0 %v11295_v31  ;;  %v11319_v17 = vld [vmem:[%s15817_s1 + $0x18c4] ss:$16 sps:$4 sm:$0xff]  }
 0x1ff   : > { %4372 = vmatprep.subr.bf16.mxu1 %v11298_v32  ;;  %v11322_v31 = vld [vmem:[%s15817_s1 + $0x1ac4] ss:$16 sps:$4 sm:$0xff]   ;;  %v2337_v32 = vadd.f32 %v13082_v21, %v13080_v19 }
 0x201   : > { %4322 = vmatpush2.bf16.msra.mxu0 %v11293_v59  ;;  %v11317_v59 = vld [vmem:[%s15817_s1 + $0x18c0] ss:$16 sps:$4 sm:$0xff]  }
 0x202   : > { %4373 = vmatpush2.bf16.msra.mxu1 %v11296_v15  ;;  %4323 = vmatprep.subr.bf16.mxu0 %v11301_v33  ;;  %v11320_v15 = vld [vmem:[%s15817_s1 + $0x1ac0] ss:$16 sps:$4 sm:$0xff]  }
 0x203   : > { %4374 = vmatprep.subr.bf16.mxu1 %v11304_v23 }
 0x205   : > { %4324 = vmatpush2.bf16.msra.mxu0 %v11299_v38  ;;  %v2388_v38 = vadd.f32 %v13333_v48, %v2337_v32  ;;  %v11331_v32 = vld [vmem:[%s15817_s1 + $0x1884] ss:$16 sps:$4 sm:$0xff]  }
 0x206   : > { %4375 = vmatpush2.bf16.msra.mxu1 %v11302_v43  ;;  %4325 = vmatprep.subr.bf16.mxu0 %v11307_v29  ;;  %v11325_v29 = vld [vmem:[%s15817_s1 + $0x18a4] ss:$16 sps:$4 sm:$0xff]  }
 0x207   : > { %4376 = vmatprep.subr.bf16.mxu1 %v11310_v50  ;;  %v11328_v50 = vld [vmem:[%s15817_s1 + $0x1aa4] ss:$16 sps:$4 sm:$0xff]  }
 0x209   : > { %4326 = vmatpush2.bf16.msra.mxu0 %v11305_v53 }
 0x20a   : > { %4377 = vmatpush2.bf16.msra.mxu1 %v11308_v0  ;;  %6191 = vmatprep.subr.bf16.mxu0 %v11313_v2  ;;  %v11326_v0 = vld [vmem:[%s15817_s1 + $0x1aa0] ss:$16 sps:$4 sm:$0xff]  }
 0x20b   : > { %6242 = vmatprep.subr.bf16.mxu1 %v11316_v41 }
 0x20c   : > { %v4023_v33 = vpop.f32.mrf.mxu0  ;;  %4328 = vmatmul.mubr.bf16.vlgmr.msra.gmra.mxu0 %v13535_v35 }
 0x20d   : > { %v4074_v23 = vpop.f32.mrf.mxu1  ;;  %4379 = vmatmul.mubr.bf16.vlgmr.msra.gmra.mxu1 %v13539_v37  ;;  %v4024_v43 = vadd.f32 %v4023_v33, %v13309_v36  ;;  %6192 = vmatpush1.bf16.msra.mxu0 %v11311_v47  ;;  %v11323_v36 = vld [vmem:[%s15817_s1 + $0x18a0] ss:$16 sps:$4 sm:$0xff]   ;;  %v2439_v47 = vadd.f32 %v13335_v49, %v2388_v38  ;;  %v11334_v33 = vld [vmem:[%s15817_s1 + $0x1a84] ss:$16 sps:$4 sm:$0xff]  }
 0x20e   : > { %6243 = vmatpush1.bf16.msra.mxu1 %v11314_v12  ;;  %v4025_v19 = vpop.f32.mrf.mxu0  ;;  %6193 = vmatprep.subr.bf16.mxu0 %v11319_v17 }
 0x20f   : > { %v4076_v21 = vpop.f32.mrf.mxu1  ;;  %6244 = vmatprep.subr.bf16.mxu1 %v11322_v31  ;;  %v14003_v53 = vadd.f32 %v4074_v23, %v4024_v43  ;;  %v4026_v48 = vadd.f32 %v4025_v19, %v13330_v46  ;;  %4337 = vmatprep.mubr.bf16.mxu0 %v13553_v54 }
 0x210   : > { %4388 = vmatprep.mubr.bf16.mxu1 %v13555_v58  ;;  %v4027_v2 = vpop.f32.mrf.mxu0 }
 0x211   : > { %v4078_v41 = vpop.f32.mrf.mxu1  ;;  %v14015_v12 = vadd.f32 %v4076_v21, %v4026_v48  ;;  %v4028_v46 = vadd.f32 %v4027_v2, %v13343_v52  ;;  %6194 = vmatpush1.bf16.msra.mxu0 %v11317_v59  ;;  %v11329_v52 = vld [vmem:[%s15817_s1 + $0x1880] ss:$16 sps:$4 sm:$0xff]   ;;  %v11340_v48 = vld [vmem:[%s15817_s1 + $0x1a64] ss:$16 sps:$4 sm:$0xff]  }
 0x212   : > { %6245 = vmatpush1.bf16.msra.mxu1 %v11320_v15  ;;  %v4029_v17 = vpop.f32.mrf.mxu0  ;;  %6195 = vmatprep.subr.bf16.mxu0 %v11325_v29  ;;  %v11332_v59 = vld [vmem:[%s15817_s1 + $0x1a80] ss:$16 sps:$4 sm:$0xff]  }
 0x213   : > { %v4080_v31 = vpop.f32.mrf.mxu1  ;;  %6246 = vmatprep.subr.bf16.mxu1 %v11328_v50  ;;  %v14024_v23 = vadd.f32 %v4078_v41, %v4028_v46  ;;  %v4030_v49 = vadd.f32 %v4029_v17, %v2439_v47  ;;  %v11337_v50 = vld [vmem:[%s15817_s1 + $0x1864] ss:$16 sps:$4 sm:$0xff]   ;;  %v11335_v47 = vld [vmem:[%s15817_s1 + $0x1860] ss:$16 sps:$4 sm:$0xff]  }
 0x214   : > { %v4033_v15 = vpop.f32.mrf.mxu0  ;;  %4338 = vmatmul.mubr.bf16.gmra.mxu0 %v13577_v18  ;;  %v11343_v46 = vld [vmem:[%s15817_s1 + $0x1844] ss:$16 sps:$4 sm:$0xff]  }
 0x215   : > { %v4084_v38 = vpop.f32.mrf.mxu1  ;;  %4389 = vmatmul.mubr.bf16.gmra.mxu1 %v13579_v7  ;;  %v14034_v43 = vadd.f32 %v4080_v31, %v4030_v49  ;;  %v4034_v19 = vadd.f32 %v4033_v15, %v13375_v22  ;;  %6196 = vmatpush1.bf16.msra.mxu0 %v11323_v36  ;;  %v11346_v17 = vld [vmem:[%s15817_s1 + $0x1a44] ss:$16 sps:$4 sm:$0xff]   ;;  %v11344_v49 = vld [vmem:[%s15817_s1 + $0x1a40] ss:$16 sps:$4 sm:$0xff]  }
 0x216   : > { %6247 = vmatpush1.bf16.msra.mxu1 %v11326_v0  ;;  %v4035_v21 = vpop.f32.mrf.mxu0  ;;  %6197 = vmatprep.subr.bf16.mxu0 %v11331_v32  ;;  %v11347_v15 = vld [vmem:[%s15817_s1 + $0x1820] ss:$16 sps:$4 sm:$0xff]  }
 0x217   : > { %v4086_v29 = vpop.f32.mrf.mxu1  ;;  %6248 = vmatprep.subr.bf16.mxu1 %v11334_v33  ;;  %v4036_v2 = vadd.f32 %v4035_v21, %v13379_v28  ;;  %v14044_v41 = vadd.f32 %v4084_v38, %v4034_v19  ;;  %6223 = vmatprep.mubr.bf16.mxu0 %v12321_v30  ;;  %v11338_v28 = vld [vmem:[%s15817_s1 + $0x1a60] ss:$16 sps:$4 sm:$0xff]   ;;  %v11355_v19 = vld [vmem:[%s15817_s1 + $0x1804] ss:$16 sps:$4 sm:$0xff]  }
 0x218   : > { %6274 = vmatprep.mubr.bf16.mxu1 %v12337_v42  ;;  %v4037_v22 = vpop.f32.mrf.mxu0  ;;  %v11341_v33 = vld [vmem:[%s15817_s1 + $0x1840] ss:$16 sps:$4 sm:$0xff]   ;;  %v11358_v21 = vld [vmem:[%s15817_s1 + $0x1a04] ss:$16 sps:$4 sm:$0xff]  }
 0x219   : > { %v4088_v36 = vpop.f32.mrf.mxu1  ;;  %v14048_v0 = vadd.f32 %v4086_v29, %v4036_v2  ;;  %6198 = vmatpush1.bf16.msra.mxu0 %v11329_v52  ;;  %v11349_v52 = vld [vmem:[%s15817_s1 + $0x1824] ss:$16 sps:$4 sm:$0xff]   ;;  %v11350_v38 = vld [vmem:[%s15817_s1 + $0x1a20] ss:$16 sps:$4 sm:$0xff]  }
 0x21a   : > { %6249 = vmatpush1.bf16.msra.mxu1 %v11332_v59  ;;  %6199 = vmatprep.subr.bf16.mxu0 %v11337_v50  ;;  %v4038_v31 = vpop.f32.mrf.mxu0  ;;  %v11352_v59 = vld [vmem:[%s15817_s1 + $0x1a24] ss:$16 sps:$4 sm:$0xff]   ;;  %v11353_v29 = vld [vmem:[%s15817_s1 + $0x1800] ss:$16 sps:$4 sm:$0xff]  }
 0x21b   : > { %6250 = vmatprep.subr.bf16.mxu1 %v11340_v48  ;;  %v4089_v32 = vpop.f32.mrf.mxu1  ;;  %v11356_v50 = vld [vmem:[%s15817_s1 + $0x1a00] ss:$16 sps:$4 sm:$0xff]   ;;  %v11361_v48 = vld [vmem:[%s15817_s1 + $0x19e4] ss:$16 sps:$4 sm:$0xff]  }
 0x21c   : > { %v11364_v2 = vld [vmem:[%s15817_s1 + $0x1be4] ss:$16 sps:$4 sm:$0xff]   ;;  %v11359_v22 = vld [vmem:[%s15817_s1 + $0x19e0] ss:$16 sps:$4 sm:$0xff]  }
 0x21d   : > { %6200 = vmatpush1.bf16.msra.mxu0 %v11335_v47  ;;  %v11362_v36 = vld [vmem:[%s15817_s1 + $0x1be0] ss:$16 sps:$4 sm:$0xff]   ;;  %v11367_v47 = vld [vmem:[%s15817_s1 + $0x19c4] ss:$16 sps:$4 sm:$0xff]  }
 0x21e   : > { %6251 = vmatpush1.bf16.msra.mxu1 %v11338_v28  ;;  %6201 = vmatprep.subr.bf16.mxu0 %v11343_v46  ;;  %v11370_v28 = vld [vmem:[%s15817_s1 + $0x1bc4] ss:$16 sps:$4 sm:$0xff]   ;;  %v11365_v46 = vld [vmem:[%s15817_s1 + $0x19c0] ss:$16 sps:$4 sm:$0xff]  }
 0x21f   : > { %6252 = vmatprep.subr.bf16.mxu1 %v11346_v17  ;;  %v11368_v17 = vld [vmem:[%s15817_s1 + $0x1bc0] ss:$16 sps:$4 sm:$0xff]   ;;  %v11373_v31 = vld [vmem:[%s15817_s1 + $0x19a4] ss:$16 sps:$4 sm:$0xff]  }
 0x220   : > { %v11376_v32 = vld [vmem:[%s15817_s1 + $0x1ba4] ss:$16 sps:$4 sm:$0xff]  }
 0x221   : > { %6202 = vmatpush1.bf16.msra.mxu0 %v11341_v33  ;;  %v11371_v33 = vld [vmem:[%s15817_s1 + $0x19a0] ss:$16 sps:$4 sm:$0xff]  }
 0x222   : > { %6253 = vmatpush1.bf16.msra.mxu1 %v11344_v49  ;;  %6203 = vmatprep.subr.bf16.mxu0 %v11349_v52  ;;  %v11374_v49 = vld [vmem:[%s15817_s1 + $0x1ba0] ss:$16 sps:$4 sm:$0xff]   ;;  %v11379_v52 = vld [vmem:[%s15817_s1 + $0x1984] ss:$16 sps:$4 sm:$0xff]  }
 0x223   : > { %6254 = vmatprep.subr.bf16.mxu1 %v11352_v59  ;;  %v11382_v59 = vld [vmem:[%s15817_s1 + $0x1b84] ss:$16 sps:$4 sm:$0xff]  }
 0x225   : > { %6204 = vmatpush1.bf16.msra.mxu0 %v11347_v15  ;;  %v11377_v15 = vld [vmem:[%s15817_s1 + $0x1980] ss:$16 sps:$4 sm:$0xff]  }
 0x226   : > { %6255 = vmatpush1.bf16.msra.mxu1 %v11350_v38  ;;  %6205 = vmatprep.subr.bf16.mxu0 %v11355_v19  ;;  %v11380_v38 = vld [vmem:[%s15817_s1 + $0x1b80] ss:$16 sps:$4 sm:$0xff]   ;;  %v11385_v19 = vld [vmem:[%s15817_s1 + $0x1964] ss:$16 sps:$4 sm:$0xff]  }
 0x227   : > { %6256 = vmatprep.subr.bf16.mxu1 %v11358_v21  ;;  %v11388_v21 = vld [vmem:[%s15817_s1 + $0x1b64] ss:$16 sps:$4 sm:$0xff]  }
 0x229   : > { %6206 = vmatpush1.bf16.msra.mxu0 %v11353_v29  ;;  %v11383_v29 = vld [vmem:[%s15817_s1 + $0x1960] ss:$16 sps:$4 sm:$0xff]  }
 0x22a   : > { %6257 = vmatpush1.bf16.msra.mxu1 %v11356_v50  ;;  %6207 = vmatprep.subr.bf16.mxu0 %v11361_v48  ;;  %v11386_v50 = vld [vmem:[%s15817_s1 + $0x1b60] ss:$16 sps:$4 sm:$0xff]   ;;  %v11391_v48 = vld [vmem:[%s15817_s1 + $0x1944] ss:$16 sps:$4 sm:$0xff]  }
 0x22b   : > { %6258 = vmatprep.subr.bf16.mxu1 %v11364_v2  ;;  %v11394_v2 = vld [vmem:[%s15817_s1 + $0x1b44] ss:$16 sps:$4 sm:$0xff]  }
 0x22d   : > { %6208 = vmatpush2.bf16.msra.mxu0 %v11359_v22  ;;  %v11389_v22 = vld [vmem:[%s15817_s1 + $0x1940] ss:$16 sps:$4 sm:$0xff]  }
 0x22e   : > { %6259 = vmatpush2.bf16.msra.mxu1 %v11362_v36  ;;  %6209 = vmatprep.subr.bf16.mxu0 %v11367_v47  ;;  %v11392_v36 = vld [vmem:[%s15817_s1 + $0x1b40] ss:$16 sps:$4 sm:$0xff]   ;;  %v11397_v47 = vld [vmem:[%s15817_s1 + $0x1924] ss:$16 sps:$4 sm:$0xff]  }
 0x22f   : > { %6260 = vmatprep.subr.bf16.mxu1 %v11370_v28  ;;  %v11400_v28 = vld [vmem:[%s15817_s1 + $0x1b24] ss:$16 sps:$4 sm:$0xff]  }
 0x231   : > { %6210 = vmatpush2.bf16.msra.mxu0 %v11365_v46  ;;  %v11395_v46 = vld [vmem:[%s15817_s1 + $0x1920] ss:$16 sps:$4 sm:$0xff]  }
 0x232   : > { %6261 = vmatpush2.bf16.msra.mxu1 %v11368_v17  ;;  %6211 = vmatprep.subr.bf16.mxu0 %v11373_v31  ;;  %v11398_v17 = vld [vmem:[%s15817_s1 + $0x1b20] ss:$16 sps:$4 sm:$0xff]   ;;  %v11403_v31 = vld [vmem:[%s15817_s1 + $0x1904] ss:$16 sps:$4 sm:$0xff]  }
 0x233   : > { %6262 = vmatprep.subr.bf16.mxu1 %v11376_v32  ;;  %v11406_v32 = vld [vmem:[%s15817_s1 + $0x1b04] ss:$16 sps:$4 sm:$0xff]  }
 0x235   : > { %6212 = vmatpush2.bf16.msra.mxu0 %v11371_v33  ;;  %v11401_v33 = vld [vmem:[%s15817_s1 + $0x1900] ss:$16 sps:$4 sm:$0xff]  }
 0x236   : > { %6263 = vmatpush2.bf16.msra.mxu1 %v11374_v49  ;;  %6213 = vmatprep.subr.bf16.mxu0 %v11379_v52  ;;  %v11404_v49 = vld [vmem:[%s15817_s1 + $0x1b00] ss:$16 sps:$4 sm:$0xff]   ;;  %v11409_v52 = vld [vmem:[%s15817_s1 + $0x1ce4] ss:$16 sps:$4 sm:$0xff]  }
 0x237   : > { %6264 = vmatprep.subr.bf16.mxu1 %v11382_v59  ;;  %v11412_v59 = vld [vmem:[%s15817_s1 + $0x1ee4] ss:$16 sps:$4 sm:$0xff]  }
 0x239   : > { %6214 = vmatpush2.bf16.msra.mxu0 %v11377_v15  ;;  %v11407_v15 = vld [vmem:[%s15817_s1 + $0x1ce0] ss:$16 sps:$4 sm:$0xff]  }
 0x23a   : > { %6265 = vmatpush2.bf16.msra.mxu1 %v11380_v38  ;;  %6215 = vmatprep.subr.bf16.mxu0 %v11385_v19  ;;  %v11410_v38 = vld [vmem:[%s15817_s1 + $0x1ee0] ss:$16 sps:$4 sm:$0xff]   ;;  %v11415_v19 = vld [vmem:[%s15817_s1 + $0x1cc4] ss:$16 sps:$4 sm:$0xff]  }
 0x23b   : > { %6266 = vmatprep.subr.bf16.mxu1 %v11388_v21  ;;  %v11418_v21 = vld [vmem:[%s15817_s1 + $0x1ec4] ss:$16 sps:$4 sm:$0xff]  }
 0x23d   : > { %6216 = vmatpush2.bf16.msra.mxu0 %v11383_v29  ;;  %v11413_v29 = vld [vmem:[%s15817_s1 + $0x1cc0] ss:$16 sps:$4 sm:$0xff]  }
 0x23e   : > { %6267 = vmatpush2.bf16.msra.mxu1 %v11386_v50  ;;  %6217 = vmatprep.subr.bf16.mxu0 %v11391_v48  ;;  %v11416_v50 = vld [vmem:[%s15817_s1 + $0x1ec0] ss:$16 sps:$4 sm:$0xff]  }
 0x23f   : > { %6268 = vmatprep.subr.bf16.mxu1 %v11394_v2 }
 0x241   : > { %6218 = vmatpush2.bf16.msra.mxu0 %v11389_v22 }
 0x242   : > { %6269 = vmatpush2.bf16.msra.mxu1 %v11392_v36  ;;  %6219 = vmatprep.subr.bf16.mxu0 %v11397_v47 }
 0x243   : > { %6270 = vmatprep.subr.bf16.mxu1 %v11400_v28  ;;  %v11421_v28 = vld [vmem:[%s15817_s1 + $0x1ca4] ss:$16 sps:$4 sm:$0xff]  }
 0x245   : > { %6220 = vmatpush2.bf16.msra.mxu0 %v11395_v46  ;;  %v11424_v46 = vld [vmem:[%s15817_s1 + $0x1ea4] ss:$16 sps:$4 sm:$0xff]  }
 0x246   : > { %6271 = vmatpush2.bf16.msra.mxu1 %v11398_v17  ;;  %6221 = vmatprep.subr.bf16.mxu0 %v11403_v31 }
 0x247   : > { %6272 = vmatprep.subr.bf16.mxu1 %v11406_v32  ;;  %v11422_v32 = vld [vmem:[%s15817_s1 + $0x1ea0] ss:$16 sps:$4 sm:$0xff]  }
 0x249   : > { %6222 = vmatpush2.bf16.msra.mxu0 %v11401_v33 }
 0x24a   : > { %6273 = vmatpush2.bf16.msra.mxu1 %v11404_v49  ;;  %6293 = vmatprep.subr.bf16.mxu0 %v11409_v52 }
 0x24b   : > { %6344 = vmatprep.subr.bf16.mxu1 %v11412_v59 }
 0x24c   : > { %v4125_v48 = vpop.f32.mrf.mxu0  ;;  %6224 = vmatmul.mubr.bf16.vlgmr.msra.gmra.mxu0 %v12367_v61 }
 0x24d   : > { %v4176_v2 = vpop.f32.mrf.mxu1  ;;  %6275 = vmatmul.mubr.bf16.vlgmr.msra.gmra.mxu1 %v12371_v62  ;;  %v4126_v22 = vadd.f32 %v4125_v48, %v14003_v53  ;;  %6294 = vmatpush1.bf16.msra.mxu0 %v11407_v15  ;;  %v11419_v53 = vld [vmem:[%s15817_s1 + $0x1ca0] ss:$16 sps:$4 sm:$0xff]  }
 0x24e   : > { %6345 = vmatpush1.bf16.msra.mxu1 %v11410_v38  ;;  %v4127_v36 = vpop.f32.mrf.mxu0  ;;  %6295 = vmatprep.subr.bf16.mxu0 %v11415_v19  ;;  %v11427_v38 = vld [vmem:[%s15817_s1 + $0x1c84] ss:$16 sps:$4 sm:$0xff]  }
 0x24f   : > { %v4178_v47 = vpop.f32.mrf.mxu1  ;;  %6346 = vmatprep.subr.bf16.mxu1 %v11418_v21  ;;  %v14221_v17 = vadd.f32 %v4176_v2, %v4126_v22  ;;  %v4128_v31 = vadd.f32 %v4127_v36, %v14015_v12  ;;  %6233 = vmatprep.mubr.bf16.mxu0 %v12308_v20  ;;  %v11430_v19 = vld [vmem:[%s15817_s1 + $0x1e84] ss:$16 sps:$4 sm:$0xff]  }
 0x250   : > { %6284 = vmatprep.mubr.bf16.mxu1 %v12326_v34  ;;  %v4129_v33 = vpop.f32.mrf.mxu0 }
 0x251   : > { %v4180_v49 = vpop.f32.mrf.mxu1  ;;  %v14232_v52 = vadd.f32 %v4178_v47, %v4128_v31  ;;  %v4130_v59 = vadd.f32 %v4129_v33, %v14024_v23  ;;  %6296 = vmatpush1.bf16.msra.mxu0 %v11413_v29  ;;  %v11425_v23 = vld [vmem:[%s15817_s1 + $0x1c80] ss:$16 sps:$4 sm:$0xff]  }
 0x252   : > { %6347 = vmatpush1.bf16.msra.mxu1 %v11416_v50  ;;  %v4131_v12 = vpop.f32.mrf.mxu0  ;;  %6297 = vmatprep.subr.bf16.mxu0 %v11421_v28  ;;  %v11428_v29 = vld [vmem:[%s15817_s1 + $0x1e80] ss:$16 sps:$4 sm:$0xff]   ;;  %v11433_v28 = vld [vmem:[%s15817_s1 + $0x1c64] ss:$16 sps:$4 sm:$0xff]  }
 0x253   : > { %v4182_v15 = vpop.f32.mrf.mxu1  ;;  %6348 = vmatprep.subr.bf16.mxu1 %v11424_v46  ;;  %v14241_v21 = vadd.f32 %v4180_v49, %v4130_v59  ;;  %v4132_v48 = vadd.f32 %v4131_v12, %v14034_v43  ;;  %v11436_v46 = vld [vmem:[%s15817_s1 + $0x1e64] ss:$16 sps:$4 sm:$0xff]   ;;  %v11431_v49 = vld [vmem:[%s15817_s1 + $0x1c60] ss:$16 sps:$4 sm:$0xff]  }
 0x254   : > { %v4135_v50 = vpop.f32.mrf.mxu0  ;;  %6234 = vmatmul.mubr.bf16.gmra.mxu0 %v12352_v55  ;;  %v11439_v59 = vld [vmem:[%s15817_s1 + $0x1c44] ss:$16 sps:$4 sm:$0xff]  }
 0x255   : > { %v4186_v2 = vpop.f32.mrf.mxu1  ;;  %6285 = vmatmul.mubr.bf16.gmra.mxu1 %v12354_v57  ;;  %v14252_v22 = vadd.f32 %v4182_v15, %v4132_v48  ;;  %v4136_v36 = vadd.f32 %v4135_v50, %v14044_v41  ;;  %6298 = vmatpush1.bf16.msra.mxu0 %v11419_v53  ;;  %v11442_v12 = vld [vmem:[%s15817_s1 + $0x1e44] ss:$16 sps:$4 sm:$0xff]   ;;  %v11440_v48 = vld [vmem:[%s15817_s1 + $0x1e40] ss:$16 sps:$4 sm:$0xff]  }
 0x256   : > { %6349 = vmatpush1.bf16.msra.mxu1 %v11422_v32  ;;  %v4137_v43 = vpop.f32.mrf.mxu0  ;;  %6299 = vmatprep.subr.bf16.mxu0 %v11427_v38  ;;  %v11443_v50 = vld [vmem:[%s15817_s1 + $0x1c20] ss:$16 sps:$4 sm:$0xff]  }
 0x257   : > { %v4188_v47 = vpop.f32.mrf.mxu1  ;;  %6350 = vmatprep.subr.bf16.mxu1 %v11430_v19  ;;  %v4138_v31 = vadd.f32 %v4137_v43, %v14048_v0  ;;  %v14262_v33 = vadd.f32 %v4186_v2, %v4136_v36  ;;  %6325 = vmatprep.mubr.bf16.mxu0 %v12534_v14  ;;  %v11434_v0 = vld [vmem:[%s15817_s1 + $0x1e60] ss:$16 sps:$4 sm:$0xff]   ;;  %v11451_v36 = vld [vmem:[%s15817_s1 + $0x1c04] ss:$16 sps:$4 sm:$0xff]  }
 0x258   : > { %6376 = vmatprep.mubr.bf16.mxu1 %v12542_v16  ;;  %v4139_v41 = vpop.f32.mrf.mxu0  ;;  %v11437_v19 = vld [vmem:[%s15817_s1 + $0x1c40] ss:$16 sps:$4 sm:$0xff]   ;;  %v11454_v43 = vld [vmem:[%s15817_s1 + $0x1e04] ss:$16 sps:$4 sm:$0xff]  }
 0x259   : > { %v4190_v53 = vpop.f32.mrf.mxu1  ;;  %v14266_v32 = vadd.f32 %v4188_v47, %v4138_v31  ;;  %6300 = vmatpush1.bf16.msra.mxu0 %v11425_v23  ;;  %v11445_v23 = vld [vmem:[%s15817_s1 + $0x1c24] ss:$16 sps:$4 sm:$0xff]   ;;  %v11446_v2 = vld [vmem:[%s15817_s1 + $0x1e20] ss:$16 sps:$4 sm:$0xff]  }
 0x25a   : > { %6351 = vmatpush1.bf16.msra.mxu1 %v11428_v29  ;;  %6301 = vmatprep.subr.bf16.mxu0 %v11433_v28  ;;  %v4140_v15 = vpop.f32.mrf.mxu0  ;;  %v11448_v29 = vld [vmem:[%s15817_s1 + $0x1e24] ss:$16 sps:$4 sm:$0xff]   ;;  %v11449_v47 = vld [vmem:[%s15817_s1 + $0x1c00] ss:$16 sps:$4 sm:$0xff]  }
 0x25b   : > { %6352 = vmatprep.subr.bf16.mxu1 %v11436_v46  ;;  %v4191_v38 = vpop.f32.mrf.mxu1  ;;  %v11452_v28 = vld [vmem:[%s15817_s1 + $0x1e00] ss:$16 sps:$4 sm:$0xff]   ;;  %v11457_v46 = vld [vmem:[%s15817_s1 + $0x1de4] ss:$16 sps:$4 sm:$0xff]  }
 0x25c   : > { %v11460_v31 = vld [vmem:[%s15817_s1 + $0x1fe4] ss:$16 sps:$4 sm:$0xff]   ;;  %v11455_v41 = vld [vmem:[%s15817_s1 + $0x1de0] ss:$16 sps:$4 sm:$0xff]  }
 0x25d   : > { %6302 = vmatpush1.bf16.msra.mxu0 %v11431_v49  ;;  %v11458_v53 = vld [vmem:[%s15817_s1 + $0x1fe0] ss:$16 sps:$4 sm:$0xff]   ;;  %v11463_v49 = vld [vmem:[%s15817_s1 + $0x1dc4] ss:$16 sps:$4 sm:$0xff]  }
 0x25e   : > { %6353 = vmatpush1.bf16.msra.mxu1 %v11434_v0  ;;  %6303 = vmatprep.subr.bf16.mxu0 %v11439_v59  ;;  %v11466_v0 = vld [vmem:[%s15817_s1 + $0x1fc4] ss:$16 sps:$4 sm:$0xff]   ;;  %v11461_v59 = vld [vmem:[%s15817_s1 + $0x1dc0] ss:$16 sps:$4 sm:$0xff]  }
 0x25f   : > { %6354 = vmatprep.subr.bf16.mxu1 %v11442_v12  ;;  %v11464_v12 = vld [vmem:[%s15817_s1 + $0x1fc0] ss:$16 sps:$4 sm:$0xff]   ;;  %v11469_v15 = vld [vmem:[%s15817_s1 + $0x1da4] ss:$16 sps:$4 sm:$0xff]  }
 0x260   : > { %v11472_v38 = vld [vmem:[%s15817_s1 + $0x1fa4] ss:$16 sps:$4 sm:$0xff]  }
 0x261   : > { %6304 = vmatpush1.bf16.msra.mxu0 %v11437_v19  ;;  %v11467_v19 = vld [vmem:[%s15817_s1 + $0x1da0] ss:$16 sps:$4 sm:$0xff]  }
 0x262   : > { %6355 = vmatpush1.bf16.msra.mxu1 %v11440_v48  ;;  %6305 = vmatprep.subr.bf16.mxu0 %v11445_v23  ;;  %v11470_v48 = vld [vmem:[%s15817_s1 + $0x1fa0] ss:$16 sps:$4 sm:$0xff]   ;;  %v11475_v23 = vld [vmem:[%s15817_s1 + $0x1d84] ss:$16 sps:$4 sm:$0xff]  }
 0x263   : > { %6356 = vmatprep.subr.bf16.mxu1 %v11448_v29  ;;  %v11478_v29 = vld [vmem:[%s15817_s1 + $0x1f84] ss:$16 sps:$4 sm:$0xff]  }
 0x265   : > { %6306 = vmatpush1.bf16.msra.mxu0 %v11443_v50  ;;  %v11473_v50 = vld [vmem:[%s15817_s1 + $0x1d80] ss:$16 sps:$4 sm:$0xff]  }
 0x266   : > { %6357 = vmatpush1.bf16.msra.mxu1 %v11446_v2  ;;  %6307 = vmatprep.subr.bf16.mxu0 %v11451_v36  ;;  %v11476_v2 = vld [vmem:[%s15817_s1 + $0x1f80] ss:$16 sps:$4 sm:$0xff]   ;;  %v11481_v36 = vld [vmem:[%s15817_s1 + $0x1d64] ss:$16 sps:$4 sm:$0xff]  }
 0x267   : > { %6358 = vmatprep.subr.bf16.mxu1 %v11454_v43  ;;  %v11484_v43 = vld [vmem:[%s15817_s1 + $0x1f64] ss:$16 sps:$4 sm:$0xff]  }
 0x269   : > { %6308 = vmatpush1.bf16.msra.mxu0 %v11449_v47  ;;  %v11479_v47 = vld [vmem:[%s15817_s1 + $0x1d60] ss:$16 sps:$4 sm:$0xff]  }
 0x26a   : > { %6359 = vmatpush1.bf16.msra.mxu1 %v11452_v28  ;;  %6309 = vmatprep.subr.bf16.mxu0 %v11457_v46  ;;  %v11482_v28 = vld [vmem:[%s15817_s1 + $0x1f60] ss:$16 sps:$4 sm:$0xff]   ;;  %v11487_v46 = vld [vmem:[%s15817_s1 + $0x1d44] ss:$16 sps:$4 sm:$0xff]  }
 0x26b   : > { %6360 = vmatprep.subr.bf16.mxu1 %v11460_v31  ;;  %v11490_v31 = vld [vmem:[%s15817_s1 + $0x1f44] ss:$16 sps:$4 sm:$0xff]  }
 0x26d   : > { %6310 = vmatpush2.bf16.msra.mxu0 %v11455_v41  ;;  %v11485_v41 = vld [vmem:[%s15817_s1 + $0x1d40] ss:$16 sps:$4 sm:$0xff]  }
 0x26e   : > { %6361 = vmatpush2.bf16.msra.mxu1 %v11458_v53  ;;  %6311 = vmatprep.subr.bf16.mxu0 %v11463_v49  ;;  %v11488_v53 = vld [vmem:[%s15817_s1 + $0x1f40] ss:$16 sps:$4 sm:$0xff]   ;;  %v11493_v49 = vld [vmem:[%s15817_s1 + $0x1d24] ss:$16 sps:$4 sm:$0xff]  }
 0x26f   : > { %6362 = vmatprep.subr.bf16.mxu1 %v11466_v0  ;;  %v11496_v0 = vld [vmem:[%s15817_s1 + $0x1f24] ss:$16 sps:$4 sm:$0xff]  }
 0x271   : > { %6312 = vmatpush2.bf16.msra.mxu0 %v11461_v59  ;;  %v11491_v59 = vld [vmem:[%s15817_s1 + $0x1d20] ss:$16 sps:$4 sm:$0xff]  }
 0x272   : > { %6363 = vmatpush2.bf16.msra.mxu1 %v11464_v12  ;;  %6313 = vmatprep.subr.bf16.mxu0 %v11469_v15  ;;  %v11494_v12 = vld [vmem:[%s15817_s1 + $0x1f20] ss:$16 sps:$4 sm:$0xff]   ;;  %v11499_v15 = vld [vmem:[%s15817_s1 + $0x1d04] ss:$16 sps:$4 sm:$0xff]  }
 0x273   : > { %6364 = vmatprep.subr.bf16.mxu1 %v11472_v38  ;;  %v11502_v38 = vld [vmem:[%s15817_s1 + $0x1f04] ss:$16 sps:$4 sm:$0xff]  }
 0x275   : > { %6314 = vmatpush2.bf16.msra.mxu0 %v11467_v19  ;;  %v11497_v19 = vld [vmem:[%s15817_s1 + $0x1d00] ss:$16 sps:$4 sm:$0xff]  }
 0x276   : > { %6365 = vmatpush2.bf16.msra.mxu1 %v11470_v48  ;;  %6315 = vmatprep.subr.bf16.mxu0 %v11475_v23  ;;  %v11500_v48 = vld [vmem:[%s15817_s1 + $0x1f00] ss:$16 sps:$4 sm:$0xff]   ;;  %v11505_v23 = vld [vmem:[%s15817_s1 + $0x18ec] ss:$16 sps:$4 sm:$0xff]  }
 0x277   : > { %6366 = vmatprep.subr.bf16.mxu1 %v11478_v29  ;;  %v11508_v29 = vld [vmem:[%s15817_s1 + $0x1aec] ss:$16 sps:$4 sm:$0xff]  }
 0x279   : > { %6316 = vmatpush2.bf16.msra.mxu0 %v11473_v50  ;;  %v11503_v50 = vld [vmem:[%s15817_s1 + $0x18e8] ss:$16 sps:$4 sm:$0xff]  }
 0x27a   : > { %6367 = vmatpush2.bf16.msra.mxu1 %v11476_v2  ;;  %6317 = vmatprep.subr.bf16.mxu0 %v11481_v36  ;;  %v11506_v2 = vld [vmem:[%s15817_s1 + $0x1ae8] ss:$16 sps:$4 sm:$0xff]   ;;  %v11511_v36 = vld [vmem:[%s15817_s1 + $0x18cc] ss:$16 sps:$4 sm:$0xff]  }
 0x27b   : > { %6368 = vmatprep.subr.bf16.mxu1 %v11484_v43  ;;  %v11514_v43 = vld [vmem:[%s15817_s1 + $0x1acc] ss:$16 sps:$4 sm:$0xff]  }
 0x27d   : > { %6318 = vmatpush2.bf16.msra.mxu0 %v11479_v47 }
 0x27e   : > { %6369 = vmatpush2.bf16.msra.mxu1 %v11482_v28  ;;  %6319 = vmatprep.subr.bf16.mxu0 %v11487_v46 }
 0x27f   : > { %6370 = vmatprep.subr.bf16.mxu1 %v11490_v31  ;;  %v11509_v31 = vld [vmem:[%s15817_s1 + $0x18c8] ss:$16 sps:$4 sm:$0xff]  }
 0x281   : > { %6320 = vmatpush2.bf16.msra.mxu0 %v11485_v41  ;;  %v11512_v41 = vld [vmem:[%s15817_s1 + $0x1ac8] ss:$16 sps:$4 sm:$0xff]  }
 0x282   : > { %6371 = vmatpush2.bf16.msra.mxu1 %v11488_v53  ;;  %6321 = vmatprep.subr.bf16.mxu0 %v11493_v49 }
 0x283   : > { %6372 = vmatprep.subr.bf16.mxu1 %v11496_v0  ;;  %v11517_v0 = vld [vmem:[%s15817_s1 + $0x18ac] ss:$16 sps:$4 sm:$0xff]  }
 0x285   : > { %6322 = vmatpush2.bf16.msra.mxu0 %v11491_v59 }
 0x286   : > { %6373 = vmatpush2.bf16.msra.mxu1 %v11494_v12  ;;  %6323 = vmatprep.subr.bf16.mxu0 %v11499_v15 }
 0x287   : > { %6374 = vmatprep.subr.bf16.mxu1 %v11502_v38 }
 0x289   : > { %6324 = vmatpush2.bf16.msra.mxu0 %v11497_v19 }
 0x28a   : > { %6375 = vmatpush2.bf16.msra.mxu1 %v11500_v48  ;;  %6395 = vmatprep.subr.bf16.mxu0 %v11505_v23  ;;  %v11515_v23 = vld [vmem:[%s15817_s1 + $0x18a8] ss:$16 sps:$4 sm:$0xff]  }
 0x28b   : > { %6446 = vmatprep.subr.bf16.mxu1 %v11508_v29 }
 0x28c   : > { %v4227_v47 = vpop.f32.mrf.mxu0  ;;  %6326 = vmatmul.mubr.bf16.vlgmr.msra.gmra.mxu0 %v12631_v10 }
 0x28d   : > { %v4278_v28 = vpop.f32.mrf.mxu1  ;;  %6377 = vmatmul.mubr.bf16.vlgmr.msra.gmra.mxu1 %v12635_v11  ;;  %v4228_v46 = vadd.f32 %v4227_v47, %v13782_v44  ;;  %6396 = vmatpush1.bf16.msra.mxu0 %v11503_v50  ;;  %v11520_v44 = vld [vmem:[%s15817_s1 + $0x1aac] ss:$16 sps:$4 sm:$0xff]  }
 0x28e   : > { %6447 = vmatpush1.bf16.msra.mxu1 %v11506_v2  ;;  %v4229_v53 = vpop.f32.mrf.mxu0  ;;  %6397 = vmatprep.subr.bf16.mxu0 %v11511_v36  ;;  %v11523_v2 = vld [vmem:[%s15817_s1 + $0x188c] ss:$16 sps:$4 sm:$0xff]  }
 0x28f   : > { %v4280_v49 = vpop.f32.mrf.mxu1  ;;  %6448 = vmatprep.subr.bf16.mxu1 %v11514_v43  ;;  %v14439_v59 = vadd.f32 %v4278_v28, %v4228_v46  ;;  %v4230_v12 = vadd.f32 %v4229_v53, %v13793_v1  ;;  %6335 = vmatprep.mubr.bf16.mxu0 %v12522_v9  ;;  %v11518_v1 = vld [vmem:[%s15817_s1 + $0x1aa8] ss:$16 sps:$4 sm:$0xff]  }
 0x290   : > { %6386 = vmatprep.mubr.bf16.mxu1 %v12530_v13  ;;  %v4231_v15 = vpop.f32.mrf.mxu0 }
 0x291   : > { %v4282_v38 = vpop.f32.mrf.mxu1  ;;  %v14444_v19 = vadd.f32 %v4280_v49, %v4230_v12  ;;  %v4232_v48 = vadd.f32 %v4231_v15, %v13802_v39  ;;  %6398 = vmatpush1.bf16.msra.mxu0 %v11509_v31  ;;  %v11526_v39 = vld [vmem:[%s15817_s1 + $0x1a8c] ss:$16 sps:$4 sm:$0xff]  }
 0x292   : > { %6449 = vmatpush1.bf16.msra.mxu1 %v11512_v41  ;;  %v4233_v29 = vpop.f32.mrf.mxu0  ;;  %6399 = vmatprep.subr.bf16.mxu0 %v11517_v0  ;;  %v11521_v41 = vld [vmem:[%s15817_s1 + $0x1888] ss:$16 sps:$4 sm:$0xff]   ;;  %v11529_v0 = vld [vmem:[%s15817_s1 + $0x186c] ss:$16 sps:$4 sm:$0xff]  }
 0x293   : > { %v4284_v50 = vpop.f32.mrf.mxu1  ;;  %6450 = vmatprep.subr.bf16.mxu1 %v11520_v44  ;;  %v14459_v36 = vadd.f32 %v4282_v38, %v4232_v48  ;;  %v4234_v43 = vadd.f32 %v4233_v29, %v13813_v40  ;;  %v11524_v40 = vld [vmem:[%s15817_s1 + $0x1a88] ss:$16 sps:$4 sm:$0xff]  }
 0x294   : > { %v4237_v47 = vpop.f32.mrf.mxu0  ;;  %6336 = vmatmul.mubr.bf16.gmra.mxu0 %v12616_v3 }
 0x295   : > { %v4288_v28 = vpop.f32.mrf.mxu1  ;;  %6387 = vmatmul.mubr.bf16.gmra.mxu1 %v12618_v5  ;;  %v14464_v46 = vadd.f32 %v4284_v50, %v4234_v43  ;;  %v4238_v31 = vadd.f32 %v4237_v47, %v13823_v63  ;;  %6400 = vmatpush1.bf16.msra.mxu0 %v11515_v23  ;;  %v11532_v63 = vld [vmem:[%s15817_s1 + $0x1a6c] ss:$16 sps:$4 sm:$0xff]   ;;  %v11527_v23 = vld [vmem:[%s15817_s1 + $0x1868] ss:$16 sps:$4 sm:$0xff]  }
 0x296   : > { %6451 = vmatpush1.bf16.msra.mxu1 %v11518_v1  ;;  %v4239_v53 = vpop.f32.mrf.mxu0  ;;  %6401 = vmatprep.subr.bf16.mxu0 %v11523_v2  ;;  %v11533_v50 = vld [vmem:[%s15817_s1 + $0x1848] ss:$16 sps:$4 sm:$0xff]   ;;  %v11544_v43 = vld [vmem:[%s15817_s1 + $0x1a2c] ss:$16 sps:$4 sm:$0xff]  }
 0x297   : > { %v4290_v49 = vpop.f32.mrf.mxu1  ;;  %6452 = vmatprep.subr.bf16.mxu1 %v11526_v39  ;;  %v4240_v44 = vadd.f32 %v4239_v53, %v13827_v51  ;;  %v14480_v12 = vadd.f32 %v4288_v28, %v4238_v31  ;;  %6427 = vmatprep.mubr.bf16.mxu0 %v12321_v30  ;;  %v11530_v51 = vld [vmem:[%s15817_s1 + $0x1a68] ss:$16 sps:$4 sm:$0xff]   ;;  %v11535_v30 = vld [vmem:[%s15817_s1 + $0x184c] ss:$16 sps:$4 sm:$0xff]  }
 0x298   : > { %6478 = vmatprep.mubr.bf16.mxu1 %v12337_v42  ;;  %v4241_v15 = vpop.f32.mrf.mxu0  ;;  %v11538_v42 = vld [vmem:[%s15817_s1 + $0x1a4c] ss:$16 sps:$4 sm:$0xff]   ;;  %v11536_v2 = vld [vmem:[%s15817_s1 + $0x1a48] ss:$16 sps:$4 sm:$0xff]  }
 0x299   : > { %v4292_v38 = vpop.f32.mrf.mxu1  ;;  %v14484_v48 = vadd.f32 %v4290_v49, %v4240_v44  ;;  %6402 = vmatpush1.bf16.msra.mxu0 %v11521_v41  ;;  %v11541_v39 = vld [vmem:[%s15817_s1 + $0x182c] ss:$16 sps:$4 sm:$0xff]   ;;  %v11539_v47 = vld [vmem:[%s15817_s1 + $0x1828] ss:$16 sps:$4 sm:$0xff]  }
 0x29a   : > { %6453 = vmatpush1.bf16.msra.mxu1 %v11524_v40  ;;  %6403 = vmatprep.subr.bf16.mxu0 %v11529_v0  ;;  %v4242_v1 = vpop.f32.mrf.mxu0  ;;  %v11542_v28 = vld [vmem:[%s15817_s1 + $0x1a28] ss:$16 sps:$4 sm:$0xff]   ;;  %v11547_v31 = vld [vmem:[%s15817_s1 + $0x180c] ss:$16 sps:$4 sm:$0xff]  }
 0x29b   : > { %6454 = vmatprep.subr.bf16.mxu1 %v11532_v63  ;;  %v4293_v29 = vpop.f32.mrf.mxu1  ;;  %v11550_v41 = vld [vmem:[%s15817_s1 + $0x1a0c] ss:$16 sps:$4 sm:$0xff]   ;;  %v11545_v40 = vld [vmem:[%s15817_s1 + $0x1808] ss:$16 sps:$4 sm:$0xff]  }
 0x29c   : > { %v11548_v53 = vld [vmem:[%s15817_s1 + $0x1a08] ss:$16 sps:$4 sm:$0xff]   ;;  %v11553_v49 = vld [vmem:[%s15817_s1 + $0x19ec] ss:$16 sps:$4 sm:$0xff]  }
 0x29d   : > { %6404 = vmatpush1.bf16.msra.mxu0 %v11527_v23  ;;  %v11556_v0 = vld [vmem:[%s15817_s1 + $0x1bec] ss:$16 sps:$4 sm:$0xff]   ;;  %v11551_v63 = vld [vmem:[%s15817_s1 + $0x19e8] ss:$16 sps:$4 sm:$0xff]  }
 0x29e   : > { %6455 = vmatpush1.bf16.msra.mxu1 %v11530_v51  ;;  %6405 = vmatprep.subr.bf16.mxu0 %v11535_v30  ;;  %v11554_v44 = vld [vmem:[%s15817_s1 + $0x1be8] ss:$16 sps:$4 sm:$0xff]   ;;  %v11559_v15 = vld [vmem:[%s15817_s1 + $0x19cc] ss:$16 sps:$4 sm:$0xff]  }
 0x29f   : > { %6456 = vmatprep.subr.bf16.mxu1 %v11538_v42  ;;  %v11562_v38 = vld [vmem:[%s15817_s1 + $0x1bcc] ss:$16 sps:$4 sm:$0xff]   ;;  %v11557_v23 = vld [vmem:[%s15817_s1 + $0x19c8] ss:$16 sps:$4 sm:$0xff]  }
 0x2a0   : > { %v11560_v51 = vld [vmem:[%s15817_s1 + $0x1bc8] ss:$16 sps:$4 sm:$0xff]   ;;  %v11565_v30 = vld [vmem:[%s15817_s1 + $0x19ac] ss:$16 sps:$4 sm:$0xff]  }
 0x2a1   : > { %6406 = vmatpush1.bf16.msra.mxu0 %v11533_v50  ;;  %v11568_v42 = vld [vmem:[%s15817_s1 + $0x1bac] ss:$16 sps:$4 sm:$0xff]   ;;  %v11563_v1 = vld [vmem:[%s15817_s1 + $0x19a8] ss:$16 sps:$4 sm:$0xff]  }
 0x2a2   : > { %6457 = vmatpush1.bf16.msra.mxu1 %v11536_v2  ;;  %6407 = vmatprep.subr.bf16.mxu0 %v11541_v39  ;;  %v11566_v29 = vld [vmem:[%s15817_s1 + $0x1ba8] ss:$16 sps:$4 sm:$0xff]   ;;  %v11571_v50 = vld [vmem:[%s15817_s1 + $0x198c] ss:$16 sps:$4 sm:$0xff]  }
 0x2a3   : > { %6458 = vmatprep.subr.bf16.mxu1 %v11544_v43  ;;  %v11574_v2 = vld [vmem:[%s15817_s1 + $0x1b8c] ss:$16 sps:$4 sm:$0xff]   ;;  %v11569_v39 = vld [vmem:[%s15817_s1 + $0x1988] ss:$16 sps:$4 sm:$0xff]  }
 0x2a4   : > { %v11572_v43 = vld [vmem:[%s15817_s1 + $0x1b88] ss:$16 sps:$4 sm:$0xff]  }
 0x2a5   : > { %6408 = vmatpush1.bf16.msra.mxu0 %v11539_v47  ;;  %v11577_v47 = vld [vmem:[%s15817_s1 + $0x196c] ss:$16 sps:$4 sm:$0xff]  }
 0x2a6   : > { %6459 = vmatpush1.bf16.msra.mxu1 %v11542_v28  ;;  %6409 = vmatprep.subr.bf16.mxu0 %v11547_v31  ;;  %v11580_v28 = vld [vmem:[%s15817_s1 + $0x1b6c] ss:$16 sps:$4 sm:$0xff]   ;;  %v11575_v31 = vld [vmem:[%s15817_s1 + $0x1968] ss:$16 sps:$4 sm:$0xff]  }
 0x2a7   : > { %6460 = vmatprep.subr.bf16.mxu1 %v11550_v41  ;;  %v11578_v41 = vld [vmem:[%s15817_s1 + $0x1b68] ss:$16 sps:$4 sm:$0xff]  }
 0x2a9   : > { %6410 = vmatpush1.bf16.msra.mxu0 %v11545_v40  ;;  %v11583_v40 = vld [vmem:[%s15817_s1 + $0x194c] ss:$16 sps:$4 sm:$0xff]  }
 0x2aa   : > { %6461 = vmatpush1.bf16.msra.mxu1 %v11548_v53  ;;  %6411 = vmatprep.subr.bf16.mxu0 %v11553_v49  ;;  %v11586_v53 = vld [vmem:[%s15817_s1 + $0x1b4c] ss:$16 sps:$4 sm:$0xff]   ;;  %v11581_v49 = vld [vmem:[%s15817_s1 + $0x1948] ss:$16 sps:$4 sm:$0xff]  }
 0x2ab   : > { %6462 = vmatprep.subr.bf16.mxu1 %v11556_v0  ;;  %v11584_v0 = vld [vmem:[%s15817_s1 + $0x1b48] ss:$16 sps:$4 sm:$0xff]  }
 0x2ad   : > { %6412 = vmatpush2.bf16.msra.mxu0 %v11551_v63  ;;  %v11589_v63 = vld [vmem:[%s15817_s1 + $0x192c] ss:$16 sps:$4 sm:$0xff]  }
 0x2ae   : > { %6463 = vmatpush2.bf16.msra.mxu1 %v11554_v44  ;;  %6413 = vmatprep.subr.bf16.mxu0 %v11559_v15  ;;  %v11592_v44 = vld [vmem:[%s15817_s1 + $0x1b2c] ss:$16 sps:$4 sm:$0xff]   ;;  %v11587_v15 = vld [vmem:[%s15817_s1 + $0x1928] ss:$16 sps:$4 sm:$0xff]  }
 0x2af   : > { %6464 = vmatprep.subr.bf16.mxu1 %v11562_v38  ;;  %v11590_v38 = vld [vmem:[%s15817_s1 + $0x1b28] ss:$16 sps:$4 sm:$0xff]  }
 0x2b1   : > { %6414 = vmatpush2.bf16.msra.mxu0 %v11557_v23  ;;  %v11595_v23 = vld [vmem:[%s15817_s1 + $0x190c] ss:$16 sps:$4 sm:$0xff]  }
 0x2b2   : > { %6465 = vmatpush2.bf16.msra.mxu1 %v11560_v51  ;;  %6415 = vmatprep.subr.bf16.mxu0 %v11565_v30  ;;  %v11598_v51 = vld [vmem:[%s15817_s1 + $0x1b0c] ss:$16 sps:$4 sm:$0xff]   ;;  %v11593_v30 = vld [vmem:[%s15817_s1 + $0x1908] ss:$16 sps:$4 sm:$0xff]  }
 0x2b3   : > { %6466 = vmatprep.subr.bf16.mxu1 %v11568_v42  ;;  %v11596_v42 = vld [vmem:[%s15817_s1 + $0x1b08] ss:$16 sps:$4 sm:$0xff]  }
 0x2b5   : > { %6416 = vmatpush2.bf16.msra.mxu0 %v11563_v1  ;;  %v11601_v1 = vld [vmem:[%s15817_s1 + $0x1cec] ss:$16 sps:$4 sm:$0xff]  }
 0x2b6   : > { %6467 = vmatpush2.bf16.msra.mxu1 %v11566_v29  ;;  %6417 = vmatprep.subr.bf16.mxu0 %v11571_v50  ;;  %v11604_v29 = vld [vmem:[%s15817_s1 + $0x1eec] ss:$16 sps:$4 sm:$0xff]   ;;  %v11599_v50 = vld [vmem:[%s15817_s1 + $0x1ce8] ss:$16 sps:$4 sm:$0xff]  }
 0x2b7   : > { %6468 = vmatprep.subr.bf16.mxu1 %v11574_v2  ;;  %v11602_v2 = vld [vmem:[%s15817_s1 + $0x1ee8] ss:$16 sps:$4 sm:$0xff]  }
 0x2b9   : > { %6418 = vmatpush2.bf16.msra.mxu0 %v11569_v39  ;;  %v11607_v39 = vld [vmem:[%s15817_s1 + $0x1ccc] ss:$16 sps:$4 sm:$0xff]  }
 0x2ba   : > { %6469 = vmatpush2.bf16.msra.mxu1 %v11572_v43  ;;  %6419 = vmatprep.subr.bf16.mxu0 %v11577_v47  ;;  %v11610_v43 = vld [vmem:[%s15817_s1 + $0x1ecc] ss:$16 sps:$4 sm:$0xff]  }
 0x2bb   : > { %6470 = vmatprep.subr.bf16.mxu1 %v11580_v28 }
 0x2bd   : > { %6420 = vmatpush2.bf16.msra.mxu0 %v11575_v31 }
 0x2be   : > { %6471 = vmatpush2.bf16.msra.mxu1 %v11578_v41  ;;  %6421 = vmatprep.subr.bf16.mxu0 %v11583_v40  ;;  %v11605_v41 = vld [vmem:[%s15817_s1 + $0x1cc8] ss:$16 sps:$4 sm:$0xff]  }
 0x2bf   : > { %6472 = vmatprep.subr.bf16.mxu1 %v11586_v53  ;;  %v11608_v40 = vld [vmem:[%s15817_s1 + $0x1ec8] ss:$16 sps:$4 sm:$0xff]  }
 0x2c1   : > { %6422 = vmatpush2.bf16.msra.mxu0 %v11581_v49 }
 0x2c2   : > { %6473 = vmatpush2.bf16.msra.mxu1 %v11584_v0  ;;  %6423 = vmatprep.subr.bf16.mxu0 %v11589_v63 }
 0x2c3   : > { %6474 = vmatprep.subr.bf16.mxu1 %v11592_v44 }
 0x2c5   : > { %6424 = vmatpush2.bf16.msra.mxu0 %v11587_v15 }
 0x2c6   : > { %6475 = vmatpush2.bf16.msra.mxu1 %v11590_v38  ;;  %6425 = vmatprep.subr.bf16.mxu0 %v11595_v23  ;;  %v11611_v23 = vld [vmem:[%s15817_s1 + $0x1ca8] ss:$16 sps:$4 sm:$0xff]  }
 0x2c7   : > { %6476 = vmatprep.subr.bf16.mxu1 %v11598_v51 }
 0x2c9   : > { %6426 = vmatpush2.bf16.msra.mxu0 %v11593_v30 }
 0x2ca   : > { %6477 = vmatpush2.bf16.msra.mxu1 %v11596_v42  ;;  %6497 = vmatprep.subr.bf16.mxu0 %v11601_v1 }
 0x2cb   : > { %6548 = vmatprep.subr.bf16.mxu1 %v11604_v29 }
 0x2cc   : > { %v4329_v47 = vpop.f32.mrf.mxu0  ;;  %6428 = vmatmul.mubr.bf16.vlgmr.msra.gmra.mxu0 %v12367_v61  ;;  %v11613_v61 = vld [vmem:[%s15817_s1 + $0x1cac] ss:$16 sps:$4 sm:$0xff]  }
 0x2cd   : > { %v4380_v28 = vpop.f32.mrf.mxu1  ;;  %6479 = vmatmul.mubr.bf16.vlgmr.msra.gmra.mxu1 %v12371_v62  ;;  %v4330_v31 = vadd.f32 %v4329_v47, %v14439_v59  ;;  %6498 = vmatpush1.bf16.msra.mxu0 %v11599_v50  ;;  %v11616_v62 = vld [vmem:[%s15817_s1 + $0x1eac] ss:$16 sps:$4 sm:$0xff]  }
 0x2ce   : > { %6549 = vmatpush1.bf16.msra.mxu1 %v11602_v2  ;;  %v4331_v53 = vpop.f32.mrf.mxu0  ;;  %6499 = vmatprep.subr.bf16.mxu0 %v11607_v39  ;;  %v11617_v39 = vld [vmem:[%s15817_s1 + $0x1c88] ss:$16 sps:$4 sm:$0xff]  }
 0x2cf   : > { %v4382_v49 = vpop.f32.mrf.mxu1  ;;  %6550 = vmatprep.subr.bf16.mxu1 %v11610_v43  ;;  %v14657_v59 = vadd.f32 %v4380_v28, %v4330_v31  ;;  %v4332_v0 = vadd.f32 %v4331_v53, %v14444_v19  ;;  %6437 = vmatprep.mubr.bf16.mxu0 %v12308_v20  ;;  %v11614_v19 = vld [vmem:[%s15817_s1 + $0x1ea8] ss:$16 sps:$4 sm:$0xff]  }
 0x2d0   : > { %6488 = vmatprep.mubr.bf16.mxu1 %v12326_v34  ;;  %v4333_v63 = vpop.f32.mrf.mxu0  ;;  %v11619_v34 = vld [vmem:[%s15817_s1 + $0x1c8c] ss:$16 sps:$4 sm:$0xff]   ;;  %v11623_v53 = vld [vmem:[%s15817_s1 + $0x1c68] ss:$16 sps:$4 sm:$0xff]  }
 0x2d1   : > { %v4384_v44 = vpop.f32.mrf.mxu1  ;;  %v14662_v15 = vadd.f32 %v4382_v49, %v4332_v0  ;;  %v4334_v38 = vadd.f32 %v4333_v63, %v14459_v36  ;;  %6500 = vmatpush1.bf16.msra.mxu0 %v11605_v41  ;;  %v11622_v36 = vld [vmem:[%s15817_s1 + $0x1e8c] ss:$16 sps:$4 sm:$0xff]   ;;  %v11632_v0 = vld [vmem:[%s15817_s1 + $0x1e48] ss:$16 sps:$4 sm:$0xff]  }
 0x2d2   : > { %6551 = vmatpush1.bf16.msra.mxu1 %v11608_v40  ;;  %v4335_v51 = vpop.f32.mrf.mxu0  ;;  %6501 = vmatprep.subr.bf16.mxu0 %v11613_v61  ;;  %v11637_v63 = vld [vmem:[%s15817_s1 + $0x1c2c] ss:$16 sps:$4 sm:$0xff]  }
 0x2d3   : > { %v4386_v20 = vpop.f32.mrf.mxu1  ;;  %6552 = vmatprep.subr.bf16.mxu1 %v11616_v62  ;;  %v14677_v30 = vadd.f32 %v4384_v44, %v4334_v38  ;;  %v4336_v42 = vadd.f32 %v4335_v51, %v14464_v46  ;;  %v11620_v46 = vld [vmem:[%s15817_s1 + $0x1e88] ss:$16 sps:$4 sm:$0xff]   ;;  %v11640_v44 = vld [vmem:[%s15817_s1 + $0x1e2c] ss:$16 sps:$4 sm:$0xff]  }
 0x2d4   : > { %v4339_v1 = vpop.f32.mrf.mxu0  ;;  %6438 = vmatmul.mubr.bf16.gmra.mxu0 %v12352_v55  ;;  %v11625_v55 = vld [vmem:[%s15817_s1 + $0x1c6c] ss:$16 sps:$4 sm:$0xff]   ;;  %v11629_v62 = vld [vmem:[%s15817_s1 + $0x1c48] ss:$16 sps:$4 sm:$0xff]  }
 0x2d5   : > { %v4390_v29 = vpop.f32.mrf.mxu1  ;;  %6489 = vmatmul.mubr.bf16.gmra.mxu1 %v12354_v57  ;;  %v14682_v50 = vadd.f32 %v4386_v20, %v4336_v42  ;;  %v4340_v2 = vadd.f32 %v4339_v1, %v14480_v12  ;;  %6502 = vmatpush1.bf16.msra.mxu0 %v11611_v23  ;;  %v11628_v57 = vld [vmem:[%s15817_s1 + $0x1e6c] ss:$16 sps:$4 sm:$0xff]   ;;  %v11635_v38 = vld [vmem:[%s15817_s1 + $0x1c28] ss:$16 sps:$4 sm:$0xff]  }
 0x2d6   : > { %6553 = vmatpush1.bf16.msra.mxu1 %v11614_v19  ;;  %v4341_v43 = vpop.f32.mrf.mxu0  ;;  %6503 = vmatprep.subr.bf16.mxu0 %v11619_v34  ;;  %v11638_v23 = vld [vmem:[%s15817_s1 + $0x1e28] ss:$16 sps:$4 sm:$0xff]   ;;  %v11643_v19 = vld [vmem:[%s15817_s1 + $0x1c0c] ss:$16 sps:$4 sm:$0xff]  }
 0x2d7   : > { %v4392_v47 = vpop.f32.mrf.mxu1  ;;  %6554 = vmatprep.subr.bf16.mxu1 %v11622_v36  ;;  %v4342_v12 = vadd.f32 %v4341_v43, %v14484_v48  ;;  %v14698_v28 = vadd.f32 %v4390_v29, %v4340_v2  ;;  %6529 = vmatprep.mubr.bf16.mxu0 %v12534_v14  ;;  %v11626_v48 = vld [vmem:[%s15817_s1 + $0x1e68] ss:$16 sps:$4 sm:$0xff]   ;;  %v11631_v14 = vld [vmem:[%s15817_s1 + $0x1c4c] ss:$16 sps:$4 sm:$0xff]  }
 0x2d8   : > { %6580 = vmatprep.mubr.bf16.mxu1 %v12542_v16  ;;  %v4343_v31 = vpop.f32.mrf.mxu0  ;;  %v11634_v16 = vld [vmem:[%s15817_s1 + $0x1e4c] ss:$16 sps:$4 sm:$0xff]   ;;  %v11641_v20 = vld [vmem:[%s15817_s1 + $0x1c08] ss:$16 sps:$4 sm:$0xff]  }
 0x2d9   : > { %v4394_v41 = vpop.f32.mrf.mxu1  ;;  %v14702_v40 = vadd.f32 %v4392_v47, %v4342_v12  ;;  %6504 = vmatpush1.bf16.msra.mxu0 %v11617_v39  ;;  %v11646_v51 = vld [vmem:[%s15817_s1 + $0x1e0c] ss:$16 sps:$4 sm:$0xff]   ;;  %v11644_v34 = vld [vmem:[%s15817_s1 + $0x1e08] ss:$16 sps:$4 sm:$0xff]  }
 0x2da   : > { %6555 = vmatpush1.bf16.msra.mxu1 %v11620_v46  ;;  %6505 = vmatprep.subr.bf16.mxu0 %v11625_v55  ;;  %v4344_v49 = vpop.f32.mrf.mxu0  ;;  %v11649_v36 = vld [vmem:[%s15817_s1 + $0x1dec] ss:$16 sps:$4 sm:$0xff]   ;;  %v11647_v1 = vld [vmem:[%s15817_s1 + $0x1de8] ss:$16 sps:$4 sm:$0xff]  }
 0x2db   : > { %6556 = vmatprep.subr.bf16.mxu1 %v11628_v57  ;;  %v4395_v61 = vpop.f32.mrf.mxu1  ;;  %v11652_v42 = vld [vmem:[%s15817_s1 + $0x1fec] ss:$16 sps:$4 sm:$0xff]   ;;  %v11650_v29 = vld [vmem:[%s15817_s1 + $0x1fe8] ss:$16 sps:$4 sm:$0xff]  }
 0x2dc   : > { %v11655_v2 = vld [vmem:[%s15817_s1 + $0x1dcc] ss:$16 sps:$4 sm:$0xff]   ;;  %v11653_v46 = vld [vmem:[%s15817_s1 + $0x1dc8] ss:$16 sps:$4 sm:$0xff]  }
 0x2dd   : > { %6506 = vmatpush1.bf16.msra.mxu0 %v11623_v53  ;;  %v11658_v39 = vld [vmem:[%s15817_s1 + $0x1fcc] ss:$16 sps:$4 sm:$0xff]   ;;  %v11656_v43 = vld [vmem:[%s15817_s1 + $0x1fc8] ss:$16 sps:$4 sm:$0xff]  }
 0x2de   : > { %6557 = vmatpush1.bf16.msra.mxu1 %v11626_v48  ;;  %6507 = vmatprep.subr.bf16.mxu0 %v11631_v14  ;;  %v11661_v47 = vld [vmem:[%s15817_s1 + $0x1dac] ss:$16 sps:$4 sm:$0xff]   ;;  %v11659_v57 = vld [vmem:[%s15817_s1 + $0x1da8] ss:$16 sps:$4 sm:$0xff]  }
 0x2df   : > { %6558 = vmatprep.subr.bf16.mxu1 %v11634_v16  ;;  %v11664_v55 = vld [vmem:[%s15817_s1 + $0x1fac] ss:$16 sps:$4 sm:$0xff]   ;;  %v11662_v12 = vld [vmem:[%s15817_s1 + $0x1fa8] ss:$16 sps:$4 sm:$0xff]  }
 0x2e0   : > { %v11667_v31 = vld [vmem:[%s15817_s1 + $0x1d8c] ss:$16 sps:$4 sm:$0xff]   ;;  %v11665_v53 = vld [vmem:[%s15817_s1 + $0x1d88] ss:$16 sps:$4 sm:$0xff]  }
 0x2e1   : > { %6508 = vmatpush1.bf16.msra.mxu0 %v11629_v62  ;;  %v11670_v41 = vld [vmem:[%s15817_s1 + $0x1f8c] ss:$16 sps:$4 sm:$0xff]   ;;  %v11668_v48 = vld [vmem:[%s15817_s1 + $0x1f88] ss:$16 sps:$4 sm:$0xff]  }
 0x2e2   : > { %6559 = vmatpush1.bf16.msra.mxu1 %v11632_v0  ;;  %6509 = vmatprep.subr.bf16.mxu0 %v11637_v63  ;;  %v11673_v14 = vld [vmem:[%s15817_s1 + $0x1d6c] ss:$16 sps:$4 sm:$0xff]   ;;  %v11671_v49 = vld [vmem:[%s15817_s1 + $0x1d68] ss:$16 sps:$4 sm:$0xff]  }
 0x2e3   : > { %6560 = vmatprep.subr.bf16.mxu1 %v11640_v44  ;;  %v11676_v16 = vld [vmem:[%s15817_s1 + $0x1f6c] ss:$16 sps:$4 sm:$0xff]   ;;  %v11674_v61 = vld [vmem:[%s15817_s1 + $0x1f68] ss:$16 sps:$4 sm:$0xff]  }
 0x2e4   : > { %v11679_v62 = vld [vmem:[%s15817_s1 + $0x1d4c] ss:$16 sps:$4 sm:$0xff]   ;;  %v11677_v63 = vld [vmem:[%s15817_s1 + $0x1d48] ss:$16 sps:$4 sm:$0xff]  }
 0x2e5   : > { %6510 = vmatpush1.bf16.msra.mxu0 %v11635_v38  ;;  %v11682_v0 = vld [vmem:[%s15817_s1 + $0x1f4c] ss:$16 sps:$4 sm:$0xff]   ;;  %v11680_v44 = vld [vmem:[%s15817_s1 + $0x1f48] ss:$16 sps:$4 sm:$0xff]  }
 0x2e6   : > { %6561 = vmatpush1.bf16.msra.mxu1 %v11638_v23  ;;  %6511 = vmatprep.subr.bf16.mxu0 %v11643_v19  ;;  %v11685_v38 = vld [vmem:[%s15817_s1 + $0x1d2c] ss:$16 sps:$4 sm:$0xff]   ;;  %v11683_v19 = vld [vmem:[%s15817_s1 + $0x1d28] ss:$16 sps:$4 sm:$0xff]  }
 0x2e7   : > { %6562 = vmatprep.subr.bf16.mxu1 %v11646_v51  ;;  %v11688_v23 = vld [vmem:[%s15817_s1 + $0x1f2c] ss:$16 sps:$4 sm:$0xff]   ;;  %v11686_v51 = vld [vmem:[%s15817_s1 + $0x1f28] ss:$16 sps:$4 sm:$0xff]  }
 0x2e9   : > { %6512 = vmatpush1.bf16.msra.mxu0 %v11641_v20  ;;  %v11691_v20 = vld [vmem:[%s15817_s1 + $0x1d0c] ss:$16 sps:$4 sm:$0xff]  }
 0x2ea   : > { %6563 = vmatpush1.bf16.msra.mxu1 %v11644_v34  ;;  %6513 = vmatprep.subr.bf16.mxu0 %v11649_v36  ;;  %v11694_v34 = vld [vmem:[%s15817_s1 + $0x1f0c] ss:$16 sps:$4 sm:$0xff]   ;;  %v11689_v36 = vld [vmem:[%s15817_s1 + $0x1d08] ss:$16 sps:$4 sm:$0xff]  }
 0x2eb   : > { %6564 = vmatprep.subr.bf16.mxu1 %v11652_v42  ;;  %v11692_v42 = vld [vmem:[%s15817_s1 + $0x1f08] ss:$16 sps:$4 sm:$0xff]  }
 0x2ed   : > { %6514 = vmatpush2.bf16.msra.mxu0 %v11647_v1  ;;  %v11697_v1 = vld [vmem:[%s15817_s1 + $0x8e4] ss:$16 sps:$4 sm:$0xff]  }
 0x2ee   : > { %6565 = vmatpush2.bf16.msra.mxu1 %v11650_v29  ;;  %6515 = vmatprep.subr.bf16.mxu0 %v11655_v2  ;;  %v11700_v29 = vld [vmem:[%s15817_s1 + $0xae4] ss:$16 sps:$4 sm:$0xff]   ;;  %v11695_v2 = vld [vmem:[%s15817_s1 + $0x8e0] ss:$16 sps:$4 sm:$0xff]  }
 0x2ef   : > { %6566 = vmatprep.subr.bf16.mxu1 %v11658_v39  ;;  %v11698_v39 = vld [vmem:[%s15817_s1 + $0xae0] ss:$16 sps:$4 sm:$0xff]  }
 0x2f1   : > { %6516 = vmatpush2.bf16.msra.mxu0 %v11653_v46  ;;  %v11703_v46 = vld [vmem:[%s15817_s1 + $0x8c4] ss:$16 sps:$4 sm:$0xff]  }
 0x2f2   : > { %6567 = vmatpush2.bf16.msra.mxu1 %v11656_v43  ;;  %6517 = vmatprep.subr.bf16.mxu0 %v11661_v47  ;;  %v11706_v43 = vld [vmem:[%s15817_s1 + $0xac4] ss:$16 sps:$4 sm:$0xff]  }
 0x2f3   : > { %6568 = vmatprep.subr.bf16.mxu1 %v11664_v55 }
 0x2f5   : > { %6518 = vmatpush2.bf16.msra.mxu0 %v11659_v57 }
 0x2f6   : > { %6569 = vmatpush2.bf16.msra.mxu1 %v11662_v12  ;;  %6519 = vmatprep.subr.bf16.mxu0 %v11667_v31  ;;  %v11701_v12 = vld [vmem:[%s15817_s1 + $0x8c0] ss:$16 sps:$4 sm:$0xff]  }
 0x2f7   : > { %6570 = vmatprep.subr.bf16.mxu1 %v11670_v41  ;;  %v11704_v31 = vld [vmem:[%s15817_s1 + $0xac0] ss:$16 sps:$4 sm:$0xff]  }
 0x2f9   : > { %6520 = vmatpush2.bf16.msra.mxu0 %v11665_v53 }
 0x2fa   : > { %6571 = vmatpush2.bf16.msra.mxu1 %v11668_v48  ;;  %6521 = vmatprep.subr.bf16.mxu0 %v11673_v14 }
 0x2fb   : > { %6572 = vmatprep.subr.bf16.mxu1 %v11676_v16 }
 0x2fd   : > { %6522 = vmatpush2.bf16.msra.mxu0 %v11671_v49 }
 0x2fe   : > { %6573 = vmatpush2.bf16.msra.mxu1 %v11674_v61  ;;  %6523 = vmatprep.subr.bf16.mxu0 %v11679_v62  ;;  %v11707_v61 = vld [vmem:[%s15817_s1 + $0x8a0] ss:$16 sps:$4 sm:$0xff]  }
 0x2ff   : > { %6574 = vmatprep.subr.bf16.mxu1 %v11682_v0  ;;  %v11710_v62 = vld [vmem:[%s15817_s1 + $0xaa0] ss:$16 sps:$4 sm:$0xff]  }
 0x301   : > { %6524 = vmatpush2.bf16.msra.mxu0 %v11677_v63 }
 0x302   : > { %6575 = vmatpush2.bf16.msra.mxu1 %v11680_v44  ;;  %6525 = vmatprep.subr.bf16.mxu0 %v11685_v38 }
 0x303   : > { %6576 = vmatprep.subr.bf16.mxu1 %v11688_v23 }
 0x305   : > { %6526 = vmatpush2.bf16.msra.mxu0 %v11683_v19  ;;  %v11713_v19 = vld [vmem:[%s15817_s1 + $0x880] ss:$16 sps:$4 sm:$0xff]  }
 0x306   : > { %6577 = vmatpush2.bf16.msra.mxu1 %v11686_v51  ;;  %6527 = vmatprep.subr.bf16.mxu0 %v11691_v20  ;;  %v11716_v51 = vld [vmem:[%s15817_s1 + $0xa80] ss:$16 sps:$4 sm:$0xff]  }
 0x307   : > { %6578 = vmatprep.subr.bf16.mxu1 %v11694_v34 }
 0x309   : > { %6528 = vmatpush2.bf16.msra.mxu0 %v11689_v36 }
 0x30a   : > { %6579 = vmatpush2.bf16.msra.mxu1 %v11692_v42  ;;  %7879 = vmatprep.subr.bf16.mxu0 %v11697_v1 }
 0x30b   : > { %7930 = vmatprep.subr.bf16.mxu1 %v11700_v29 }
 0x30c   : > { %v6225_v47 = vpop.f32.mrf.mxu0  ;;  %6530 = vmatmul.mubr.bf16.vlgmr.msra.gmra.mxu0 %v12631_v10  ;;  %v11709_v10 = vld [vmem:[%s15817_s1 + $0x8a4] ss:$16 sps:$4 sm:$0xff]  }
 0x30d   : > { %v6276_v55 = vpop.f32.mrf.mxu1  ;;  %6581 = vmatmul.mubr.bf16.vlgmr.msra.gmra.mxu1 %v12635_v11  ;;  %7880 = vmatpush1.bf16.msra.mxu0 %v11695_v2  ;;  %v11712_v11 = vld [vmem:[%s15817_s1 + $0xaa4] ss:$16 sps:$4 sm:$0xff]   ;;  %v11719_v2 = vld [vmem:[%s15817_s1 + $0x860] ss:$16 sps:$4 sm:$0xff]  }
 0x30e   : > { %v14862_v57 = vadd.f32 %v6276_v55, %v6225_v47  ;;  %7931 = vmatpush1.bf16.msra.mxu1 %v11698_v39  ;;  %v6227_v41 = vpop.f32.mrf.mxu0  ;;  %7881 = vmatprep.subr.bf16.mxu0 %v11703_v46  ;;  %v11722_v39 = vld [vmem:[%s15817_s1 + $0xa60] ss:$16 sps:$4 sm:$0xff]   ;;  %v11727_v46 = vld [vmem:[%s15817_s1 + $0x844] ss:$16 sps:$4 sm:$0xff]  }
 0x30f   : > { %v6278_v53 = vpop.f32.mrf.mxu1  ;;  %7932 = vmatprep.subr.bf16.mxu1 %v11706_v43  ;;  %6539 = vmatprep.mubr.bf16.mxu0 %v12522_v9  ;;  %v11715_v9 = vld [vmem:[%s15817_s1 + $0x884] ss:$16 sps:$4 sm:$0xff]  }
 0x310   : > { %v14876_v48 = vadd.f32 %v6278_v53, %v6227_v41  ;;  %6590 = vmatprep.mubr.bf16.mxu1 %v12530_v13  ;;  %v6229_v14 = vpop.f32.mrf.mxu0  ;;  %v11718_v13 = vld [vmem:[%s15817_s1 + $0xa84] ss:$16 sps:$4 sm:$0xff]  }
 0x311   : > { %v6280_v16 = vpop.f32.mrf.mxu1  ;;  %7882 = vmatpush1.bf16.msra.mxu0 %v11701_v12  ;;  %v11730_v43 = vld [vmem:[%s15817_s1 + $0xa44] ss:$16 sps:$4 sm:$0xff]   ;;  %v11725_v12 = vld [vmem:[%s15817_s1 + $0x840] ss:$16 sps:$4 sm:$0xff]  }
 0x312   : > { %v14880_v49 = vadd.f32 %v6280_v16, %v6229_v14  ;;  %7933 = vmatpush1.bf16.msra.mxu1 %v11704_v31  ;;  %v6231_v0 = vpop.f32.mrf.mxu0  ;;  %7883 = vmatprep.subr.bf16.mxu0 %v11709_v10  ;;  %v11728_v31 = vld [vmem:[%s15817_s1 + $0xa40] ss:$16 sps:$4 sm:$0xff]   ;;  %v11733_v41 = vld [vmem:[%s15817_s1 + $0x824] ss:$16 sps:$4 sm:$0xff]  }
 0x313   : > { %v6282_v63 = vpop.f32.mrf.mxu1  ;;  %7934 = vmatprep.subr.bf16.mxu1 %v11712_v11  ;;  %v11736_v53 = vld [vmem:[%s15817_s1 + $0xa24] ss:$16 sps:$4 sm:$0xff]   ;;  %v11731_v10 = vld [vmem:[%s15817_s1 + $0x820] ss:$16 sps:$4 sm:$0xff]  }
 0x314   : > { %v14894_v44 = vadd.f32 %v6282_v63, %v6231_v0  ;;  %6540 = vmatmul.mubr.bf16.gmra.mxu0 %v12616_v3  ;;  %v6235_v38 = vpop.f32.mrf.mxu0  ;;  %v11721_v3 = vld [vmem:[%s15817_s1 + $0x864] ss:$16 sps:$4 sm:$0xff]   ;;  %v11734_v11 = vld [vmem:[%s15817_s1 + $0xa20] ss:$16 sps:$4 sm:$0xff]  }
 0x315   : > { %6591 = vmatmul.mubr.bf16.gmra.mxu1 %v12618_v5  ;;  %v6286_v23 = vpop.f32.mrf.mxu1  ;;  %7884 = vmatpush1.bf16.msra.mxu0 %v11707_v61  ;;  %v11724_v5 = vld [vmem:[%s15817_s1 + $0xa64] ss:$16 sps:$4 sm:$0xff]   ;;  %v11737_v61 = vld [vmem:[%s15817_s1 + $0x800] ss:$16 sps:$4 sm:$0xff]  }
 0x316   : > { %7935 = vmatpush1.bf16.msra.mxu1 %v11710_v62  ;;  %v14904_v20 = vadd.f32 %v6286_v23, %v6235_v38  ;;  %7885 = vmatprep.subr.bf16.mxu0 %v11715_v9  ;;  %v6237_v34 = vpop.f32.mrf.mxu0  ;;  %v11739_v14 = vld [vmem:[%s15817_s1 + $0x804] ss:$16 sps:$4 sm:$0xff]   ;;  %v11740_v62 = vld [vmem:[%s15817_s1 + $0xa00] ss:$16 sps:$4 sm:$0xff]  }
 0x317   : > { %7936 = vmatprep.subr.bf16.mxu1 %v11718_v13  ;;  %v6288_v36 = vpop.f32.mrf.mxu1  ;;  %7911 = vmatprep.mubr.bf16.mxu0 %v13095_v25  ;;  %v11742_v16 = vld [vmem:[%s15817_s1 + $0xa04] ss:$16 sps:$4 sm:$0xff]   ;;  %v11743_v9 = vld [vmem:[%s15817_s1 + $0x9e0] ss:$16 sps:$4 sm:$0xff]  }
 0x318   : > { %v14912_v42 = vadd.f32 %v6288_v36, %v6237_v34  ;;  %7962 = vmatprep.mubr.bf16.mxu1 %v13102_v27  ;;  %v6239_v1 = vpop.f32.mrf.mxu0  ;;  %v11745_v0 = vld [vmem:[%s15817_s1 + $0x9e4] ss:$16 sps:$4 sm:$0xff]   ;;  %v11746_v13 = vld [vmem:[%s15817_s1 + $0xbe0] ss:$16 sps:$4 sm:$0xff]  }
 0x319   : > { %v6290_v29 = vpop.f32.mrf.mxu1  ;;  %7886 = vmatpush1.bf16.msra.mxu0 %v11713_v19  ;;  %v11748_v63 = vld [vmem:[%s15817_s1 + $0xbe4] ss:$16 sps:$4 sm:$0xff]   ;;  %v11749_v19 = vld [vmem:[%s15817_s1 + $0x9c0] ss:$16 sps:$4 sm:$0xff]  }
 0x31a   : > { %7937 = vmatpush1.bf16.msra.mxu1 %v11716_v51  ;;  %7887 = vmatprep.subr.bf16.mxu0 %v11721_v3  ;;  %v6240_v47 = vpop.f32.mrf.mxu0  ;;  %v11751_v38 = vld [vmem:[%s15817_s1 + $0x9c4] ss:$16 sps:$4 sm:$0xff]   ;;  %v11752_v51 = vld [vmem:[%s15817_s1 + $0xbc0] ss:$16 sps:$4 sm:$0xff]  }
 0x31b   : > { %7938 = vmatprep.subr.bf16.mxu1 %v11724_v5  ;;  %v6291_v55 = vpop.f32.mrf.mxu1  ;;  %v11754_v23 = vld [vmem:[%s15817_s1 + $0xbc4] ss:$16 sps:$4 sm:$0xff]   ;;  %v11755_v34 = vld [vmem:[%s15817_s1 + $0x9a0] ss:$16 sps:$4 sm:$0xff]  }
 0x31c   : > { %v11757_v3 = vld [vmem:[%s15817_s1 + $0x9a4] ss:$16 sps:$4 sm:$0xff]   ;;  %v11758_v36 = vld [vmem:[%s15817_s1 + $0xba0] ss:$16 sps:$4 sm:$0xff]  }
 0x31d   : > { %7888 = vmatpush1.bf16.msra.mxu0 %v11719_v2  ;;  %v11760_v5 = vld [vmem:[%s15817_s1 + $0xba4] ss:$16 sps:$4 sm:$0xff]   ;;  %v11761_v2 = vld [vmem:[%s15817_s1 + $0x980] ss:$16 sps:$4 sm:$0xff]  }
 0x31e   : > { %7939 = vmatpush1.bf16.msra.mxu1 %v11722_v39  ;;  %7889 = vmatprep.subr.bf16.mxu0 %v11727_v46  ;;  %v11763_v1 = vld [vmem:[%s15817_s1 + $0x984] ss:$16 sps:$4 sm:$0xff]   ;;  %v11764_v39 = vld [vmem:[%s15817_s1 + $0xb80] ss:$16 sps:$4 sm:$0xff]  }
 0x31f   : > { %7940 = vmatprep.subr.bf16.mxu1 %v11730_v43  ;;  %v11766_v29 = vld [vmem:[%s15817_s1 + $0xb84] ss:$16 sps:$4 sm:$0xff]   ;;  %v11767_v47 = vld [vmem:[%s15817_s1 + $0x960] ss:$16 sps:$4 sm:$0xff]  }
 0x320   : > { %v11769_v46 = vld [vmem:[%s15817_s1 + $0x964] ss:$16 sps:$4 sm:$0xff]   ;;  %v11770_v55 = vld [vmem:[%s15817_s1 + $0xb60] ss:$16 sps:$4 sm:$0xff]  }
 0x321   : > { %7890 = vmatpush1.bf16.msra.mxu0 %v11725_v12  ;;  %v11772_v43 = vld [vmem:[%s15817_s1 + $0xb64] ss:$16 sps:$4 sm:$0xff]  }
 0x322   : > { %7941 = vmatpush1.bf16.msra.mxu1 %v11728_v31  ;;  %7891 = vmatprep.subr.bf16.mxu0 %v11733_v41  ;;  %v11775_v12 = vld [vmem:[%s15817_s1 + $0x944] ss:$16 sps:$4 sm:$0xff]   ;;  %v11773_v41 = vld [vmem:[%s15817_s1 + $0x940] ss:$16 sps:$4 sm:$0xff]  }
 0x323   : > { %7942 = vmatprep.subr.bf16.mxu1 %v11736_v53  ;;  %v11778_v31 = vld [vmem:[%s15817_s1 + $0xb44] ss:$16 sps:$4 sm:$0xff]   ;;  %v11776_v53 = vld [vmem:[%s15817_s1 + $0xb40] ss:$16 sps:$4 sm:$0xff]  }
 0x325   : > { %7892 = vmatpush1.bf16.msra.mxu0 %v11731_v10  ;;  %v11781_v10 = vld [vmem:[%s15817_s1 + $0x924] ss:$16 sps:$4 sm:$0xff]  }
 0x326   : > { %7943 = vmatpush1.bf16.msra.mxu1 %v11734_v11  ;;  %7893 = vmatprep.subr.bf16.mxu0 %v11739_v14  ;;  %v11784_v11 = vld [vmem:[%s15817_s1 + $0xb24] ss:$16 sps:$4 sm:$0xff]   ;;  %v11779_v14 = vld [vmem:[%s15817_s1 + $0x920] ss:$16 sps:$4 sm:$0xff]  }
 0x327   : > { %7944 = vmatprep.subr.bf16.mxu1 %v11742_v16  ;;  %v11782_v16 = vld [vmem:[%s15817_s1 + $0xb20] ss:$16 sps:$4 sm:$0xff]  }
 0x329   : > { %7894 = vmatpush1.bf16.msra.mxu0 %v11737_v61  ;;  %v11787_v61 = vld [vmem:[%s15817_s1 + $0x904] ss:$16 sps:$4 sm:$0xff]  }
 0x32a   : > { %7945 = vmatpush1.bf16.msra.mxu1 %v11740_v62  ;;  %7895 = vmatprep.subr.bf16.mxu0 %v11745_v0  ;;  %v11790_v62 = vld [vmem:[%s15817_s1 + $0xb04] ss:$16 sps:$4 sm:$0xff]   ;;  %v11785_v0 = vld [vmem:[%s15817_s1 + $0x900] ss:$16 sps:$4 sm:$0xff]  }
 0x32b   : > { %7946 = vmatprep.subr.bf16.mxu1 %v11748_v63  ;;  %v11788_v63 = vld [vmem:[%s15817_s1 + $0xb00] ss:$16 sps:$4 sm:$0xff]  }
 0x32d   : > { %7896 = vmatpush2.bf16.msra.mxu0 %v11743_v9  ;;  %v11793_v9 = vld [vmem:[%s15817_s1 + $0xce4] ss:$16 sps:$4 sm:$0xff]  }
 0x32e   : > { %7947 = vmatpush2.bf16.msra.mxu1 %v11746_v13  ;;  %7897 = vmatprep.subr.bf16.mxu0 %v11751_v38  ;;  %v11796_v13 = vld [vmem:[%s15817_s1 + $0xee4] ss:$16 sps:$4 sm:$0xff]   ;;  %v11791_v38 = vld [vmem:[%s15817_s1 + $0xce0] ss:$16 sps:$4 sm:$0xff]  }
 0x32f   : > { %7948 = vmatprep.subr.bf16.mxu1 %v11754_v23  ;;  %v11794_v23 = vld [vmem:[%s15817_s1 + $0xee0] ss:$16 sps:$4 sm:$0xff]  }
 0x331   : > { %7898 = vmatpush2.bf16.msra.mxu0 %v11749_v19  ;;  %v11799_v19 = vld [vmem:[%s15817_s1 + $0xcc4] ss:$16 sps:$4 sm:$0xff]  }
 0x332   : > { %7949 = vmatpush2.bf16.msra.mxu1 %v11752_v51  ;;  %7899 = vmatprep.subr.bf16.mxu0 %v11757_v3  ;;  %v11802_v51 = vld [vmem:[%s15817_s1 + $0xec4] ss:$16 sps:$4 sm:$0xff]  }
 0x333   : > { %7950 = vmatprep.subr.bf16.mxu1 %v11760_v5 }
 0x335   : > { %7900 = vmatpush2.bf16.msra.mxu0 %v11755_v34 }
 0x336   : > { %7951 = vmatpush2.bf16.msra.mxu1 %v11758_v36  ;;  %7901 = vmatprep.subr.bf16.mxu0 %v11763_v1  ;;  %v11797_v36 = vld [vmem:[%s15817_s1 + $0xcc0] ss:$16 sps:$4 sm:$0xff]  }
 0x337   : > { %7952 = vmatprep.subr.bf16.mxu1 %v11766_v29  ;;  %v11800_v1 = vld [vmem:[%s15817_s1 + $0xec0] ss:$16 sps:$4 sm:$0xff]  }
 0x339   : > { %7902 = vmatpush2.bf16.msra.mxu0 %v11761_v2 }
 0x33a   : > { %7953 = vmatpush2.bf16.msra.mxu1 %v11764_v39  ;;  %7903 = vmatprep.subr.bf16.mxu0 %v11769_v46  ;;  %v11805_v39 = vld [vmem:[%s15817_s1 + $0xca4] ss:$16 sps:$4 sm:$0xff]  }
 0x33b   : > { %7954 = vmatprep.subr.bf16.mxu1 %v11772_v43 }
 0x33d   : > { %7904 = vmatpush2.bf16.msra.mxu0 %v11767_v47 }
 0x33e   : > { %7955 = vmatpush2.bf16.msra.mxu1 %v11770_v55  ;;  %7905 = vmatprep.subr.bf16.mxu0 %v11775_v12 }
 0x33f   : > { %7956 = vmatprep.subr.bf16.mxu1 %v11778_v31 }
 0x341   : > { %7906 = vmatpush2.bf16.msra.mxu0 %v11773_v41  ;;  %v11803_v41 = vld [vmem:[%s15817_s1 + $0xca0] ss:$16 sps:$4 sm:$0xff]  }
 0x342   : > { %7957 = vmatpush2.bf16.msra.mxu1 %v11776_v53  ;;  %7907 = vmatprep.subr.bf16.mxu0 %v11781_v10 }
 0x343   : > { %7958 = vmatprep.subr.bf16.mxu1 %v11784_v11  ;;  %v11811_v11 = vld [vmem:[%s15817_s1 + $0xc84] ss:$16 sps:$4 sm:$0xff]  }
 0x345   : > { %7908 = vmatpush2.bf16.msra.mxu0 %v11779_v14 }
 0x346   : > { %7959 = vmatpush2.bf16.msra.mxu1 %v11782_v16  ;;  %7909 = vmatprep.subr.bf16.mxu0 %v11787_v61 }
 0x347   : > { %7960 = vmatprep.subr.bf16.mxu1 %v11790_v62 }
 0x349   : > { %7910 = vmatpush2.bf16.msra.mxu0 %v11785_v0 }
 0x34a   : > { %7961 = vmatpush2.bf16.msra.mxu1 %v11788_v63  ;;  %7981 = vmatprep.subr.bf16.mxu0 %v11793_v9  ;;  %v11809_v9 = vld [vmem:[%s15817_s1 + $0xc80] ss:$16 sps:$4 sm:$0xff]  }
 0x34b   : > { %8032 = vmatprep.subr.bf16.mxu1 %v11796_v13 }
 0x34c   : > { %v6327_v3 = vpop.f32.mrf.mxu0  ;;  %7912 = vmatmul.mubr.bf16.vlgmr.msra.gmra.mxu0 %v13278_v6 }
 0x34d   : > { %v6378_v5 = vpop.f32.mrf.mxu1  ;;  %7963 = vmatmul.mubr.bf16.vlgmr.msra.gmra.mxu1 %v13282_v8  ;;  %v6328_v34 = vadd.f32 %v6327_v3, %v14862_v57  ;;  %7982 = vmatpush1.bf16.msra.mxu0 %v11791_v38  ;;  %v11808_v57 = vld [vmem:[%s15817_s1 + $0xea4] ss:$16 sps:$4 sm:$0xff]  }
 0x34e   : > { %8033 = vmatpush1.bf16.msra.mxu1 %v11794_v23  ;;  %v6329_v29 = vpop.f32.mrf.mxu0  ;;  %7983 = vmatprep.subr.bf16.mxu0 %v11799_v19  ;;  %v11817_v23 = vld [vmem:[%s15817_s1 + $0xc64] ss:$16 sps:$4 sm:$0xff]  }
 0x34f   : > { %v6380_v2 = vpop.f32.mrf.mxu1  ;;  %8034 = vmatprep.subr.bf16.mxu1 %v11802_v51  ;;  %v15087_v46 = vadd.f32 %v6378_v5, %v6328_v34  ;;  %v6330_v43 = vadd.f32 %v6329_v29, %v14876_v48  ;;  %7921 = vmatprep.mubr.bf16.mxu0 %v13296_v24  ;;  %v11806_v48 = vld [vmem:[%s15817_s1 + $0xea0] ss:$16 sps:$4 sm:$0xff]   ;;  %v11826_v29 = vld [vmem:[%s15817_s1 + $0xe44] ss:$16 sps:$4 sm:$0xff]  }
 0x350   : > { %7972 = vmatprep.mubr.bf16.mxu1 %v13298_v26  ;;  %v6331_v47 = vpop.f32.mrf.mxu0 }
 0x351   : > { %v6382_v55 = vpop.f32.mrf.mxu1  ;;  %v15092_v12 = vadd.f32 %v6380_v2, %v6330_v43  ;;  %v6332_v31 = vadd.f32 %v6331_v47, %v14880_v49  ;;  %7984 = vmatpush1.bf16.msra.mxu0 %v11797_v36  ;;  %v11814_v49 = vld [vmem:[%s15817_s1 + $0xe84] ss:$16 sps:$4 sm:$0xff]   ;;  %v11815_v36 = vld [vmem:[%s15817_s1 + $0xc60] ss:$16 sps:$4 sm:$0xff]  }
 0x352   : > { %8035 = vmatpush1.bf16.msra.mxu1 %v11800_v1  ;;  %v6333_v53 = vpop.f32.mrf.mxu0  ;;  %7985 = vmatprep.subr.bf16.mxu0 %v11805_v39  ;;  %v11823_v1 = vld [vmem:[%s15817_s1 + $0xc44] ss:$16 sps:$4 sm:$0xff]   ;;  %v11821_v43 = vld [vmem:[%s15817_s1 + $0xc40] ss:$16 sps:$4 sm:$0xff]  }
 0x353   : > { %v6384_v10 = vpop.f32.mrf.mxu1  ;;  %8036 = vmatprep.subr.bf16.mxu1 %v11808_v57  ;;  %v15107_v14 = vadd.f32 %v6382_v55, %v6332_v31  ;;  %v6334_v16 = vadd.f32 %v6333_v53, %v14894_v44  ;;  %v11812_v44 = vld [vmem:[%s15817_s1 + $0xe80] ss:$16 sps:$4 sm:$0xff]   ;;  %v12091_v57 = vmov 0   ;;  %v11829_v31 = vld [vmem:[%s15817_s1 + $0xc24] ss:$16 sps:$4 sm:$0xff]  }
 0x354   : > { %v6337_v61 = vpop.f32.mrf.mxu0  ;;  %7922 = vmatmul.mubr.bf16.gmra.mxu0 %v13326_v4  ;;  %10533 = vset.pattern.permute.xlu0 %v12091_v57  ;;  %v11824_v47 = vld [vmem:[%s15817_s1 + $0xe40] ss:$16 sps:$4 sm:$0xff]  }
 0x355   : > { %v6388_v62 = vpop.f32.mrf.mxu1  ;;  %7973 = vmatmul.mubr.bf16.gmra.mxu1 %v13328_v45  ;;  %v15112_v0 = vadd.f32 %v6384_v10, %v6334_v16  ;;  %v6338_v63 = vadd.f32 %v6337_v61, %v14904_v20  ;;  %7986 = vmatpush1.bf16.msra.mxu0 %v11803_v41  ;;  %v11820_v20 = vld [vmem:[%s15817_s1 + $0xe64] ss:$16 sps:$4 sm:$0xff]   ;;  %v11830_v53 = vld [vmem:[%s15817_s1 + $0xe20] ss:$16 sps:$4 sm:$0xff]  }
 0x356   : > { %8037 = vmatpush1.bf16.msra.mxu1 %v11806_v48  ;;  %v6339_v13 = vpop.f32.mrf.mxu0  ;;  %7987 = vmatprep.subr.bf16.mxu0 %v11811_v11  ;;  %v8357_v55 = vld [vmem:[%s15818_s2] sm:$0xff]  ;;  %v8359_v10 = vld [vmem:[%s15818_s2 + $0x10] sm:$0xf]  ;;  %v8358_v11 = vld [vmem:[%s15818_s2 + $0x8] sm:$0xff] }
 0x357   : > { %v6390_v38 = vpop.f32.mrf.mxu1  ;;  %8038 = vmatprep.subr.bf16.mxu1 %v11814_v49  ;;  %v6340_v19 = vadd.f32 %v6339_v13, %v14912_v42  ;;  %v15128_v51 = vadd.f32 %v6388_v62, %v6338_v63  ;;  %8013 = vmatprep.mubr.bf16.mxu0 %v13356_v56  ;;  %v11818_v42 = vld [vmem:[%s15817_s1 + $0xe60] ss:$16 sps:$4 sm:$0xff]   ;;  %v11832_v41 = vld [vmem:[%s15817_s1 + $0xe24] ss:$16 sps:$4 sm:$0xff]  }
 0x358   : > { %8064 = vmatprep.mubr.bf16.mxu1 %v13363_v60  ;;  %v6341_v3 = vpop.f32.mrf.mxu0  ;;  %10534 = vset.pattern.permute.xlu1 %v12091_v57  ;;  %v11827_v48 = vld [vmem:[%s15817_s1 + $0xc20] ss:$16 sps:$4 sm:$0xff]   ;;  %v11835_v49 = vld [vmem:[%s15817_s1 + $0xc04] ss:$16 sps:$4 sm:$0xff]  }
 0x359   : > { %v6392_v5 = vpop.f32.mrf.mxu1  ;;  %v15132_v34 = vadd.f32 %v6390_v38, %v6340_v19  ;;  %7988 = vmatpush1.bf16.msra.mxu0 %v11809_v9  ;;  %8362 = vperm.xlu0 %10533, %v8357_v55   ;;  %v11838_v16 = vld [vmem:[%s15817_s1 + $0xe04] ss:$16 sps:$4 sm:$0xff]   ;;  %v11833_v61 = vld [vmem:[%s15817_s1 + $0xc00] ss:$16 sps:$4 sm:$0xff]  }
 0x35a   : > { %8039 = vmatpush1.bf16.msra.mxu1 %v11812_v44  ;;  %7989 = vmatprep.subr.bf16.mxu0 %v11817_v23  ;;  %v6342_v2 = vpop.f32.mrf.mxu0  ;;  %v11836_v62 = vld [vmem:[%s15817_s1 + $0xe00] ss:$16 sps:$4 sm:$0xff]   ;;  %v11841_v63 = vld [vmem:[%s15817_s1 + $0xde4] ss:$16 sps:$4 sm:$0xff]  }
 0x35b   : > { %8040 = vmatprep.subr.bf16.mxu1 %v11820_v20  ;;  %v6393_v39 = vpop.f32.mrf.mxu1  ;;  %8372 = vperm.xlu1 %10534, %v8359_v10   ;;  %v11844_v9 = vld [vmem:[%s15817_s1 + $0xfe4] ss:$16 sps:$4 sm:$0xff]   ;;  %v11839_v44 = vld [vmem:[%s15817_s1 + $0xde0] ss:$16 sps:$4 sm:$0xff]  }
 0x35c   : > { %v11842_v13 = vld [vmem:[%s15817_s1 + $0xfe0] ss:$16 sps:$4 sm:$0xff]   ;;  %v11847_v38 = vld [vmem:[%s15817_s1 + $0xdc4] ss:$16 sps:$4 sm:$0xff]  }
 0x35d   : > { %7990 = vmatpush1.bf16.msra.mxu0 %v11815_v36  ;;  %8367 = vperm.xlu0 %10533, %v8358_v11   ;;  %v11850_v23 = vld [vmem:[%s15817_s1 + $0xfc4] ss:$16 sps:$4 sm:$0xff]   ;;  %v11845_v20 = vld [vmem:[%s15817_s1 + $0xdc0] ss:$16 sps:$4 sm:$0xff]  }
 0x35e   : > { %8041 = vmatpush1.bf16.msra.mxu1 %v11818_v42  ;;  %7991 = vmatprep.subr.bf16.mxu0 %v11823_v1  ;;  %v11848_v19 = vld [vmem:[%s15817_s1 + $0xfc0] ss:$16 sps:$4 sm:$0xff]   ;;  %v11853_v3 = vld [vmem:[%s15817_s1 + $0xda4] ss:$16 sps:$4 sm:$0xff]  }
 0x35f   : > { %8042 = vmatprep.subr.bf16.mxu1 %v11826_v29  ;;  %v11856_v5 = vld [vmem:[%s15817_s1 + $0xfa4] ss:$16 sps:$4 sm:$0xff]   ;;  %v11851_v36 = vld [vmem:[%s15817_s1 + $0xda0] ss:$16 sps:$4 sm:$0xff]  }
 0x360   : > { %v11854_v42 = vld [vmem:[%s15817_s1 + $0xfa0] ss:$16 sps:$4 sm:$0xff]   ;;  %v11859_v1 = vld [vmem:[%s15817_s1 + $0xd84] ss:$16 sps:$4 sm:$0xff]  }
 0x361   : > { %7992 = vmatpush1.bf16.msra.mxu0 %v11821_v43  ;;  %v11862_v29 = vld [vmem:[%s15817_s1 + $0xf84] ss:$16 sps:$4 sm:$0xff]   ;;  %v11857_v2 = vld [vmem:[%s15817_s1 + $0xd80] ss:$16 sps:$4 sm:$0xff]  }
 0x362   : > { %8043 = vmatpush1.bf16.msra.mxu1 %v11824_v47  ;;  %7993 = vmatprep.subr.bf16.mxu0 %v11829_v31  ;;  %v11860_v39 = vld [vmem:[%s15817_s1 + $0xf80] ss:$16 sps:$4 sm:$0xff]   ;;  %v11865_v57 = vld [vmem:[%s15817_s1 + $0xd64] ss:$16 sps:$4 sm:$0xff]  }
 0x363   : > { %8044 = vmatprep.subr.bf16.mxu1 %v11832_v41  ;;  %v11868_v43 = vld [vmem:[%s15817_s1 + $0xf64] ss:$16 sps:$4 sm:$0xff]   ;;  %v11863_v47 = vld [vmem:[%s15817_s1 + $0xd60] ss:$16 sps:$4 sm:$0xff]  }
 0x364   : > { %v11866_v55 = vld [vmem:[%s15817_s1 + $0xf60] ss:$16 sps:$4 sm:$0xff]   ;;  %v11871_v31 = vld [vmem:[%s15817_s1 + $0xd44] ss:$16 sps:$4 sm:$0xff]  }
 0x365   : > { %7994 = vmatpush1.bf16.msra.mxu0 %v11827_v48  ;;  %v11874_v41 = vld [vmem:[%s15817_s1 + $0xf44] ss:$16 sps:$4 sm:$0xff]   ;;  %v11869_v48 = vld [vmem:[%s15817_s1 + $0xd40] ss:$16 sps:$4 sm:$0xff]  }
 0x366   : > { %8045 = vmatpush1.bf16.msra.mxu1 %v11830_v53  ;;  %7995 = vmatprep.subr.bf16.mxu0 %v11835_v49  ;;  %v11872_v53 = vld [vmem:[%s15817_s1 + $0xf40] ss:$16 sps:$4 sm:$0xff]   ;;  %v11877_v10 = vld [vmem:[%s15817_s1 + $0xd24] ss:$16 sps:$4 sm:$0xff]  }
 0x367   : > { %8046 = vmatprep.subr.bf16.mxu1 %v11838_v16  ;;  %v11880_v11 = vld [vmem:[%s15817_s1 + $0xf24] ss:$16 sps:$4 sm:$0xff]   ;;  %v11875_v49 = vld [vmem:[%s15817_s1 + $0xd20] ss:$16 sps:$4 sm:$0xff]  }
 0x368   : > { %v11878_v16 = vld [vmem:[%s15817_s1 + $0xf20] ss:$16 sps:$4 sm:$0xff]  }
 0x369   : > { %7996 = vmatpush1.bf16.msra.mxu0 %v11833_v61  ;;  %v11883_v61 = vld [vmem:[%s15817_s1 + $0xd04] ss:$16 sps:$4 sm:$0xff]  }
 0x36a   : > { %8047 = vmatpush1.bf16.msra.mxu1 %v11836_v62  ;;  %7997 = vmatprep.subr.bf16.mxu0 %v11841_v63  ;;  %v11886_v62 = vld [vmem:[%s15817_s1 + $0xf04] ss:$16 sps:$4 sm:$0xff]   ;;  %v11881_v63 = vld [vmem:[%s15817_s1 + $0xd00] ss:$16 sps:$4 sm:$0xff]  }
 0x36b   : > { %8048 = vmatprep.subr.bf16.mxu1 %v11844_v9  ;;  %v11884_v9 = vld [vmem:[%s15817_s1 + $0xf00] ss:$16 sps:$4 sm:$0xff]  }
 0x36d   : > { %7998 = vmatpush2.bf16.msra.mxu0 %v11839_v44  ;;  %v11889_v44 = vld [vmem:[%s15817_s1 + $0x8ec] ss:$16 sps:$4 sm:$0xff]  }
 0x36e   : > { %8049 = vmatpush2.bf16.msra.mxu1 %v11842_v13  ;;  %7999 = vmatprep.subr.bf16.mxu0 %v11847_v38  ;;  %v11892_v13 = vld [vmem:[%s15817_s1 + $0xaec] ss:$16 sps:$4 sm:$0xff]   ;;  %v11887_v38 = vld [vmem:[%s15817_s1 + $0x8e8] ss:$16 sps:$4 sm:$0xff]  }
 0x36f   : > { %8050 = vmatprep.subr.bf16.mxu1 %v11850_v23  ;;  %v11890_v23 = vld [vmem:[%s15817_s1 + $0xae8] ss:$16 sps:$4 sm:$0xff]  }
 0x371   : > { %8000 = vmatpush2.bf16.msra.mxu0 %v11845_v20  ;;  %v11895_v20 = vld [vmem:[%s15817_s1 + $0x8cc] ss:$16 sps:$4 sm:$0xff]  }
 0x372   : > { %8051 = vmatpush2.bf16.msra.mxu1 %v11848_v19  ;;  %8001 = vmatprep.subr.bf16.mxu0 %v11853_v3  ;;  %v11898_v19 = vld [vmem:[%s15817_s1 + $0xacc] ss:$16 sps:$4 sm:$0xff]  }
 0x373   : > { %8052 = vmatprep.subr.bf16.mxu1 %v11856_v5 }
 0x375   : > { %8002 = vmatpush2.bf16.msra.mxu0 %v11851_v36 }
 0x376   : > { %8053 = vmatpush2.bf16.msra.mxu1 %v11854_v42  ;;  %8003 = vmatprep.subr.bf16.mxu0 %v11859_v1  ;;  %v11893_v42 = vld [vmem:[%s15817_s1 + $0x8c8] ss:$16 sps:$4 sm:$0xff]  }
 0x377   : > { %8054 = vmatprep.subr.bf16.mxu1 %v11862_v29  ;;  %v11896_v1 = vld [vmem:[%s15817_s1 + $0xac8] ss:$16 sps:$4 sm:$0xff]  }
 0x379   : > { %8004 = vmatpush2.bf16.msra.mxu0 %v11857_v2 }
 0x37a   : > { %8055 = vmatpush2.bf16.msra.mxu1 %v11860_v39  ;;  %8005 = vmatprep.subr.bf16.mxu0 %v11865_v57  ;;  %v11901_v39 = vld [vmem:[%s15817_s1 + $0x8ac] ss:$16 sps:$4 sm:$0xff]  }
 0x37b   : > { %8056 = vmatprep.subr.bf16.mxu1 %v11868_v43  ;;  %v11904_v57 = vld [vmem:[%s15817_s1 + $0xaac] ss:$16 sps:$4 sm:$0xff]  }
 0x37d   : > { %8006 = vmatpush2.bf16.msra.mxu0 %v11863_v47 }
 0x37e   : > { %8057 = vmatpush2.bf16.msra.mxu1 %v11866_v55  ;;  %8007 = vmatprep.subr.bf16.mxu0 %v11871_v31 }
 0x37f   : > { %8058 = vmatprep.subr.bf16.mxu1 %v11874_v41  ;;  %v11899_v41 = vld [vmem:[%s15817_s1 + $0x8a8] ss:$16 sps:$4 sm:$0xff]  }
 0x381   : > { %8008 = vmatpush2.bf16.msra.mxu0 %v11869_v48  ;;  %v11902_v48 = vld [vmem:[%s15817_s1 + $0xaa8] ss:$16 sps:$4 sm:$0xff]  }
 0x382   : > { %8059 = vmatpush2.bf16.msra.mxu1 %v11872_v53  ;;  %8009 = vmatprep.subr.bf16.mxu0 %v11877_v10 }
 0x383   : > { %8060 = vmatprep.subr.bf16.mxu1 %v11880_v11  ;;  %v11907_v11 = vld [vmem:[%s15817_s1 + $0x88c] ss:$16 sps:$4 sm:$0xff]  }
 0x385   : > { %8010 = vmatpush2.bf16.msra.mxu0 %v11875_v49  ;;  %v11910_v49 = vld [vmem:[%s15817_s1 + $0xa8c] ss:$16 sps:$4 sm:$0xff]  }
 0x386   : > { %8061 = vmatpush2.bf16.msra.mxu1 %v11878_v16  ;;  %8011 = vmatprep.subr.bf16.mxu0 %v11883_v61 }
 0x387   : > { %8062 = vmatprep.subr.bf16.mxu1 %v11886_v62 }
 0x389   : > { %8012 = vmatpush2.bf16.msra.mxu0 %v11881_v63  ;;  %v11905_v63 = vld [vmem:[%s15817_s1 + $0x888] ss:$16 sps:$4 sm:$0xff]  }
 0x38a   : > { %8063 = vmatpush2.bf16.msra.mxu1 %v11884_v9  ;;  %8083 = vmatprep.subr.bf16.mxu0 %v11889_v44  ;;  %v11908_v9 = vld [vmem:[%s15817_s1 + $0xa88] ss:$16 sps:$4 sm:$0xff]  }
 0x38b   : > { %8134 = vmatprep.subr.bf16.mxu1 %v11892_v13  ;;  %v11913_v13 = vld [vmem:[%s15817_s1 + $0x86c] ss:$16 sps:$4 sm:$0xff]  }
 0x38c   : > { %v6429_v3 = vpop.f32.mrf.mxu0  ;;  %8014 = vmatmul.mubr.bf16.vlgmr.msra.gmra.mxu0 %v13535_v35 }
 0x38d   : > { %v6480_v5 = vpop.f32.mrf.mxu1  ;;  %8065 = vmatmul.mubr.bf16.vlgmr.msra.gmra.mxu1 %v13539_v37  ;;  %8084 = vmatpush1.bf16.msra.mxu0 %v11887_v38  ;;  %v11916_v38 = vld [vmem:[%s15817_s1 + $0xa6c] ss:$16 sps:$4 sm:$0xff]  }
 0x38e   : > { %v15301_v36 = vadd.f32 %v6480_v5, %v6429_v3  ;;  %8135 = vmatpush1.bf16.msra.mxu1 %v11890_v23  ;;  %v6431_v29 = vpop.f32.mrf.mxu0  ;;  %8085 = vmatprep.subr.bf16.mxu0 %v11895_v20 }
 0x38f   : > { %v6482_v2 = vpop.f32.mrf.mxu1  ;;  %8136 = vmatprep.subr.bf16.mxu1 %v11898_v19  ;;  %8023 = vmatprep.mubr.bf16.mxu0 %v13553_v54 }
 0x390   : > { %v15315_v43 = vadd.f32 %v6482_v2, %v6431_v29  ;;  %8074 = vmatprep.mubr.bf16.mxu1 %v13555_v58  ;;  %v6433_v47 = vpop.f32.mrf.mxu0 }
 0x391   : > { %v6484_v55 = vpop.f32.mrf.mxu1  ;;  %8086 = vmatpush1.bf16.msra.mxu0 %v11893_v42  ;;  %v11911_v42 = vld [vmem:[%s15817_s1 + $0x868] ss:$16 sps:$4 sm:$0xff]  }
 0x392   : > { %v15319_v31 = vadd.f32 %v6484_v55, %v6433_v47  ;;  %8137 = vmatpush1.bf16.msra.mxu1 %v11896_v1  ;;  %v6435_v53 = vpop.f32.mrf.mxu0  ;;  %8087 = vmatprep.subr.bf16.mxu0 %v11901_v39  ;;  %v11914_v1 = vld [vmem:[%s15817_s1 + $0xa68] ss:$16 sps:$4 sm:$0xff]   ;;  %v11925_v47 = vld [vmem:[%s15817_s1 + $0x82c] ss:$16 sps:$4 sm:$0xff]  }
 0x393   : > { %v6486_v10 = vpop.f32.mrf.mxu1  ;;  %8138 = vmatprep.subr.bf16.mxu1 %v11904_v57  ;;  %v11917_v39 = vld [vmem:[%s15817_s1 + $0x848] ss:$16 sps:$4 sm:$0xff]   ;;  %v11928_v55 = vld [vmem:[%s15817_s1 + $0xa2c] ss:$16 sps:$4 sm:$0xff]  }
 0x394   : > { %v15333_v16 = vadd.f32 %v6486_v10, %v6435_v53  ;;  %8024 = vmatmul.mubr.bf16.gmra.mxu0 %v13577_v18  ;;  %v6439_v61 = vpop.f32.mrf.mxu0  ;;  %v11920_v57 = vld [vmem:[%s15817_s1 + $0xa48] ss:$16 sps:$4 sm:$0xff]   ;;  %v11931_v53 = vld [vmem:[%s15817_s1 + $0x80c] ss:$16 sps:$4 sm:$0xff]  }
 0x395   : > { %8075 = vmatmul.mubr.bf16.gmra.mxu1 %v13579_v7  ;;  %v6490_v62 = vpop.f32.mrf.mxu1  ;;  %8088 = vmatpush1.bf16.msra.mxu0 %v11899_v41  ;;  %v11923_v41 = vld [vmem:[%s15817_s1 + $0x828] ss:$16 sps:$4 sm:$0xff]   ;;  %v11934_v10 = vld [vmem:[%s15817_s1 + $0xa0c] ss:$16 sps:$4 sm:$0xff]  }
 0x396   : > { %8139 = vmatpush1.bf16.msra.mxu1 %v11902_v48  ;;  %v15343_v44 = vadd.f32 %v6490_v62, %v6439_v61  ;;  %8089 = vmatprep.subr.bf16.mxu0 %v11907_v11  ;;  %v6441_v23 = vpop.f32.mrf.mxu0  ;;  %v11926_v48 = vld [vmem:[%s15817_s1 + $0xa28] ss:$16 sps:$4 sm:$0xff]   ;;  %v11937_v61 = vld [vmem:[%s15817_s1 + $0x9ec] ss:$16 sps:$4 sm:$0xff]  }
 0x397   : > { %8140 = vmatprep.subr.bf16.mxu1 %v11910_v49  ;;  %v6492_v20 = vpop.f32.mrf.mxu1  ;;  %8115 = vmatprep.mubr.bf16.mxu0 %v13095_v25  ;;  %v11919_v25 = vld [vmem:[%s15817_s1 + $0x84c] ss:$16 sps:$4 sm:$0xff]   ;;  %v11929_v11 = vld [vmem:[%s15817_s1 + $0x808] ss:$16 sps:$4 sm:$0xff]  }
 0x398   : > { %v15351_v19 = vadd.f32 %v6492_v20, %v6441_v23  ;;  %8166 = vmatprep.mubr.bf16.mxu1 %v13102_v27  ;;  %v6443_v3 = vpop.f32.mrf.mxu0  ;;  %v11922_v27 = vld [vmem:[%s15817_s1 + $0xa4c] ss:$16 sps:$4 sm:$0xff]   ;;  %v11932_v49 = vld [vmem:[%s15817_s1 + $0xa08] ss:$16 sps:$4 sm:$0xff]  }
 0x399   : > { %v6494_v5 = vpop.f32.mrf.mxu1  ;;  %8090 = vmatpush1.bf16.msra.mxu0 %v11905_v63  ;;  %v11940_v62 = vld [vmem:[%s15817_s1 + $0xbec] ss:$16 sps:$4 sm:$0xff]   ;;  %v11935_v63 = vld [vmem:[%s15817_s1 + $0x9e8] ss:$16 sps:$4 sm:$0xff]  }
 0x39a   : > { %8141 = vmatpush1.bf16.msra.mxu1 %v11908_v9  ;;  %8091 = vmatprep.subr.bf16.mxu0 %v11913_v13  ;;  %v6444_v29 = vpop.f32.mrf.mxu0  ;;  %v11938_v9 = vld [vmem:[%s15817_s1 + $0xbe8] ss:$16 sps:$4 sm:$0xff]   ;;  %v11943_v13 = vld [vmem:[%s15817_s1 + $0x9cc] ss:$16 sps:$4 sm:$0xff]  }
 0x39b   : > { %8142 = vmatprep.subr.bf16.mxu1 %v11916_v38  ;;  %v6495_v2 = vpop.f32.mrf.mxu1  ;;  %v11946_v38 = vld [vmem:[%s15817_s1 + $0xbcc] ss:$16 sps:$4 sm:$0xff]   ;;  %v11941_v23 = vld [vmem:[%s15817_s1 + $0x9c8] ss:$16 sps:$4 sm:$0xff]  }
 0x39c   : > { %v11944_v20 = vld [vmem:[%s15817_s1 + $0xbc8] ss:$16 sps:$4 sm:$0xff]   ;;  %v11949_v3 = vld [vmem:[%s15817_s1 + $0x9ac] ss:$16 sps:$4 sm:$0xff]  }
 0x39d   : > { %8092 = vmatpush1.bf16.msra.mxu0 %v11911_v42  ;;  %v11952_v5 = vld [vmem:[%s15817_s1 + $0xbac] ss:$16 sps:$4 sm:$0xff]   ;;  %v11947_v42 = vld [vmem:[%s15817_s1 + $0x9a8] ss:$16 sps:$4 sm:$0xff]  }
 0x39e   : > { %8143 = vmatpush1.bf16.msra.mxu1 %v11914_v1  ;;  %8093 = vmatprep.subr.bf16.mxu0 %v11919_v25  ;;  %v11950_v1 = vld [vmem:[%s15817_s1 + $0xba8] ss:$16 sps:$4 sm:$0xff]   ;;  %v11955_v25 = vld [vmem:[%s15817_s1 + $0x98c] ss:$16 sps:$4 sm:$0xff]  }
 0x39f   : > { %8144 = vmatprep.subr.bf16.mxu1 %v11922_v27  ;;  %v11958_v27 = vld [vmem:[%s15817_s1 + $0xb8c] ss:$16 sps:$4 sm:$0xff]   ;;  %v11953_v29 = vld [vmem:[%s15817_s1 + $0x988] ss:$16 sps:$4 sm:$0xff]  }
 0x3a0   : > { %v11956_v2 = vld [vmem:[%s15817_s1 + $0xb88] ss:$16 sps:$4 sm:$0xff]  }
 0x3a1   : > { %8094 = vmatpush1.bf16.msra.mxu0 %v11917_v39  ;;  %v11961_v39 = vld [vmem:[%s15817_s1 + $0x96c] ss:$16 sps:$4 sm:$0xff]  }
 0x3a2   : > { %8145 = vmatpush1.bf16.msra.mxu1 %v11920_v57  ;;  %8095 = vmatprep.subr.bf16.mxu0 %v11925_v47  ;;  %v11964_v57 = vld [vmem:[%s15817_s1 + $0xb6c] ss:$16 sps:$4 sm:$0xff]   ;;  %v11959_v47 = vld [vmem:[%s15817_s1 + $0x968] ss:$16 sps:$4 sm:$0xff]  }
 0x3a3   : > { %8146 = vmatprep.subr.bf16.mxu1 %v11928_v55  ;;  %v11962_v55 = vld [vmem:[%s15817_s1 + $0xb68] ss:$16 sps:$4 sm:$0xff]  }
 0x3a5   : > { %8096 = vmatpush1.bf16.msra.mxu0 %v11923_v41  ;;  %v11967_v41 = vld [vmem:[%s15817_s1 + $0x94c] ss:$16 sps:$4 sm:$0xff]  }
 0x3a6   : > { %8147 = vmatpush1.bf16.msra.mxu1 %v11926_v48  ;;  %8097 = vmatprep.subr.bf16.mxu0 %v11931_v53  ;;  %v11970_v48 = vld [vmem:[%s15817_s1 + $0xb4c] ss:$16 sps:$4 sm:$0xff]   ;;  %v11965_v53 = vld [vmem:[%s15817_s1 + $0x948] ss:$16 sps:$4 sm:$0xff]  }
 0x3a7   : > { %8148 = vmatprep.subr.bf16.mxu1 %v11934_v10  ;;  %v11968_v10 = vld [vmem:[%s15817_s1 + $0xb48] ss:$16 sps:$4 sm:$0xff]  }
 0x3a9   : > { %8098 = vmatpush1.bf16.msra.mxu0 %v11929_v11  ;;  %v11973_v11 = vld [vmem:[%s15817_s1 + $0x92c] ss:$16 sps:$4 sm:$0xff]  }
 0x3aa   : > { %8149 = vmatpush1.bf16.msra.mxu1 %v11932_v49  ;;  %8099 = vmatprep.subr.bf16.mxu0 %v11937_v61  ;;  %v11976_v49 = vld [vmem:[%s15817_s1 + $0xb2c] ss:$16 sps:$4 sm:$0xff]   ;;  %v11971_v61 = vld [vmem:[%s15817_s1 + $0x928] ss:$16 sps:$4 sm:$0xff]  }
 0x3ab   : > { %8150 = vmatprep.subr.bf16.mxu1 %v11940_v62  ;;  %v11974_v62 = vld [vmem:[%s15817_s1 + $0xb28] ss:$16 sps:$4 sm:$0xff]  }
 0x3ad   : > { %8100 = vmatpush2.bf16.msra.mxu0 %v11935_v63  ;;  %v11979_v63 = vld [vmem:[%s15817_s1 + $0x90c] ss:$16 sps:$4 sm:$0xff]  }
 0x3ae   : > { %8151 = vmatpush2.bf16.msra.mxu1 %v11938_v9  ;;  %8101 = vmatprep.subr.bf16.mxu0 %v11943_v13  ;;  %v11982_v9 = vld [vmem:[%s15817_s1 + $0xb0c] ss:$16 sps:$4 sm:$0xff]   ;;  %v11977_v13 = vld [vmem:[%s15817_s1 + $0x908] ss:$16 sps:$4 sm:$0xff]  }
 0x3af   : > { %8152 = vmatprep.subr.bf16.mxu1 %v11946_v38  ;;  %v11980_v38 = vld [vmem:[%s15817_s1 + $0xb08] ss:$16 sps:$4 sm:$0xff]  }
 0x3b1   : > { %8102 = vmatpush2.bf16.msra.mxu0 %v11941_v23  ;;  %v11985_v23 = vld [vmem:[%s15817_s1 + $0xcec] ss:$16 sps:$4 sm:$0xff]  }
 0x3b2   : > { %8153 = vmatpush2.bf16.msra.mxu1 %v11944_v20  ;;  %8103 = vmatprep.subr.bf16.mxu0 %v11949_v3  ;;  %v11988_v20 = vld [vmem:[%s15817_s1 + $0xeec] ss:$16 sps:$4 sm:$0xff]   ;;  %v11983_v3 = vld [vmem:[%s15817_s1 + $0xce8] ss:$16 sps:$4 sm:$0xff]  }
 0x3b3   : > { %8154 = vmatprep.subr.bf16.mxu1 %v11952_v5  ;;  %v11986_v5 = vld [vmem:[%s15817_s1 + $0xee8] ss:$16 sps:$4 sm:$0xff]  }
 0x3b5   : > { %8104 = vmatpush2.bf16.msra.mxu0 %v11947_v42  ;;  %v11991_v42 = vld [vmem:[%s15817_s1 + $0xccc] ss:$16 sps:$4 sm:$0xff]  }
 0x3b6   : > { %8155 = vmatpush2.bf16.msra.mxu1 %v11950_v1  ;;  %8105 = vmatprep.subr.bf16.mxu0 %v11955_v25  ;;  %v11994_v1 = vld [vmem:[%s15817_s1 + $0xecc] ss:$16 sps:$4 sm:$0xff]  }
 0x3b7   : > { %8156 = vmatprep.subr.bf16.mxu1 %v11958_v27 }
 0x3b9   : > { %8106 = vmatpush2.bf16.msra.mxu0 %v11953_v29 }
 0x3ba   : > { %8157 = vmatpush2.bf16.msra.mxu1 %v11956_v2  ;;  %8107 = vmatprep.subr.bf16.mxu0 %v11961_v39  ;;  %v11989_v2 = vld [vmem:[%s15817_s1 + $0xcc8] ss:$16 sps:$4 sm:$0xff]  }
 0x3bb   : > { %8158 = vmatprep.subr.bf16.mxu1 %v11964_v57  ;;  %v11992_v39 = vld [vmem:[%s15817_s1 + $0xec8] ss:$16 sps:$4 sm:$0xff]  }
 0x3bd   : > { %8108 = vmatpush2.bf16.msra.mxu0 %v11959_v47 }
 0x3be   : > { %8159 = vmatpush2.bf16.msra.mxu1 %v11962_v55  ;;  %8109 = vmatprep.subr.bf16.mxu0 %v11967_v41 }
 0x3bf   : > { %8160 = vmatprep.subr.bf16.mxu1 %v11970_v48 }
 0x3c1   : > { %8110 = vmatpush2.bf16.msra.mxu0 %v11965_v53 }
 0x3c2   : > { %8161 = vmatpush2.bf16.msra.mxu1 %v11968_v10  ;;  %8111 = vmatprep.subr.bf16.mxu0 %v11973_v11  ;;  %v11995_v11 = vld [vmem:[%s15817_s1 + $0xca8] ss:$16 sps:$4 sm:$0xff]  }
 0x3c3   : > { %8162 = vmatprep.subr.bf16.mxu1 %v11976_v49 }
 0x3c5   : > { %8112 = vmatpush2.bf16.msra.mxu0 %v11971_v61 }
 0x3c6   : > { %8163 = vmatpush2.bf16.msra.mxu1 %v11974_v62  ;;  %8113 = vmatprep.subr.bf16.mxu0 %v11979_v63 }
 0x3c7   : > { %8164 = vmatprep.subr.bf16.mxu1 %v11982_v9 }
 0x3c9   : > { %8114 = vmatpush2.bf16.msra.mxu0 %v11977_v13 }
 0x3ca   : > { %8165 = vmatpush2.bf16.msra.mxu1 %v11980_v38  ;;  %8185 = vmatprep.subr.bf16.mxu0 %v11985_v23  ;;  %v12001_v23 = vld [vmem:[%s15817_s1 + $0xc88] ss:$16 sps:$4 sm:$0xff]  }
 0x3cb   : > { %8236 = vmatprep.subr.bf16.mxu1 %v11988_v20 }
 0x3cc   : > { %v6531_v25 = vpop.f32.mrf.mxu0  ;;  %8116 = vmatmul.mubr.bf16.vlgmr.msra.gmra.mxu0 %v13278_v6  ;;  %v11997_v6 = vld [vmem:[%s15817_s1 + $0xcac] ss:$16 sps:$4 sm:$0xff]  }
 0x3cd   : > { %v6582_v27 = vpop.f32.mrf.mxu1  ;;  %8167 = vmatmul.mubr.bf16.vlgmr.msra.gmra.mxu1 %v13282_v8  ;;  %v6532_v29 = vadd.f32 %v6531_v25, %v15301_v36  ;;  %8186 = vmatpush1.bf16.msra.mxu0 %v11983_v3  ;;  %v12000_v8 = vld [vmem:[%s15817_s1 + $0xeac] ss:$16 sps:$4 sm:$0xff]  }
 0x3ce   : > { %8237 = vmatpush1.bf16.msra.mxu1 %v11986_v5  ;;  %v6533_v57 = vpop.f32.mrf.mxu0  ;;  %8187 = vmatprep.subr.bf16.mxu0 %v11991_v42 }
 0x3cf   : > { %v6584_v47 = vpop.f32.mrf.mxu1  ;;  %8238 = vmatprep.subr.bf16.mxu1 %v11994_v1  ;;  %v15526_v36 = vadd.f32 %v6582_v27, %v6532_v29  ;;  %v6534_v55 = vadd.f32 %v6533_v57, %v15315_v43  ;;  %8125 = vmatprep.mubr.bf16.mxu0 %v13296_v24  ;;  %v11998_v43 = vld [vmem:[%s15817_s1 + $0xea8] ss:$16 sps:$4 sm:$0xff]  }
 0x3d0   : > { %8176 = vmatprep.mubr.bf16.mxu1 %v13298_v26  ;;  %v6535_v41 = vpop.f32.mrf.mxu0  ;;  %v12003_v26 = vld [vmem:[%s15817_s1 + $0xc8c] ss:$16 sps:$4 sm:$0xff]   ;;  %v12007_v27 = vld [vmem:[%s15817_s1 + $0xc68] ss:$16 sps:$4 sm:$0xff]  }
 0x3d1   : > { %v6586_v48 = vpop.f32.mrf.mxu1  ;;  %v15531_v53 = vadd.f32 %v6584_v47, %v6534_v55  ;;  %v6536_v10 = vadd.f32 %v6535_v41, %v15319_v31  ;;  %8188 = vmatpush1.bf16.msra.mxu0 %v11989_v2  ;;  %v12006_v31 = vld [vmem:[%s15817_s1 + $0xe8c] ss:$16 sps:$4 sm:$0xff]   ;;  %v12016_v57 = vld [vmem:[%s15817_s1 + $0xe48] ss:$16 sps:$4 sm:$0xff]  }
 0x3d2   : > { %8239 = vmatpush1.bf16.msra.mxu1 %v11992_v39  ;;  %v6537_v49 = vpop.f32.mrf.mxu0  ;;  %8189 = vmatprep.subr.bf16.mxu0 %v11997_v6  ;;  %v12013_v39 = vld [vmem:[%s15817_s1 + $0xc48] ss:$16 sps:$4 sm:$0xff]   ;;  %v12021_v47 = vld [vmem:[%s15817_s1 + $0xc2c] ss:$16 sps:$4 sm:$0xff]  }
 0x3d3   : > { %v6588_v24 = vpop.f32.mrf.mxu1  ;;  %8240 = vmatprep.subr.bf16.mxu1 %v12000_v8  ;;  %v15546_v61 = vadd.f32 %v6586_v48, %v6536_v10  ;;  %v6538_v62 = vadd.f32 %v6537_v49, %v15333_v16  ;;  %v12004_v16 = vld [vmem:[%s15817_s1 + $0xe88] ss:$16 sps:$4 sm:$0xff]   ;;  %v12024_v6 = vld [vmem:[%s15817_s1 + $0xe2c] ss:$16 sps:$4 sm:$0xff]  }
 0x3d4   : > { %v6541_v63 = vpop.f32.mrf.mxu0  ;;  %8126 = vmatmul.mubr.bf16.gmra.mxu0 %v13326_v4  ;;  %v12009_v4 = vld [vmem:[%s15817_s1 + $0xc6c] ss:$16 sps:$4 sm:$0xff]   ;;  %v12019_v8 = vld [vmem:[%s15817_s1 + $0xc28] ss:$16 sps:$4 sm:$0xff]  }
 0x3d5   : > { %v6592_v9 = vpop.f32.mrf.mxu1  ;;  %8177 = vmatmul.mubr.bf16.gmra.mxu1 %v13328_v45  ;;  %v15551_v13 = vadd.f32 %v6588_v24, %v6538_v62  ;;  %v6542_v38 = vadd.f32 %v6541_v63, %v15343_v44  ;;  %8190 = vmatpush1.bf16.msra.mxu0 %v11995_v11  ;;  %v12012_v45 = vld [vmem:[%s15817_s1 + $0xe6c] ss:$16 sps:$4 sm:$0xff]   ;;  %v12022_v55 = vld [vmem:[%s15817_s1 + $0xe28] ss:$16 sps:$4 sm:$0xff]  }
 0x3d6   : > { %8241 = vmatpush1.bf16.msra.mxu1 %v11998_v43  ;;  %v6543_v20 = vpop.f32.mrf.mxu0  ;;  %8191 = vmatprep.subr.bf16.mxu0 %v12003_v26  ;;  %v12027_v41 = vld [vmem:[%s15817_s1 + $0xc0c] ss:$16 sps:$4 sm:$0xff]   ;;  %v12025_v10 = vld [vmem:[%s15817_s1 + $0xc08] ss:$16 sps:$4 sm:$0xff]  }
 0x3d7   : > { %v6594_v3 = vpop.f32.mrf.mxu1  ;;  %8242 = vmatprep.subr.bf16.mxu1 %v12006_v31  ;;  %v6544_v44 = vadd.f32 %v6543_v20, %v15351_v19  ;;  %v15567_v5 = vadd.f32 %v6592_v9, %v6542_v38  ;;  %8217 = vmatprep.mubr.bf16.mxu0 %v13356_v56  ;;  %v12010_v19 = vld [vmem:[%s15817_s1 + $0xe68] ss:$16 sps:$4 sm:$0xff]   ;;  %v12015_v56 = vld [vmem:[%s15817_s1 + $0xc4c] ss:$16 sps:$4 sm:$0xff]  }
 0x3d8   : > { %8268 = vmatprep.mubr.bf16.mxu1 %v13363_v60  ;;  %v6545_v42 = vpop.f32.mrf.mxu0  ;;  %v12018_v60 = vld [vmem:[%s15817_s1 + $0xe4c] ss:$16 sps:$4 sm:$0xff]   ;;  %v12028_v11 = vld [vmem:[%s15817_s1 + $0xe08] ss:$16 sps:$4 sm:$0xff]  }
 0x3d9   : > { %v6596_v1 = vpop.f32.mrf.mxu1  ;;  %v15571_v25 = vadd.f32 %v6594_v3, %v6544_v44  ;;  %8192 = vmatpush1.bf16.msra.mxu0 %v12001_v23  ;;  %v12030_v48 = vld [vmem:[%s15817_s1 + $0xe0c] ss:$16 sps:$4 sm:$0xff]   ;;  %v12031_v24 = vld [vmem:[%s15817_s1 + $0xde8] ss:$16 sps:$4 sm:$0xff]  }
 0x3da   : > { %8243 = vmatpush1.bf16.msra.mxu1 %v12004_v16  ;;  %8193 = vmatprep.subr.bf16.mxu0 %v12009_v4  ;;  %v6546_v29 = vpop.f32.mrf.mxu0  ;;  %v12033_v43 = vld [vmem:[%s15817_s1 + $0xdec] ss:$16 sps:$4 sm:$0xff]   ;;  %v12034_v26 = vld [vmem:[%s15817_s1 + $0xfe8] ss:$16 sps:$4 sm:$0xff]  }
 0x3db   : > { %8244 = vmatprep.subr.bf16.mxu1 %v12012_v45  ;;  %v6597_v2 = vpop.f32.mrf.mxu1  ;;  %v12036_v49 = vld [vmem:[%s15817_s1 + $0xfec] ss:$16 sps:$4 sm:$0xff]   ;;  %v12037_v63 = vld [vmem:[%s15817_s1 + $0xdc8] ss:$16 sps:$4 sm:$0xff]  }
 0x3dc   : > { %v12039_v31 = vld [vmem:[%s15817_s1 + $0xdcc] ss:$16 sps:$4 sm:$0xff]   ;;  %v12040_v9 = vld [vmem:[%s15817_s1 + $0xfc8] ss:$16 sps:$4 sm:$0xff]  }
 0x3dd   : > { %8194 = vmatpush1.bf16.msra.mxu0 %v12007_v27  ;;  %v12042_v62 = vld [vmem:[%s15817_s1 + $0xfcc] ss:$16 sps:$4 sm:$0xff]   ;;  %v12043_v16 = vld [vmem:[%s15817_s1 + $0xda8] ss:$16 sps:$4 sm:$0xff]  }
 0x3de   : > { %8245 = vmatpush1.bf16.msra.mxu1 %v12010_v19  ;;  %8195 = vmatprep.subr.bf16.mxu0 %v12015_v56  ;;  %v12045_v38 = vld [vmem:[%s15817_s1 + $0xdac] ss:$16 sps:$4 sm:$0xff]   ;;  %v12046_v20 = vld [vmem:[%s15817_s1 + $0xfa8] ss:$16 sps:$4 sm:$0xff]  }
 0x3df   : > { %8246 = vmatprep.subr.bf16.mxu1 %v12018_v60  ;;  %v12048_v23 = vld [vmem:[%s15817_s1 + $0xfac] ss:$16 sps:$4 sm:$0xff]   ;;  %v12049_v45 = vld [vmem:[%s15817_s1 + $0xd88] ss:$16 sps:$4 sm:$0xff]  }
 0x3e0   : > { %v12051_v3 = vld [vmem:[%s15817_s1 + $0xd8c] ss:$16 sps:$4 sm:$0xff]   ;;  %v12052_v44 = vld [vmem:[%s15817_s1 + $0xf88] ss:$16 sps:$4 sm:$0xff]  }
 0x3e1   : > { %8196 = vmatpush1.bf16.msra.mxu0 %v12013_v39  ;;  %v12054_v4 = vld [vmem:[%s15817_s1 + $0xf8c] ss:$16 sps:$4 sm:$0xff]   ;;  %v12055_v27 = vld [vmem:[%s15817_s1 + $0xd68] ss:$16 sps:$4 sm:$0xff]  }
 0x3e2   : > { %8247 = vmatpush1.bf16.msra.mxu1 %v12016_v57  ;;  %8197 = vmatprep.subr.bf16.mxu0 %v12021_v47  ;;  %v12057_v42 = vld [vmem:[%s15817_s1 + $0xd6c] ss:$16 sps:$4 sm:$0xff]   ;;  %v12058_v19 = vld [vmem:[%s15817_s1 + $0xf68] ss:$16 sps:$4 sm:$0xff]  }
 0x3e3   : > { %8248 = vmatprep.subr.bf16.mxu1 %v12024_v6  ;;  %v12060_v1 = vld [vmem:[%s15817_s1 + $0xf6c] ss:$16 sps:$4 sm:$0xff]   ;;  %v12061_v29 = vld [vmem:[%s15817_s1 + $0xd48] ss:$16 sps:$4 sm:$0xff]  }
 0x3e4   : > { %v12063_v56 = vld [vmem:[%s15817_s1 + $0xd4c] ss:$16 sps:$4 sm:$0xff]   ;;  %v12064_v2 = vld [vmem:[%s15817_s1 + $0xf48] ss:$16 sps:$4 sm:$0xff]  }
 0x3e5   : > { %8198 = vmatpush1.bf16.msra.mxu0 %v12019_v8  ;;  %v12066_v60 = vld [vmem:[%s15817_s1 + $0xf4c] ss:$16 sps:$4 sm:$0xff]   ;;  %v12067_v47 = vld [vmem:[%s15817_s1 + $0xd28] ss:$16 sps:$4 sm:$0xff]  }
 0x3e6   : > { %8249 = vmatpush1.bf16.msra.mxu1 %v12022_v55  ;;  %8199 = vmatprep.subr.bf16.mxu0 %v12027_v41  ;;  %v12069_v39 = vld [vmem:[%s15817_s1 + $0xd2c] ss:$16 sps:$4 sm:$0xff]   ;;  %v12070_v6 = vld [vmem:[%s15817_s1 + $0xf28] ss:$16 sps:$4 sm:$0xff]  }
 0x3e7   : > { %8250 = vmatprep.subr.bf16.mxu1 %v12030_v48  ;;  %v12072_v57 = vld [vmem:[%s15817_s1 + $0xf2c] ss:$16 sps:$4 sm:$0xff]   ;;  %v12073_v41 = vld [vmem:[%s15817_s1 + $0xd08] ss:$16 sps:$4 sm:$0xff]  }
 0x3e8   : > { %v12075_v8 = vld [vmem:[%s15817_s1 + $0xd0c] ss:$16 sps:$4 sm:$0xff]   ;;  %v12076_v48 = vld [vmem:[%s15817_s1 + $0xf08] ss:$16 sps:$4 sm:$0xff]  }
 0x3e9   : > { %8200 = vmatpush1.bf16.msra.mxu0 %v12025_v10  ;;  %v12078_v55 = vld [vmem:[%s15817_s1 + $0xf0c] ss:$16 sps:$4 sm:$0xff]  }
 0x3ea   : > { %8251 = vmatpush1.bf16.msra.mxu1 %v12028_v11  ;;  %8201 = vmatprep.subr.bf16.mxu0 %v12033_v43 }
 0x3eb   : > { %8252 = vmatprep.subr.bf16.mxu1 %v12036_v49 }
 0x3ed   : > { %8202 = vmatpush2.bf16.msra.mxu0 %v12031_v24 }
 0x3ee   : > { %8253 = vmatpush2.bf16.msra.mxu1 %v12034_v26  ;;  %8203 = vmatprep.subr.bf16.mxu0 %v12039_v31 }
 0x3ef   : > { %8254 = vmatprep.subr.bf16.mxu1 %v12042_v62 }
 0x3f1   : > { %8204 = vmatpush2.bf16.msra.mxu0 %v12037_v63 }
 0x3f2   : > { %8255 = vmatpush2.bf16.msra.mxu1 %v12040_v9  ;;  %8205 = vmatprep.subr.bf16.mxu0 %v12045_v38 }
 0x3f3   : > { %8256 = vmatprep.subr.bf16.mxu1 %v12048_v23 }
 0x3f5   : > { %8206 = vmatpush2.bf16.msra.mxu0 %v12043_v16 }
 0x3f6   : > { %8257 = vmatpush2.bf16.msra.mxu1 %v12046_v20  ;;  %8207 = vmatprep.subr.bf16.mxu0 %v12051_v3 }
 0x3f7   : > { %8258 = vmatprep.subr.bf16.mxu1 %v12054_v4 }
 0x3f9   : > { %8208 = vmatpush2.bf16.msra.mxu0 %v12049_v45 }
 0x3fa   : > { %8259 = vmatpush2.bf16.msra.mxu1 %v12052_v44  ;;  %8209 = vmatprep.subr.bf16.mxu0 %v12057_v42 }
 0x3fb   : > { %8260 = vmatprep.subr.bf16.mxu1 %v12060_v1 }
 0x3fd   : > { %8210 = vmatpush2.bf16.msra.mxu0 %v12055_v27 }
 0x3fe   : > { %8261 = vmatpush2.bf16.msra.mxu1 %v12058_v19  ;;  %8211 = vmatprep.subr.bf16.mxu0 %v12063_v56 }
 0x3ff   : > { %8262 = vmatprep.subr.bf16.mxu1 %v12066_v60 }
 0x401   : > { %8212 = vmatpush2.bf16.msra.mxu0 %v12061_v29 }
 0x402   : > { %8263 = vmatpush2.bf16.msra.mxu1 %v12064_v2  ;;  %8213 = vmatprep.subr.bf16.mxu0 %v12069_v39 }
 0x403   : > { %8264 = vmatprep.subr.bf16.mxu1 %v12072_v57 }
 0x405   : > { %8214 = vmatpush2.bf16.msra.mxu0 %v12067_v47 }
 0x406   : > { %8265 = vmatpush2.bf16.msra.mxu1 %v12070_v6  ;;  %8215 = vmatprep.subr.bf16.mxu0 %v12075_v8 }
 0x407   : > { %8266 = vmatprep.subr.bf16.mxu1 %v12078_v55 }
 0x409   : > { %8216 = vmatpush2.bf16.msra.mxu0 %v12073_v41 }
 0x40a   : > { %8267 = vmatpush2.bf16.msra.mxu1 %v12076_v48 }
 0x40c   : > { %v7913_v10 = vpop.f32.mrf.mxu0  ;;  %8218 = vmatmul.mubr.bf16.vlgmr.msra.gmra.mxu0 %v13535_v35 }
 0x40d   : > { %v7964_v11 = vpop.f32.mrf.mxu1  ;;  %8269 = vmatmul.mubr.bf16.vlgmr.msra.gmra.mxu1 %v13539_v37  ;;  %v7914_v43 = vadd.f32 %v7913_v10, %v15087_v46  ;;  %8227 = vmatprep.mubr.bf16.mxu0 %v13553_v54 }
 0x40e   : > { %8278 = vmatprep.mubr.bf16.mxu1 %v13555_v58  ;;  %v7915_v49 = vpop.f32.mrf.mxu0 }
 0x40f   : > { %v7966_v24 = vpop.f32.mrf.mxu1  ;;  %v7965_v26 = vadd.f32 %v7964_v11, %v7914_v43  ;;  %v7916_v31 = vadd.f32 %v7915_v49, %v15092_v12 }
 0x410   : > { %v7917_v62 = vpop.f32.mrf.mxu0 }
 0x411   : > { %v7968_v63 = vpop.f32.mrf.mxu1  ;;  %v7967_v9 = vadd.f32 %v7966_v24, %v7916_v31  ;;  %v7918_v38 = vadd.f32 %v7917_v62, %v15107_v14  ;;  %v15723_v24 = vpop.permute.xlu0 %8362 }
 0x412   : > { %v7919_v23 = vpop.f32.mrf.mxu0 }
 0x413   : > { %v7970_v35 = vpop.f32.mrf.mxu1  ;;  %v7969_v16 = vadd.f32 %v7968_v63, %v7918_v38  ;;  %v7920_v1 = vadd.f32 %v7919_v23, %v15112_v0 }
 0x414   : > { %v7923_v37 = vpop.f32.mrf.mxu0  ;;  %8228 = vmatmul.mubr.bf16.gmra.mxu0 %v13577_v18 }
 0x415   : > { %8279 = vmatmul.mubr.bf16.gmra.mxu1 %v13579_v7  ;;  %v7974_v54 = vpop.f32.mrf.mxu1  ;;  %v7924_v58 = vadd.f32 %v7923_v37, %v15128_v51  ;;  %v7971_v51 = vadd.f32 %v7970_v35, %v7920_v1 }
 0x416   : > { %v7925_v46 = vpop.f32.mrf.mxu0 }
 0x417   : > { %v7976_v20 = vpop.f32.mrf.mxu1  ;;  %v7975_v3 = vadd.f32 %v7974_v54, %v7924_v58  ;;  %v7926_v7 = vadd.f32 %v7925_v46, %v15132_v34 }
 0x418   : > { %v7927_v12 = vpop.f32.mrf.mxu0 }
 0x419   : > { %v7978_v4 = vpop.f32.mrf.mxu1  ;;  %v7977_v41 = vadd.f32 %v7976_v20, %v7926_v7 }
 0x41a   : > { %v7928_v45 = vpop.f32.mrf.mxu0 }
 0x41b   : > { %v7979_v44 = vpop.f32.mrf.mxu1 }
 0x44c   : > { %v8015_v42 = vpop.f32.mrf.mxu0 }
 0x44d   : > { %v8066_v14 = vpop.f32.mrf.mxu1  ;;  %v8016_v27 = vadd.f32 %v8015_v42, %v7965_v26 }
 0x44e   : > { %v8017_v19 = vpop.f32.mrf.mxu0 }
 0x44f   : > { %v8068_v56 = vpop.f32.mrf.mxu1  ;;  %v8018_v18 = vadd.f32 %v8017_v19, %v7967_v9  ;;  %v8067_v2 = vadd.f32 %v8066_v14, %v8016_v27  ;;  %v15737_v19 = vpop.permute.xlu0 %8367 }
 0x450   : > { %v8019_v60 = vpop.f32.mrf.mxu0 }
 0x451   : > { %v8070_v29 = vpop.f32.mrf.mxu1  ;;  %v8020_v39 = vadd.f32 %v8019_v60, %v7969_v16  ;;  %v8069_v57 = vadd.f32 %v8068_v56, %v8018_v18  ;;  %v8300_v10 = vrot.slane %v8067_v2, 1  ;;  %v8332_v37 = vrot.slane %v8067_v2, 5 }
 0x452   : > { %v8021_v47 = vpop.f32.mrf.mxu0 }
 0x453   : > { %v8072_v6 = vpop.f32.mrf.mxu1  ;;  %v8071_v8 = vadd.f32 %v8070_v29, %v8020_v39  ;;  %v8022_v55 = vadd.f32 %v8021_v47, %v7971_v51  ;;  %v8303_v34 = vrot.slane %v8069_v57, 1  ;;  %v8333_v4 = vrot.slane %v8069_v57, 5 }
 0x454   : > { %v8025_v48 = vpop.f32.mrf.mxu0 }
 0x455   : > { %v8076_v0 = vpop.f32.mrf.mxu1  ;;  %v8301_v11 = vrot.slane %v8071_v8, 1  ;;  %v8073_v43 = vadd.f32 %v8072_v6, %v8022_v55  ;;  %v8026_v49 = vadd.f32 %v8025_v48, %v7975_v3 }
 0x456   : > { %v8027_v26 = vpop.f32.mrf.mxu0 }
 0x457   : > { %v8078_v31 = vpop.f32.mrf.mxu1  ;;  %v8302_v62 = vsel %vm8299_vm1, %v8300_v10, %v8301_v11  ;;  %v8304_v63 = vrot.slane %v8073_v43, 1  ;;  %v8028_v9 = vadd.f32 %v8027_v26, %v7977_v41  ;;  %v8077_v38 = vadd.f32 %v8076_v0, %v8026_v49 }
 0x458   : > { %v8345_v23 = vadd.f32 %v8302_v62, %v14221_v17  ;;  %v8029_v35 = vpop.f32.mrf.mxu0  ;;  %v15732_v17 = vpop.permute.xlu1 %8372 }
 0x459   : > { %v8080_v16 = vpop.f32.mrf.mxu1  ;;  %v8305_v54 = vsel %vm8299_vm1, %v8303_v34, %v8304_v63  ;;  %v8312_v58 = vrot.slane %v8077_v38, 1  ;;  %v8079_v46 = vadd.f32 %v8078_v31, %v8028_v9 }
 0x45a   : > { %v8346_v20 = vadd.f32 %v8305_v54, %v14232_v52  ;;  %v8030_v3 = vpop.f32.mrf.mxu0  ;;  %v8375_v14 = vmul.f32 %v15723_v24, %v8345_v23 }
 0x45b   : > { %v8081_v12 = vpop.f32.mrf.mxu1  ;;  %v8313_v45 = vsel %vm8299_vm1, %v8301_v11, %v8312_v58  ;;  %v8341_v44 = vsel %vm8340_vm2, %v8312_v58, %v8332_v37  ;;  %v8314_v42 = vrot.slane %v8079_v46, 1 }
 0x45c   : > { %v8376_v1 = vmul.f32 %v15723_v24, %v8346_v20  ;;  %v8353_v27 = vadd.f32 %v8341_v44, %v14262_v33  ;;  %v8349_v52 = vadd.f32 %v8313_v45, %v14241_v21  ;;  %v8504_v51 = vmul.f32 %v8375_v14, %v8375_v14 }
 0x45d   : > { %v8315_v56 = vsel %vm8299_vm1, %v8304_v63, %v8314_v42  ;;  %v8342_v18 = vsel %vm8340_vm2, %v8314_v42, %v8333_v4 }
 0x45e   : > { %v10516_v7 = vpack.c.bf16 %v8376_v1, %v8375_v14  ;;  %v8354_v60 = vadd.f32 %v8342_v18, %v14266_v32  ;;  %v8383_v33 = vmul.f32 %v15732_v17, %v8353_v27  ;;  %v8350_v29 = vadd.f32 %v8315_v56, %v14252_v22 }
 0x45f   : > { %v8379_v21 = vmul.f32 %v15737_v19, %v8349_v52  ;;  %v8505_v47 = vmul.f32 %v8376_v1, %v8376_v1 }
 0x460   : > { %8427 = vst [vmem:[%s15745_s19] sm:$0xff] %v10516_v7  ;;  %v8384_v2 = vmul.f32 %v15732_v17, %v8354_v60  ;;  %v8435_v39 = vsel %vm8434_vm3, %v8383_v33, 0.0  ;;  %v8512_v57 = vmul.f32 %v8383_v33, %v8383_v33  ;;  %v8380_v6 = vmul.f32 %v15737_v19, %v8350_v29 }
 0x461   : > { %v8433_v8 = vadd.f32 %v8379_v21, %v8375_v14  ;;  %v8508_v32 = vmul.f32 %v8379_v21, %v8379_v21 }
 0x462   : > { %v10520_v55 = vpack.c.bf16 %v8384_v2, %v8383_v33  ;;  %v8444_v41 = vsel %vm8434_vm3, %v8384_v2, 0.0  ;;  %v8513_v22 = vmul.f32 %v8384_v2, %v8384_v2  ;;  %v8517_v48 = vsel %vm8434_vm3, %v8512_v57, 0.0 }
 0x463   : > { %v10518_v0 = vpack.c.bf16 %v8380_v6, %v8379_v21  ;;  %v8436_v10 = vadd.f32 %v8435_v39, %v8433_v8  ;;  %v8443_v11 = vadd.f32 %v8380_v6, %v8376_v1  ;;  %v8509_v43 = vmul.f32 %v8380_v6, %v8380_v6 }
 0x464   : > { %8431 = vst [vmem:[%s15745_s19 + $0x20] sm:$0x33] %v10520_v55  ;;  %v8526_v49 = vsel %vm8434_vm3, %v8513_v22, 0.0  ;;  %v8516_v34 = vadd.f32 %v8508_v32, %v8504_v51 }
 0x465   : > { %8429 = vst [vmem:[%s15745_s19 + $0x10] sm:$0xff] %v10518_v0  ;;  %v8437_v26 = vrot.slane %v8436_v10, 4  ;;  %v8445_v31 = vadd.f32 %v8444_v41, %v8443_v11  ;;  %v8525_v62 = vadd.f32 %v8509_v43, %v8505_v47 }
 0x466   : > { %v8518_v63 = vadd.f32 %v8517_v48, %v8516_v34 }
 0x467   : > { %v8438_v9 = vadd.f32 %v8437_v26, %v8436_v10  ;;  %v8446_v38 = vrot.slane %v8445_v31, 4  ;;  %v8527_v23 = vadd.f32 %v8526_v49, %v8525_v62 }
 0x468   : > { %v8519_v35 = vrot.slane %v8518_v63, 4 }
 0x469   : > { %v8439_v16 = vrot.slane %v8438_v9, 2  ;;  %v8447_v37 = vadd.f32 %v8446_v38, %v8445_v31  ;;  %v8528_v54 = vrot.slane %v8527_v23, 4 }
 0x46a   : > { %v8520_v58 = vadd.f32 %v8519_v35, %v8518_v63 }
 0x46b   : > { %v8440_v46 = vadd.f32 %v8439_v16, %v8438_v9  ;;  %v8448_v20 = vrot.slane %v8447_v37, 2  ;;  %v8529_v3 = vadd.f32 %v8528_v54, %v8527_v23 }
 0x46c   : > { %v8521_v12 = vrot.slane %v8520_v58, 2 }
 0x46d   : > { %v8441_v4 = vrot.slane %v8440_v46, 1  ;;  %v8449_v45 = vadd.f32 %v8448_v20, %v8447_v37  ;;  %v8530_v44 = vrot.slane %v8529_v3, 2 }
 0x46e   : > { %v8522_v42 = vadd.f32 %v8521_v12, %v8520_v58 }
 0x46f   : > { %v8450_v14 = vrot.slane %v8449_v45, 1  ;;  %v8531_v1 = vadd.f32 %v8530_v44, %v8529_v3  ;;  %v15760_v52 = vadd.f32 %v8441_v4, %v8440_v46 }
 0x470   : > { %v8523_v27 = vrot.slane %v8522_v42, 1 }
 0x471   : > { %v15762_v56 = vadd.f32 %v8450_v14, %v8449_v45  ;;  %v8532_v18 = vrot.slane %v8531_v1, 1 }
 0x472   : > { %v15766_v60 = vadd.f32 %v8523_v27, %v8522_v42 }
 0x473   : > { %v8474_v7 = vcombine.low %v15760_v52, %v15762_v56  ;;  %v15768_v33 = vadd.f32 %v8532_v18, %v8531_v1 }
 0x475   : > { %v8556_v29 = vcombine.low %v15766_v60, %v15768_v33 }
 0x48c   : > { %v8117_v21 = vpop.f32.mrf.mxu0 }
 0x48d   : > { %v8168_v51 = vpop.f32.mrf.mxu1  ;;  %v8118_v2 = vadd.f32 %v8117_v21, %v15526_v36 }
 0x48e   : > { %v8119_v39 = vpop.f32.mrf.mxu0 }
 0x48f   : > { %v8170_v57 = vpop.f32.mrf.mxu1  ;;  %v8169_v47 = vadd.f32 %v8168_v51, %v8118_v2  ;;  %v8120_v6 = vadd.f32 %v8119_v39, %v15531_v53 }
 0x490   : > { %v8121_v8 = vpop.f32.mrf.mxu0 }
 0x491   : > { %v8172_v32 = vpop.f32.mrf.mxu1  ;;  %v8171_v55 = vadd.f32 %v8170_v57, %v8120_v6  ;;  %v8122_v41 = vadd.f32 %v8121_v8, %v15546_v61 }
 0x492   : > { %v8123_v22 = vpop.f32.mrf.mxu0 }
 0x493   : > { %v8174_v48 = vpop.f32.mrf.mxu1  ;;  %v8173_v0 = vadd.f32 %v8172_v32, %v8122_v41  ;;  %v8124_v38 = vadd.f32 %v8123_v22, %v15551_v13 }
 0x494   : > { %v8127_v10 = vpop.f32.mrf.mxu0 }
 0x495   : > { %v8178_v11 = vpop.f32.mrf.mxu1  ;;  %v8128_v43 = vadd.f32 %v8127_v10, %v15567_v5  ;;  %v8175_v5 = vadd.f32 %v8174_v48, %v8124_v38 }
 0x496   : > { %v8129_v49 = vpop.f32.mrf.mxu0 }
 0x497   : > { %v8180_v34 = vpop.f32.mrf.mxu1  ;;  %v8179_v36 = vadd.f32 %v8178_v11, %v8128_v43  ;;  %v8130_v37 = vadd.f32 %v8129_v49, %v15571_v25 }
 0x498   : > { %v8131_v26 = vpop.f32.mrf.mxu0 }
 0x499   : > { %v8182_v31 = vpop.f32.mrf.mxu1  ;;  %v8181_v42 = vadd.f32 %v8180_v34, %v8130_v37 }
 0x49a   : > { %v8132_v62 = vpop.f32.mrf.mxu0 }
 0x49b   : > { %v8183_v63 = vpop.f32.mrf.mxu1 }
 0x4cc   : > { %v8219_v53 = vpop.f32.mrf.mxu0 }
 0x4cd   : > { %v8270_v9 = vpop.f32.mrf.mxu1  ;;  %v8220_v23 = vadd.f32 %v8219_v53, %v8169_v47 }
 0x4ce   : > { %v8221_v61 = vpop.f32.mrf.mxu0 }
 0x4cf   : > { %v8272_v35 = vpop.f32.mrf.mxu1  ;;  %v8222_v16 = vadd.f32 %v8221_v61, %v8171_v55  ;;  %v8271_v46 = vadd.f32 %v8270_v9, %v8220_v23 }
 0x4d0   : > { %v8223_v54 = vpop.f32.mrf.mxu0 }
 0x4d1   : > { %v8274_v58 = vpop.f32.mrf.mxu1  ;;  %v8224_v20 = vadd.f32 %v8223_v54, %v8173_v0  ;;  %v8273_v3 = vadd.f32 %v8272_v35, %v8222_v16  ;;  %v8306_v13 = vrot.slane %v8271_v46, 1  ;;  %v8334_v41 = vrot.slane %v8271_v46, 5 }
 0x4d2   : > { %v8225_v12 = vpop.f32.mrf.mxu0 }
 0x4d3   : > { %v8276_v4 = vpop.f32.mrf.mxu1  ;;  %v8275_v45 = vadd.f32 %v8274_v58, %v8224_v20  ;;  %v8226_v44 = vadd.f32 %v8225_v12, %v8175_v5  ;;  %v8309_v51 = vrot.slane %v8273_v3, 1  ;;  %v8335_v10 = vrot.slane %v8273_v3, 5 }
 0x4d4   : > { %v8229_v14 = vpop.f32.mrf.mxu0 }
 0x4d5   : > { %v8280_v1 = vpop.f32.mrf.mxu1  ;;  %v8307_v27 = vrot.slane %v8275_v45, 1  ;;  %v8277_v18 = vadd.f32 %v8276_v4, %v8226_v44  ;;  %v8230_v21 = vadd.f32 %v8229_v14, %v8179_v36 }
 0x4d6   : > { %v8231_v2 = vpop.f32.mrf.mxu0 }
 0x4d7   : > { %v8282_v25 = vpop.f32.mrf.mxu1  ;;  %v8308_v39 = vsel %vm8299_vm1, %v8306_v13, %v8307_v27  ;;  %v8310_v57 = vrot.slane %v8277_v18, 1  ;;  %v8281_v47 = vadd.f32 %v8280_v1, %v8230_v21  ;;  %v8232_v6 = vadd.f32 %v8231_v2, %v8181_v42 }
 0x4d8   : > { %v8347_v8 = vadd.f32 %v8308_v39, %v14657_v59  ;;  %v8233_v32 = vpop.f32.mrf.mxu0 }
 0x4d9   : > { %v8284_v55 = vpop.f32.mrf.mxu1  ;;  %v8311_v22 = vsel %vm8299_vm1, %v8309_v51, %v8310_v57  ;;  %v8316_v48 = vrot.slane %v8281_v47, 1  ;;  %v8283_v0 = vadd.f32 %v8282_v25, %v8232_v6  ;;  %v12092_v25 = vmov 1966171168  }
 0x4da   : > { %v8348_v11 = vadd.f32 %v8311_v22, %v14662_v15  ;;  %v8234_v43 = vpop.f32.mrf.mxu0  ;;  %v8377_v34 = vmul.f32 %v15723_v24, %v8347_v8  ;;  %v8477_v39 = vunpack.c.l.s4 %v12092_v25 }
 0x4db   : > { %v8285_v49 = vpop.f32.mrf.mxu1  ;;  %v8317_v36 = vsel %vm8299_vm1, %v8307_v27, %v8316_v48  ;;  %v8343_v26 = vsel %vm8340_vm2, %v8316_v48, %v8334_v41  ;;  %v8318_v59 = vrot.slane %v8283_v0, 1 }
 0x4dc   : > { %v8378_v31 = vmul.f32 %v15723_v24, %v8348_v11  ;;  %v8351_v62 = vadd.f32 %v8317_v36, %v14677_v30  ;;  %v8355_v63 = vadd.f32 %v8343_v26, %v14698_v28  ;;  %v8506_v61 = vmul.f32 %v8377_v34, %v8377_v34 }
 0x4dd   : > { %v8319_v53 = vsel %vm8299_vm1, %v8310_v57, %v8318_v59  ;;  %v8344_v15 = vsel %vm8340_vm2, %v8318_v59, %v8335_v10  ;;  %v8479_v57 = vlaneseq  ;;  %v8478_v48 = vunpack.c.0.s8 %v8477_v39 }
 0x4de   : > { %v10517_v9 = vpack.c.bf16 %v8378_v31, %v8377_v34  ;;  %v8381_v38 = vmul.f32 %v15737_v19, %v8351_v62  ;;  %v8385_v23 = vmul.f32 %v15732_v17, %v8355_v63  ;;  %v8352_v35 = vadd.f32 %v8319_v53, %v14682_v50 }
 0x4df   : > { %v8356_v16 = vadd.f32 %v8344_v15, %v14702_v40  ;;  %v8507_v5 = vmul.f32 %v8378_v31, %v8378_v31  ;;  %v8480_v0 = vshrl.u32 %v8479_v57, 7  ;;  %vm8501_vm4 = vcmp.lt.s32.totalorder %v8479_v57, 512 }
 0x4e0   : > { %8428 = vst [vmem:[%s15745_s19 + $0x8] sm:$0xff] %v10517_v9  ;;  %v8452_v24 = vadd.f32 %v8381_v38, %v8377_v34  ;;  %v8453_v30 = vsel %vm8434_vm3, %v8385_v23, 0.0  ;;  %v8510_v37 = vmul.f32 %v8381_v38, %v8381_v38  ;;  %v8514_v28 = vmul.f32 %v8385_v23, %v8385_v23 }
 0x4e1   : > { %v8382_v54 = vmul.f32 %v15737_v19, %v8352_v35  ;;  %v8386_v58 = vmul.f32 %v15732_v17, %v8356_v16  ;;  %v8481_v26 = vsub.s32 %v8478_v48, %v8480_v0 }
 0x4e2   : > { %v8454_v46 = vadd.f32 %v8453_v30, %v8452_v24  ;;  %v8534_v20 = vadd.f32 %v8510_v37, %v8506_v61  ;;  %v8535_v3 = vsel %vm8434_vm3, %v8514_v28, 0.0 }
 0x4e3   : > { %v10519_v50 = vpack.c.bf16 %v8382_v54, %v8381_v38  ;;  %v10521_v12 = vpack.c.bf16 %v8386_v58, %v8385_v23  ;;  %v8461_v40 = vadd.f32 %v8382_v54, %v8378_v31  ;;  %v8462_v4 = vsel %vm8434_vm3, %v8386_v58, 0.0 }
 0x4e4   : > { %v8455_v45 = vrot.slane %v8454_v46, 4  ;;  %v8536_v44 = vadd.f32 %v8535_v3, %v8534_v20  ;;  %v8511_v42 = vmul.f32 %v8382_v54, %v8382_v54  ;;  %v8515_v14 = vmul.f32 %v8386_v58, %v8386_v58 }
 0x4e5   : > { %8430 = vst [vmem:[%s15745_s19 + $0x18] sm:$0xff] %v10519_v50  ;;  %8432 = vst [vmem:[%s15745_s19 + $0x28] sm:$0x33] %v10521_v12  ;;  %v8463_v1 = vadd.f32 %v8462_v4, %v8461_v40  ;;  %v8482_v9 = vrot.slane %v8474_v7, %v8481_v26  ;;  %v8564_v35 = vrot.slane %v8556_v29, %v8481_v26 }
 0x4e6   : > { %v8456_v19 = vadd.f32 %v8455_v45, %v8454_v46  ;;  %v8537_v13 = vrot.slane %v8536_v44, 4  ;;  %v8543_v17 = vadd.f32 %v8511_v42, %v8507_v5  ;;  %v8544_v27 = vsel %vm8434_vm3, %v8515_v14, 0.0 }
 0x4e7   : > { %v8464_v18 = vrot.slane %v8463_v1, 4 }
 0x4e8   : > { %v8457_v21 = vrot.slane %v8456_v19, 2  ;;  %v8538_v51 = vadd.f32 %v8537_v13, %v8536_v44  ;;  %v8545_v2 = vadd.f32 %v8544_v27, %v8543_v17 }
 0x4e9   : > { %v8465_v47 = vadd.f32 %v8464_v18, %v8463_v1 }
 0x4ea   : > { %v8458_v6 = vadd.f32 %v8457_v21, %v8456_v19  ;;  %v8539_v8 = vrot.slane %v8538_v51, 2  ;;  %v8546_v32 = vrot.slane %v8545_v2, 4 }
 0x4eb   : > { %v8466_v55 = vrot.slane %v8465_v47, 2 }
 0x4ec   : > { %v8540_v41 = vadd.f32 %v8539_v8, %v8538_v51  ;;  %v8547_v22 = vadd.f32 %v8546_v32, %v8545_v2  ;;  %v8459_v10 = vrot.slane %v8458_v6, 1 }
 0x4ed   : > { %v8467_v11 = vadd.f32 %v8466_v55, %v8465_v47 }
 0x4ee   : > { %v8548_v43 = vrot.slane %v8547_v22, 2  ;;  %v8541_v34 = vrot.slane %v8540_v41, 1  ;;  %v8460_v59 = vadd.f32 %v8459_v10, %v8458_v6 }
 0x4ef   : > { %v8468_v49 = vrot.slane %v8467_v11, 1 }
 0x4f0   : > { %v8549_v36 = vadd.f32 %v8548_v43, %v8547_v22  ;;  %v8542_v53 = vadd.f32 %v8541_v34, %v8540_v41 }
 0x4f1   : > { %v8469_v31 = vadd.f32 %v8468_v49, %v8467_v11 }
 0x4f2   : > { %v8550_v62 = vrot.slane %v8549_v36, 1 }
 0x4f3   : > { %v8475_v63 = vcombine.low %v8460_v59, %v8469_v31 }
 0x4f4   : > { %v8551_v15 = vadd.f32 %v8550_v62, %v8549_v36 }
 0x4f5   : > { %v8489_v38 = vrot.slane %v8475_v63, %v8481_v26 }
 0x4f6   : > { %v8557_v23 = vcombine.low %v8542_v53, %v8551_v15 }
 0x4f7   : > { %v8490_v61 = vcombine.low %v8482_v9, %v8489_v38 }
 0x4f8   : > { %v8571_v16 = vrot.slane %v8557_v23, %v8481_v26 }
 0x4f9   : > { %v8497_v24 = vrot.slane %v8490_v61, %v8481_v26 }
 0x4fa   : > { %v8572_v30 = vcombine.low %v8564_v35, %v8571_v16 }
 0x4fb   : > { %8503 = vst.msk [vmem:[%s210_s23] ss:$2 sm:$0xf] %vm8501_vm4, %v8497_v24 }
 0x4fc   : > { %v8579_v37 = vrot.slane %v8572_v30, %v8481_v26 }
 0x4fe   : > { %10511 = vst.msk [vmem:[%s210_s23 + $0x1] ss:$2 sm:$0xf] %vm8501_vm4, %v8579_v37 }
 0x4ff PF: > { %s15_s15 = sadd.s32 1, %s12089_s15  }
 0x500   : > { %p12_p4 = scmp.ge.s32.totalorder %s15_s15, 4  }
 0x502   :  { %14 = sbr.rel (!%p12_p4) target bundleno = 1 (0x1), region = 78 }

</bundles_post_ra>
